<compile_context>
chip_gen: v7x
topology: tpu7x:2x2x1
jax: 0.10.0
libtpu: 0.0.40
codegen_flags: <defaults>
</compile_context>

<pallas_src>
import numpy as np

import jax
import jax.numpy as jnp
from jax.experimental import pallas as pl
from jax.experimental.pallas import tpu as pltpu


# ----------------------------------------------------------------------------
# Model hyper-parameters (cnn_type=5, img_num=1; image 64x64 so flatten == 512)
# ----------------------------------------------------------------------------
IMG_H = 64
IMG_W = 64
C_IN = 3
C1 = 8           # conv1 / conv11 output channels
KSZ = 5          # conv kernel size
PAD = 2
H1, W1 = IMG_H, IMG_W          # conv1 output spatial size
H2, W2 = H1 // 2, W1 // 2      # after pool2 (32, 32)
H3, W3 = H2 // 4, W2 // 4      # after pool4 (8, 8)
FLAT = C1 * H3 * W3            # 512
NUM_INPUTS = 8
NUM_OUTPUTS = 4
HIDDEN_AC = 32
HIDDEN_CNN = 64
OUT_CNN = 16
STD = 0.0


# ----------------------------------------------------------------------------
# Fused forward-pass kernel (one sample per grid step)
# ----------------------------------------------------------------------------
def _acnet_kernel(
    # data
    x_ref, s_ref,
    # conv trunk operands (prepared at init)
    b1_ref, b1b_ref, pw2_ref, ph2_ref, b2_ref, b2b_ref, pw4_ref, ph4_ref,
    # cnn head
    fc2w_ref, fc2b_ref, fc3w_ref, fc3b_ref,
    # critic
    c1wx_ref, c1ws_ref, c1b_ref, c2w_ref, c2b_ref, c3w_ref, c3b_ref,
    # actor
    a1wx_ref, a1ws_ref, a1b_ref, a2w_ref, a2b_ref, a3w_ref, a3b_ref,
    # outputs
    mu_ref, val_ref,
    # scratch
    xpad_s, pad2_s,
):
    f32 = jnp.float32

    # ---- stage 0: NCHW image -> H-padded, channel-planar rows in VMEM -------
    #      xpad_s[y+PAD, ci*W + x] = img[ci, y, x]; top/bottom PAD rows are 0.
    xpad_s[0:PAD, :] = jnp.zeros((PAD, C_IN * IMG_W), f32)
    xpad_s[PAD + IMG_H:2 * PAD + IMG_H, :] = jnp.zeros((PAD, C_IN * IMG_W), f32)
    for ci in range(C_IN):
        xpad_s[PAD:PAD + IMG_H, ci * IMG_W:(ci + 1) * IMG_W] = x_ref[0, ci]

    # ---- conv1 (5x5, pad 2) as 5 banded matmuls + bias + ReLU ---------------
    acc1 = jnp.zeros((H1, W1 * C1), f32)
    for dy in range(KSZ):
        acc1 = acc1 + jnp.dot(xpad_s[dy:dy + H1, :], b1_ref[dy],
                              preferred_element_type=f32)
    relu1 = jnp.maximum(acc1 + b1b_ref[...], 0.0)                  # (64, 512)

    # ---- avg-pool 2x2 fused as two matmuls; H-pool also emits pad rows ------
    t2 = jnp.dot(relu1, pw2_ref[...], preferred_element_type=f32)          # (64, 256)
    pad2_s[...] = jnp.dot(ph2_ref[...], t2, preferred_element_type=f32)    # (36, 256)

    # ---- conv11 (5x5, pad 2) -------------------------------------------------
    acc2 = jnp.zeros((H2, W2 * C1), f32)
    for dy in range(KSZ):
        acc2 = acc2 + jnp.dot(pad2_s[dy:dy + H2, :], b2_ref[dy],
                              preferred_element_type=f32)
    relu2 = jnp.maximum(acc2 + b2b_ref[...], 0.0)                  # (32, 256)

    # ---- avg-pool 4x4 --------------------------------------------------------
    t4 = jnp.dot(relu2, pw4_ref[...], preferred_element_type=f32)          # (32, 64)
    pooled = jnp.dot(ph4_ref[...], t4, preferred_element_type=f32)         # (8, 64)

    # ---- fc2 (torch flatten order folded into a permuted weight) + ReLU ------
    h = fc2b_ref[...]                                              # (1, 64)
    for yo in range(H3):
        h = h + jnp.dot(pooled[yo:yo + 1, :], fc2w_ref[yo],
                        preferred_element_type=f32)
    h = jnp.maximum(h, 0.0)

    # ---- fc3 (no activation) --------------------------------------------------
    xf = jnp.dot(h, fc3w_ref[...], preferred_element_type=f32) + fc3b_ref[...]  # (1, 16)

    # ---- torch.hstack((x, sensor)) folded into split first-layer weights ------
    s = s_ref[0]                                                   # (1, 8)

    def mlp2(v0, w1x_ref, w1s_ref, b1h_ref, w2_ref, b2h_ref):
        v = jnp.maximum(
            jnp.dot(v0, w1x_ref[...], preferred_element_type=f32)
            + jnp.dot(s, w1s_ref[...], preferred_element_type=f32)
            + b1h_ref[...], 0.0)
        return jnp.maximum(
            jnp.dot(v, w2_ref[...], preferred_element_type=f32) + b2h_ref[...],
            0.0)

    # critic
    c = mlp2(xf, c1wx_ref, c1ws_ref, c1b_ref, c2w_ref, c2b_ref)
    val_ref[0] = jnp.dot(c, c3w_ref[...], preferred_element_type=f32) + c3b_ref[...]

    # actor (detach_cnn only changes gradients, not forward values)
    a = mlp2(xf, a1wx_ref, a1ws_ref, a1b_ref, a2w_ref, a2b_ref)
    mu_ref[0] = jnp.tanh(
        jnp.dot(a, a3w_ref[...], preferred_element_type=f32) + a3b_ref[...])


# ----------------------------------------------------------------------------
# pallas_call wrapper
# ----------------------------------------------------------------------------
_WEIGHT_ORDER = (
    "B1", "b1_row", "PW2", "PH2p", "B2", "b2_row", "PW4", "PH4",
    "fc2_w_r", "fc2_b", "fc3_wT", "fc3_b",
    "c1_wx", "c1_ws", "c1_b", "c2_wT", "c2_b", "c3_wT", "c3_b",
    "a1_wx", "a1_ws", "a1_b", "a2_wT", "a2_b", "a3_wT", "a3_b",
)


def _const_spec(arr):
    shape = tuple(arr.shape)
    zeros = (0,) * len(shape)
    return pl.BlockSpec(shape, lambda i: zeros)


def convnet_forward(prep, sensor, x_nchw):
    """Returns (mu, std, value); dist == Normal(mu, std) in the PyTorch code."""
    # TODO(synk): torch.distributions.Normal has no Pallas equivalent; we return
    #             its parameters (mu, std) instead.
    n = x_nchw.shape[0]
    x = x_nchw.astype(jnp.float32)
    sensor3 = sensor.astype(jnp.float32).reshape(n, 1, NUM_INPUTS)
    weights = [prep[k] for k in _WEIGHT_ORDER]

    in_specs = [
        pl.BlockSpec((1, C_IN, IMG_H, IMG_W), lambda i: (i, 0, 0, 0)),
        pl.BlockSpec((1, 1, NUM_INPUTS), lambda i: (i, 0, 0)),
    ] + [_const_spec(w) for w in weights]

    out_shape = (
        jax.ShapeDtypeStruct((n, 1, NUM_OUTPUTS), jnp.float32),
        jax.ShapeDtypeStruct((n, 1, 1), jnp.float32),
    )
    out_specs = (
        pl.BlockSpec((1, 1, NUM_OUTPUTS), lambda i: (i, 0, 0)),
        pl.BlockSpec((1, 1, 1), lambda i: (i, 0, 0)),
    )

    mu3, val3 = pl.pallas_call(
        _acnet_kernel,
        grid=(n,),
        out_shape=out_shape,
        in_specs=in_specs,
        out_specs=out_specs,
        scratch_shapes=[
            pltpu.VMEM((IMG_H + 2 * PAD, C_IN * IMG_W), jnp.float32),  # (68, 192)
            pltpu.VMEM((H2 + 2 * PAD, W2 * C1), jnp.float32),          # (36, 256)
        ],
        compiler_params=pltpu.CompilerParams(
            dimension_semantics=("parallel",),
            vmem_limit_bytes=32 * 1024 * 1024,
        ),
    )(x, sensor3, *weights)

    mu = mu3.reshape(n, NUM_OUTPUTS)
    value = val3.reshape(n, 1)
    std = jnp.broadcast_to(jnp.exp(prep["log_std"]), mu.shape)
    return mu, std, value


# ----------------------------------------------------------------------------
# Init-time parameter preparation (all transposes / permutations hoisted here)
# ----------------------------------------------------------------------------
def _band_matrix(w_oihw, w_in, w_out, pad, interleaved_in):
    """Banded conv-as-matmul weights: out(H, w_out*Cout) = sum_dy L_dy @ B[dy],
    where L_dy holds input row (y+dy-pad) with columns in either planar
    (ci*w_in + x) or channel-interleaved (x*Cin + ci) order."""
    c_out, c_in, kh, kw = w_oihw.shape
    B = np.zeros((kh, c_in * w_in, w_out * c_out), np.float32)
    for dy in range(kh):
        for dx in range(kw):
            wt = w_oihw[:, :, dy, dx].T                     # (Cin, Cout)
            for x in range(w_out):
                xin = x + dx - pad
                if 0 <= xin < w_in:
                    if interleaved_in:
                        rows = xin * c_in + np.arange(c_in)
                    else:
                        rows = np.arange(c_in) * w_in + xin
                    B[dy, rows, x * c_out:(x + 1) * c_out] += wt
    return B


def _pool_w_matrix(w_in, c, k):
    """Right-multiply pooling over W for channel-interleaved (x*c + ch) columns."""
    w_out = w_in // k
    P = np.zeros((w_in * c, w_out * c), np.float32)
    for x in range(w_in):
        for ch in range(c):
            P[x * c + ch, (x // k) * c + ch] = 1.0 / k
    return P


def _pool_h_matrix(h_in, k, pad_out):
    """Left-multiply pooling over rows; optionally emits pad_out zero rows."""
    P = np.zeros((h_in // k + 2 * pad_out, h_in), np.float32)
    for y in range(h_in):
        P[y // k + pad_out, y] = 1.0 / k
    return P


def _fc2_permuted(fc2_w):
    """fc2 weight with the torch NCHW flatten order (c*64 + y*8 + x) re-indexed
    to the kernel's (y, x*C + c) layout:  r[y, x*C + c, :] = fc2_w[:, c*64+y*8+x]."""
    r = np.zeros((H3, W3 * C1, HIDDEN_CNN), np.float32)
    for yo in range(H3):
        for xo in range(W3):
            for ch in range(C1):
                r[yo, xo * C1 + ch, :] = fc2_w[:, ch * H3 * W3 + yo * W3 + xo]
    return r


def prepare_params(params):
    """One-time conversion of PyTorch-layout params into the matmul-friendly
    operands consumed by the fused kernel (runs once at init, NOT per step)."""
    p = {k: np.asarray(v, np.float32) for k, v in params.items()}
    prep = {
        "B1": _band_matrix(p["conv1_w"], W1, W1, PAD, interleaved_in=False),
        "b1_row": np.tile(p["conv1_b"], W1)[None, :],                     # (1, 512)
        "PW2": _pool_w_matrix(W1, C1, 2),                                 # (512, 256)
        "PH2p": _pool_h_matrix(H1, 2, pad_out=PAD),                       # (36, 64)
        "B2": _band_matrix(p["conv11_w"], W2, W2, PAD, interleaved_in=True),
        "b2_row": np.tile(p["conv11_b"], W2)[None, :],                    # (1, 256)
        "PW4": _pool_w_matrix(W2, C1, 4),                                 # (256, 64)
        "PH4": _pool_h_matrix(H2, 4, pad_out=0),                          # (8, 32)
        "fc2_w_r": _fc2_permuted(p["fc2_w"]),                             # (8, 64, 64)
        "fc2_b": p["fc2_b"][None, :],
        "fc3_wT": p["fc3_w"].T,
        "fc3_b": p["fc3_b"][None, :],
        "c1_wx": p["c1_w"][:, :OUT_CNN].T,
        "c1_ws": p["c1_w"][:, OUT_CNN:].T,
        "c1_b": p["c1_b"][None, :],
        "c2_wT": p["c2_w"].T,
        "c2_b": p["c2_b"][None, :],
        "c3_wT": p["c3_w"].T,
        "c3_b": p["c3_b"][None, :],
        "a1_wx": p["a1_w"][:, :OUT_CNN].T,
        "a1_ws": p["a1_w"][:, OUT_CNN:].T,
        "a1_b": p["a1_b"][None, :],
        "a2_wT": p["a2_w"].T,
        "a2_b": p["a2_b"][None, :],
        "a3_wT": p["a3_w"].T,
        "a3_b": p["a3_b"][None, :],
        "log_std": p["log_std"],
    }
    return {k: jnp.asarray(v, jnp.float32) for k, v in prep.items()}


# ----------------------------------------------------------------------------
# PyTorch-layout parameters + a pure-JAX reference of the nn.Module forward
# ----------------------------------------------------------------------------
def init_params(key):
    def dense(k, shape, scale=0.1):
        return jax.random.normal(k, shape, jnp.float32) * scale

    ks = jax.random.split(key, 17)
    return {
        "conv1_w": dense(ks[0], (C1, C_IN, KSZ, KSZ)),
        "conv1_b": dense(ks[1], (C1,)),
        "conv11_w": dense(ks[2], (C1, C1, KSZ, KSZ)),
        "conv11_b": dense(ks[3], (C1,)),
        "fc2_w": dense(ks[4], (HIDDEN_CNN, FLAT)),
        "fc2_b": dense(ks[5], (HIDDEN_CNN,)),
        "fc3_w": dense(ks[6], (OUT_CNN, HIDDEN_CNN)),
        "fc3_b": dense(ks[7], (OUT_CNN,)),
        "c1_w": dense(ks[8], (HIDDEN_AC, OUT_CNN + NUM_INPUTS)),
        "c1_b": dense(ks[9], (HIDDEN_AC,)),
        "c2_w": dense(ks[10], (HIDDEN_AC, HIDDEN_AC)),
        "c2_b": dense(ks[11], (HIDDEN_AC,)),
        "c3_w": dense(ks[12], (1, HIDDEN_AC)),
        "c3_b": jnp.zeros((1,), jnp.float32),
        "a1_w": dense(ks[13], (HIDDEN_AC, OUT_CNN + NUM_INPUTS)),
        "a1_b": dense(ks[14], (HIDDEN_AC,)),
        "a2_w": dense(ks[15], (HIDDEN_AC, HIDDEN_AC)),
        "a2_b": jnp.zeros((HIDDEN_AC,), jnp.float32),
        "a3_w": dense(ks[16], (NUM_OUTPUTS, HIDDEN_AC)),
        "a3_b": jnp.zeros((NUM_OUTPUTS,), jnp.float32),
        "log_std": jnp.full((1, NUM_OUTPUTS), STD, jnp.float32),
    }


def reference_forward(params, sensor, x_nchw):
    """Pure-JAX transcription of ConvNetActorCritic.forward (cnn_type=5)."""
    hp = jax.lax.Precision.HIGHEST

    def conv(v, w, b):
        y = jax.lax.conv_general_dilated(
            v, w, window_strides=(1, 1), padding=((PAD, PAD), (PAD, PAD)),
            dimension_numbers=("NCHW", "OIHW", "NCHW"), precision=hp)
        return y + b.reshape(1, -1, 1, 1)

    def avgpool(v, k):
        n, c, h, w = v.shape
        return v.reshape(n, c, h // k, k, w // k, k).mean(axis=(3, 5))

    def dense(v, w, b):
        return jnp.dot(v, w.T, precision=hp) + b

    x = x_nchw.astype(jnp.float32)
    x = avgpool(jax.nn.relu(conv(x, params["conv1_w"], params["conv1_b"])), 2)
    x = avgpool(jax.nn.relu(conv(x, params["conv11_w"], params["conv11_b"])), 4)
    x = x.reshape(x.shape[0], -1)
    x = jax.nn.relu(dense(x, params["fc2_w"], params["fc2_b"]))
    x = dense(x, params["fc3_w"], params["fc3_b"])
    xa = jnp.concatenate([x, sensor.astype(jnp.float32)], axis=1)
    v = jax.nn.relu(dense(xa, params["c1_w"], params["c1_b"]))
    v = jax.nn.relu(dense(v, params["c2_w"], params["c2_b"]))
    value = dense(v, params["c3_w"], params["c3_b"])
    a = jax.nn.relu(dense(xa, params["a1_w"], params["a1_b"]))
    a = jax.nn.relu(dense(a, params["a2_w"], params["a2_b"]))
    mu = jnp.tanh(dense(a, params["a3_w"], params["a3_b"]))
    std = jnp.broadcast_to(jnp.exp(params["log_std"]), mu.shape)
    return mu, std, value


if __name__ == "__main__":
    key = jax.random.PRNGKey(0)
    kp, kx, ks = jax.random.split(key, 3)

    params = init_params(kp)
    prep = prepare_params(params)           # init-time weight repacking

    x = jax.random.normal(kx, (2, C_IN, IMG_H, IMG_W), jnp.float32)   # NCHW image
    sensor = jax.random.normal(ks, (2, NUM_INPUTS), jnp.float32)

    fwd = jax.jit(convnet_forward)
    mu, std, value = fwd(prep, sensor, x)
    jax.block_until_ready((mu, std, value))

    assert mu.shape == (2, NUM_OUTPUTS)
    assert std.shape == (2, NUM_OUTPUTS)
    assert value.shape == (2, 1)

    # Numerical parity with the (pure-JAX) PyTorch-module reference.
    mu_r, std_r, val_r = reference_forward(params, sensor, x)
    np.testing.assert_allclose(np.asarray(mu), np.asarray(mu_r), rtol=2e-2, atol=5e-3)
    np.testing.assert_allclose(np.asarray(value), np.asarray(val_r), rtol=2e-2, atol=5e-3)
    np.testing.assert_allclose(np.asarray(std), np.asarray(std_r), rtol=1e-6, atol=1e-6)

    print("KERNEL_OK")
</pallas_src>

<mosaic_0001>
module attributes {stable_mosaic.version = 11 : i64} {
  func.func @_acnet_kernel(%arg0: i32, %arg1: memref<1x3x64x64xf32, #tpu.memory_space<vmem>>, %arg2: memref<1x1x8xf32, #tpu.memory_space<vmem>>, %arg3: memref<5x192x512xf32, #tpu.memory_space<vmem>>, %arg4: memref<1x512xf32, #tpu.memory_space<vmem>>, %arg5: memref<512x256xf32, #tpu.memory_space<vmem>>, %arg6: memref<36x64xf32, #tpu.memory_space<vmem>>, %arg7: memref<5x256x256xf32, #tpu.memory_space<vmem>>, %arg8: memref<1x256xf32, #tpu.memory_space<vmem>>, %arg9: memref<256x64xf32, #tpu.memory_space<vmem>>, %arg10: memref<8x32xf32, #tpu.memory_space<vmem>>, %arg11: memref<8x64x64xf32, #tpu.memory_space<vmem>>, %arg12: memref<1x64xf32, #tpu.memory_space<vmem>>, %arg13: memref<64x16xf32, #tpu.memory_space<vmem>>, %arg14: memref<1x16xf32, #tpu.memory_space<vmem>>, %arg15: memref<16x32xf32, #tpu.memory_space<vmem>>, %arg16: memref<8x32xf32, #tpu.memory_space<vmem>>, %arg17: memref<1x32xf32, #tpu.memory_space<vmem>>, %arg18: memref<32x32xf32, #tpu.memory_space<vmem>>, %arg19: memref<1x32xf32, #tpu.memory_space<vmem>>, %arg20: memref<32x1xf32, #tpu.memory_space<vmem>>, %arg21: memref<1x1xf32, #tpu.memory_space<vmem>>, %arg22: memref<16x32xf32, #tpu.memory_space<vmem>>, %arg23: memref<8x32xf32, #tpu.memory_space<vmem>>, %arg24: memref<1x32xf32, #tpu.memory_space<vmem>>, %arg25: memref<32x32xf32, #tpu.memory_space<vmem>>, %arg26: memref<1x32xf32, #tpu.memory_space<vmem>>, %arg27: memref<32x4xf32, #tpu.memory_space<vmem>>, %arg28: memref<1x4xf32, #tpu.memory_space<vmem>>, %arg29: memref<1x1x4xf32, #tpu.memory_space<vmem>>, %arg30: memref<1x1x1xf32, #tpu.memory_space<vmem>>, %arg31: memref<68x192xf32, #tpu.memory_space<vmem>>, %arg32: memref<36x256xf32, #tpu.memory_space<vmem>>) attributes {dimension_semantics = [#tpu.dimension_semantics<parallel>], iteration_bounds = array<i64: 2>, scalar_prefetch = 0 : i64, scratch_operands = 2 : i64, tpu.core_type = #tpu.core_type<tc>, window_params = [{transform_indices = @transform_0, window_bounds = array<i64: 1, 3, 64, 64>}, {transform_indices = @transform_1, window_bounds = array<i64: 1, 1, 8>}, {pipeline_mode = #tpu.pipeline_mode<synchronous>, transform_indices = @transform_2, window_bounds = array<i64: 5, 192, 512>}, {pipeline_mode = #tpu.pipeline_mode<synchronous>, transform_indices = @transform_3, window_bounds = array<i64: 1, 512>}, {pipeline_mode = #tpu.pipeline_mode<synchronous>, transform_indices = @transform_4, window_bounds = array<i64: 512, 256>}, {pipeline_mode = #tpu.pipeline_mode<synchronous>, transform_indices = @transform_5, window_bounds = array<i64: 36, 64>}, {pipeline_mode = #tpu.pipeline_mode<synchronous>, transform_indices = @transform_6, window_bounds = array<i64: 5, 256, 256>}, {pipeline_mode = #tpu.pipeline_mode<synchronous>, transform_indices = @transform_7, window_bounds = array<i64: 1, 256>}, {pipeline_mode = #tpu.pipeline_mode<synchronous>, transform_indices = @transform_8, window_bounds = array<i64: 256, 64>}, {pipeline_mode = #tpu.pipeline_mode<synchronous>, transform_indices = @transform_9, window_bounds = array<i64: 8, 32>}, {pipeline_mode = #tpu.pipeline_mode<synchronous>, transform_indices = @transform_10, window_bounds = array<i64: 8, 64, 64>}, {pipeline_mode = #tpu.pipeline_mode<synchronous>, transform_indices = @transform_11, window_bounds = array<i64: 1, 64>}, {pipeline_mode = #tpu.pipeline_mode<synchronous>, transform_indices = @transform_12, window_bounds = array<i64: 64, 16>}, {pipeline_mode = #tpu.pipeline_mode<synchronous>, transform_indices = @transform_13, window_bounds = array<i64: 1, 16>}, {pipeline_mode = #tpu.pipeline_mode<synchronous>, transform_indices = @transform_14, window_bounds = array<i64: 16, 32>}, {pipeline_mode = #tpu.pipeline_mode<synchronous>, transform_indices = @transform_15, window_bounds = array<i64: 8, 32>}, {pipeline_mode = #tpu.pipeline_mode<synchronous>, transform_indices = @transform_16, window_bounds = array<i64: 1, 32>}, {pipeline_mode = #tpu.pipeline_mode<synchronous>, transform_indices = @transform_17, window_bounds = array<i64: 32, 32>}, {pipeline_mode = #tpu.pipeline_mode<synchronous>, transform_indices = @transform_18, window_bounds = array<i64: 1, 32>}, {pipeline_mode = #tpu.pipeline_mode<synchronous>, transform_indices = @transform_19, window_bounds = array<i64: 32, 1>}, {pipeline_mode = #tpu.pipeline_mode<synchronous>, transform_indices = @transform_20, window_bounds = array<i64: 1, 1>}, {pipeline_mode = #tpu.pipeline_mode<synchronous>, transform_indices = @transform_21, window_bounds = array<i64: 16, 32>}, {pipeline_mode = #tpu.pipeline_mode<synchronous>, transform_indices = @transform_22, window_bounds = array<i64: 8, 32>}, {pipeline_mode = #tpu.pipeline_mode<synchronous>, transform_indices = @transform_23, window_bounds = array<i64: 1, 32>}, {pipeline_mode = #tpu.pipeline_mode<synchronous>, transform_indices = @transform_24, window_bounds = array<i64: 32, 32>}, {pipeline_mode = #tpu.pipeline_mode<synchronous>, transform_indices = @transform_25, window_bounds = array<i64: 1, 32>}, {pipeline_mode = #tpu.pipeline_mode<synchronous>, transform_indices = @transform_26, window_bounds = array<i64: 32, 4>}, {pipeline_mode = #tpu.pipeline_mode<synchronous>, transform_indices = @transform_27, window_bounds = array<i64: 1, 4>}, {transform_indices = @transform_28, window_bounds = array<i64: 1, 1, 4>}, {transform_indices = @transform_29, window_bounds = array<i64: 1, 1, 1>}]} {
    %cst = arith.constant 0.000000e+00 : f32
    %0 = vector.broadcast %cst : f32 to vector<2x192xf32>
    %c0 = arith.constant 0 : index
    %c0_0 = arith.constant 0 : index
    %1 = vector.load %arg31[%c0, %c0_0] : memref<68x192xf32, #tpu.memory_space<vmem>>, vector<2x192xf32>
    tpu.vector_store %arg31[%c0, %c0_0], %0 {strides = array<i32>} : memref<68x192xf32, #tpu.memory_space<vmem>>, vector<2x192xf32>,
    %cst_1 = arith.constant 0.000000e+00 : f32
    %2 = vector.broadcast %cst_1 : f32 to vector<2x192xf32>
    %c66 = arith.constant 66 : index
    %c0_2 = arith.constant 0 : index
    %3 = vector.load %arg31[%c66, %c0_2] : memref<68x192xf32, #tpu.memory_space<vmem>>, vector<2x192xf32>
    tpu.vector_store %arg31[%c66, %c0_2], %2 {strides = array<i32>} : memref<68x192xf32, #tpu.memory_space<vmem>>, vector<2x192xf32>,
    %c0_3 = arith.constant 0 : index
    %c0_4 = arith.constant 0 : index
    %c0_5 = arith.constant 0 : index
    %c0_6 = arith.constant 0 : index
    %4 = vector.load %arg1[%c0_3, %c0_4, %c0_5, %c0_6] : memref<1x3x64x64xf32, #tpu.memory_space<vmem>>, vector<1x1x64x64xf32>
    %5 = vector.shape_cast %4 : vector<1x1x64x64xf32> to vector<64x64xf32>
    %c2 = arith.constant 2 : index
    %c0_7 = arith.constant 0 : index
    %6 = vector.load %arg31[%c2, %c0_7] : memref<68x192xf32, #tpu.memory_space<vmem>>, vector<64x64xf32>
    tpu.vector_store %arg31[%c2, %c0_7], %5 {strides = array<i32>} : memref<68x192xf32, #tpu.memory_space<vmem>>, vector<64x64xf32>,
    %c0_8 = arith.constant 0 : index
    %c1 = arith.constant 1 : index
    %c0_9 = arith.constant 0 : index
    %c0_10 = arith.constant 0 : index
    %7 = vector.load %arg1[%c0_8, %c1, %c0_9, %c0_10] : memref<1x3x64x64xf32, #tpu.memory_space<vmem>>, vector<1x1x64x64xf32>
    %8 = vector.shape_cast %7 : vector<1x1x64x64xf32> to vector<64x64xf32>
    %c2_11 = arith.constant 2 : index
    %c64 = arith.constant 64 : index
    %9 = vector.load %arg31[%c2_11, %c64] : memref<68x192xf32, #tpu.memory_space<vmem>>, vector<64x64xf32>
    tpu.vector_store %arg31[%c2_11, %c64], %8 {strides = array<i32>} : memref<68x192xf32, #tpu.memory_space<vmem>>, vector<64x64xf32>,
    %c0_12 = arith.constant 0 : index
    %c2_13 = arith.constant 2 : index
    %c0_14 = arith.constant 0 : index
    %c0_15 = arith.constant 0 : index
    %10 = vector.load %arg1[%c0_12, %c2_13, %c0_14, %c0_15] : memref<1x3x64x64xf32, #tpu.memory_space<vmem>>, vector<1x1x64x64xf32>
    %11 = vector.shape_cast %10 : vector<1x1x64x64xf32> to vector<64x64xf32>
    %c2_16 = arith.constant 2 : index
    %c128 = arith.constant 128 : index
    %12 = vector.load %arg31[%c2_16, %c128] : memref<68x192xf32, #tpu.memory_space<vmem>>, vector<64x64xf32>
    tpu.vector_store %arg31[%c2_16, %c128], %11 {strides = array<i32>} : memref<68x192xf32, #tpu.memory_space<vmem>>, vector<64x64xf32>,
    %cst_17 = arith.constant 0.000000e+00 : f32
    %13 = vector.broadcast %cst_17 : f32 to vector<64x512xf32>
    %c0_18 = arith.constant 0 : index
    %c0_19 = arith.constant 0 : index
    %14 = vector.load %arg31[%c0_18, %c0_19] : memref<68x192xf32, #tpu.memory_space<vmem>>, vector<64x192xf32>
    %c0_20 = arith.constant 0 : index
    %c0_21 = arith.constant 0 : index
    %c0_22 = arith.constant 0 : index
    %15 = vector.load %arg3[%c0_20, %c0_21, %c0_22] : memref<5x192x512xf32, #tpu.memory_space<vmem>>, vector<1x192x512xf32>
    %16 = vector.shape_cast %15 : vector<1x192x512xf32> to vector<192x512xf32>
    %cst_23 = arith.constant dense<0.000000e+00> : vector<64x512xf32>
    %17 = tpu.matmul %14, %16, %cst_23 {dimension_numbers = #tpu.dot_dimension_numbers<[1], [0], [0], [1], [0, 0, 1, 1], [], []>} : vector<64x192xf32>, vector<192x512xf32>, vector<64x512xf32> -> vector<64x512xf32>
    %18 = arith.addf %13, %17 : vector<64x512xf32>
    %c1_24 = arith.constant 1 : index
    %c0_25 = arith.constant 0 : index
    %19 = vector.load %arg31[%c1_24, %c0_25] : memref<68x192xf32, #tpu.memory_space<vmem>>, vector<64x192xf32>
    %c1_26 = arith.constant 1 : index
    %c0_27 = arith.constant 0 : index
    %c0_28 = arith.constant 0 : index
    %20 = vector.load %arg3[%c1_26, %c0_27, %c0_28] : memref<5x192x512xf32, #tpu.memory_space<vmem>>, vector<1x192x512xf32>
    %21 = vector.shape_cast %20 : vector<1x192x512xf32> to vector<192x512xf32>
    %cst_29 = arith.constant dense<0.000000e+00> : vector<64x512xf32>
    %22 = tpu.matmul %19, %21, %cst_29 {dimension_numbers = #tpu.dot_dimension_numbers<[1], [0], [0], [1], [0, 0, 1, 1], [], []>} : vector<64x192xf32>, vector<192x512xf32>, vector<64x512xf32> -> vector<64x512xf32>
    %23 = arith.addf %18, %22 : vector<64x512xf32>
    %c2_30 = arith.constant 2 : index
    %c0_31 = arith.constant 0 : index
    %24 = vector.load %arg31[%c2_30, %c0_31] : memref<68x192xf32, #tpu.memory_space<vmem>>, vector<64x192xf32>
    %c2_32 = arith.constant 2 : index
    %c0_33 = arith.constant 0 : index
    %c0_34 = arith.constant 0 : index
    %25 = vector.load %arg3[%c2_32, %c0_33, %c0_34] : memref<5x192x512xf32, #tpu.memory_space<vmem>>, vector<1x192x512xf32>
    %26 = vector.shape_cast %25 : vector<1x192x512xf32> to vector<192x512xf32>
    %cst_35 = arith.constant dense<0.000000e+00> : vector<64x512xf32>
    %27 = tpu.matmul %24, %26, %cst_35 {dimension_numbers = #tpu.dot_dimension_numbers<[1], [0], [0], [1], [0, 0, 1, 1], [], []>} : vector<64x192xf32>, vector<192x512xf32>, vector<64x512xf32> -> vector<64x512xf32>
    %28 = arith.addf %23, %27 : vector<64x512xf32>
    %c3 = arith.constant 3 : index
    %c0_36 = arith.constant 0 : index
    %29 = vector.load %arg31[%c3, %c0_36] : memref<68x192xf32, #tpu.memory_space<vmem>>, vector<64x192xf32>
    %c3_37 = arith.constant 3 : index
    %c0_38 = arith.constant 0 : index
    %c0_39 = arith.constant 0 : index
    %30 = vector.load %arg3[%c3_37, %c0_38, %c0_39] : memref<5x192x512xf32, #tpu.memory_space<vmem>>, vector<1x192x512xf32>
    %31 = vector.shape_cast %30 : vector<1x192x512xf32> to vector<192x512xf32>
    %cst_40 = arith.constant dense<0.000000e+00> : vector<64x512xf32>
    %32 = tpu.matmul %29, %31, %cst_40 {dimension_numbers = #tpu.dot_dimension_numbers<[1], [0], [0], [1], [0, 0, 1, 1], [], []>} : vector<64x192xf32>, vector<192x512xf32>, vector<64x512xf32> -> vector<64x512xf32>
    %33 = arith.addf %28, %32 : vector<64x512xf32>
    %c4 = arith.constant 4 : index
    %c0_41 = arith.constant 0 : index
    %34 = vector.load %arg31[%c4, %c0_41] : memref<68x192xf32, #tpu.memory_space<vmem>>, vector<64x192xf32>
    %c4_42 = arith.constant 4 : index
    %c0_43 = arith.constant 0 : index
    %c0_44 = arith.constant 0 : index
    %35 = vector.load %arg3[%c4_42, %c0_43, %c0_44] : memref<5x192x512xf32, #tpu.memory_space<vmem>>, vector<1x192x512xf32>
    %36 = vector.shape_cast %35 : vector<1x192x512xf32> to vector<192x512xf32>
    %cst_45 = arith.constant dense<0.000000e+00> : vector<64x512xf32>
    %37 = tpu.matmul %34, %36, %cst_45 {dimension_numbers = #tpu.dot_dimension_numbers<[1], [0], [0], [1], [0, 0, 1, 1], [], []>} : vector<64x192xf32>, vector<192x512xf32>, vector<64x512xf32> -> vector<64x512xf32>
    %38 = arith.addf %33, %37 : vector<64x512xf32>
    %c0_46 = arith.constant 0 : index
    %c0_47 = arith.constant 0 : index
    %39 = vector.load %arg4[%c0_46, %c0_47] : memref<1x512xf32, #tpu.memory_space<vmem>>, vector<1x512xf32>
    %40 = vector.broadcast %39 : vector<1x512xf32> to vector<64x512xf32>
    %41 = arith.addf %38, %40 : vector<64x512xf32>
    %cst_48 = arith.constant 0.000000e+00 : f32
    %42 = vector.broadcast %cst_48 : f32 to vector<64x512xf32>
    %43 = arith.maximumf %41, %42 : vector<64x512xf32>
    %c0_49 = arith.constant 0 : index
    %c0_50 = arith.constant 0 : index
    %44 = vector.load %arg5[%c0_49, %c0_50] : memref<512x256xf32, #tpu.memory_space<vmem>>, vector<512x256xf32>
    %cst_51 = arith.constant dense<0.000000e+00> : vector<64x256xf32>
    %45 = tpu.matmul %43, %44, %cst_51 {dimension_numbers = #tpu.dot_dimension_numbers<[1], [0], [0], [1], [0, 0, 1, 1], [], []>} : vector<64x512xf32>, vector<512x256xf32>, vector<64x256xf32> -> vector<64x256xf32>
    %c0_52 = arith.constant 0 : index
    %c0_53 = arith.constant 0 : index
    %46 = vector.load %arg6[%c0_52, %c0_53] : memref<36x64xf32, #tpu.memory_space<vmem>>, vector<36x64xf32>
    %cst_54 = arith.constant dense<0.000000e+00> : vector<36x256xf32>
    %47 = tpu.matmul %46, %45, %cst_54 {dimension_numbers = #tpu.dot_dimension_numbers<[1], [0], [0], [1], [0, 0, 1, 1], [], []>} : vector<36x64xf32>, vector<64x256xf32>, vector<36x256xf32> -> vector<36x256xf32>
    %c0_55 = arith.constant 0 : index
    %c0_56 = arith.constant 0 : index
    %48 = vector.load %arg32[%c0_55, %c0_56] : memref<36x256xf32, #tpu.memory_space<vmem>>, vector<36x256xf32>
    tpu.vector_store %arg32[%c0_55, %c0_56], %47 {strides = array<i32>} : memref<36x256xf32, #tpu.memory_space<vmem>>, vector<36x256xf32>,
    %cst_57 = arith.constant 0.000000e+00 : f32
    %49 = vector.broadcast %cst_57 : f32 to vector<32x256xf32>
    %c0_58 = arith.constant 0 : index
    %c0_59 = arith.constant 0 : index
    %50 = vector.load %arg32[%c0_58, %c0_59] : memref<36x256xf32, #tpu.memory_space<vmem>>, vector<32x256xf32>
    %c0_60 = arith.constant 0 : index
    %c0_61 = arith.constant 0 : index
    %c0_62 = arith.constant 0 : index
    %51 = vector.load %arg7[%c0_60, %c0_61, %c0_62] : memref<5x256x256xf32, #tpu.memory_space<vmem>>, vector<1x256x256xf32>
    %52 = vector.shape_cast %51 : vector<1x256x256xf32> to vector<256x256xf32>
    %cst_63 = arith.constant dense<0.000000e+00> : vector<32x256xf32>
    %53 = tpu.matmul %50, %52, %cst_63 {dimension_numbers = #tpu.dot_dimension_numbers<[1], [0], [0], [1], [0, 0, 1, 1], [], []>} : vector<32x256xf32>, vector<256x256xf32>, vector<32x256xf32> -> vector<32x256xf32>
    %54 = arith.addf %49, %53 : vector<32x256xf32>
    %c1_64 = arith.constant 1 : index
    %c0_65 = arith.constant 0 : index
    %55 = vector.load %arg32[%c1_64, %c0_65] : memref<36x256xf32, #tpu.memory_space<vmem>>, vector<32x256xf32>
    %c1_66 = arith.constant 1 : index
    %c0_67 = arith.constant 0 : index
    %c0_68 = arith.constant 0 : index
    %56 = vector.load %arg7[%c1_66, %c0_67, %c0_68] : memref<5x256x256xf32, #tpu.memory_space<vmem>>, vector<1x256x256xf32>
    %57 = vector.shape_cast %56 : vector<1x256x256xf32> to vector<256x256xf32>
    %cst_69 = arith.constant dense<0.000000e+00> : vector<32x256xf32>
    %58 = tpu.matmul %55, %57, %cst_69 {dimension_numbers = #tpu.dot_dimension_numbers<[1], [0], [0], [1], [0, 0, 1, 1], [], []>} : vector<32x256xf32>, vector<256x256xf32>, vector<32x256xf32> -> vector<32x256xf32>
    %59 = arith.addf %54, %58 : vector<32x256xf32>
    %c2_70 = arith.constant 2 : index
    %c0_71 = arith.constant 0 : index
    %60 = vector.load %arg32[%c2_70, %c0_71] : memref<36x256xf32, #tpu.memory_space<vmem>>, vector<32x256xf32>
    %c2_72 = arith.constant 2 : index
    %c0_73 = arith.constant 0 : index
    %c0_74 = arith.constant 0 : index
    %61 = vector.load %arg7[%c2_72, %c0_73, %c0_74] : memref<5x256x256xf32, #tpu.memory_space<vmem>>, vector<1x256x256xf32>
    %62 = vector.shape_cast %61 : vector<1x256x256xf32> to vector<256x256xf32>
    %cst_75 = arith.constant dense<0.000000e+00> : vector<32x256xf32>
    %63 = tpu.matmul %60, %62, %cst_75 {dimension_numbers = #tpu.dot_dimension_numbers<[1], [0], [0], [1], [0, 0, 1, 1], [], []>} : vector<32x256xf32>, vector<256x256xf32>, vector<32x256xf32> -> vector<32x256xf32>
    %64 = arith.addf %59, %63 : vector<32x256xf32>
    %c3_76 = arith.constant 3 : index
    %c0_77 = arith.constant 0 : index
    %65 = vector.load %arg32[%c3_76, %c0_77] : memref<36x256xf32, #tpu.memory_space<vmem>>, vector<32x256xf32>
    %c3_78 = arith.constant 3 : index
    %c0_79 = arith.constant 0 : index
    %c0_80 = arith.constant 0 : index
    %66 = vector.load %arg7[%c3_78, %c0_79, %c0_80] : memref<5x256x256xf32, #tpu.memory_space<vmem>>, vector<1x256x256xf32>
    %67 = vector.shape_cast %66 : vector<1x256x256xf32> to vector<256x256xf32>
    %cst_81 = arith.constant dense<0.000000e+00> : vector<32x256xf32>
    %68 = tpu.matmul %65, %67, %cst_81 {dimension_numbers = #tpu.dot_dimension_numbers<[1], [0], [0], [1], [0, 0, 1, 1], [], []>} : vector<32x256xf32>, vector<256x256xf32>, vector<32x256xf32> -> vector<32x256xf32>
    %69 = arith.addf %64, %68 : vector<32x256xf32>
    %c4_82 = arith.constant 4 : index
    %c0_83 = arith.constant 0 : index
    %70 = vector.load %arg32[%c4_82, %c0_83] : memref<36x256xf32, #tpu.memory_space<vmem>>, vector<32x256xf32>
    %c4_84 = arith.constant 4 : index
    %c0_85 = arith.constant 0 : index
    %c0_86 = arith.constant 0 : index
    %71 = vector.load %arg7[%c4_84, %c0_85, %c0_86] : memref<5x256x256xf32, #tpu.memory_space<vmem>>, vector<1x256x256xf32>
    %72 = vector.shape_cast %71 : vector<1x256x256xf32> to vector<256x256xf32>
    %cst_87 = arith.constant dense<0.000000e+00> : vector<32x256xf32>
    %73 = tpu.matmul %70, %72, %cst_87 {dimension_numbers = #tpu.dot_dimension_numbers<[1], [0], [0], [1], [0, 0, 1, 1], [], []>} : vector<32x256xf32>, vector<256x256xf32>, vector<32x256xf32> -> vector<32x256xf32>
    %74 = arith.addf %69, %73 : vector<32x256xf32>
    %c0_88 = arith.constant 0 : index
    %c0_89 = arith.constant 0 : index
    %75 = vector.load %arg8[%c0_88, %c0_89] : memref<1x256xf32, #tpu.memory_space<vmem>>, vector<1x256xf32>
    %76 = vector.broadcast %75 : vector<1x256xf32> to vector<32x256xf32>
    %77 = arith.addf %74, %76 : vector<32x256xf32>
    %cst_90 = arith.constant 0.000000e+00 : f32
    %78 = vector.broadcast %cst_90 : f32 to vector<32x256xf32>
    %79 = arith.maximumf %77, %78 : vector<32x256xf32>
    %c0_91 = arith.constant 0 : index
    %c0_92 = arith.constant 0 : index
    %80 = vector.load %arg9[%c0_91, %c0_92] : memref<256x64xf32, #tpu.memory_space<vmem>>, vector<256x64xf32>
    %cst_93 = arith.constant dense<0.000000e+00> : vector<32x64xf32>
    %81 = tpu.matmul %79, %80, %cst_93 {dimension_numbers = #tpu.dot_dimension_numbers<[1], [0], [0], [1], [0, 0, 1, 1], [], []>} : vector<32x256xf32>, vector<256x64xf32>, vector<32x64xf32> -> vector<32x64xf32>
    %c0_94 = arith.constant 0 : index
    %c0_95 = arith.constant 0 : index
    %82 = vector.load %arg10[%c0_94, %c0_95] : memref<8x32xf32, #tpu.memory_space<vmem>>, vector<8x32xf32>
    %cst_96 = arith.constant dense<0.000000e+00> : vector<8x64xf32>
    %83 = tpu.matmul %82, %81, %cst_96 {dimension_numbers = #tpu.dot_dimension_numbers<[1], [0], [0], [1], [0, 0, 1, 1], [], []>} : vector<8x32xf32>, vector<32x64xf32>, vector<8x64xf32> -> vector<8x64xf32>
    %c0_97 = arith.constant 0 : index
    %c0_98 = arith.constant 0 : index
    %84 = vector.load %arg12[%c0_97, %c0_98] : memref<1x64xf32, #tpu.memory_space<vmem>>, vector<1x64xf32>
    %85 = vector.extract_strided_slice %83 {offsets = [0, 0], sizes = [1, 64], strides = [1, 1]} : vector<8x64xf32> to vector<1x64xf32>
    %c0_99 = arith.constant 0 : index
    %c0_100 = arith.constant 0 : index
    %c0_101 = arith.constant 0 : index
    %86 = vector.load %arg11[%c0_99, %c0_100, %c0_101] : memref<8x64x64xf32, #tpu.memory_space<vmem>>, vector<1x64x64xf32>
    %87 = vector.shape_cast %86 : vector<1x64x64xf32> to vector<64x64xf32>
    %cst_102 = arith.constant dense<0.000000e+00> : vector<1x64xf32>
    %88 = tpu.matmul %85, %87, %cst_102 {dimension_numbers = #tpu.dot_dimension_numbers<[1], [0], [0], [1], [0, 0, 1, 1], [], []>} : vector<1x64xf32>, vector<64x64xf32>, vector<1x64xf32> -> vector<1x64xf32>
    %89 = arith.addf %84, %88 : vector<1x64xf32>
    %90 = vector.extract_strided_slice %83 {offsets = [1, 0], sizes = [1, 64], strides = [1, 1]} : vector<8x64xf32> to vector<1x64xf32>
    %c1_103 = arith.constant 1 : index
    %c0_104 = arith.constant 0 : index
    %c0_105 = arith.constant 0 : index
    %91 = vector.load %arg11[%c1_103, %c0_104, %c0_105] : memref<8x64x64xf32, #tpu.memory_space<vmem>>, vector<1x64x64xf32>
    %92 = vector.shape_cast %91 : vector<1x64x64xf32> to vector<64x64xf32>
    %cst_106 = arith.constant dense<0.000000e+00> : vector<1x64xf32>
    %93 = tpu.matmul %90, %92, %cst_106 {dimension_numbers = #tpu.dot_dimension_numbers<[1], [0], [0], [1], [0, 0, 1, 1], [], []>} : vector<1x64xf32>, vector<64x64xf32>, vector<1x64xf32> -> vector<1x64xf32>
    %94 = arith.addf %89, %93 : vector<1x64xf32>
    %95 = vector.extract_strided_slice %83 {offsets = [2, 0], sizes = [1, 64], strides = [1, 1]} : vector<8x64xf32> to vector<1x64xf32>
    %c2_107 = arith.constant 2 : index
    %c0_108 = arith.constant 0 : index
    %c0_109 = arith.constant 0 : index
    %96 = vector.load %arg11[%c2_107, %c0_108, %c0_109] : memref<8x64x64xf32, #tpu.memory_space<vmem>>, vector<1x64x64xf32>
    %97 = vector.shape_cast %96 : vector<1x64x64xf32> to vector<64x64xf32>
    %cst_110 = arith.constant dense<0.000000e+00> : vector<1x64xf32>
    %98 = tpu.matmul %95, %97, %cst_110 {dimension_numbers = #tpu.dot_dimension_numbers<[1], [0], [0], [1], [0, 0, 1, 1], [], []>} : vector<1x64xf32>, vector<64x64xf32>, vector<1x64xf32> -> vector<1x64xf32>
    %99 = arith.addf %94, %98 : vector<1x64xf32>
    %100 = vector.extract_strided_slice %83 {offsets = [3, 0], sizes = [1, 64], strides = [1, 1]} : vector<8x64xf32> to vector<1x64xf32>
    %c3_111 = arith.constant 3 : index
    %c0_112 = arith.constant 0 : index
    %c0_113 = arith.constant 0 : index
    %101 = vector.load %arg11[%c3_111, %c0_112, %c0_113] : memref<8x64x64xf32, #tpu.memory_space<vmem>>, vector<1x64x64xf32>
    %102 = vector.shape_cast %101 : vector<1x64x64xf32> to vector<64x64xf32>
    %cst_114 = arith.constant dense<0.000000e+00> : vector<1x64xf32>
    %103 = tpu.matmul %100, %102, %cst_114 {dimension_numbers = #tpu.dot_dimension_numbers<[1], [0], [0], [1], [0, 0, 1, 1], [], []>} : vector<1x64xf32>, vector<64x64xf32>, vector<1x64xf32> -> vector<1x64xf32>
    %104 = arith.addf %99, %103 : vector<1x64xf32>
    %105 = vector.extract_strided_slice %83 {offsets = [4, 0], sizes = [1, 64], strides = [1, 1]} : vector<8x64xf32> to vector<1x64xf32>
    %c4_115 = arith.constant 4 : index
    %c0_116 = arith.constant 0 : index
    %c0_117 = arith.constant 0 : index
    %106 = vector.load %arg11[%c4_115, %c0_116, %c0_117] : memref<8x64x64xf32, #tpu.memory_space<vmem>>, vector<1x64x64xf32>
    %107 = vector.shape_cast %106 : vector<1x64x64xf32> to vector<64x64xf32>
    %cst_118 = arith.constant dense<0.000000e+00> : vector<1x64xf32>
    %108 = tpu.matmul %105, %107, %cst_118 {dimension_numbers = #tpu.dot_dimension_numbers<[1], [0], [0], [1], [0, 0, 1, 1], [], []>} : vector<1x64xf32>, vector<64x64xf32>, vector<1x64xf32> -> vector<1x64xf32>
    %109 = arith.addf %104, %108 : vector<1x64xf32>
    %110 = vector.extract_strided_slice %83 {offsets = [5, 0], sizes = [1, 64], strides = [1, 1]} : vector<8x64xf32> to vector<1x64xf32>
    %c5 = arith.constant 5 : index
    %c0_119 = arith.constant 0 : index
    %c0_120 = arith.constant 0 : index
    %111 = vector.load %arg11[%c5, %c0_119, %c0_120] : memref<8x64x64xf32, #tpu.memory_space<vmem>>, vector<1x64x64xf32>
    %112 = vector.shape_cast %111 : vector<1x64x64xf32> to vector<64x64xf32>
    %cst_121 = arith.constant dense<0.000000e+00> : vector<1x64xf32>
    %113 = tpu.matmul %110, %112, %cst_121 {dimension_numbers = #tpu.dot_dimension_numbers<[1], [0], [0], [1], [0, 0, 1, 1], [], []>} : vector<1x64xf32>, vector<64x64xf32>, vector<1x64xf32> -> vector<1x64xf32>
    %114 = arith.addf %109, %113 : vector<1x64xf32>
    %115 = vector.extract_strided_slice %83 {offsets = [6, 0], sizes = [1, 64], strides = [1, 1]} : vector<8x64xf32> to vector<1x64xf32>
    %c6 = arith.constant 6 : index
    %c0_122 = arith.constant 0 : index
    %c0_123 = arith.constant 0 : index
    %116 = vector.load %arg11[%c6, %c0_122, %c0_123] : memref<8x64x64xf32, #tpu.memory_space<vmem>>, vector<1x64x64xf32>
    %117 = vector.shape_cast %116 : vector<1x64x64xf32> to vector<64x64xf32>
    %cst_124 = arith.constant dense<0.000000e+00> : vector<1x64xf32>
    %118 = tpu.matmul %115, %117, %cst_124 {dimension_numbers = #tpu.dot_dimension_numbers<[1], [0], [0], [1], [0, 0, 1, 1], [], []>} : vector<1x64xf32>, vector<64x64xf32>, vector<1x64xf32> -> vector<1x64xf32>
    %119 = arith.addf %114, %118 : vector<1x64xf32>
    %120 = vector.extract_strided_slice %83 {offsets = [7, 0], sizes = [1, 64], strides = [1, 1]} : vector<8x64xf32> to vector<1x64xf32>
    %c7 = arith.constant 7 : index
    %c0_125 = arith.constant 0 : index
    %c0_126 = arith.constant 0 : index
    %121 = vector.load %arg11[%c7, %c0_125, %c0_126] : memref<8x64x64xf32, #tpu.memory_space<vmem>>, vector<1x64x64xf32>
    %122 = vector.shape_cast %121 : vector<1x64x64xf32> to vector<64x64xf32>
    %cst_127 = arith.constant dense<0.000000e+00> : vector<1x64xf32>
    %123 = tpu.matmul %120, %122, %cst_127 {dimension_numbers = #tpu.dot_dimension_numbers<[1], [0], [0], [1], [0, 0, 1, 1], [], []>} : vector<1x64xf32>, vector<64x64xf32>, vector<1x64xf32> -> vector<1x64xf32>
    %124 = arith.addf %119, %123 : vector<1x64xf32>
    %cst_128 = arith.constant 0.000000e+00 : f32
    %125 = vector.broadcast %cst_128 : f32 to vector<1x64xf32>
    %126 = arith.maximumf %124, %125 : vector<1x64xf32>
    %c0_129 = arith.constant 0 : index
    %c0_130 = arith.constant 0 : index
    %127 = vector.load %arg13[%c0_129, %c0_130] : memref<64x16xf32, #tpu.memory_space<vmem>>, vector<64x16xf32>
    %cst_131 = arith.constant dense<0.000000e+00> : vector<1x16xf32>
    %128 = tpu.matmul %126, %127, %cst_131 {dimension_numbers = #tpu.dot_dimension_numbers<[1], [0], [0], [1], [0, 0, 1, 1], [], []>} : vector<1x64xf32>, vector<64x16xf32>, vector<1x16xf32> -> vector<1x16xf32>
    %c0_132 = arith.constant 0 : index
    %c0_133 = arith.constant 0 : index
    %129 = vector.load %arg14[%c0_132, %c0_133] : memref<1x16xf32, #tpu.memory_space<vmem>>, vector<1x16xf32>
    %130 = arith.addf %128, %129 : vector<1x16xf32>
    %c0_134 = arith.constant 0 : index
    %c0_135 = arith.constant 0 : index
    %c0_136 = arith.constant 0 : index
    %131 = vector.load %arg2[%c0_134, %c0_135, %c0_136] : memref<1x1x8xf32, #tpu.memory_space<vmem>>, vector<1x1x8xf32>
    %132 = vector.shape_cast %131 : vector<1x1x8xf32> to vector<1x8xf32>
    %c0_137 = arith.constant 0 : index
    %c0_138 = arith.constant 0 : index
    %133 = vector.load %arg15[%c0_137, %c0_138] : memref<16x32xf32, #tpu.memory_space<vmem>>, vector<16x32xf32>
    %cst_139 = arith.constant dense<0.000000e+00> : vector<1x32xf32>
    %134 = tpu.matmul %130, %133, %cst_139 {dimension_numbers = #tpu.dot_dimension_numbers<[1], [0], [0], [1], [0, 0, 1, 1], [], []>} : vector<1x16xf32>, vector<16x32xf32>, vector<1x32xf32> -> vector<1x32xf32>
    %c0_140 = arith.constant 0 : index
    %c0_141 = arith.constant 0 : index
    %135 = vector.load %arg16[%c0_140, %c0_141] : memref<8x32xf32, #tpu.memory_space<vmem>>, vector<8x32xf32>
    %cst_142 = arith.constant dense<0.000000e+00> : vector<1x32xf32>
    %136 = tpu.matmul %132, %135, %cst_142 {dimension_numbers = #tpu.dot_dimension_numbers<[1], [0], [0], [1], [0, 0, 1, 1], [], []>} : vector<1x8xf32>, vector<8x32xf32>, vector<1x32xf32> -> vector<1x32xf32>
    %137 = arith.addf %134, %136 : vector<1x32xf32>
    %c0_143 = arith.constant 0 : index
    %c0_144 = arith.constant 0 : index
    %138 = vector.load %arg17[%c0_143, %c0_144] : memref<1x32xf32, #tpu.memory_space<vmem>>, vector<1x32xf32>
    %139 = arith.addf %137, %138 : vector<1x32xf32>
    %cst_145 = arith.constant 0.000000e+00 : f32
    %140 = vector.broadcast %cst_145 : f32 to vector<1x32xf32>
    %141 = arith.maximumf %139, %140 : vector<1x32xf32>
    %c0_146 = arith.constant 0 : index
    %c0_147 = arith.constant 0 : index
    %142 = vector.load %arg18[%c0_146, %c0_147] : memref<32x32xf32, #tpu.memory_space<vmem>>, vector<32x32xf32>
    %cst_148 = arith.constant dense<0.000000e+00> : vector<1x32xf32>
    %143 = tpu.matmul %141, %142, %cst_148 {dimension_numbers = #tpu.dot_dimension_numbers<[1], [0], [0], [1], [0, 0, 1, 1], [], []>} : vector<1x32xf32>, vector<32x32xf32>, vector<1x32xf32> -> vector<1x32xf32>
    %c0_149 = arith.constant 0 : index
    %c0_150 = arith.constant 0 : index
    %144 = vector.load %arg19[%c0_149, %c0_150] : memref<1x32xf32, #tpu.memory_space<vmem>>, vector<1x32xf32>
    %145 = arith.addf %143, %144 : vector<1x32xf32>
    %cst_151 = arith.constant 0.000000e+00 : f32
    %146 = vector.broadcast %cst_151 : f32 to vector<1x32xf32>
    %147 = arith.maximumf %145, %146 : vector<1x32xf32>
    %c0_152 = arith.constant 0 : index
    %c0_153 = arith.constant 0 : index
    %148 = vector.load %arg20[%c0_152, %c0_153] : memref<32x1xf32, #tpu.memory_space<vmem>>, vector<32x1xf32>
    %cst_154 = arith.constant dense<0.000000e+00> : vector<1x1xf32>
    %149 = tpu.matmul %147, %148, %cst_154 {dimension_numbers = #tpu.dot_dimension_numbers<[1], [0], [0], [1], [0, 0, 1, 1], [], []>} : vector<1x32xf32>, vector<32x1xf32>, vector<1x1xf32> -> vector<1x1xf32>
    %c0_155 = arith.constant 0 : index
    %c0_156 = arith.constant 0 : index
    %150 = vector.load %arg21[%c0_155, %c0_156] : memref<1x1xf32, #tpu.memory_space<vmem>>, vector<1x1xf32>
    %151 = arith.addf %149, %150 : vector<1x1xf32>
    %c0_157 = arith.constant 0 : index
    %c0_158 = arith.constant 0 : index
    %c0_159 = arith.constant 0 : index
    %152 = vector.load %arg30[%c0_157, %c0_158, %c0_159] : memref<1x1x1xf32, #tpu.memory_space<vmem>>, vector<1x1x1xf32>
    %153 = vector.shape_cast %152 : vector<1x1x1xf32> to vector<1x1xf32>
    %154 = vector.shape_cast %151 : vector<1x1xf32> to vector<1x1x1xf32>
    tpu.vector_store %arg30[%c0_157, %c0_158, %c0_159], %154 {strides = array<i32>} : memref<1x1x1xf32, #tpu.memory_space<vmem>>, vector<1x1x1xf32>,
    %c0_160 = arith.constant 0 : index
    %c0_161 = arith.constant 0 : index
    %155 = vector.load %arg22[%c0_160, %c0_161] : memref<16x32xf32, #tpu.memory_space<vmem>>, vector<16x32xf32>
    %cst_162 = arith.constant dense<0.000000e+00> : vector<1x32xf32>
    %156 = tpu.matmul %130, %155, %cst_162 {dimension_numbers = #tpu.dot_dimension_numbers<[1], [0], [0], [1], [0, 0, 1, 1], [], []>} : vector<1x16xf32>, vector<16x32xf32>, vector<1x32xf32> -> vector<1x32xf32>
    %c0_163 = arith.constant 0 : index
    %c0_164 = arith.constant 0 : index
    %157 = vector.load %arg23[%c0_163, %c0_164] : memref<8x32xf32, #tpu.memory_space<vmem>>, vector<8x32xf32>
    %cst_165 = arith.constant dense<0.000000e+00> : vector<1x32xf32>
    %158 = tpu.matmul %132, %157, %cst_165 {dimension_numbers = #tpu.dot_dimension_numbers<[1], [0], [0], [1], [0, 0, 1, 1], [], []>} : vector<1x8xf32>, vector<8x32xf32>, vector<1x32xf32> -> vector<1x32xf32>
    %159 = arith.addf %156, %158 : vector<1x32xf32>
    %c0_166 = arith.constant 0 : index
    %c0_167 = arith.constant 0 : index
    %160 = vector.load %arg24[%c0_166, %c0_167] : memref<1x32xf32, #tpu.memory_space<vmem>>, vector<1x32xf32>
    %161 = arith.addf %159, %160 : vector<1x32xf32>
    %cst_168 = arith.constant 0.000000e+00 : f32
    %162 = vector.broadcast %cst_168 : f32 to vector<1x32xf32>
    %163 = arith.maximumf %161, %162 : vector<1x32xf32>
    %c0_169 = arith.constant 0 : index
    %c0_170 = arith.constant 0 : index
    %164 = vector.load %arg25[%c0_169, %c0_170] : memref<32x32xf32, #tpu.memory_space<vmem>>, vector<32x32xf32>
    %cst_171 = arith.constant dense<0.000000e+00> : vector<1x32xf32>
    %165 = tpu.matmul %163, %164, %cst_171 {dimension_numbers = #tpu.dot_dimension_numbers<[1], [0], [0], [1], [0, 0, 1, 1], [], []>} : vector<1x32xf32>, vector<32x32xf32>, vector<1x32xf32> -> vector<1x32xf32>
    %c0_172 = arith.constant 0 : index
    %c0_173 = arith.constant 0 : index
    %166 = vector.load %arg26[%c0_172, %c0_173] : memref<1x32xf32, #tpu.memory_space<vmem>>, vector<1x32xf32>
    %167 = arith.addf %165, %166 : vector<1x32xf32>
    %cst_174 = arith.constant 0.000000e+00 : f32
    %168 = vector.broadcast %cst_174 : f32 to vector<1x32xf32>
    %169 = arith.maximumf %167, %168 : vector<1x32xf32>
    %c0_175 = arith.constant 0 : index
    %c0_176 = arith.constant 0 : index
    %170 = vector.load %arg27[%c0_175, %c0_176] : memref<32x4xf32, #tpu.memory_space<vmem>>, vector<32x4xf32>
    %cst_177 = arith.constant dense<0.000000e+00> : vector<1x4xf32>
    %171 = tpu.matmul %169, %170, %cst_177 {dimension_numbers = #tpu.dot_dimension_numbers<[1], [0], [0], [1], [0, 0, 1, 1], [], []>} : vector<1x32xf32>, vector<32x4xf32>, vector<1x4xf32> -> vector<1x4xf32>
    %c0_178 = arith.constant 0 : index
    %c0_179 = arith.constant 0 : index
    %172 = vector.load %arg28[%c0_178, %c0_179] : memref<1x4xf32, #tpu.memory_space<vmem>>, vector<1x4xf32>
    %173 = arith.addf %171, %172 : vector<1x4xf32>
    %174 = math.tanh %173 : vector<1x4xf32>
    %c0_180 = arith.constant 0 : index
    %c0_181 = arith.constant 0 : index
    %c0_182 = arith.constant 0 : index
    %175 = vector.load %arg29[%c0_180, %c0_181, %c0_182] : memref<1x1x4xf32, #tpu.memory_space<vmem>>, vector<1x1x4xf32>
    %176 = vector.shape_cast %175 : vector<1x1x4xf32> to vector<1x4xf32>
    %177 = vector.shape_cast %174 : vector<1x4xf32> to vector<1x1x4xf32>
    tpu.vector_store %arg29[%c0_180, %c0_181, %c0_182], %177 {strides = array<i32>} : memref<1x1x4xf32, #tpu.memory_space<vmem>>, vector<1x1x4xf32>,
    return
  }
  func.func @transform_0(%arg0: i32) -> (i32, i32, i32, i32) {
    %c0_i32 = arith.constant 0 : i32
    %c0_i32_0 = arith.constant 0 : i32
    %c0_i32_1 = arith.constant 0 : i32
    %c0_i32_2 = arith.constant 0 : i32
    return %arg0, %c0_i32, %c0_i32_0, %c0_i32_1 : i32, i32, i32, i32
  }
  func.func @transform_1(%arg0: i32) -> (i32, i32, i32) {
    %c0_i32 = arith.constant 0 : i32
    %c0_i32_0 = arith.constant 0 : i32
    %c0_i32_1 = arith.constant 0 : i32
    return %arg0, %c0_i32, %c0_i32_0 : i32, i32, i32
  }
  func.func @transform_2(%arg0: i32) -> (i32, i32, i32) {
    %c0_i32 = arith.constant 0 : i32
    %c0_i32_0 = arith.constant 0 : i32
    %c0_i32_1 = arith.constant 0 : i32
    %c0_i32_2 = arith.constant 0 : i32
    return %c0_i32, %c0_i32_0, %c0_i32_1 : i32, i32, i32
  }
  func.func @transform_3(%arg0: i32) -> (i32, i32) {
    %c0_i32 = arith.constant 0 : i32
    %c0_i32_0 = arith.constant 0 : i32
    %c0_i32_1 = arith.constant 0 : i32
    return %c0_i32, %c0_i32_0 : i32, i32
  }
  func.func @transform_4(%arg0: i32) -> (i32, i32) {
    %c0_i32 = arith.constant 0 : i32
    %c0_i32_0 = arith.constant 0 : i32
    %c0_i32_1 = arith.constant 0 : i32
    return %c0_i32, %c0_i32_0 : i32, i32
  }
  func.func @transform_5(%arg0: i32) -> (i32, i32) {
    %c0_i32 = arith.constant 0 : i32
    %c0_i32_0 = arith.constant 0 : i32
    %c0_i32_1 = arith.constant 0 : i32
    return %c0_i32, %c0_i32_0 : i32, i32
  }
  func.func @transform_6(%arg0: i32) -> (i32, i32, i32) {
    %c0_i32 = arith.constant 0 : i32
    %c0_i32_0 = arith.constant 0 : i32
    %c0_i32_1 = arith.constant 0 : i32
    %c0_i32_2 = arith.constant 0 : i32
    return %c0_i32, %c0_i32_0, %c0_i32_1 : i32, i32, i32
  }
  func.func @transform_7(%arg0: i32) -> (i32, i32) {
    %c0_i32 = arith.constant 0 : i32
    %c0_i32_0 = arith.constant 0 : i32
    %c0_i32_1 = arith.constant 0 : i32
    return %c0_i32, %c0_i32_0 : i32, i32
  }
  func.func @transform_8(%arg0: i32) -> (i32, i32) {
    %c0_i32 = arith.constant 0 : i32
    %c0_i32_0 = arith.constant 0 : i32
    %c0_i32_1 = arith.constant 0 : i32
    return %c0_i32, %c0_i32_0 : i32, i32
  }
  func.func @transform_9(%arg0: i32) -> (i32, i32) {
    %c0_i32 = arith.constant 0 : i32
    %c0_i32_0 = arith.constant 0 : i32
    %c0_i32_1 = arith.constant 0 : i32
    return %c0_i32, %c0_i32_0 : i32, i32
  }
  func.func @transform_10(%arg0: i32) -> (i32, i32, i32) {
    %c0_i32 = arith.constant 0 : i32
    %c0_i32_0 = arith.constant 0 : i32
    %c0_i32_1 = arith.constant 0 : i32
    %c0_i32_2 = arith.constant 0 : i32
    return %c0_i32, %c0_i32_0, %c0_i32_1 : i32, i32, i32
  }
  func.func @transform_11(%arg0: i32) -> (i32, i32) {
    %c0_i32 = arith.constant 0 : i32
    %c0_i32_0 = arith.constant 0 : i32
    %c0_i32_1 = arith.constant 0 : i32
    return %c0_i32, %c0_i32_0 : i32, i32
  }
  func.func @transform_12(%arg0: i32) -> (i32, i32) {
    %c0_i32 = arith.constant 0 : i32
    %c0_i32_0 = arith.constant 0 : i32
    %c0_i32_1 = arith.constant 0 : i32
    return %c0_i32, %c0_i32_0 : i32, i32
  }
  func.func @transform_13(%arg0: i32) -> (i32, i32) {
    %c0_i32 = arith.constant 0 : i32
    %c0_i32_0 = arith.constant 0 : i32
    %c0_i32_1 = arith.constant 0 : i32
    return %c0_i32, %c0_i32_0 : i32, i32
  }
  func.func @transform_14(%arg0: i32) -> (i32, i32) {
    %c0_i32 = arith.constant 0 : i32
    %c0_i32_0 = arith.constant 0 : i32
    %c0_i32_1 = arith.constant 0 : i32
    return %c0_i32, %c0_i32_0 : i32, i32
  }
  func.func @transform_15(%arg0: i32) -> (i32, i32) {
    %c0_i32 = arith.constant 0 : i32
    %c0_i32_0 = arith.constant 0 : i32
    %c0_i32_1 = arith.constant 0 : i32
    return %c0_i32, %c0_i32_0 : i32, i32
  }
  func.func @transform_16(%arg0: i32) -> (i32, i32) {
    %c0_i32 = arith.constant 0 : i32
    %c0_i32_0 = arith.constant 0 : i32
    %c0_i32_1 = arith.constant 0 : i32
    return %c0_i32, %c0_i32_0 : i32, i32
  }
  func.func @transform_17(%arg0: i32) -> (i32, i32) {
    %c0_i32 = arith.constant 0 : i32
    %c0_i32_0 = arith.constant 0 : i32
    %c0_i32_1 = arith.constant 0 : i32
    return %c0_i32, %c0_i32_0 : i32, i32
  }
  func.func @transform_18(%arg0: i32) -> (i32, i32) {
    %c0_i32 = arith.constant 0 : i32
    %c0_i32_0 = arith.constant 0 : i32
    %c0_i32_1 = arith.constant 0 : i32
    return %c0_i32, %c0_i32_0 : i32, i32
  }
  func.func @transform_19(%arg0: i32) -> (i32, i32) {
    %c0_i32 = arith.constant 0 : i32
    %c0_i32_0 = arith.constant 0 : i32
    %c0_i32_1 = arith.constant 0 : i32
    return %c0_i32, %c0_i32_0 : i32, i32
  }
  func.func @transform_20(%arg0: i32) -> (i32, i32) {
    %c0_i32 = arith.constant 0 : i32
    %c0_i32_0 = arith.constant 0 : i32
    %c0_i32_1 = arith.constant 0 : i32
    return %c0_i32, %c0_i32_0 : i32, i32
  }
  func.func @transform_21(%arg0: i32) -> (i32, i32) {
    %c0_i32 = arith.constant 0 : i32
    %c0_i32_0 = arith.constant 0 : i32
    %c0_i32_1 = arith.constant 0 : i32
    return %c0_i32, %c0_i32_0 : i32, i32
  }
  func.func @transform_22(%arg0: i32) -> (i32, i32) {
    %c0_i32 = arith.constant 0 : i32
    %c0_i32_0 = arith.constant 0 : i32
    %c0_i32_1 = arith.constant 0 : i32
    return %c0_i32, %c0_i32_0 : i32, i32
  }
  func.func @transform_23(%arg0: i32) -> (i32, i32) {
    %c0_i32 = arith.constant 0 : i32
    %c0_i32_0 = arith.constant 0 : i32
    %c0_i32_1 = arith.constant 0 : i32
    return %c0_i32, %c0_i32_0 : i32, i32
  }
  func.func @transform_24(%arg0: i32) -> (i32, i32) {
    %c0_i32 = arith.constant 0 : i32
    %c0_i32_0 = arith.constant 0 : i32
    %c0_i32_1 = arith.constant 0 : i32
    return %c0_i32, %c0_i32_0 : i32, i32
  }
  func.func @transform_25(%arg0: i32) -> (i32, i32) {
    %c0_i32 = arith.constant 0 : i32
    %c0_i32_0 = arith.constant 0 : i32
    %c0_i32_1 = arith.constant 0 : i32
    return %c0_i32, %c0_i32_0 : i32, i32
  }
  func.func @transform_26(%arg0: i32) -> (i32, i32) {
    %c0_i32 = arith.constant 0 : i32
    %c0_i32_0 = arith.constant 0 : i32
    %c0_i32_1 = arith.constant 0 : i32
    return %c0_i32, %c0_i32_0 : i32, i32
  }
  func.func @transform_27(%arg0: i32) -> (i32, i32) {
    %c0_i32 = arith.constant 0 : i32
    %c0_i32_0 = arith.constant 0 : i32
    %c0_i32_1 = arith.constant 0 : i32
    return %c0_i32, %c0_i32_0 : i32, i32
  }
  func.func @transform_28(%arg0: i32) -> (i32, i32, i32) {
    %c0_i32 = arith.constant 0 : i32
    %c0_i32_0 = arith.constant 0 : i32
    %c0_i32_1 = arith.constant 0 : i32
    return %arg0, %c0_i32, %c0_i32_0 : i32, i32, i32
  }
  func.func @transform_29(%arg0: i32) -> (i32, i32, i32) {
    %c0_i32 = arith.constant 0 : i32
    %c0_i32_0 = arith.constant 0 : i32
    %c0_i32_1 = arith.constant 0 : i32
    return %arg0, %c0_i32, %c0_i32_0 : i32, i32, i32
  }
}

</mosaic_0001>

<bundles_post_ra>
// kernel: convnet_forward.1
= control target key start
LH: loop header
LB: loop body
LE: loop exit
PB: predicated region body
PF: predicated region fallthrough
CT: control target
= control target key end

     0   :  { %s9867_s6 = smov 1   ;;  %s9868_s10 = smov 2   ;;  %s11561_s0 = inlined_call_operand.smem [shape: u32[30], index: -1, kind: input, shape index: {}] }
   0x1   :  { %s9938_s5 = sld [smem:[%s11561_s0]]   ;;  %s9869_s14 = smov 3  }
   0x2   :  { %s9943_s9 = sld [smem:[%s11561_s0 + %s9867_s6]]   ;;  %s9870_s18 = smov 4  }
   0x3   :  { %s9948_s13 = sld [smem:[%s11561_s0 + %s9868_s10]]   ;;  %s9871_s22 = smov 5  }
   0x4   :  { %s9953_s17 = sld [smem:[%s11561_s0 + %s9869_s14]]   ;;  %s9872_s26 = smov 6  }
   0x5   :  { %s9958_s21 = sld [smem:[%s11561_s0 + %s9870_s18]]   ;;  %s9873_s30 = smov 7  }
   0x6   :  { %s9963_s25 = sld [smem:[%s11561_s0 + %s9871_s22]]   ;;  %s9874_s4 = smov 8  }
   0x7   :  { %11602 = sst [smem:[#allocation56_spill]] %s9938_s5  ;;  %s9875_s10 = smov 9  }
   0x8   :  { %11603 = sst [smem:[#allocation57_spill]] %s9943_s9  ;;  %s9876_s15 = smov 10  }
   0x9   :  { %11604 = sst [smem:[#allocation58_spill]] %s9948_s13  ;;  %s9877_s20 = smov 11  }
   0xa   :  { %11605 = sst [smem:[#allocation59_spill]] %s9953_s17  ;;  %s9879_s1 = smov 13  }
   0xb   :  { %11606 = sst [smem:[#allocation60_spill]] %s9958_s21  ;;  %s9880_s7 = smov 14  }
   0xc   :  { %s9968_s29 = sld [smem:[%s11561_s0 + %s9872_s26]]   ;;  %s9878_s26 = smov 12  }
   0xd   :  { %s9973_s3 = sld [smem:[%s11561_s0 + %s9873_s30]]   ;;  %s9882_s22 = smov 16  }
   0xe   :  { %s9978_s8 = sld [smem:[%s11561_s0 + %s9874_s4]]   ;;  %s9883_s28 = smov 17  }
   0xf   :  { %s9983_s14 = sld [smem:[%s11561_s0 + %s9875_s10]]   ;;  %s9888_s10 = smov 22  }
  0x10   :  { %s9988_s19 = sld [smem:[%s11561_s0 + %s9876_s15]]   ;;  %s9881_s15 = smov 15  }
  0x11   :  { %s9993_s24 = sld [smem:[%s11561_s0 + %s9877_s20]]   ;;  %s9889_s16 = smov 23  }
  0x12   :  { %s9998_s30 = sld [smem:[%s11561_s0 + %s9878_s26]]   ;;  %s9890_s23 = smov 24  }
  0x13   :  { %11607 = sst [smem:[#allocation61_spill]] %s9973_s3 }
  0x14   :  { %11608 = sst [smem:[#allocation62_spill]] %s9978_s8 }
  0x15   :  { %11609 = sst [smem:[#allocation63_spill]] %s9983_s14 }
  0x16   :  { %11610 = sst [smem:[#allocation64_spill]] %s9988_s19 }
  0x17   :  { %11611 = sst [smem:[#allocation65_spill]] %s9993_s24 }
  0x18   :  { %11612 = sst [smem:[#allocation66_spill]] %s9998_s30 }
  0x19   :  { %s10003_s6 = sld [smem:[%s11561_s0 + %s9879_s1]]   ;;  %s9887_s1 = smov 21  }
  0x1a   :  { %s10008_s12 = sld [smem:[%s11561_s0 + %s9880_s7]]   ;;  %s9884_s7 = smov 18  }
  0x1b   :  { %s10013_s20 = sld [smem:[%s11561_s0 + %s9881_s15]]   ;;  %s9885_s15 = smov 19  }
  0x1c   :  { %s10018_s27 = sld [smem:[%s11561_s0 + %s9882_s22]]   ;;  %s9886_s22 = smov 20  }
  0x1d   :  { %s10023_s4 = sld [smem:[%s11561_s0 + %s9883_s28]]   ;;  %s9895_s28 = smov 29  }
  0x1e   :  { %s10028_s30 = sld [smem:[%s11561_s0 + %s9884_s7]]  }
  0x1f   :  { %11613 = sst [smem:[#allocation67_spill]] %s10003_s6 }
  0x20   :  { %11614 = sst [smem:[#allocation68_spill]] %s10008_s12 }
  0x21   :  { %11615 = sst [smem:[#allocation69_spill]] %s10013_s20 }
  0x22   :  { %11616 = sst [smem:[#allocation70_spill]] %s10018_s27 }
  0x23   :  { %11617 = sst [smem:[#allocation71_spill]] %s10023_s4 }
  0x24   :  { %11618 = sst [smem:[#allocation72_spill]] %s10028_s30 }
  0x25   :  { %s10033_s8 = sld [smem:[%s11561_s0 + %s9885_s15]]  }
  0x26   :  { %s6885_s9 = sld [smem:[%s11561_s0 + %s9886_s22]]  }
  0x27   :  { %s10041_s5 = sld [smem:[%s11561_s0 + %s9887_s1]]   ;;  %s9891_s1 = smov 25  }
  0x28   :  { %s10046_s30 = sld [smem:[%s11561_s0 + %s9888_s10]]   ;;  %s9892_s10 = smov 26  }
  0x29   :  { %s10056_s27 = sld [smem:[%s11561_s0 + %s9890_s23]]   ;;  %s9894_s23 = smov 28  }
  0x2a   :  { %s10061_s12 = sld [smem:[%s11561_s0 + %s9891_s1]]  }
  0x2b   :  { %11619 = sst [smem:[#allocation73_spill]] %s10033_s8 }
  0x2c   :  { %s10051_s8 = sld [smem:[%s11561_s0 + %s9889_s16]]   ;;  %v65_v0 = vstv %s6885_s9  ;;  %s9893_s16 = smov 27  }
  0x2d   :  { %11620 = sst [smem:[#allocation74_spill]] %s10041_s5  ;;  %66 = vst [vmem:[#allocation4] sm:$0x1] %v65_v0 }
  0x2e   :  { %11621 = sst [smem:[#allocation75_spill]] %s10046_s30 }
  0x2f   :  { %11623 = sst [smem:[#allocation77_spill]] %s10056_s27 }
  0x30   :  { %11624 = sst [smem:[#allocation78_spill]] %s10061_s12 }
  0x31   :  { %s10066_s30 = sld [smem:[%s11561_s0 + %s9892_s10]]  }
  0x32   :  { %11622 = sst [smem:[#allocation76_spill]] %s10051_s8 }
  0x33   :  { %s10071_s22 = sld [smem:[%s11561_s0 + %s9893_s16]]  }
  0x34   :  { %s10076_s1 = sld [smem:[%s11561_s0 + %s9894_s23]]  }
  0x35   :  { %s10081_s10 = sld [smem:[%s11561_s0 + %s9895_s28]]  }
  0x37   :  { %11625 = sst [smem:[#allocation79_spill]] %s10066_s30 }
  0x39   :  { %11626 = sst [smem:[#allocation80_spill]] %s10071_s22 }
  0x3a   :  { %11627 = sst [smem:[#allocation81_spill]] %s10076_s1 }
  0x3b   :  { %67 = vsyncpa [#allocation6], 0 }
  0x3c   :  { %69 = vsyncpa [#allocation6 + $0x1], 0 }
  0x3d   :  { %70 = vsyncpa [#allocation9], 0 }
  0x3e   :  { %72 = vsyncpa [#allocation9 + $0x1], 0 }
  0x3f   :  { %73 = vsyncpa [#allocation12], 0 }
  0x40   :  { %74 = vsyncpa [#allocation15], 0 }
  0x41   :  { %75 = vsyncpa [#allocation18], 0 }
  0x42   :  { %76 = vsyncpa [#allocation21], 0 }
  0x43   :  { %77 = vsyncpa [#allocation24], 0 }
  0x44   :  { %78 = vsyncpa [#allocation27], 0 }
  0x45   :  { %79 = vsyncpa [#allocation30], 0 }
  0x46   :  { %80 = vsyncpa [#allocation33], 0 }
  0x47   :  { %81 = vsyncpa [#allocation36], 0 }
  0x48   :  { %82 = vsyncpa [#allocation39], 0 }
  0x49   :  { %83 = vsyncpa [#allocation7], 0 }
  0x4a   :  { %85 = vsyncpa [#allocation7 + $0x1], 0  ;;  %s10083_s9 = smov 0   ;;  %s10085_s0 = smov 0  }
  0x4b   :  { %s10087_s24 = smov 0   ;;  %s10089_s27 = smov 0  }
  0x4c LB: > { %s11628_s22 = sld [smem:[#allocation80_spill]]  ;;  %s11629_s21 = sld [smem:[#allocation60_spill]]  ;;  %s9853_s9 = sphi %s10083_s9, %s11693_s9   ;;  %s9865_s27 = sphi %s10089_s27, %s11696_s27   ;;  %s9861_s24 = sphi %s10087_s24, %s11695_s24   ;;  %s9857_s0 = sphi %s10085_s0, %s11694_s0  }
  0x4d   : > { %s11630_s20 = sld [smem:[#allocation69_spill]]  ;;  %s11631_s19 = sld [smem:[#allocation64_spill]] }
  0x4e   : > { %s11632_s14 = sld [smem:[#allocation63_spill]]  ;;  %s11633_s12 = sld [smem:[#allocation78_spill]] }
  0x4f   : > { %s11634_s8 = sld [smem:[#allocation76_spill]]  ;;  %s11635_s6 = sld [smem:[#allocation67_spill]] }
  0x50   : > { %s11636_s5 = sld [smem:[#allocation74_spill]]  ;;  %s11637_s4 = sld [smem:[#allocation71_spill]] }
  0x51   : > { %s11638_s3 = sld [smem:[#allocation61_spill]]  ;;  %s11639_s17 = sld [smem:[#allocation59_spill]] }
  0x52   : > { %s11640_s13 = sld [smem:[#allocation58_spill]]  ;;  %s9896_s7 = smov [#allocation10]  }
  0x53   : > { %s758_s11 = sshll.u32 %s9896_s7, 4  ;;  %s10104_s16 = sadd.s32 4294967295, %s9865_s27   ;;  %s10109_s11 = int_to_ptr.vmem [resolvable:$true] %s758_s11 }
  0x54   : > { %p6897_p0 = scmp.ge.s32.totalorder %s9865_s27, 1  ;;  %p11574_p1 = scmp.eq.s32.totalorder %s10104_s16, 0 }
  0x55   : > { %p746_p2 = scmp.lt.s32.totalorder %s9865_s27, 3  ;;  %s9897_s18 = smov [#allocation11]  }
  0x56   : > { %s772_s23 = sshll.u32 %s9897_s18, 4  ;;  %s9898_s28 = smov [#allocation14]   ;;  %s10124_s23 = int_to_ptr.vmem [resolvable:$true] %s772_s23 }
  0x57   : > { %p10111_p3 = pnand %p6897_p0, %p746_p2  ;;  %s795_s2 = sshll.u32 %s9898_s28, 4  ;;  %s10126_s2 = int_to_ptr.vmem [resolvable:$true] %s795_s2 }
  0x58   : > { %s9103_s7 = scalar_lea.hbm %s11640_s13, 61440 }
  0x59   : > { %s11641_s15 = scalar_select %p10111_p3, 1, 0 }
  0x5a   : > { %p8880_p5 = pneg %p10111_p3  ;;  %p9104_p7 = scmp.ne.s32.totalorder %s11640_s13, %s9103_s7 }
  0x5b   : > { %p9110_p11 = scmp.lt.u32.totalorder %s9103_s7, %s11640_s13 }
  0x5c   : > { %p10120_p6 = pnand %p8880_p5, %p11574_p1 }
  0x5e   : > { %p10132_p8 = pneg %p10120_p6 }
  0x60   : > { %p9106_p9 = pnand %p10132_p8, %p9104_p7 }
  0x62   : > { %p9107_p10 = pneg %p9106_p9 }
  0x64   : > { %p9112_p12 = pnand %p9110_p11, %p9107_p10 }
  0x66   : > { %9115 = shalt.err (!%p9112_p12)
}
  0x67   : > { %s9116_s18 = scalar_lea.vmem %s10109_s11, 61440  ;;  %p9124_p5 = scmp.lt.s32.totalorder %s10109_s11, %s10109_s11 }
  0x68   : > { %p9117_p13 = scmp.ne.s32.totalorder %s10109_s11, %s9116_s18  ;;  %p9125_p4 = scmp.lt.s32.totalorder %s9116_s18, %s9116_s18 }
  0x6a   : > { %p9119_p0 = pnand %p9117_p13, %p10132_p8  ;;  %p9126_p1 = por %p9125_p4, %p9124_p5 }
  0x6c   : > { %p9120_p2 = pneg %p9119_p0 }
  0x6e   : > { %p9127_p3 = pnand %p9126_p1, %p9120_p2 }
  0x70   : > { %9130 = shalt.err (!%p9127_p3)
}
  0x71   : > { %s9899_s28 = smov 512   ;;  %s9900_s7 = smov 32  }
  0x72   : > { %8883 = dma.hbm_to_vmem [thread:$0]  (!%p10120_p6), %s11640_s13, 61440, %s10109_s11, [#allocation9], %s9899_s28, %s9899_s28, %s9900_s7  }
  0x73   : > { %s9131_s30 = scalar_lea.hbm %s11639_s17, 64 }
  0x74   : > { %p9132_p7 = scmp.ne.s32.totalorder %s11639_s17, %s9131_s30  ;;  %p9138_p11 = scmp.lt.u32.totalorder %s9131_s30, %s11639_s17 }
  0x76   : > { %p9134_p9 = pnand %p9132_p7, %p10132_p8 }
  0x78   : > { %p9135_p10 = pneg %p9134_p9 }
  0x7a   : > { %p9140_p4 = pnand %p9138_p11, %p9135_p10 }
  0x7c   : > { %9143 = shalt.err (!%p9140_p4)
}
  0x7d   : > { %s9144_s18 = scalar_lea.vmem %s10124_s23, 64  ;;  %p9152_p13 = scmp.lt.s32.totalorder %s10124_s23, %s10124_s23 }
  0x7e   : > { %p9145_p1 = scmp.ne.s32.totalorder %s10124_s23, %s9144_s18  ;;  %p9153_p0 = scmp.lt.s32.totalorder %s9144_s18, %s9144_s18 }
  0x80   : > { %p9147_p3 = pnand %p9145_p1, %p10132_p8  ;;  %p9154_p2 = por %p9153_p0, %p9152_p13 }
  0x82   : > { %p9148_p12 = pneg %p9147_p3 }
  0x84   : > { %p9155_p5 = pnand %p9154_p2, %p9148_p12 }
  0x86   : > { %9158 = shalt.err (!%p9155_p5)
}
  0x87   : > { %8886 = dma.hbm_to_vmem [thread:$0]  (!%p10120_p6), %s11639_s17, 64, %s10124_s23, [#allocation12]  }
  0x88   : > { %s9159_s30 = scalar_lea.hbm %s9963_s25, 640 }
  0x89   : > { %p9160_p7 = scmp.ne.s32.totalorder %s9963_s25, %s9159_s30  ;;  %p9166_p11 = scmp.lt.u32.totalorder %s9159_s30, %s9963_s25 }
  0x8b   : > { %p9162_p9 = pnand %p9160_p7, %p10132_p8 }
  0x8d   : > { %p9163_p10 = pneg %p9162_p9 }
  0x8f   : > { %p9168_p4 = pnand %p9166_p11, %p9163_p10 }
  0x91   : > { %9171 = shalt.err (!%p9168_p4)
}
  0x92   : > { %s9172_s11 = scalar_lea.vmem %s10126_s2, 640  ;;  %p9180_p13 = scmp.lt.s32.totalorder %s10126_s2, %s10126_s2 }
  0x93   : > { %p9173_p1 = scmp.ne.s32.totalorder %s10126_s2, %s9172_s11  ;;  %p9181_p0 = scmp.lt.s32.totalorder %s9172_s11, %s9172_s11 }
  0x95   : > { %p9175_p3 = pnand %p9173_p1, %p10132_p8  ;;  %p9182_p2 = por %p9181_p0, %p9180_p13 }
  0x97   : > { %p9176_p12 = pneg %p9175_p3 }
  0x99   : > { %p9183_p5 = pnand %p9182_p2, %p9176_p12 }
  0x9b   : > { %9186 = shalt.err (!%p9183_p5)
}
  0x9c   : > { %s11579_s23 = smov 128   ;;  %s11581_s28 = smov 8  }
  0x9d   : > { %8892 = dma.hbm_to_vmem [thread:$0]  (!%p10120_p6), %s9963_s25, 640, %s10126_s2, [#allocation15], %s11579_s23, %s11579_s23, %s11581_s28  }
  0x9e   : > { %s9903_s7 = smov [#allocation17]   ;;  %s9904_s30 = smov [#allocation20]  }
  0x9f   : > { %s822_s18 = sshll.u32 %s9903_s7, 4  ;;  %s846_s11 = sshll.u32 %s9904_s30, 4  ;;  %s823_s18 = int_to_ptr.vmem [resolvable:$true] %s822_s18  ;;  %s847_s11 = int_to_ptr.vmem [resolvable:$true] %s846_s11 }
  0xa0   : > { %s9187_s13 = scalar_lea.hbm %s11638_s3, 32 }
  0xa1   : > { %p9188_p7 = scmp.ne.s32.totalorder %s11638_s3, %s9187_s13  ;;  %p9194_p11 = scmp.lt.u32.totalorder %s9187_s13, %s11638_s3 }
  0xa3   : > { %p9190_p9 = pnand %p9188_p7, %p10132_p8 }
  0xa5   : > { %p9191_p10 = pneg %p9190_p9 }
  0xa7   : > { %p9196_p4 = pnand %p9194_p11, %p9191_p10 }
  0xa9   : > { %9199 = shalt.err (!%p9196_p4)
}
  0xaa   : > { %s9200_s17 = scalar_lea.vmem %s823_s18, 32  ;;  %p9208_p13 = scmp.lt.s32.totalorder %s823_s18, %s823_s18 }
  0xab   : > { %p9201_p1 = scmp.ne.s32.totalorder %s823_s18, %s9200_s17  ;;  %p9209_p0 = scmp.lt.s32.totalorder %s9200_s17, %s9200_s17 }
  0xad   : > { %p9203_p3 = pnand %p9201_p1, %p10132_p8  ;;  %p9210_p2 = por %p9209_p0, %p9208_p13 }
  0xaf   : > { %p9204_p12 = pneg %p9203_p3 }
  0xb1   : > { %p9211_p5 = pnand %p9210_p2, %p9204_p12 }
  0xb3   : > { %9214 = shalt.err (!%p9211_p5)
}
  0xb4   : > { %8898 = dma.hbm_to_vmem [thread:$0]  (!%p10120_p6), %s11638_s3, 32, %s823_s18, [#allocation18]  }
  0xb5   : > { %s9215_s13 = scalar_lea.hbm %s11631_s19, 8192 }
  0xb6   : > { %p9216_p7 = scmp.ne.s32.totalorder %s11631_s19, %s9215_s13  ;;  %p9222_p11 = scmp.lt.u32.totalorder %s9215_s13, %s11631_s19 }
  0xb8   : > { %p9218_p9 = pnand %p9216_p7, %p10132_p8 }
  0xba   : > { %p9219_p10 = pneg %p9218_p9 }
  0xbc   : > { %p9224_p4 = pnand %p9222_p11, %p9219_p10 }
  0xbe   : > { %9227 = shalt.err (!%p9224_p4)
}
  0xbf   : > { %s9228_s17 = scalar_lea.vmem %s847_s11, 8192  ;;  %p9236_p13 = scmp.lt.s32.totalorder %s847_s11, %s847_s11 }
  0xc0   : > { %p9229_p1 = scmp.ne.s32.totalorder %s847_s11, %s9228_s17  ;;  %p9237_p0 = scmp.lt.s32.totalorder %s9228_s17, %s9228_s17 }
  0xc2   : > { %p9231_p3 = pnand %p9229_p1, %p10132_p8  ;;  %p9238_p2 = por %p9237_p0, %p9236_p13 }
  0xc4   : > { %p9232_p12 = pneg %p9231_p3 }
  0xc6   : > { %p9239_p5 = pnand %p9238_p2, %p9232_p12 }
  0xc8   : > { %9242 = shalt.err (!%p9239_p5)
}
  0xc9   : > { %8904 = dma.hbm_to_vmem [thread:$0]  (!%p10120_p6), %s11631_s19, 8192, %s847_s11, [#allocation21], %s11579_s23, %s11579_s23, %s11581_s28  }
  0xca   : > { %s9905_s2 = smov [#allocation23]   ;;  %s9906_s18 = smov [#allocation26]  }
  0xcb   : > { %s874_s7 = sshll.u32 %s9905_s2, 4  ;;  %s898_s30 = sshll.u32 %s9906_s18, 4  ;;  %s875_s7 = int_to_ptr.vmem [resolvable:$true] %s874_s7  ;;  %s899_s30 = int_to_ptr.vmem [resolvable:$true] %s898_s30 }
  0xcc   : > { %s9243_s13 = scalar_lea.hbm %s11635_s6, 16 }
  0xcd   : > { %p9244_p7 = scmp.ne.s32.totalorder %s11635_s6, %s9243_s13  ;;  %p9250_p11 = scmp.lt.u32.totalorder %s9243_s13, %s11635_s6 }
  0xcf   : > { %p9246_p9 = pnand %p9244_p7, %p10132_p8 }
  0xd1   : > { %p9247_p10 = pneg %p9246_p9 }
  0xd3   : > { %p9252_p4 = pnand %p9250_p11, %p9247_p10 }
  0xd5   : > { %9255 = shalt.err (!%p9252_p4)
}
  0xd6   : > { %s9256_s17 = scalar_lea.vmem %s875_s7, 16  ;;  %s9263_s11 = scalar_lea.vmem %s875_s7, 32 }
  0xd7   : > { %p9257_p1 = scmp.ne.s32.totalorder %s875_s7, %s9256_s17  ;;  %p9264_p13 = scmp.lt.s32.totalorder %s875_s7, %s875_s7 }
  0xd8   : > { %p9265_p0 = scmp.lt.s32.totalorder %s9263_s11, %s9256_s17 }
  0xd9   : > { %p9259_p3 = pnand %p9257_p1, %p10132_p8 }
  0xda   : > { %p9266_p2 = por %p9265_p0, %p9264_p13 }
  0xdb   : > { %p9260_p12 = pneg %p9259_p3 }
  0xdd   : > { %p9267_p5 = pnand %p9266_p2, %p9260_p12 }
  0xdf   : > { %9270 = shalt.err (!%p9267_p5)
}
  0xe0   : > { %8910 = dma.hbm_to_vmem [thread:$0]  (!%p10120_p6), %s11635_s6, 16, %s875_s7, [#allocation24]  }
  0xe1   : > { %s9271_s2 = scalar_lea.hbm %s11630_s20, 128 }
  0xe2   : > { %p9272_p7 = scmp.ne.s32.totalorder %s11630_s20, %s9271_s2  ;;  %p9278_p11 = scmp.lt.u32.totalorder %s9271_s2, %s11630_s20 }
  0xe4   : > { %p9274_p9 = pnand %p9272_p7, %p10132_p8 }
  0xe6   : > { %p9275_p10 = pneg %p9274_p9 }
  0xe8   : > { %p9280_p4 = pnand %p9278_p11, %p9275_p10 }
  0xea   : > { %9283 = shalt.err (!%p9280_p4)
}
  0xeb   : > { %s9284_s18 = scalar_lea.vmem %s899_s30, 128  ;;  %p9292_p13 = scmp.lt.s32.totalorder %s899_s30, %s899_s30 }
  0xec   : > { %p9285_p1 = scmp.ne.s32.totalorder %s899_s30, %s9284_s18  ;;  %p9293_p0 = scmp.lt.s32.totalorder %s9284_s18, %s9284_s18 }
  0xee   : > { %p9287_p3 = pnand %p9285_p1, %p10132_p8  ;;  %p9294_p2 = por %p9293_p0, %p9292_p13 }
  0xf0   : > { %p9288_p12 = pneg %p9287_p3 }
  0xf2   : > { %p9295_p5 = pnand %p9294_p2, %p9288_p12 }
  0xf4   : > { %9298 = shalt.err (!%p9295_p5)
}
  0xf5   : > { %8916 = dma.hbm_to_vmem [thread:$0]  (!%p10120_p6), %s11630_s20, 128, %s899_s30, [#allocation27]  }
  0xf6   : > { %s9907_s7 = smov [#allocation29]   ;;  %s9908_s17 = smov [#allocation32]  }
  0xf7   : > { %s919_s13 = sshll.u32 %s9907_s7, 4  ;;  %s949_s11 = sshll.u32 %s9908_s17, 4  ;;  %s920_s13 = int_to_ptr.vmem [resolvable:$true] %s919_s13  ;;  %s950_s11 = int_to_ptr.vmem [resolvable:$true] %s949_s11 }
  0xf8   : > { %s9299_s2 = scalar_lea.hbm %s11637_s4, 512 }
  0xf9   : > { %p9300_p7 = scmp.ne.s32.totalorder %s11637_s4, %s9299_s2  ;;  %p9306_p11 = scmp.lt.u32.totalorder %s9299_s2, %s11637_s4 }
  0xfb   : > { %p9302_p9 = pnand %p9300_p7, %p10132_p8 }
  0xfd   : > { %p9303_p10 = pneg %p9302_p9 }
  0xff   : > { %p9308_p4 = pnand %p9306_p11, %p9303_p10 }
 0x101   : > { %9311 = shalt.err (!%p9308_p4)
}
 0x102   : > { %s9312_s18 = scalar_lea.vmem %s920_s13, 512  ;;  %p9320_p13 = scmp.lt.s32.totalorder %s920_s13, %s920_s13 }
 0x103   : > { %p9313_p1 = scmp.ne.s32.totalorder %s920_s13, %s9312_s18  ;;  %p9321_p0 = scmp.lt.s32.totalorder %s9312_s18, %s9312_s18 }
 0x105   : > { %p9315_p3 = pnand %p9313_p1, %p10132_p8  ;;  %p9322_p2 = por %p9321_p0, %p9320_p13 }
 0x107   : > { %p9316_p12 = pneg %p9315_p3 }
 0x109   : > { %p9323_p5 = pnand %p9322_p2, %p9316_p12 }
 0x10b   : > { %9326 = shalt.err (!%p9323_p5)
}
 0x10c   : > { %8922 = dma.hbm_to_vmem [thread:$0]  (!%p10120_p6), %s11637_s4, 512, %s920_s13, [#allocation30], %s11579_s23, %s11579_s23, %s11581_s28  }
 0x10d   : > { %s9327_s30 = scalar_lea.hbm %s11636_s5, 256 }
 0x10e   : > { %p9328_p7 = scmp.ne.s32.totalorder %s11636_s5, %s9327_s30  ;;  %p9334_p11 = scmp.lt.u32.totalorder %s9327_s30, %s11636_s5 }
 0x110   : > { %p9330_p9 = pnand %p9328_p7, %p10132_p8 }
 0x112   : > { %p9331_p10 = pneg %p9330_p9 }
 0x114   : > { %p9336_p4 = pnand %p9334_p11, %p9331_p10 }
 0x116   : > { %9339 = shalt.err (!%p9336_p4)
}
 0x117   : > { %s9340_s7 = scalar_lea.vmem %s950_s11, 256  ;;  %p9348_p13 = scmp.lt.s32.totalorder %s950_s11, %s950_s11 }
 0x118   : > { %p9341_p1 = scmp.ne.s32.totalorder %s950_s11, %s9340_s7  ;;  %p9349_p0 = scmp.lt.s32.totalorder %s9340_s7, %s9340_s7 }
 0x11a   : > { %p9343_p3 = pnand %p9341_p1, %p10132_p8  ;;  %p9350_p2 = por %p9349_p0, %p9348_p13 }
 0x11c   : > { %p9344_p12 = pneg %p9343_p3 }
 0x11e   : > { %p9351_p5 = pnand %p9350_p2, %p9344_p12 }
 0x120   : > { %9354 = shalt.err (!%p9351_p5)
}
 0x121   : > { %8928 = dma.hbm_to_vmem [thread:$0]  (!%p10120_p6), %s11636_s5, 256, %s950_s11, [#allocation33], %s11579_s23, %s11579_s23, %s11581_s28  }
 0x122   : > { %s9909_s13 = smov [#allocation35]   ;;  %s9910_s2 = smov [#allocation38]  }
 0x123   : > { %s974_s17 = sshll.u32 %s9909_s13, 4  ;;  %s998_s18 = sshll.u32 %s9910_s2, 4  ;;  %s975_s17 = int_to_ptr.vmem [resolvable:$true] %s974_s17  ;;  %s999_s18 = int_to_ptr.vmem [resolvable:$true] %s998_s18 }
 0x124   : > { %s9355_s30 = scalar_lea.hbm %s11634_s8, 16 }
 0x125   : > { %p9356_p7 = scmp.ne.s32.totalorder %s11634_s8, %s9355_s30  ;;  %p9362_p11 = scmp.lt.u32.totalorder %s9355_s30, %s11634_s8 }
 0x127   : > { %p9358_p9 = pnand %p9356_p7, %p10132_p8 }
 0x129   : > { %p9359_p10 = pneg %p9358_p9 }
 0x12b   : > { %p9364_p4 = pnand %p9362_p11, %p9359_p10 }
 0x12d   : > { %9367 = shalt.err (!%p9364_p4)
}
 0x12e   : > { %s9368_s7 = scalar_lea.vmem %s975_s17, 16  ;;  %s9375_s11 = scalar_lea.vmem %s975_s17, 32 }
 0x12f   : > { %p9369_p1 = scmp.ne.s32.totalorder %s975_s17, %s9368_s7  ;;  %p9376_p13 = scmp.lt.s32.totalorder %s975_s17, %s975_s17 }
 0x130   : > { %p9377_p0 = scmp.lt.s32.totalorder %s9375_s11, %s9368_s7 }
 0x131   : > { %p9371_p3 = pnand %p9369_p1, %p10132_p8 }
 0x132   : > { %p9378_p2 = por %p9377_p0, %p9376_p13 }
 0x133   : > { %p9372_p12 = pneg %p9371_p3 }
 0x135   : > { %p9379_p5 = pnand %p9378_p2, %p9372_p12 }
 0x137   : > { %9382 = shalt.err (!%p9379_p5)
}
 0x138   : > { %8934 = dma.hbm_to_vmem [thread:$0]  (!%p10120_p6), %s11634_s8, 16, %s975_s17, [#allocation36]  }
 0x139   : > { %s9383_s13 = scalar_lea.hbm %s11633_s12, 16 }
 0x13a   : > { %p9384_p7 = scmp.ne.s32.totalorder %s11633_s12, %s9383_s13  ;;  %p9390_p11 = scmp.lt.u32.totalorder %s9383_s13, %s11633_s12 }
 0x13c   : > { %p9386_p9 = pnand %p9384_p7, %p10132_p8 }
 0x13e   : > { %p9387_p10 = pneg %p9386_p9 }
 0x140   : > { %p9392_p4 = pnand %p9390_p11, %p9387_p10 }
 0x142   : > { %9395 = shalt.err (!%p9392_p4)
}
 0x143   : > { %s9396_s2 = scalar_lea.vmem %s999_s18, 16  ;;  %s9403_s30 = scalar_lea.vmem %s999_s18, 32 }
 0x144   : > { %p9397_p1 = scmp.ne.s32.totalorder %s999_s18, %s9396_s2  ;;  %p9404_p13 = scmp.lt.s32.totalorder %s999_s18, %s999_s18 }
 0x145   : > { %p9405_p0 = scmp.lt.s32.totalorder %s9403_s30, %s9396_s2 }
 0x146   : > { %p9399_p3 = pnand %p9397_p1, %p10132_p8 }
 0x147   : > { %p9406_p2 = por %p9405_p0, %p9404_p13 }
 0x148   : > { %p9400_p12 = pneg %p9399_p3 }
 0x14a   : > { %p9407_p5 = pnand %p9406_p2, %p9400_p12 }
 0x14c   : > { %9410 = shalt.err (!%p9407_p5)
}
 0x14d   : > { %8940 = dma.hbm_to_vmem [thread:$0]  (!%p10120_p6), %s11633_s12, 16, %s999_s18, [#allocation39]  }
 0x14e   : > { %s9911_s17 = smov [#allocation13]   ;;  %s9411_s11 = scalar_lea.hbm %s11629_s21, 16384 }
 0x14f   : > { %s782_s7 = sshll.u32 %s9911_s17, 4  ;;  %p9412_p7 = scmp.ne.s32.totalorder %s11629_s21, %s9411_s11  ;;  %s783_s7 = int_to_ptr.vmem [resolvable:$true] %s782_s7 }
 0x150   : > { %p9418_p11 = scmp.lt.u32.totalorder %s9411_s11, %s11629_s21 }
 0x151   : > { %p9414_p9 = pnand %p9412_p7, %p10132_p8 }
 0x153   : > { %p9415_p10 = pneg %p9414_p9 }
 0x155   : > { %p9420_p4 = pnand %p9418_p11, %p9415_p10 }
 0x157   : > { %9423 = shalt.err (!%p9420_p4)
}
 0x158   : > { %s9424_s13 = scalar_lea.vmem %s783_s7, 16384  ;;  %p9432_p13 = scmp.lt.s32.totalorder %s783_s7, %s783_s7 }
 0x159   : > { %p9425_p1 = scmp.ne.s32.totalorder %s783_s7, %s9424_s13  ;;  %p9433_p0 = scmp.lt.s32.totalorder %s9424_s13, %s9424_s13 }
 0x15b   : > { %p9427_p3 = pnand %p9425_p1, %p10132_p8  ;;  %p9434_p2 = por %p9433_p0, %p9432_p13 }
 0x15d   : > { %p9428_p12 = pneg %p9427_p3 }
 0x15f   : > { %p9435_p5 = pnand %p9434_p2, %p9428_p12 }
 0x161   : > { %9438 = shalt.err (!%p9435_p5)
}
 0x162   : > { %s9912_s18 = smov 256   ;;  %s9913_s2 = smov 16  }
 0x163   : > { %8889 = dma.hbm_to_vmem [thread:$0]  (!%p10120_p6), %s11629_s21, 16384, %s783_s7, [#allocation12], %s9912_s18, %s9912_s18, %s9913_s2  }
 0x164   : > { %s9914_s30 = smov [#allocation16]   ;;  %s9915_s11 = smov [#allocation19]  }
 0x165   : > { %s808_s17 = sshll.u32 %s9914_s30, 4  ;;  %s836_s23 = sshll.u32 %s9915_s11, 4  ;;  %s809_s17 = int_to_ptr.vmem [resolvable:$true] %s808_s17  ;;  %s10281_s23 = int_to_ptr.vmem [resolvable:$true] %s836_s23 }
 0x166   : > { %s9439_s13 = scalar_lea.hbm %s9968_s29, 40960 }
 0x167   : > { %p9440_p7 = scmp.ne.s32.totalorder %s9968_s29, %s9439_s13  ;;  %p9446_p11 = scmp.lt.u32.totalorder %s9439_s13, %s9968_s29 }
 0x169   : > { %p9442_p9 = pnand %p9440_p7, %p10132_p8 }
 0x16b   : > { %p9443_p10 = pneg %p9442_p9 }
 0x16d   : > { %p9448_p4 = pnand %p9446_p11, %p9443_p10 }
 0x16f   : > { %9451 = shalt.err (!%p9448_p4)
}
 0x170   : > { %s9452_s28 = scalar_lea.vmem %s809_s17, 40960  ;;  %p9460_p13 = scmp.lt.s32.totalorder %s809_s17, %s809_s17 }
 0x171   : > { %p9453_p1 = scmp.ne.s32.totalorder %s809_s17, %s9452_s28  ;;  %p9461_p0 = scmp.lt.s32.totalorder %s9452_s28, %s9452_s28 }
 0x173   : > { %p9455_p3 = pnand %p9453_p1, %p10132_p8  ;;  %p9462_p2 = por %p9461_p0, %p9460_p13 }
 0x175   : > { %p9456_p12 = pneg %p9455_p3 }
 0x177   : > { %p9463_p5 = pnand %p9462_p2, %p9456_p12 }
 0x179   : > { %9466 = shalt.err (!%p9463_p5)
}
 0x17a   : > { %8895 = dma.hbm_to_vmem [thread:$0]  (!%p10120_p6), %s9968_s29, 40960, %s809_s17, [#allocation15], %s9912_s18, %s9912_s18, %s9913_s2  }
 0x17b   : > { %s9467_s7 = scalar_lea.hbm %s11632_s14, 128 }
 0x17c   : > { %p9468_p7 = scmp.ne.s32.totalorder %s11632_s14, %s9467_s7  ;;  %p9474_p11 = scmp.lt.u32.totalorder %s9467_s7, %s11632_s14 }
 0x17e   : > { %p9470_p9 = pnand %p9468_p7, %p10132_p8 }
 0x180   : > { %p9471_p10 = pneg %p9470_p9 }
 0x182   : > { %p9476_p4 = pnand %p9474_p11, %p9471_p10 }
 0x184   : > { %9479 = shalt.err (!%p9476_p4)
}
 0x185   : > { %s9480_s28 = scalar_lea.vmem %s10281_s23, 128  ;;  %p9488_p13 = scmp.lt.s32.totalorder %s10281_s23, %s10281_s23 }
 0x186   : > { %p9481_p1 = scmp.ne.s32.totalorder %s10281_s23, %s9480_s28  ;;  %p9489_p0 = scmp.lt.s32.totalorder %s9480_s28, %s9480_s28 }
 0x188   : > { %p9483_p3 = pnand %p9481_p1, %p10132_p8  ;;  %p9490_p2 = por %p9489_p0, %p9488_p13 }
 0x18a   : > { %p9484_p12 = pneg %p9483_p3 }
 0x18c   : > { %p9491_p5 = pnand %p9490_p2, %p9484_p12 }
 0x18e   : > { %9494 = shalt.err (!%p9491_p5)
}
 0x18f   : > { %s11644_s18 = sld [smem:[#allocation65_spill]]  ;;  %s9916_s2 = smov [#allocation22]  }
 0x190   : > { %8901 = dma.hbm_to_vmem [thread:$0]  (!%p10120_p6), %s11632_s14, 128, %s10281_s23, [#allocation18]  }
 0x191   : > { %s860_s30 = sshll.u32 %s9916_s2, 4  ;;  %s9917_s17 = smov [#allocation25]   ;;  %s861_s30 = int_to_ptr.vmem [resolvable:$true] %s860_s30 }
 0x192   : > { %s884_s11 = sshll.u32 %s9917_s17, 4  ;;  %s10308_s11 = int_to_ptr.vmem [resolvable:$true] %s884_s11 }
 0x195   : > { %s9495_s13 = scalar_lea.hbm %s11644_s18, 16 }
 0x196   : > { %p9496_p7 = scmp.ne.s32.totalorder %s11644_s18, %s9495_s13  ;;  %p9502_p11 = scmp.lt.u32.totalorder %s9495_s13, %s11644_s18 }
 0x198   : > { %p9498_p9 = pnand %p9496_p7, %p10132_p8 }
 0x19a   : > { %p9499_p10 = pneg %p9498_p9 }
 0x19c   : > { %p9504_p4 = pnand %p9502_p11, %p9499_p10 }
 0x19e   : > { %9507 = shalt.err (!%p9504_p4)
}
 0x19f   : > { %s9508_s7 = scalar_lea.vmem %s861_s30, 16  ;;  %s9515_s23 = scalar_lea.vmem %s861_s30, 32 }
 0x1a0   : > { %p9509_p1 = scmp.ne.s32.totalorder %s861_s30, %s9508_s7  ;;  %p9516_p13 = scmp.lt.s32.totalorder %s861_s30, %s861_s30 }
 0x1a1   : > { %p9517_p0 = scmp.lt.s32.totalorder %s9515_s23, %s9508_s7 }
 0x1a2   : > { %p9511_p3 = pnand %p9509_p1, %p10132_p8 }
 0x1a3   : > { %p9518_p2 = por %p9517_p0, %p9516_p13 }
 0x1a4   : > { %p9512_p12 = pneg %p9511_p3 }
 0x1a6   : > { %p9519_p5 = pnand %p9518_p2, %p9512_p12 }
 0x1a8   : > { %9522 = shalt.err (!%p9519_p5)
}
 0x1a9   : > { %s11645_s28 = sld [smem:[#allocation68_spill]] }
 0x1aa   : > { %8907 = dma.hbm_to_vmem [thread:$0]  (!%p10120_p6), %s11644_s18, 16, %s861_s30, [#allocation21]  }
 0x1af   : > { %s9523_s2 = scalar_lea.hbm %s11645_s28, 256 }
 0x1b0   : > { %p9524_p7 = scmp.ne.s32.totalorder %s11645_s28, %s9523_s2  ;;  %p9530_p11 = scmp.lt.u32.totalorder %s9523_s2, %s11645_s28 }
 0x1b2   : > { %p9526_p9 = pnand %p9524_p7, %p10132_p8 }
 0x1b4   : > { %p9527_p10 = pneg %p9526_p9 }
 0x1b6   : > { %p9532_p4 = pnand %p9530_p11, %p9527_p10 }
 0x1b8   : > { %9535 = shalt.err (!%p9532_p4)
}
 0x1b9   : > { %s9536_s17 = scalar_lea.vmem %s10308_s11, 256  ;;  %p9544_p13 = scmp.lt.s32.totalorder %s10308_s11, %s10308_s11 }
 0x1ba   : > { %p9537_p1 = scmp.ne.s32.totalorder %s10308_s11, %s9536_s17  ;;  %p9545_p0 = scmp.lt.s32.totalorder %s9536_s17, %s9536_s17 }
 0x1bc   : > { %p9539_p3 = pnand %p9537_p1, %p10132_p8  ;;  %p9546_p2 = por %p9545_p0, %p9544_p13 }
 0x1be   : > { %p9540_p12 = pneg %p9539_p3 }
 0x1c0   : > { %p9547_p5 = pnand %p9546_p2, %p9540_p12 }
 0x1c2   : > { %9550 = shalt.err (!%p9547_p5)
}
 0x1c3   : > { %s11646_s30 = smov 8   ;;  %s11647_s13 = smov 128  }
 0x1c4   : > { %s11648_s7 = sld [smem:[#allocation70_spill]]  ;;  %s9918_s23 = smov [#allocation28]  }
 0x1c5   : > { %8913 = dma.hbm_to_vmem [thread:$0]  (!%p10120_p6), %s11645_s28, 256, %s10308_s11, [#allocation24], %s11647_s13, %s11647_s13, %s11646_s30  }
 0x1c6   : > { %s909_s2 = sshll.u32 %s9918_s23, 4  ;;  %s9919_s3 = smov [#allocation31]   ;;  %s910_s2 = int_to_ptr.vmem [resolvable:$true] %s909_s2 }
 0x1c7   : > { %s933_s4 = sshll.u32 %s9919_s3, 4  ;;  %s10338_s4 = int_to_ptr.vmem [resolvable:$true] %s933_s4 }
 0x1ca   : > { %s9551_s17 = scalar_lea.hbm %s11648_s7, 16 }
 0x1cb   : > { %p9552_p7 = scmp.ne.s32.totalorder %s11648_s7, %s9551_s17  ;;  %p9558_p11 = scmp.lt.u32.totalorder %s9551_s17, %s11648_s7 }
 0x1cd   : > { %p9554_p9 = pnand %p9552_p7, %p10132_p8 }
 0x1cf   : > { %p9555_p10 = pneg %p9554_p9 }
 0x1d1   : > { %p9560_p4 = pnand %p9558_p11, %p9555_p10 }
 0x1d3   : > { %9563 = shalt.err (!%p9560_p4)
}
 0x1d4   : > { %s9564_s5 = scalar_lea.vmem %s910_s2, 16  ;;  %s9571_s11 = scalar_lea.vmem %s910_s2, 32 }
 0x1d5   : > { %p9565_p1 = scmp.ne.s32.totalorder %s910_s2, %s9564_s5  ;;  %p9572_p13 = scmp.lt.s32.totalorder %s910_s2, %s910_s2 }
 0x1d6   : > { %p9573_p0 = scmp.lt.s32.totalorder %s9571_s11, %s9564_s5 }
 0x1d7   : > { %p9567_p3 = pnand %p9565_p1, %p10132_p8 }
 0x1d8   : > { %p9574_p2 = por %p9573_p0, %p9572_p13 }
 0x1d9   : > { %p9568_p12 = pneg %p9567_p3 }
 0x1db   : > { %p9575_p5 = pnand %p9574_p2, %p9568_p12 }
 0x1dd   : > { %9578 = shalt.err (!%p9575_p5)
}
 0x1de   : > { %s11649_s3 = sld [smem:[#allocation72_spill]] }
 0x1df   : > { %8919 = dma.hbm_to_vmem [thread:$0]  (!%p10120_p6), %s11648_s7, 16, %s910_s2, [#allocation27]  }
 0x1e4   : > { %s9579_s23 = scalar_lea.hbm %s11649_s3, 16 }
 0x1e5   : > { %p9580_p7 = scmp.ne.s32.totalorder %s11649_s3, %s9579_s23  ;;  %p9586_p11 = scmp.lt.u32.totalorder %s9579_s23, %s11649_s3 }
 0x1e7   : > { %p9582_p9 = pnand %p9580_p7, %p10132_p8 }
 0x1e9   : > { %p9583_p10 = pneg %p9582_p9 }
 0x1eb   : > { %p9588_p4 = pnand %p9586_p11, %p9583_p10 }
 0x1ed   : > { %9591 = shalt.err (!%p9588_p4)
}
 0x1ee   : > { %s9592_s5 = scalar_lea.vmem %s10338_s4, 16  ;;  %s9599_s17 = scalar_lea.vmem %s10338_s4, 32 }
 0x1ef   : > { %p9593_p1 = scmp.ne.s32.totalorder %s10338_s4, %s9592_s5  ;;  %p9600_p13 = scmp.lt.s32.totalorder %s10338_s4, %s10338_s4 }
 0x1f0   : > { %p9601_p0 = scmp.lt.s32.totalorder %s9599_s17, %s9592_s5 }
 0x1f1   : > { %p9595_p3 = pnand %p9593_p1, %p10132_p8 }
 0x1f2   : > { %p9602_p2 = por %p9601_p0, %p9600_p13 }
 0x1f3   : > { %p9596_p12 = pneg %p9595_p3 }
 0x1f5   : > { %p9603_p5 = pnand %p9602_p2, %p9596_p12 }
 0x1f7   : > { %9606 = shalt.err (!%p9603_p5)
}
 0x1f8   : > { %s11650_s2 = sld [smem:[#allocation75_spill]]  ;;  %s9920_s11 = smov [#allocation34]  }
 0x1f9   : > { %8925 = dma.hbm_to_vmem [thread:$0]  (!%p10120_p6), %s11649_s3, 16, %s10338_s4, [#allocation30]  }
 0x1fa   : > { %s963_s23 = sshll.u32 %s9920_s11, 4  ;;  %s9921_s6 = smov [#allocation37]   ;;  %s964_s23 = int_to_ptr.vmem [resolvable:$true] %s963_s23 }
 0x1fb   : > { %s984_s7 = sshll.u32 %s9921_s6, 4  ;;  %s10366_s7 = int_to_ptr.vmem [resolvable:$true] %s984_s7 }
 0x1fe   : > { %s9607_s5 = scalar_lea.hbm %s11650_s2, 128 }
 0x1ff   : > { %p9608_p7 = scmp.ne.s32.totalorder %s11650_s2, %s9607_s5  ;;  %p9614_p11 = scmp.lt.u32.totalorder %s9607_s5, %s11650_s2 }
 0x201   : > { %p9610_p9 = pnand %p9608_p7, %p10132_p8 }
 0x203   : > { %p9611_p10 = pneg %p9610_p9 }
 0x205   : > { %p9616_p4 = pnand %p9614_p11, %p9611_p10 }
 0x207   : > { %9619 = shalt.err (!%p9616_p4)
}
 0x208   : > { %s9620_s17 = scalar_lea.vmem %s964_s23, 128  ;;  %p9628_p13 = scmp.lt.s32.totalorder %s964_s23, %s964_s23 }
 0x209   : > { %p9621_p1 = scmp.ne.s32.totalorder %s964_s23, %s9620_s17  ;;  %p9629_p0 = scmp.lt.s32.totalorder %s9620_s17, %s9620_s17 }
 0x20b   : > { %p9623_p3 = pnand %p9621_p1, %p10132_p8  ;;  %p9630_p2 = por %p9629_p0, %p9628_p13 }
 0x20d   : > { %p9624_p12 = pneg %p9623_p3 }
 0x20f   : > { %p9631_p5 = pnand %p9630_p2, %p9624_p12 }
 0x211   : > { %9634 = shalt.err (!%p9631_p5)
}
 0x212   : > { %s11651_s6 = sld [smem:[#allocation77_spill]] }
 0x213   : > { %8931 = dma.hbm_to_vmem [thread:$0]  (!%p10120_p6), %s11650_s2, 128, %s964_s23, [#allocation33]  }
 0x218   : > { %s9635_s4 = scalar_lea.hbm %s11651_s6, 512 }
 0x219   : > { %p9636_p7 = scmp.ne.s32.totalorder %s11651_s6, %s9635_s4  ;;  %p9642_p11 = scmp.lt.u32.totalorder %s9635_s4, %s11651_s6 }
 0x21b   : > { %p9638_p9 = pnand %p9636_p7, %p10132_p8 }
 0x21d   : > { %p9639_p10 = pneg %p9638_p9 }
 0x21f   : > { %p9644_p4 = pnand %p9642_p11, %p9639_p10 }
 0x221   : > { %9647 = shalt.err (!%p9644_p4)
}
 0x222   : > { %s9648_s11 = scalar_lea.vmem %s10366_s7, 512  ;;  %p9656_p13 = scmp.lt.s32.totalorder %s10366_s7, %s10366_s7 }
 0x223   : > { %p9649_p1 = scmp.ne.s32.totalorder %s10366_s7, %s9648_s11  ;;  %p9657_p0 = scmp.lt.s32.totalorder %s9648_s11, %s9648_s11 }
 0x225   : > { %p9651_p3 = pnand %p9649_p1, %p10132_p8  ;;  %p9658_p2 = por %p9657_p0, %p9656_p13 }
 0x227   : > { %p9652_p12 = pneg %p9651_p3 }
 0x229   : > { %p9659_p5 = pnand %p9658_p2, %p9652_p12 }
 0x22b   : > { %9662 = shalt.err (!%p9659_p5)
}
 0x22c   : > { %8937 = dma.hbm_to_vmem [thread:$0]  (!%p10120_p6), %s11651_s6, 512, %s10366_s7, [#allocation36], %s11647_s13, %s11647_s13, %s11646_s30  }
 0x22d   : > { %s9922_s23 = smov [#allocation40]   ;;  %s9663_s17 = scalar_lea.hbm %s11628_s22, 16 }
 0x22e   : > { %s1012_s5 = sshll.u32 %s9922_s23, 4  ;;  %p9664_p7 = scmp.ne.s32.totalorder %s11628_s22, %s9663_s17  ;;  %s1013_s5 = int_to_ptr.vmem [resolvable:$true] %s1012_s5 }
 0x22f   : > { %p9670_p11 = scmp.lt.u32.totalorder %s9663_s17, %s11628_s22 }
 0x230   : > { %p9666_p9 = pnand %p9664_p7, %p10132_p8 }
 0x232   : > { %p9667_p10 = pneg %p9666_p9 }
 0x234   : > { %p9672_p4 = pnand %p9670_p11, %p9667_p10 }
 0x236   : > { %9675 = shalt.err (!%p9672_p4)
}
 0x237   : > { %s9676_s4 = scalar_lea.vmem %s1013_s5, 16  ;;  %s9683_s11 = scalar_lea.vmem %s1013_s5, 32 }
 0x238   : > { %p9677_p1 = scmp.ne.s32.totalorder %s1013_s5, %s9676_s4  ;;  %p9684_p13 = scmp.lt.s32.totalorder %s1013_s5, %s1013_s5 }
 0x239   : > { %p9685_p0 = scmp.lt.s32.totalorder %s9683_s11, %s9676_s4 }
 0x23a   : > { %p9679_p3 = pnand %p9677_p1, %p10132_p8 }
 0x23b   : > { %p9686_p2 = por %p9685_p0, %p9684_p13 }
 0x23c   : > { %p9680_p12 = pneg %p9679_p3 }
 0x23e   : > { %p9687_p5 = pnand %p9686_p2, %p9680_p12 }
 0x240   : > { %9690 = shalt.err (!%p9687_p5)
}
 0x241   : > { %8943 = dma.hbm_to_vmem [thread:$0]  (!%p10120_p6), %s11628_s22, 16, %s1013_s5, [#allocation39]  }
 0x242   : > { %s6896_s1 = sadd.s32 4294967294, %s9865_s27   ;;  %s10408_s7 = sadd.s32 1, %s9865_s27  }
 0x243   : > { %s98_s26 = sadd.s32 1, %s9861_s24  ;;  %s95_s23 = ssub.s32 %s9865_s27, %s10408_s7 }
 0x244   : > { %p105_p8 = scmp.ne.s32.totalorder %s9861_s24, %s9857_s0  ;;  %p96_p7 = scmp.eq.s32.totalorder %s95_s23, 0 }
 0x245   : > { %s11652_s17 = sld [smem:[#allocation56_spill]]  ;;  %p106_p9 = scmp.eq.s32.totalorder %s9865_s27, 0 }
 0x246   : > { %p111_p10 = scmp.ne.s32.totalorder %s9857_s0, %s9853_s9  ;;  %p707_p11 = scmp.eq.s32.totalorder %s10104_s16, 1 }
 0x247   : > { %s10420_s4 = scalar_select %p96_p7, %s9861_s24, %s98_s26  }
 0x248   : > { %p107_p4 = por %p106_p9, %p105_p8  ;;  %p11653_p1 = scmp.eq.s32.totalorder %s10104_s16, 0 }
 0x249   : > { %p10428_p3 = por %p707_p11, %p105_p8  ;;  %p713_p12 = scmp.eq.s32.totalorder %s6896_s1, 1 }
 0x24a   : > { %p10424_p6 = por %p11653_p1, %p111_p10  ;;  %p8976_p13 = scmp.lt.s32.totalorder %s9865_s27, 2 }
 0x24b   : > { %s11655_s11 = scalar_select %p10428_p3, 1, 0 }
 0x24c   : > { %s11654_s5 = scalar_select %p10424_p6, 1, 0 }
 0x24d   : > { %s10434_s2 = sand.u32 1, %s9861_s24   ;;  %p10436_p0 = por %p713_p12, %p111_p10 }
 0x24e   : > { %s8787_s23 = smul.u32 192, %s10434_s2  ;;  %p10441_p2 = pnand %p8976_p13, %p107_p4 }
 0x24f   : > { %s11656_s26 = scalar_select %p10436_p0, 1, 0 }
 0x250   : > { %s8788_s6 = smul.u32 3072, %s9865_s27  ;;  %s1027_s12 = scalar_lea.vmem [#allocation5], %s8787_s23 }
 0x251   : > { %s1034_s14 = sshll.u32 %s1027_s12, 4  ;;  %p9693_p8 = pneg %p10441_p2  ;;  %s10450_s14 = int_to_ptr.vmem [resolvable:$true] %s1034_s14 }
 0x252   : > { %s10448_s8 = scalar_lea.hbm %s11652_s17, %s8788_s6  ;;  %s9696_s1 = scalar_lea.hbm %s11652_s17, 6144 }
 0x253   : > { %s9691_s19 = scalar_lea.hbm %s10448_s8, 3072  ;;  %p9697_p10 = scmp.lt.u32.totalorder %s10448_s8, %s11652_s17 }
 0x254   : > { %p9692_p5 = scmp.ne.s32.totalorder %s10448_s8, %s9691_s19  ;;  %p9698_p11 = scmp.lt.u32.totalorder %s9696_s1, %s9691_s19 }
 0x255   : > { %p9700_p1 = scmp.lt.u32.totalorder %s9691_s19, %s10448_s8 }
 0x256   : > { %p9694_p7 = pnand %p9693_p8, %p9692_p5  ;;  %p9699_p4 = por %p9698_p11, %p9697_p10 }
 0x258   : > { %p9695_p9 = pneg %p9694_p7  ;;  %p9701_p12 = por %p9700_p1, %p9699_p4 }
 0x25a   : > { %p9702_p13 = pnand %p9701_p12, %p9695_p9 }
 0x25c   : > { %9705 = shalt.err (!%p9702_p13)
}
 0x25d   : > { %s9706_s12 = scalar_lea.vmem %s10450_s14, 3072  ;;  %s9923_s6 = smov [#allocation5]  }
 0x25e   : > { %p9707_p0 = scmp.ne.s32.totalorder %s10450_s14, %s9706_s12  ;;  %s9711_s23 = sshll.u32 %s9923_s6, 4  ;;  %s9712_s23 = int_to_ptr.vmem [resolvable:$false] %s9711_s23 }
 0x25f   : > { %s9713_s18 = scalar_lea.vmem %s9712_s23, 6144  ;;  %p9714_p5 = scmp.lt.s32.totalorder %s10450_s14, %s9712_s23 }
 0x260   : > { %p9709_p3 = pnand %p9707_p0, %p9693_p8  ;;  %p9715_p7 = scmp.lt.s32.totalorder %s9713_s18, %s9706_s12 }
 0x262   : > { %p9710_p6 = pneg %p9709_p3  ;;  %p9716_p10 = por %p9715_p7, %p9714_p5 }
 0x264   : > { %p9717_p11 = pnand %p9716_p10, %p9710_p6 }
 0x266   : > { %9720 = shalt.err (!%p9717_p11)
}
 0x267   : > { %s11658_s19 = scalar_lea.sflag [#allocation6], %s10434_s2  ;;  %s11659_s1 = sld [smem:[#allocation57_spill]] }
 0x268   : > { %8947 = dma.hbm_to_vmem [thread:$0]  (!%p10441_p2), %s10448_s8, 3072, %s10450_s14, %s11658_s19, %s11647_s13, %s11647_s13, %s11646_s30  }
 0x269   : > { %s6921_s18 = sshll.u32 %s9865_s27, 4  ;;  %s1047_s6 = scalar_lea.vmem [#allocation8], %s10434_s2 }
 0x26a   : > { %s1054_s23 = sshll.u32 %s1047_s6, 4  ;;  %s11660_s17 = sand.u32 1, %s9865_s27   ;;  %s1055_s23 = int_to_ptr.vmem [resolvable:$true] %s1054_s23 }
 0x26b   : > { %s1045_s20 = scalar_lea.sflag [#allocation9], %s11660_s17 }
 0x26d   : > { %s10481_s12 = scalar_lea.hbm %s11659_s1, %s6921_s18  ;;  %s9726_s22 = scalar_lea.hbm %s11659_s1, 32 }
 0x26e   : > { %s9721_s21 = scalar_lea.hbm %s10481_s12, 16  ;;  %p9727_p9 = scmp.lt.u32.totalorder %s10481_s12, %s11659_s1 }
 0x26f   : > { %p9722_p6 = scmp.ne.s32.totalorder %s10481_s12, %s9721_s21  ;;  %p9728_p4 = scmp.lt.u32.totalorder %s9726_s22, %s9721_s21 }
 0x270   : > { %p9730_p12 = scmp.lt.u32.totalorder %s9721_s21, %s10481_s12 }
 0x271   : > { %p9724_p3 = pnand %p9722_p6, %p9693_p8  ;;  %p9729_p1 = por %p9728_p4, %p9727_p9 }
 0x273   : > { %p9725_p0 = pneg %p9724_p3  ;;  %p9731_p13 = por %p9730_p12, %p9729_p1 }
 0x275   : > { %p9732_p5 = pnand %p9731_p13, %p9725_p0 }
 0x277   : > { %9735 = shalt.err (!%p9732_p5)
}
 0x278   : > { %s9736_s8 = scalar_lea.vmem %s1055_s23, 16  ;;  %s9924_s14 = smov [#allocation8]  }
 0x279   : > { %p9737_p7 = scmp.ne.s32.totalorder %s1055_s23, %s9736_s8  ;;  %s9741_s30 = sshll.u32 %s9924_s14, 4  ;;  %s9742_s30 = int_to_ptr.vmem [resolvable:$false] %s9741_s30 }
 0x27a   : > { %s9743_s13 = scalar_lea.vmem %s9742_s30, 32  ;;  %p9744_p6 = scmp.lt.s32.totalorder %s1055_s23, %s9742_s30 }
 0x27b   : > { %p9739_p10 = pnand %p9737_p7, %p9693_p8  ;;  %p9745_p3 = scmp.lt.s32.totalorder %s9743_s13, %s9736_s8 }
 0x27d   : > { %p9740_p11 = pneg %p9739_p10  ;;  %p9746_p4 = por %p9745_p3, %p9744_p6 }
 0x27f   : > { %p9747_p9 = pnand %p9746_p4, %p9740_p11 }
 0x281   : > { %9750 = shalt.err (!%p9747_p9)
}
 0x282   : > { %8950 = dma.hbm_to_vmem [thread:$0]  (!%p10441_p2), %s10481_s12, 16, %s1055_s23, %s1045_s20  }
 0x283   : > { %p11661_p0 = scmp.ne.s32.totalorder %s11641_s15, 0 }
 0x284   : > { %s10504_s21 = sand.u32 (!%p11661_p0), 1, %s9857_s0   ;;  %p11662_p8 = scmp.ne.s32.totalorder (!%p11661_p0), %s11654_s5, 0 }
 0x285   : > { %1063 = sbr.rel (%p11661_p0) target bundleno = 4345 (0x10f9), region = 132  ;;  %s1066_s2 = scalar_lea.sflag (!%p11661_p0), [#allocation6], %s10504_s21 }
 0x286   : > { %s8789_s22 = smul.u32 (!%p11661_p0), 192, %s10504_s21 }
 0x288   : > { %s10508_s17 = scalar_lea.vmem (!%p11661_p0), [#allocation5], %s8789_s22 }
 0x28c   : > { %9796 = dma.done.wait (%p11662_p8), %s1066_s2, 3072  }
 0x28d   : > { %9798 = vsyncadd (%p11662_p8), %s1066_s2, 4294964224  ;;  %s1074_s20 = sand.u32 1, %s10104_s16   ;;  %s1077_s3 = scalar_lea.vmem [#allocation8], %s10504_s21 }
 0x28e   : > { %s1075_s15 = scalar_lea.sflag [#allocation9], %s1074_s20 }
 0x28f   : > { %9800 = dma.done.wait (%p11662_p8), %s1075_s15, 16  }
 0x290   : > { %9802 = vsyncadd (%p11662_p8), %s1075_s15, 4294967280  ;;  %p11663_p2 = scmp.eq.s32.totalorder %s10104_s16, 0 }
 0x292   : > { %9804 = dma.done.wait (%p11663_p2), [#allocation9], 61440   ;;  %p11664_p1 = pmov %p11663_p2 }
 0x294   : > { %9806 = vsyncadd (%p11664_p1), [#allocation9], 4294905856  ;;  %p11665_p12 = pmov %p11664_p1 }
 0x295   : > { %p11666_p13 = pmov %p11664_p1 }
 0x296   : > { %9808 = dma.done.wait (%p11665_p12), [#allocation12], 16448  }
 0x297   : > { %9810 = vsyncadd (%p11666_p13), [#allocation12], 4294950848  ;;  %p11667_p5 = pmov %p11664_p1 }
 0x298   : > { %p11668_p7 = pmov %p11664_p1 }
 0x299   : > { %9812 = dma.done.wait (%p11667_p5), [#allocation15], 41600  }
 0x29a   : > { %9814 = vsyncadd (%p11668_p7), [#allocation15], 4294925696  ;;  %p11669_p10 = pmov %p11664_p1 }
 0x29b   : > { %p11670_p11 = pmov %p11664_p1 }
 0x29c   : > { %9816 = dma.done.wait (%p11669_p10), [#allocation18], 160  }
 0x29d   : > { %9818 = vsyncadd (%p11670_p11), [#allocation18], 4294967136  ;;  %p11671_p6 = pmov %p11664_p1 }
 0x29e   : > { %p11672_p3 = pmov %p11664_p1 }
 0x29f   : > { %9820 = dma.done.wait (%p11671_p6), [#allocation21], 8208  }
 0x2a0   : > { %9822 = vsyncadd (%p11672_p3), [#allocation21], 4294959088  ;;  %p11673_p4 = pmov %p11664_p1 }
 0x2a1   : > { %p11674_p9 = pmov %p11664_p1 }
 0x2a2   : > { %9824 = dma.done.wait (%p11673_p4), [#allocation24], 272  }
 0x2a3   : > { %9826 = vsyncadd (%p11674_p9), [#allocation24], 4294967024  ;;  %p11675_p0 = pmov %p11664_p1 }
 0x2a5   : > { %9828 = dma.done.wait (%p11675_p0), [#allocation27], 144   ;;  %p11676_p8 = pmov %p11675_p0 }
 0x2a6   : > { %p11677_p2 = pmov %p11675_p0 }
 0x2a7   : > { %9830 = vsyncadd (%p11676_p8), [#allocation27], 4294967152 }
 0x2a8   : > { %9832 = dma.done.wait (%p11677_p2), [#allocation30], 528   ;;  %p11678_p1 = pmov %p11675_p0 }
 0x2a9   : > { %p11679_p12 = pmov %p11675_p0 }
 0x2aa   : > { %9834 = vsyncadd (%p11678_p1), [#allocation30], 4294966768 }
 0x2ab   : > { %9836 = dma.done.wait (%p11679_p12), [#allocation33], 384   ;;  %p11680_p13 = pmov %p11675_p0 }
 0x2ac   : > { %p11681_p5 = pmov %p11675_p0 }
 0x2ad   : > { %9838 = vsyncadd (%p11680_p13), [#allocation33], 4294966912 }
 0x2ae   : > { %9840 = dma.done.wait (%p11681_p5), [#allocation36], 528   ;;  %p11682_p7 = pmov %p11675_p0 }
 0x2af   : > { %p11683_p10 = pmov %p11675_p0 }
 0x2b0   : > { %9842 = vsyncadd (%p11682_p7), [#allocation36], 4294966768 }
 0x2b1   : > { %9844 = dma.done.wait (%p11683_p10), [#allocation39], 32   ;;  %p11684_p11 = pmov %p11675_p0 }
 0x2b2   : > { %vm1246_vm0 = vcmask 517120   ;;  %v9925_v1 = vmov 0.0   ;;  %v6944_v2 = vld [vmem:[%s10508_s17 + $0x40] sm:$0xff]  ;;  %vm1267_vm1 = vcmask 1041408   ;;  %v6945_v3 = vld [vmem:[%s10508_s17 + $0x48] sm:$0xff]  ;;  %v6946_v4 = vld [vmem:[%s10508_s17 + $0x50] sm:$0xff] }
 0x2b3   : > { %9846 = vsyncadd (%p11684_p11), [#allocation39], 4294967264  ;;  %1247 = vst.msk [vmem:[#allocation2 + $0x8] sm:$0x3] %vm1246_vm0, %v9925_v1  ;;  %v1320_v5 = vrot.slane %v6944_v2, 6  ;;  %v1321_v6 = vrot.slane %v6945_v3, 6 }
 0x2b4   : > { %1245 = vst [vmem:[#allocation2] sm:$0x3] %v9925_v1  ;;  %1248 = vst [vmem:[#allocation2 + $0x80] sm:$0xc] %v9925_v1  ;;  %v1323_v7 = vrot.slane %v6946_v4, 6  ;;  %v6947_v8 = vld [vmem:[%s10508_s17 + $0x58] sm:$0xff] }
 0x2b5   : > { %v6948_v9 = vld [vmem:[%s10508_s17 + $0x60] sm:$0xff]  ;;  %v1325_v10 = vrot.slane %v6947_v8, 6  ;;  %v10574_v11 = vld [vmem:[%s10508_s17 + $0x68] sm:$0xff]  ;;  %s9926_s5 = smov 64   ;;  %v10579_v14 = vld [vmem:[%s10508_s17 + $0x70] sm:$0xff]  ;;  %v1322_v18 = vsel %vm1267_vm1, %v1320_v5, %v1321_v6  ;;  %vm1292_vm2 = vcmask 523266  }
 0x2b6   : > { %v1542_v12 = vld [vmem:[#allocation10 + $0x308] sm:$0xff]  ;;  %1335 = vrot.lane.b32.xlu0 %v1320_v5, %s9926_s5  ;;  %v1324_v13 = vsel %vm1267_vm1, %v1321_v6, %v1323_v7  ;;  %v1544_v16 = vld [vmem:[#allocation10 + $0x318] sm:$0xff]  ;;  %v1327_v19 = vrot.slane %v6948_v9, 6  ;;  %v1541_v22 = vld [vmem:[#allocation10 + $0x300] sm:$0xff]  ;;  %v1329_v26 = vrot.slane %v10574_v11, 6  ;;  %v1331_v42 = vrot.slane %v10579_v14, 6 }
 0x2b7   : > { %v1546_v15 = vld [vmem:[#allocation10 + $0x328] sm:$0xff]  ;;  %v1548_v17 = vld [vmem:[#allocation10 + $0x338] sm:$0xff]  ;;  %1339 = vrot.lane.b32.xlu1 %v1324_v13, %s9926_s5  ;;  %v1545_v23 = vld [vmem:[#allocation10 + $0x320] sm:$0xff]  ;;  %v1326_v25 = vsel %vm1267_vm1, %v1323_v7, %v1325_v10  ;;  %vm1294_vm3 = vcmask 523264   ;;  %vm1655_vm4 = vcmask 1046528   ;;  %vm1362_vm5 = vcmask 1048066  }
 0x2b8   : > { %v10584_v20 = vld [vmem:[%s10508_s17 + $0x78] sm:$0xff]  ;;  %v7476_v21 = vpack.c.bf16 %v1546_v15, %v1542_v12  ;;  %v7524_v27 = vpack.c.bf16 %v1548_v17, %v1544_v16  ;;  %v7478_v28 = vpack.c.bf16 %v1545_v23, %v1541_v22  ;;  %v1550_v30 = vld [vmem:[#allocation10 + $0x348] sm:$0xff]  ;;  %v1549_v36 = vld [vmem:[#allocation10 + $0x340] sm:$0xff]  ;;  %v1328_v41 = vsel %vm1267_vm1, %v1325_v10, %v1327_v19  ;;  %s11685_s19 = sld [smem:[#allocation62_spill]]  ;;  %s11686_s18 = sld [smem:[#allocation66_spill]] }
 0x2b9   : > { %v1543_v24 = vld [vmem:[#allocation10 + $0x310] sm:$0xff]  ;;  %v1554_v31 = vld [vmem:[#allocation10 + $0x368] sm:$0xff]  ;;  %v1552_v34 = vld [vmem:[#allocation10 + $0x358] sm:$0xff]  ;;  %v1330_v47 = vsel %vm1267_vm1, %v1327_v19, %v1329_v26  ;;  %v1333_v48 = vrot.slane %v10584_v20, 6  ;;  %v1332_v61 = vsel %vm1267_vm1, %v1329_v26, %v1331_v42  ;;  %vm1364_vm6 = vcmask 1048064   ;;  %s11687_s12 = sld [smem:[#allocation73_spill]] }
 0x2ba   : > { %v1547_v29 = vld [vmem:[#allocation10 + $0x330] sm:$0xff]  ;;  %7477 = vmatprep.subr.bf16.mxu0 %v7476_v21  ;;  %v7480_v33 = vpack.c.bf16 %v1554_v31, %v1550_v30  ;;  %v1556_v35 = vld [vmem:[#allocation10 + $0x378] sm:$0xff]  ;;  %1337 = vrot.lane.b32.xlu0 %v1322_v18, %s9926_s5  ;;  %v1553_v38 = vld [vmem:[#allocation10 + $0x360] sm:$0xff]  ;;  %vm2288_vm7 = vcmask 1045504   ;;  %vm1372_vm8 = vcmask 1041920   ;;  %vm2710_vm9 = vcmask 1044480  }
 0x2bb   : > { %v7526_v32 = vpack.c.bf16 %v1547_v29, %v1543_v24  ;;  %7525 = vmatprep.subr.bf16.mxu1 %v7524_v27  ;;  %v7528_v37 = vpack.c.bf16 %v1556_v35, %v1552_v34  ;;  %v1551_v39 = vld [vmem:[#allocation10 + $0x350] sm:$0xff]  ;;  %1341 = vrot.lane.b32.xlu1 %v1326_v25, %s9926_s5  ;;  %v7482_v43 = vpack.c.bf16 %v1553_v38, %v1549_v36  ;;  %v1558_v44 = vld [vmem:[#allocation10 + $0x388] sm:$0xff]  ;;  %v1560_v46 = vld [vmem:[#allocation10 + $0x398] sm:$0xff]  ;;  %vm3132_vm10 = vcmask 1043456   ;;  %s11688_s6 = sld [smem:[#allocation79_spill]]  ;;  %p1242_p6 = scmp.lt.s32.totalorder %s10104_s16, 1 }
 0x2bc   : > { %v1555_v40 = vld [vmem:[#allocation10 + $0x370] sm:$0xff]  ;;  %7479 = vmatpush1.bf16.msra.mxu0 %v7478_v28  ;;  %v1562_v45 = vld [vmem:[#allocation10 + $0x3a8] sm:$0xff]  ;;  %v1564_v51 = vld [vmem:[#allocation10 + $0x3b8] sm:$0xff]  ;;  %v1334_v63 = vsel %vm1267_vm1, %v1331_v42, %v1333_v48  ;;  %vm1249_vm11 = vcmask 519170   ;;  %vm9928_vm12 = vmmov 0   ;;  %vm5103_vm13 = vcmask 261120  }
 0x2bd   : > { %7527 = vmatpush1.bf16.msra.mxu1 %v7526_v32  ;;  %7481 = vmatprep.subr.bf16.mxu0 %v7480_v33  ;;  %v7530_v49 = vpack.c.bf16 %v1555_v40, %v1551_v39  ;;  %v7484_v50 = vpack.c.bf16 %v1562_v45, %v1558_v44  ;;  %v1557_v52 = vld [vmem:[#allocation10 + $0x380] sm:$0xff]  ;;  %v7532_v54 = vpack.c.bf16 %v1564_v51, %v1560_v46  ;;  %v1559_v55 = vld [vmem:[#allocation10 + $0x390] sm:$0xff]  ;;  %v1566_v57 = vld [vmem:[#allocation10 + $0x3c8] sm:$0xff]  ;;  %vm5928_vm14 = vcmask 64512   ;;  %s1243_s23 = scalar_select %p1242_p6, %s10104_s16, 1 }
 0x2be   : > { %v1561_v53 = vld [vmem:[#allocation10 + $0x3a0] sm:$0xff]  ;;  %7529 = vmatprep.subr.bf16.mxu1 %v7528_v37  ;;  %v1563_v56 = vld [vmem:[#allocation10 + $0x3b0] sm:$0xff]  ;;  %1343 = vrot.lane.b32.xlu0 %v1328_v41, %s9926_s5  ;;  %v1570_v58 = vld [vmem:[#allocation10 + $0x3e8] sm:$0xff]  ;;  %1250 = vst.msk [vmem:[#allocation2 + $0x88] sm:$0xc] %vm1249_vm11, %v9925_v1  ;;  %vm6002_vm15 = vcmask 130048  }
 0x2bf   : > { %v1568_v59 = vld [vmem:[#allocation10 + $0x3d8] sm:$0xff]  ;;  %1345 = vrot.lane.b32.xlu1 %v1330_v47, %s9926_s5  ;;  %v7486_v62 = vpack.c.bf16 %v1561_v53, %v1557_v52  ;;  %v7534_v0 = vpack.c.bf16 %v1563_v56, %v1559_v55  ;;  %v7488_v2 = vpack.c.bf16 %v1570_v58, %v1566_v57  ;;  %v1565_v3 = vld [vmem:[#allocation10 + $0x3c0] sm:$0xff]  ;;  %v1567_v5 = vld [vmem:[#allocation10 + $0x3d0] sm:$0xff]  ;;  %s1244_s8 = scalar_lea.vmem %s10081_s10, %s1243_s23  ;;  %s11689_s14 = sld [smem:[#allocation81_spill]] }
 0x2c0   : > { %v1572_v60 = vld [vmem:[#allocation10 + $0x3f8] sm:$0xff]  ;;  %7483 = vmatpush1.bf16.msra.mxu0 %v7482_v43  ;;  %v1569_v4 = vld [vmem:[#allocation10 + $0x3e0] sm:$0xff]  ;;  %v1571_v7 = vld [vmem:[#allocation10 + $0x3f0] sm:$0xff]  ;;  %s7063_s30 = sshll.u32 %s10104_s16, 4  ;;  %s1236_s13 = scalar_lea.vmem [#allocation41], %s10504_s21 }
 0x2c1   : > { %7531 = vmatpush1.bf16.msra.mxu1 %v7530_v49  ;;  %7485 = vmatprep.subr.bf16.mxu0 %v7484_v50  ;;  %v7536_v6 = vpack.c.bf16 %v1572_v60, %v1568_v59  ;;  %v1574_v8 = vld [vmem:[#allocation10 + $0x408] sm:$0xff]  ;;  %v1576_v10 = vld [vmem:[#allocation10 + $0x418] sm:$0xff]  ;;  %v7490_v12 = vpack.c.bf16 %v1569_v4, %v1565_v3  ;;  %v7538_v13 = vpack.c.bf16 %v1571_v7, %v1567_v5  ;;  %v1573_v15 = vld [vmem:[#allocation10 + $0x400] sm:$0xff]  ;;  %s6560_s22 = sshll.u32 %s1236_s13, 4  ;;  %p11690_p4 = scmp.ne.s32.totalorder %s11655_s11, 0  ;;  %s11523_s22 = int_to_ptr.vmem [resolvable:$true] %s6560_s22 }
 0x2c2   : > { %7533 = vmatprep.subr.bf16.mxu1 %v7532_v54  ;;  %v1578_v9 = vld [vmem:[#allocation10 + $0x428] sm:$0xff]  ;;  %1347 = vrot.lane.b32.xlu0 %v1332_v61, %s9926_s5  ;;  %v1580_v11 = vld [vmem:[#allocation10 + $0x438] sm:$0xff]  ;;  %v1577_v16 = vld [vmem:[#allocation10 + $0x420] sm:$0xff]  ;;  %s9751_s20 = scalar_lea.vmem %s11523_s22, 16  ;;  %s9929_s15 = smov [#allocation41]  }
 0x2c3   : > { %1349 = vrot.lane.b32.xlu1 %v1334_v63, %s9926_s5  ;;  %v7492_v14 = vpack.c.bf16 %v1578_v9, %v1574_v8  ;;  %v1575_v17 = vld [vmem:[#allocation10 + $0x410] sm:$0xff]  ;;  %v7540_v18 = vpack.c.bf16 %v1580_v11, %v1576_v10  ;;  %v1582_v20 = vld [vmem:[#allocation10 + $0x448] sm:$0xff]  ;;  %v1584_v22 = vld [vmem:[#allocation10 + $0x458] sm:$0xff]  ;;  %v7494_v24 = vpack.c.bf16 %v1577_v16, %v1573_v15  ;;  %p9752_p3 = scmp.ne.s32.totalorder %s11523_s22, %s9751_s20  ;;  %s9755_s16 = sshll.u32 %s9929_s15, 4  ;;  %s9756_s16 = int_to_ptr.vmem [resolvable:$false] %s9755_s16 }
 0x2c4   : > { %7487 = vmatpush1.bf16.msra.mxu0 %v7486_v62  ;;  %v1579_v19 = vld [vmem:[#allocation10 + $0x430] sm:$0xff]  ;;  %v1586_v21 = vld [vmem:[#allocation10 + $0x468] sm:$0xff]  ;;  %v1588_v23 = vld [vmem:[#allocation10 + $0x478] sm:$0xff]  ;;  %p9758_p8 = scmp.lt.s32.totalorder %s11523_s22, %s9756_s16 }
 0x2c5   : > { %7535 = vmatpush1.bf16.msra.mxu1 %v7534_v0  ;;  %7489 = vmatprep.subr.bf16.mxu0 %v7488_v2  ;;  %v7542_v25 = vpack.c.bf16 %v1579_v19, %v1575_v17  ;;  %v7496_v26 = vpack.c.bf16 %v1586_v21, %v1582_v20  ;;  %v1581_v27 = vld [vmem:[#allocation10 + $0x440] sm:$0xff]  ;;  %v1583_v29 = vld [vmem:[#allocation10 + $0x450] sm:$0xff]  ;;  %v7544_v30 = vpack.c.bf16 %v1588_v23, %v1584_v22  ;;  %v1590_v32 = vld [vmem:[#allocation10 + $0x488] sm:$0xff]  ;;  %s11521_s2 = scalar_lea.hbm %s11689_s14, %s7063_s30  ;;  %p9753_p9 = pnand %p9752_p3, %p11690_p4 }
 0x2c6   : > { %7537 = vmatprep.subr.bf16.mxu1 %v7536_v6  ;;  %1351 = vrot.lane.b32.xlu0 %v1333_v48, %s9926_s5  ;;  %v1585_v28 = vld [vmem:[#allocation10 + $0x460] sm:$0xff]  ;;  %v1587_v31 = vld [vmem:[#allocation10 + $0x470] sm:$0xff]  ;;  %v1594_v33 = vld [vmem:[#allocation10 + $0x4a8] sm:$0xff] }
 0x2c7   : > { %v1592_v34 = vld [vmem:[#allocation10 + $0x498] sm:$0xff]  ;;  %v7498_v36 = vpack.c.bf16 %v1585_v28, %v1581_v27  ;;  %v1589_v37 = vld [vmem:[#allocation10 + $0x480] sm:$0xff]  ;;  %v1591_v39 = vld [vmem:[#allocation10 + $0x490] sm:$0xff]  ;;  %v7546_v40 = vpack.c.bf16 %v1587_v31, %v1583_v29  ;;  %v7500_v41 = vpack.c.bf16 %v1594_v33, %v1590_v32  ;;  %p9754_p0 = pneg %p9753_p9 }
 0x2c8   : > { %7491 = vmatpush1.bf16.msra.mxu0 %v7490_v12  ;;  %v1596_v35 = vld [vmem:[#allocation10 + $0x4b8] sm:$0xff]  ;;  %v1593_v38 = vld [vmem:[#allocation10 + $0x4a0] sm:$0xff]  ;;  %v1595_v42 = vld [vmem:[#allocation10 + $0x4b0] sm:$0xff] }
 0x2c9   : > { %7539 = vmatpush1.bf16.msra.mxu1 %v7538_v13  ;;  %7493 = vmatprep.subr.bf16.mxu0 %v7492_v14  ;;  %v1598_v43 = vld [vmem:[#allocation10 + $0x4c8] sm:$0xff]  ;;  %v7548_v45 = vpack.c.bf16 %v1596_v35, %v1592_v34  ;;  %v1600_v46 = vld [vmem:[#allocation10 + $0x4d8] sm:$0xff]  ;;  %v7502_v53 = vpack.c.bf16 %v1593_v38, %v1589_v37  ;;  %v1597_v54 = vld [vmem:[#allocation10 + $0x4c0] sm:$0xff]  ;;  %v7550_v60 = vpack.c.bf16 %v1595_v42, %v1591_v39 }
 0x2ca   : > { %7541 = vmatprep.subr.bf16.mxu1 %v7540_v18  ;;  %v1602_v44 = vld [vmem:[#allocation10 + $0x4e8] sm:$0xff]  ;;  %v1604_v47 = vld [vmem:[#allocation10 + $0x4f8] sm:$0xff]  ;;  %v1601_v62 = vld [vmem:[#allocation10 + $0x4e0] sm:$0xff] }
 0x2cb   : > { %v6952_v48 = vld [vmem:[%s10508_s17 + $0x80] sm:$0xff]  ;;  %v6953_v49 = vld [vmem:[%s10508_s17 + $0x88] sm:$0xff]  ;;  %v6954_v50 = vld [vmem:[%s10508_s17 + $0x90] sm:$0xff]  ;;  %v7504_v61 = vpack.c.bf16 %v1602_v44, %v1598_v43  ;;  %v7552_v4 = vpack.c.bf16 %v1604_v47, %v1600_v46  ;;  %v7506_v15 = vpack.c.bf16 %v1601_v62, %v1597_v54 }
 0x2cc   : > { %7495 = vmatpush1.bf16.msra.mxu0 %v7494_v24  ;;  %v6955_v51 = vld [vmem:[%s10508_s17 + $0x98] sm:$0xff]  ;;  %v1391_v52 = vrot.slane %v6952_v48, 6  ;;  %v10606_v55 = vld [vmem:[%s10508_s17 + $0xa0] sm:$0xff]  ;;  %v1392_v56 = vrot.slane %v6953_v49, 6  ;;  %v1394_v57 = vrot.slane %v6954_v50, 6  ;;  %v1606_v5 = vld [vmem:[#allocation10 + $0x508] sm:$0xff] }
 0x2cd   : > { %7543 = vmatpush1.bf16.msra.mxu1 %v7542_v25  ;;  %7497 = vmatprep.subr.bf16.mxu0 %v7496_v26  ;;  %v1396_v58 = vrot.slane %v6955_v51, 6  ;;  %v1251_v59 = vld [vmem:[%s10508_s17] sm:$0xff]  ;;  %v1599_v63 = vld [vmem:[#allocation10 + $0x4d0] sm:$0xff]  ;;  %v1398_v2 = vrot.slane %v10606_v55, 6  ;;  %v1610_v6 = vld [vmem:[#allocation10 + $0x528] sm:$0xff] }
 0x2ce   : > { %7545 = vmatprep.subr.bf16.mxu1 %v7544_v30  ;;  %v1603_v0 = vld [vmem:[#allocation10 + $0x4f0] sm:$0xff]  ;;  %1415 = vst.msk [vmem:[#allocation2 + $0x8] sm:$0xfc] %vm1292_vm2, %v1391_v52  ;;  %v1268_v3 = vrot.slane %v1251_v59, 6  ;;  %v1608_v7 = vld [vmem:[#allocation10 + $0x518] sm:$0xff]  ;;  %v1393_v8 = vsel %vm1267_vm1, %v1391_v52, %v1392_v56  ;;  %v1395_v9 = vsel %vm1267_vm1, %v1392_v56, %v1394_v57  ;;  %v1252_v13 = vld [vmem:[%s10508_s17 + $0x8] sm:$0xff]  ;;  %v7508_v19 = vpack.c.bf16 %v1610_v6, %v1606_v5 }
 0x2cf   : > { %v1397_v10 = vsel %vm1267_vm1, %v1394_v57, %v1396_v58  ;;  %v1612_v11 = vld [vmem:[#allocation10 + $0x538] sm:$0xff]  ;;  %v1399_v12 = vsel %vm1267_vm1, %v1396_v58, %v1398_v2  ;;  %1416 = vst.msk [vmem:[#allocation2 + $0x18] sm:$0xff] %vm1294_vm3, %v1393_v8  ;;  %1417 = vst.msk [vmem:[#allocation2 + $0x28] sm:$0xff] %vm1294_vm3, %v1395_v9  ;;  %v10623_v14 = vld [vmem:[%s10508_s17 + $0x10] sm:$0xff]  ;;  %v1269_v16 = vrot.slane %v1252_v13, 6  ;;  %v7554_v18 = vpack.c.bf16 %v1603_v0, %v1599_v63 }
 0x2d0   : > { %7499 = vmatpush1.bf16.msra.mxu0 %v7498_v36  ;;  %1418 = vst.msk [vmem:[#allocation2 + $0x38] sm:$0xff] %vm1294_vm3, %v1397_v10  ;;  %1419 = vst.msk [vmem:[#allocation2 + $0x48] sm:$0xff] %vm1294_vm3, %v1399_v12  ;;  %v1271_v17 = vrot.slane %v10623_v14, 6  ;;  %v1605_v20 = vld [vmem:[#allocation10 + $0x500] sm:$0xff]  ;;  %v1607_v22 = vld [vmem:[#allocation10 + $0x510] sm:$0xff]  ;;  %v7556_v23 = vpack.c.bf16 %v1612_v11, %v1608_v7 }
 0x2d1   : > { %7547 = vmatpush1.bf16.msra.mxu1 %v7546_v40  ;;  %7501 = vmatprep.subr.bf16.mxu0 %v7500_v41  ;;  %1293 = vst.msk [vmem:[#allocation2] sm:$0xfc] %vm1292_vm2, %v1268_v3  ;;  %v1609_v21 = vld [vmem:[#allocation10 + $0x520] sm:$0xff]  ;;  %v1611_v24 = vld [vmem:[#allocation10 + $0x530] sm:$0xff]  ;;  %v1614_v25 = vld [vmem:[#allocation10 + $0x548] sm:$0xff]  ;;  %v1270_v28 = vsel %vm1267_vm1, %v1268_v3, %v1269_v16 }
 0x2d2   : > { %7549 = vmatprep.subr.bf16.mxu1 %v7548_v45  ;;  %v1618_v26 = vld [vmem:[#allocation10 + $0x568] sm:$0xff]  ;;  %v1272_v27 = vsel %vm1267_vm1, %v1269_v16, %v1271_v17  ;;  %v1616_v29 = vld [vmem:[#allocation10 + $0x558] sm:$0xff]  ;;  %1295 = vst.msk [vmem:[#allocation2 + $0x10] sm:$0xff] %vm1294_vm3, %v1270_v28  ;;  %v7510_v31 = vpack.c.bf16 %v1609_v21, %v1605_v20  ;;  %v1613_v32 = vld [vmem:[#allocation10 + $0x540] sm:$0xff]  ;;  %v7558_v34 = vpack.c.bf16 %v1611_v24, %v1607_v22 }
 0x2d3   : > { %v1620_v30 = vld [vmem:[#allocation10 + $0x578] sm:$0xff]  ;;  %1296 = vst.msk [vmem:[#allocation2 + $0x20] sm:$0xff] %vm1294_vm3, %v1272_v27  ;;  %v1617_v33 = vld [vmem:[#allocation10 + $0x560] sm:$0xff]  ;;  %v7512_v35 = vpack.c.bf16 %v1618_v26, %v1614_v25  ;;  %v1615_v36 = vld [vmem:[#allocation10 + $0x550] sm:$0xff] }
 0x2d4   : > { %7503 = vmatpush1.bf16.msra.mxu0 %v7502_v53  ;;  %v1619_v37 = vld [vmem:[#allocation10 + $0x570] sm:$0xff]  ;;  %v7560_v39 = vpack.c.bf16 %v1620_v30, %v1616_v29  ;;  %v1622_v40 = vld [vmem:[#allocation10 + $0x588] sm:$0xff]  ;;  %v1624_v44 = vld [vmem:[#allocation10 + $0x598] sm:$0xff]  ;;  %v7514_v47 = vpack.c.bf16 %v1617_v33, %v1613_v32 }
 0x2d5   : > { %7551 = vmatpush1.bf16.msra.mxu1 %v7550_v60  ;;  %7505 = vmatprep.subr.bf16.mxu0 %v7504_v61  ;;  %v1537_v38 = vld [vmem:[#allocation2 + $0x8] sm:$0xfe]  ;;  %v1628_v45 = vld [vmem:[#allocation10 + $0x5b8] sm:$0xff]  ;;  %v7562_v48 = vpack.c.bf16 %v1619_v37, %v1615_v36  ;;  %v1623_v52 = vld [vmem:[#allocation10 + $0x590] sm:$0xff] }
 0x2d6   : > { %7553 = vmatprep.subr.bf16.mxu1 %v7552_v4  ;;  %v1626_v41 = vld [vmem:[#allocation10 + $0x5a8] sm:$0xff]  ;;  %v10633_v42 = vld [vmem:[#allocation2 + $0x18] sm:$0xff]  ;;  %v1659_v43 = vrot.slane %v1537_v38, 1  ;;  %v1621_v50 = vld [vmem:[#allocation10 + $0x580] sm:$0xff]  ;;  %v7564_v54 = vpack.c.bf16 %v1628_v45, %v1624_v44 }
 0x2d7   : > { %v1660_v46 = vrot.slane %v10633_v42, 1  ;;  %v7516_v49 = vpack.c.bf16 %v1626_v41, %v1622_v40  ;;  %v1625_v51 = vld [vmem:[#allocation10 + $0x5a0] sm:$0xff]  ;;  %v1627_v56 = vld [vmem:[#allocation10 + $0x5b0] sm:$0xff]  ;;  %v1630_v57 = vld [vmem:[#allocation10 + $0x5c8] sm:$0xff] }
 0x2d8   : > { %7507 = vmatpush1.bf16.msra.mxu0 %v7506_v15  ;;  %v1634_v58 = vld [vmem:[#allocation10 + $0x5e8] sm:$0xff]  ;;  %v1632_v59 = vld [vmem:[#allocation10 + $0x5d8] sm:$0xff]  ;;  %v7518_v61 = vpack.c.bf16 %v1625_v51, %v1621_v50  ;;  %v1629_v62 = vld [vmem:[#allocation10 + $0x5c0] sm:$0xff]  ;;  %v7566_v63 = vpack.c.bf16 %v1627_v56, %v1623_v52 }
 0x2d9   : > { %7555 = vmatpush1.bf16.msra.mxu1 %v7554_v18  ;;  %7509 = vmatprep.subr.bf16.mxu0 %v7508_v19  ;;  %v1661_v53 = vsel %vm1655_vm4, %v1659_v43, %v1660_v46  ;;  %v1636_v60 = vld [vmem:[#allocation10 + $0x5f8] sm:$0xff]  ;;  %v7520_v0 = vpack.c.bf16 %v1634_v58, %v1630_v57  ;;  %v1633_v3 = vld [vmem:[#allocation10 + $0x5e0] sm:$0xff]  ;;  %v1631_v4 = vld [vmem:[#allocation10 + $0x5d0] sm:$0xff] }
 0x2da   : > { %7557 = vmatprep.subr.bf16.mxu1 %v7556_v23  ;;  %6960 = vmatprep.mubr.msk.f32.mxu0 %vm1294_vm3, %v1661_v53  ;;  %v1254_v5 = vld [vmem:[%s10508_s17 + $0x18] sm:$0xff]  ;;  %v7568_v6 = vpack.c.bf16 %v1636_v60, %v1632_v59  ;;  %v1441_v8 = vld [vmem:[#allocation10 + $0x8] sm:$0xff]  ;;  %v7522_v13 = vpack.c.bf16 %v1633_v3, %v1629_v62  ;;  %v1255_v16 = vld [vmem:[%s10508_s17 + $0x20] sm:$0xff] }
 0x2db   : > { %6968 = vmatprep.mubr.msk.f32.mxu1 %vm1294_vm3, %v1661_v53  ;;  %v1635_v7 = vld [vmem:[#allocation10 + $0x5f0] sm:$0xff]  ;;  %v1445_v9 = vld [vmem:[#allocation10 + $0x28] sm:$0xff]  ;;  %v1273_v10 = vrot.slane %v1254_v5, 6  ;;  %v1443_v11 = vld [vmem:[#allocation10 + $0x18] sm:$0xff]  ;;  %v1275_v20 = vrot.slane %v1255_v16, 6 }
 0x2dc   : > { %7511 = vmatpush1.bf16.msra.mxu0 %v7510_v31  ;;  %v1447_v12 = vld [vmem:[#allocation10 + $0x38] sm:$0xff]  ;;  %v7570_v18 = vpack.c.bf16 %v1635_v7, %v1631_v4  ;;  %v7572_v19 = vpack.c.bf16 %v1445_v9, %v1441_v8  ;;  %v1256_v23 = vld [vmem:[%s10508_s17 + $0x28] sm:$0xff]  ;;  %v1257_v24 = vld [vmem:[%s10508_s17 + $0x30] sm:$0xff] }
 0x2dd   : > { %7559 = vmatpush1.bf16.msra.mxu1 %v7558_v34  ;;  %7513 = vmatprep.subr.bf16.mxu0 %v7512_v35  ;;  %v1274_v15 = vsel %vm1267_vm1, %v1271_v17, %v1273_v10  ;;  %v7620_v21 = vpack.c.bf16 %v1447_v12, %v1443_v11  ;;  %v1276_v22 = vsel %vm1267_vm1, %v1273_v10, %v1275_v20  ;;  %v1277_v14 = vrot.slane %v1256_v23, 6  ;;  %v1258_v27 = vld [vmem:[%s10508_s17 + $0x38] sm:$0xff]  ;;  %v6957_v29 = vld [vmem:[%s10508_s17 + $0xa8] sm:$0xff]  ;;  %v6958_v33 = vld [vmem:[%s10508_s17 + $0xb0] sm:$0xff] }
 0x2de   : > { %7561 = vmatprep.subr.bf16.mxu1 %v7560_v39  ;;  %1297 = vst.msk [vmem:[#allocation2 + $0x30] sm:$0xff] %vm1294_vm3, %v1274_v15  ;;  %1298 = vst.msk [vmem:[#allocation2 + $0x40] sm:$0xff] %vm1294_vm3, %v1276_v22  ;;  %v1279_v25 = vrot.slane %v1257_v24, 6  ;;  %v1281_v28 = vrot.slane %v1258_v27, 6  ;;  %v1400_v31 = vrot.slane %v6957_v29, 6  ;;  %v1402_v34 = vrot.slane %v6958_v33, 6 }
 0x2df   : > { %v1278_v17 = vsel %vm1267_vm1, %v1275_v20, %v1277_v14  ;;  %v6959_v36 = vld [vmem:[%s10508_s17 + $0xb8] sm:$0xff]  ;;  %v10674_v41 = vld [vmem:[#allocation2 + $0x28] sm:$0xff]  ;;  %s6545_s17 = scalar_lea.sflag [#allocation7], %s10504_s21 }
 0x2e0   : > { %7515 = vmatpush1.bf16.msra.mxu0 %v7514_v47  ;;  %1299 = vst.msk [vmem:[#allocation2 + $0x50] sm:$0xff] %vm1294_vm3, %v1278_v17  ;;  %v1280_v26 = vsel %vm1267_vm1, %v1277_v14, %v1279_v25  ;;  %v1282_v30 = vsel %vm1267_vm1, %v1279_v25, %v1281_v28  ;;  %v1401_v32 = vsel %vm1267_vm1, %v1398_v2, %v1400_v31  ;;  %v1404_v37 = vrot.slane %v6959_v36, 6  ;;  %v1440_v44 = vld [vmem:[#allocation10] sm:$0xff]  ;;  %v1442_v50 = vld [vmem:[#allocation10 + $0x10] sm:$0xff]  ;;  %v1449_v53 = vld [vmem:[#allocation10 + $0x48] sm:$0xff] }
 0x2e1   : > { %7563 = vmatpush1.bf16.msra.mxu1 %v7562_v48  ;;  %7517 = vmatprep.subr.bf16.mxu0 %v7516_v49  ;;  %1300 = vst.msk [vmem:[#allocation2 + $0x60] sm:$0xff] %vm1294_vm3, %v1280_v26  ;;  %1301 = vst.msk [vmem:[#allocation2 + $0x70] sm:$0xff] %vm1294_vm3, %v1282_v30  ;;  %v1403_v35 = vsel %vm1267_vm1, %v1400_v31, %v1402_v34  ;;  %v1444_v45 = vld [vmem:[#allocation10 + $0x20] sm:$0xff]  ;;  %v1446_v51 = vld [vmem:[#allocation10 + $0x30] sm:$0xff]  ;;  %v1664_v52 = vrot.slane %v10674_v41, 1 }
 0x2e2   : > { %7565 = vmatprep.subr.bf16.mxu1 %v7564_v54  ;;  %1302 = vst.msk [vmem:[#allocation2 + $0x80] sm:$0x3] %vm1246_vm0, %v1281_v28  ;;  %v1405_v38 = vsel %vm1267_vm1, %v1402_v34, %v1404_v37  ;;  %1423 = vst.msk [vmem:[#allocation2 + $0x88] sm:$0x3] %vm1246_vm0, %v1404_v37  ;;  %v1453_v54 = vld [vmem:[#allocation10 + $0x68] sm:$0xff]  ;;  %v1451_v56 = vld [vmem:[#allocation10 + $0x58] sm:$0xff]  ;;  %v7574_v59 = vpack.c.bf16 %v1444_v45, %v1440_v44  ;;  %v7622_v3 = vpack.c.bf16 %v1446_v51, %v1442_v50 }
 0x2e3   : > { %1420 = vst.msk [vmem:[#allocation2 + $0x58] sm:$0xff] %vm1294_vm3, %v1401_v32  ;;  %1421 = vst.msk [vmem:[#allocation2 + $0x68] sm:$0xff] %vm1294_vm3, %v1403_v35  ;;  %v1455_v60 = vld [vmem:[#allocation10 + $0x78] sm:$0xff]  ;;  %v1452_v4 = vld [vmem:[#allocation10 + $0x60] sm:$0xff]  ;;  %v1665_v9 = vsel %vm1655_vm4, %v1660_v46, %v1664_v52  ;;  %v7576_v10 = vpack.c.bf16 %v1453_v54, %v1449_v53  ;;  %vm6236_vm0 = vcmask 0   ;;  %vm6542_vm1 = vcmask 24576  }
 0x2e4   : > { %7519 = vmatpush1.bf16.msra.mxu0 %v7518_v61  ;;  %1422 = vst.msk [vmem:[#allocation2 + $0x78] sm:$0xff] %vm1294_vm3, %v1405_v38  ;;  %v10684_v61 = vld [vmem:[#allocation10 + $0x40] sm:$0xff]  ;;  %v10687_v5 = vld [vmem:[#allocation2 + $0x38] sm:$0xff]  ;;  %v1461_v20 = vld [vmem:[#allocation10 + $0xa8] sm:$0xff] }
 0x2e5   : > { %7567 = vmatpush1.bf16.msra.mxu1 %v7566_v63  ;;  %7521 = vmatprep.subr.bf16.mxu0 %v7520_v0  ;;  %v1450_v11 = vld [vmem:[#allocation10 + $0x50] sm:$0xff]  ;;  %v1463_v22 = vld [vmem:[#allocation10 + $0xb8] sm:$0xff]  ;;  %v10707_v23 = vld [vmem:[#allocation10 + $0x80] sm:$0xff]  ;;  %v1668_v14 = vrot.slane %v10687_v5, 1  ;;  %v7578_v26 = vpack.c.bf16 %v1452_v4, %v10684_v61 }
 0x2e6   : > { %7569 = vmatprep.subr.bf16.mxu1 %v7568_v6  ;;  %v1454_v12 = vld [vmem:[#allocation10 + $0x70] sm:$0xff]  ;;  %v1460_v28 = vld [vmem:[#allocation10 + $0xa0] sm:$0xff]  ;;  %v1465_v36 = vld [vmem:[#allocation10 + $0xc8] sm:$0xff] }
 0x2e7   : > { %v7626_v27 = vpack.c.bf16 %v1454_v12, %v1450_v11  ;;  %v1458_v29 = vld [vmem:[#allocation10 + $0x90] sm:$0xff]  ;;  %v10717_v31 = vld [vmem:[#allocation2 + $0x48] sm:$0xff] }
 0x2e8   : > { %7523 = vmatpush1.bf16.msra.mxu0 %v7522_v13  ;;  %v1457_v13 = vld [vmem:[#allocation10 + $0x88] sm:$0xff]  ;;  %v1462_v35 = vld [vmem:[#allocation10 + $0xb0] sm:$0xff]  ;;  %v10732_v44 = vld [vmem:[#allocation10 + $0xe0] sm:$0xff]  ;;  %v1672_v50 = vrot.slane %v10717_v31, 1 }
 0x2e9   : > { %7571 = vmatpush1.bf16.msra.mxu1 %v7570_v18  ;;  %7573 = vmatprep.subr.bf16.mxu0 %v7572_v19  ;;  %v7624_v18 = vpack.c.bf16 %v1455_v60, %v1451_v56  ;;  %v7580_v33 = vpack.c.bf16 %v1461_v20, %v1457_v13  ;;  %v1469_v37 = vld [vmem:[#allocation10 + $0xe8] sm:$0xff]  ;;  %v10734_v45 = vld [vmem:[#allocation10 + $0xd0] sm:$0xff]  ;;  %v7630_v51 = vpack.c.bf16 %v1462_v35, %v1458_v29  ;;  %v10765_v11 = vld [vmem:[#allocation10 + $0x100] sm:$0xff] }
 0x2ea   : > { %7621 = vmatprep.subr.bf16.mxu1 %v7620_v21  ;;  %v1459_v21 = vld [vmem:[#allocation10 + $0x98] sm:$0xff]  ;;  %v7584_v53 = vpack.c.bf16 %v1469_v37, %v1465_v36  ;;  %v10744_v54 = vld [vmem:[#allocation10 + $0x108] sm:$0xff]  ;;  %v1673_v12 = vsel %vm1655_vm4, %v1668_v14, %v1672_v50  ;;  %v1480_v37 = vld [vmem:[#allocation10 + $0x140] sm:$0xff] }
 0x2eb   : > { %v7628_v34 = vpack.c.bf16 %v1463_v22, %v1459_v21  ;;  %v10746_v56 = vld [vmem:[#allocation10 + $0x128] sm:$0xff]  ;;  %v10750_v60 = vld [vmem:[#allocation2 + $0x58] sm:$0xff] }
 0x2ec   : > { %v1676_v13 = vrot.slane %v10750_v60, 1  ;;  %v10773_v21 = vld [vmem:[#allocation2 + $0x68] sm:$0xff] }
 0x328   : > { %v1336_v55 = vpop.permute.xlu0 %1335 }
 0x329   : > { %1363 = vst.msk [vmem:[#allocation2] sm:$0xfc] %vm1362_vm5, %v1336_v55  ;;  %v1340_v2 = vpop.permute.xlu1 %1339  ;;  %v1467_v55 = vld [vmem:[#allocation10 + $0xd8] sm:$0xff] }
 0x32a   : > { %1366 = vst.msk [vmem:[#allocation2 + $0x20] sm:$0xff] %vm1364_vm6, %v1340_v2  ;;  %v1471_v2 = vld [vmem:[#allocation10 + $0xf8] sm:$0xff] }
 0x32b   : > { %v7632_v61 = vpack.c.bf16 %v1471_v2, %v1467_v55  ;;  %v1680_v55 = vrot.slane %v10773_v21, 1 }
 0x32c   : > { %v1338_v39 = vpop.permute.xlu0 %1337 }
 0x32d   : > { %1365 = vst.msk [vmem:[#allocation2 + $0x10] sm:$0xff] %vm1364_vm6, %v1338_v39  ;;  %v1342_v40 = vpop.permute.xlu1 %1341  ;;  %v10724_v39 = vld [vmem:[#allocation10 + $0xc0] sm:$0xff] }
 0x32e   : > { %1367 = vst.msk [vmem:[#allocation2 + $0x30] sm:$0xff] %vm1364_vm6, %v1342_v40 }
 0x330   : > { %v1344_v43 = vpop.permute.xlu0 %1343  ;;  %v1536_v49 = vld [vmem:[#allocation2] sm:$0xfe] }
 0x331   : > { %v10676_v47 = vld [vmem:[#allocation2 + $0x20] sm:$0xff]  ;;  %1368 = vst.msk [vmem:[#allocation2 + $0x40] sm:$0xff] %vm1364_vm6, %v1344_v43  ;;  %v1346_v48 = vpop.permute.xlu1 %1345  ;;  %v1656_v63 = vrot.slane %v1536_v49, 1  ;;  %v7582_v43 = vpack.c.bf16 %v1460_v28, %v10707_v23  ;;  %v1669_v49 = vsel %vm1655_vm4, %v1664_v52, %v1668_v14  ;;  %v1478_v23 = vld [vmem:[#allocation10 + $0x130] sm:$0xff] }
 0x332   : > { %1369 = vst.msk [vmem:[#allocation2 + $0x50] sm:$0xff] %vm1364_vm6, %v1346_v48  ;;  %v2295_v57 = vrot.slane %v10676_v47, 2  ;;  %v1662_v19 = vrot.slane %v10676_v47, 1  ;;  %v10736_v48 = vld [vmem:[#allocation10 + $0xf0] sm:$0xff]  ;;  %v1475_v52 = vld [vmem:[#allocation10 + $0x118] sm:$0xff]  ;;  %v3139_v29 = vrot.slane %v10676_v47, 4 }
 0x334   : > { %v10682_v58 = vld [vmem:[#allocation2 + $0x10] sm:$0xff]  ;;  %v1348_v62 = vpop.permute.xlu0 %1347 }
 0x335   : > { %v1657_v0 = vrot.slane %v10682_v58, 1  ;;  %1370 = vst.msk [vmem:[#allocation2 + $0x60] sm:$0xff] %vm1364_vm6, %v1348_v62  ;;  %v10690_v6 = vld [vmem:[#allocation2 + $0x30] sm:$0xff]  ;;  %v1350_v7 = vpop.permute.xlu1 %1349  ;;  %v2290_v8 = vrot.slane %v10682_v58, 2  ;;  %v1479_v62 = vld [vmem:[#allocation10 + $0x138] sm:$0xff]  ;;  %v3134_v28 = vrot.slane %v10682_v58, 4 }
 0x336   : > { %1371 = vst.msk [vmem:[#allocation2 + $0x70] sm:$0xff] %vm1364_vm6, %v1350_v7  ;;  %v2299_v15 = vrot.slane %v10690_v6, 2  ;;  %v1666_v30 = vrot.slane %v10690_v6, 1  ;;  %v2721_v4 = vrot.slane %v10690_v6, 3  ;;  %v7586_v7 = vpack.c.bf16 %v10732_v44, %v10724_v39  ;;  %v1484_v39 = vld [vmem:[#allocation10 + $0x160] sm:$0xff] }
 0x337   : > { %v1658_v16 = vsel %vm1655_vm4, %v1656_v63, %v1657_v0  ;;  %v10705_v46 = vsel %vm2288_vm7, %v2290_v8, %v2295_v57  ;;  %v1663_v38 = vsel %vm1655_vm4, %v1657_v0, %v1662_v19  ;;  %v2712_v0 = vrot.slane %v10682_v58, 3 }
 0x338   : > { %1779 = vmatmul.mubr.f32.vlgmr.msra.gmra.mrb[0].mxu0 %v1658_v16  ;;  %1892 = vmatmul.mubr.f32.vlgmr.msra.gmra.mrb[0].mxu1 %v1658_v16  ;;  %v10710_v17 = vld [vmem:[#allocation2 + $0x40] sm:$0xff]  ;;  %v1352_v24 = vpop.permute.xlu0 %1351  ;;  %v10713_v25 = vsel %vm2288_vm7, %v2295_v57, %v2299_v15  ;;  %v1667_v57 = vsel %vm1655_vm4, %v1662_v19, %v1666_v30  ;;  %v3143_v35 = vrot.slane %v10690_v6, 4 }
 0x339   : > { %7575 = vmatpush1.bf16.msra.mxu0 %v7574_v59  ;;  %7623 = vmatpush1.bf16.msra.mxu1 %v7622_v3  ;;  %1373 = vst.msk [vmem:[#allocation2 + $0x80] sm:$0x3] %vm1372_vm8, %v1352_v24  ;;  %v2303_v32 = vrot.slane %v10710_v17, 2  ;;  %v1670_v59 = vrot.slane %v10710_v17, 1  ;;  %v10752_v63 = vld [vmem:[#allocation2 + $0x50] sm:$0xff]  ;;  %v2717_v3 = vrot.slane %v10676_v47, 3 }
 0x33a   : > { %6961 = vmatprep.mubr.msk.f32.mxu0 %vm1294_vm3, %v1665_v9  ;;  %6969 = vmatprep.mubr.msk.f32.mxu1 %vm1294_vm3, %v1665_v9  ;;  %v7634_v9 = vpack.c.bf16 %v10736_v48, %v10734_v45  ;;  %v1476_v16 = vld [vmem:[#allocation10 + $0x120] sm:$0xff]  ;;  %v1674_v20 = vrot.slane %v10752_v63, 1  ;;  %v2725_v22 = vrot.slane %v10710_v17, 3  ;;  %v1481_v24 = vld [vmem:[#allocation10 + $0x148] sm:$0xff]  ;;  %v10796_v48 = vld [vmem:[#allocation2 + $0x78] sm:$0xff] }
 0x33b   : > { %7577 = vmatprep.subr.bf16.mxu0 %v7576_v10  ;;  %7625 = vmatprep.subr.bf16.mxu1 %v7624_v18  ;;  %v10729_v40 = vsel %vm2288_vm7, %v2299_v15, %v2303_v32  ;;  %v7588_v10 = vpack.c.bf16 %v10746_v56, %v10744_v54  ;;  %v7636_v15 = vpack.c.bf16 %v1479_v62, %v1475_v52  ;;  %v1474_v18 = vld [vmem:[#allocation10 + $0x110] sm:$0xff]  ;;  %v1489_v54 = vld [vmem:[#allocation10 + $0x188] sm:$0xff]  ;;  %v1495_v52 = vld [vmem:[#allocation10 + $0x1b8] sm:$0xff] }
 0x33c   : > { %1785 = vmatmul.mubr.f32.gmra.mrb[2].mxu0 %v1663_v38  ;;  %1898 = vmatmul.mubr.f32.gmra.mrb[2].mxu1 %v1663_v38  ;;  %v1671_v19 = vsel %vm1655_vm4, %v1666_v30, %v1670_v59  ;;  %v10776_v14 = vld [vmem:[#allocation2 + $0x60] sm:$0xff]  ;;  %v1485_v30 = vld [vmem:[#allocation10 + $0x168] sm:$0xff]  ;;  %v7590_v36 = vpack.c.bf16 %v1476_v16, %v10765_v11  ;;  %v1677_v38 = vsel %vm1655_vm4, %v1672_v50, %v1676_v13 }
 0x33d   : > { %7579 = vmatpush1.bf16.msra.mxu0 %v7578_v26  ;;  %7627 = vmatpush1.bf16.msra.mxu1 %v7626_v27  ;;  %v10781_v26 = vsel %vm2710_vm9, %v2712_v0, %v2717_v3  ;;  %v10784_v27 = vsel %vm2710_vm9, %v2717_v3, %v2721_v4  ;;  %v7638_v2 = vpack.c.bf16 %v1478_v23, %v1474_v18  ;;  %v1678_v45 = vrot.slane %v10776_v14, 1  ;;  %v10803_v56 = vld [vmem:[#allocation2 + $0x70] sm:$0xff] }
 0x33e   : > { %7581 = vmatprep.subr.bf16.mxu0 %v7580_v33  ;;  %7629 = vmatprep.subr.bf16.mxu1 %v7628_v34  ;;  %v1483_v33 = vld [vmem:[#allocation10 + $0x158] sm:$0xff]  ;;  %v1675_v44 = vsel %vm1655_vm4, %v1670_v59, %v1674_v20  ;;  %v7592_v50 = vpack.c.bf16 %v1485_v30, %v1481_v24  ;;  %v1493_v59 = vld [vmem:[#allocation10 + $0x1a8] sm:$0xff]  ;;  %v10813_v62 = vsel %vm3132_vm10, %v3139_v29, %v3143_v35  ;;  %v3147_v3 = vrot.slane %v10710_v17, 4 }
 0x33f   : > { %6962 = vmatprep.mubr.msk.f32.mxu0 %vm1294_vm3, %v1669_v49  ;;  %6970 = vmatprep.mubr.msk.f32.mxu1 %vm1294_vm3, %v1669_v49  ;;  %v1487_v34 = vld [vmem:[#allocation10 + $0x178] sm:$0xff]  ;;  %v10801_v49 = vsel %vm2710_vm9, %v2721_v4, %v2725_v22  ;;  %v7594_v4 = vpack.c.bf16 %v1484_v39, %v1480_v37  ;;  %v1679_v16 = vsel %vm1655_vm4, %v1674_v20, %v1678_v45  ;;  %v1682_v18 = vrot.slane %v10803_v56, 1  ;;  %v1497_v30 = vld [vmem:[#allocation10 + $0x1c8] sm:$0xff]  ;;  %v1496_v39 = vld [vmem:[#allocation10 + $0x1c0] sm:$0xff] }
 0x340   : > { %1791 = vmatmul.mubr.f32.gmra.mrb[4].mxu0 %v1667_v57  ;;  %1904 = vmatmul.mubr.f32.gmra.mrb[4].mxu1 %v1667_v57  ;;  %v10808_v57 = vsel %vm3132_vm10, %v3134_v28, %v3139_v29  ;;  %v10823_v23 = vsel %vm3132_vm10, %v3143_v35, %v3147_v3  ;;  %v1494_v29 = vld [vmem:[#allocation10 + $0x1b0] sm:$0xff]  ;;  %v1503_v37 = vld [vmem:[#allocation10 + $0x1f8] sm:$0xff] }
 0x341   : > { %7583 = vmatpush1.bf16.msra.mxu0 %v7582_v43  ;;  %7631 = vmatpush1.bf16.msra.mxu1 %v7630_v51  ;;  %v1482_v43 = vld [vmem:[#allocation10 + $0x150] sm:$0xff]  ;;  %v7640_v51 = vpack.c.bf16 %v1487_v34, %v1483_v33  ;;  %v1538_v33 = vld [vmem:[#allocation2 + $0x80] sm:$0x1]  ;;  %v1501_v34 = vld [vmem:[#allocation10 + $0x1e8] sm:$0xff] }
 0x342   : > { %7585 = vmatprep.subr.bf16.mxu0 %v7584_v53  ;;  %7633 = vmatprep.subr.bf16.mxu1 %v7632_v61  ;;  %v1486_v53 = vld [vmem:[#allocation10 + $0x170] sm:$0xff]  ;;  %v1491_v61 = vld [vmem:[#allocation10 + $0x198] sm:$0xff] }
 0x343   : > { %6963 = vmatprep.mubr.msk.f32.mxu0 %vm1294_vm3, %v1673_v12  ;;  %6971 = vmatprep.mubr.msk.f32.mxu1 %vm1294_vm3, %v1673_v12  ;;  %v7642_v11 = vpack.c.bf16 %v1486_v53, %v1482_v43  ;;  %v1492_v12 = vld [vmem:[#allocation10 + $0x1a0] sm:$0xff]  ;;  %v7644_v24 = vpack.c.bf16 %v1495_v52, %v1491_v61  ;;  %v1505_v61 = vld [vmem:[#allocation10 + $0x208] sm:$0xff] }
 0x344   : > { %1797 = vmatmul.mubr.f32.gmra.mrb[6].mxu0 %v1671_v19  ;;  %1910 = vmatmul.mubr.f32.gmra.mrb[6].mxu1 %v1671_v19  ;;  %v1539_v19 = vld [vmem:[#allocation2 + $0x88] sm:$0x1]  ;;  %v1509_v52 = vld [vmem:[#allocation10 + $0x228] sm:$0xff] }
 0x345   : > { %7587 = vmatpush1.bf16.msra.mxu0 %v7586_v7  ;;  %7635 = vmatpush1.bf16.msra.mxu1 %v7634_v9  ;;  %v1488_v7 = vld [vmem:[#allocation10 + $0x180] sm:$0xff]  ;;  %v1681_v9 = vsel %vm1655_vm4, %v1676_v13, %v1680_v55  ;;  %v7596_v13 = vpack.c.bf16 %v1493_v59, %v1489_v54  ;;  %v1688_v35 = vrot.slane %v1539_v19, 1  ;;  %v1498_v54 = vld [vmem:[#allocation10 + $0x1d0] sm:$0xff] }
 0x346   : > { %7589 = vmatprep.subr.bf16.mxu0 %v7588_v10  ;;  %7637 = vmatprep.subr.bf16.mxu1 %v7636_v15  ;;  %v1684_v10 = vrot.slane %v10796_v48, 1  ;;  %v1490_v15 = vld [vmem:[#allocation10 + $0x190] sm:$0xff]  ;;  %v1500_v43 = vld [vmem:[#allocation10 + $0x1e0] sm:$0xff] }
 0x347   : > { %6964 = vmatprep.mubr.msk.f32.mxu0 %vm1294_vm3, %v1677_v38  ;;  %6972 = vmatprep.mubr.msk.f32.mxu1 %vm1294_vm3, %v1677_v38  ;;  %v7598_v38 = vpack.c.bf16 %v1492_v12, %v1488_v7  ;;  %v1502_v59 = vld [vmem:[#allocation10 + $0x1f0] sm:$0xff]  ;;  %v1508_v12 = vld [vmem:[#allocation10 + $0x220] sm:$0xff] }
 0x348   : > { %1803 = vmatmul.mubr.f32.gmra.mrb[8].mxu0 %v1675_v44  ;;  %1916 = vmatmul.mubr.f32.gmra.mrb[8].mxu1 %v1675_v44  ;;  %v1685_v20 = vsel %vm1655_vm4, %v1680_v55, %v1684_v10  ;;  %v1683_v44 = vsel %vm1655_vm4, %v1678_v45, %v1682_v18  ;;  %v1511_v55 = vld [vmem:[#allocation10 + $0x238] sm:$0xff]  ;;  %v7602_v45 = vpack.c.bf16 %v1500_v43, %v1496_v39  ;;  %v1518_v39 = vld [vmem:[#allocation10 + $0x270] sm:$0xff]  ;;  %v1521_v43 = vld [vmem:[#allocation10 + $0x288] sm:$0xff] }
 0x349   : > { %7591 = vmatpush1.bf16.msra.mxu0 %v7590_v36  ;;  %7639 = vmatpush1.bf16.msra.mxu1 %v7638_v2  ;;  %v1499_v36 = vld [vmem:[#allocation10 + $0x1d8] sm:$0xff]  ;;  %v7646_v2 = vpack.c.bf16 %v1494_v29, %v1490_v15  ;;  %v7650_v7 = vpack.c.bf16 %v1502_v59, %v1498_v54  ;;  %v1513_v29 = vld [vmem:[#allocation10 + $0x248] sm:$0xff]  ;;  %v1520_v59 = vld [vmem:[#allocation10 + $0x280] sm:$0xff] }
 0x34a   : > { %7593 = vmatprep.subr.bf16.mxu0 %v7592_v50  ;;  %7641 = vmatprep.subr.bf16.mxu1 %v7640_v51  ;;  %v1686_v50 = vrot.slane %v1538_v33, 1  ;;  %v7600_v51 = vpack.c.bf16 %v1501_v34, %v1497_v30  ;;  %v7648_v53 = vpack.c.bf16 %v1503_v37, %v1499_v36  ;;  %v1517_v30 = vld [vmem:[#allocation10 + $0x268] sm:$0xff]  ;;  %v1515_v33 = vld [vmem:[#allocation10 + $0x258] sm:$0xff]  ;;  %v1512_v37 = vld [vmem:[#allocation10 + $0x240] sm:$0xff] }
 0x34b   : > { %6965 = vmatprep.mubr.msk.f32.mxu0 %vm1294_vm3, %v1681_v9  ;;  %6973 = vmatprep.mubr.msk.f32.mxu1 %vm1294_vm3, %v1681_v9  ;;  %v1507_v9 = vld [vmem:[#allocation10 + $0x218] sm:$0xff] }
 0x34c   : > { %1809 = vmatmul.mubr.f32.gmra.mrb[10].mxu0 %v1679_v16  ;;  %1922 = vmatmul.mubr.f32.gmra.mrb[10].mxu1 %v1679_v16  ;;  %v1687_v15 = vsel %vm1655_vm4, %v1682_v18, %v1686_v50  ;;  %v7604_v16 = vpack.c.bf16 %v1509_v52, %v1505_v61  ;;  %v7652_v19 = vpack.c.bf16 %v1511_v55, %v1507_v9  ;;  %v1519_v34 = vld [vmem:[#allocation10 + $0x278] sm:$0xff]  ;;  %v1524_v61 = vld [vmem:[#allocation10 + $0x2a0] sm:$0xff]  ;;  %v1522_v55 = vld [vmem:[#allocation10 + $0x290] sm:$0xff] }
 0x34d   : > { %7595 = vmatpush1.bf16.msra.mxu0 %v7594_v4  ;;  %7643 = vmatpush1.bf16.msra.mxu1 %v7642_v11  ;;  %v1689_v4 = vsel %vm1655_vm4, %v1684_v10, %v1688_v35  ;;  %v1504_v11 = vld [vmem:[#allocation10 + $0x200] sm:$0xff]  ;;  %v7608_v35 = vpack.c.bf16 %v1517_v30, %v1513_v29  ;;  %v1523_v50 = vld [vmem:[#allocation10 + $0x298] sm:$0xff]  ;;  %v1530_v30 = vld [vmem:[#allocation10 + $0x2d0] sm:$0xff] }
 0x34e   : > { %7597 = vmatprep.subr.bf16.mxu0 %v7596_v13  ;;  %7645 = vmatprep.subr.bf16.mxu1 %v7644_v24  ;;  %v1506_v13 = vld [vmem:[#allocation10 + $0x210] sm:$0xff]  ;;  %v1425_v10 = vld [vmem:[#allocation2 + $0x8] sm:$0xff]  ;;  %v7606_v18 = vpack.c.bf16 %v1508_v12, %v1504_v11  ;;  %v1531_v11 = vld [vmem:[#allocation10 + $0x2d8] sm:$0xff] }
 0x34f   : > { %6966 = vmatprep.mubr.msk.f32.mxu0 %vm1294_vm3, %v1685_v20  ;;  %6974 = vmatprep.mubr.msk.f32.mxu1 %vm1294_vm3, %v1685_v20  ;;  %v1510_v24 = vld [vmem:[#allocation10 + $0x230] sm:$0xff]  ;;  %v1516_v20 = vld [vmem:[#allocation10 + $0x260] sm:$0xff]  ;;  %v1535_v12 = vld [vmem:[#allocation10 + $0x2f8] sm:$0xff] }
 0x350   : > { %1815 = vmatmul.mubr.f32.gmra.mrb[12].mxu0 %v1683_v44  ;;  %1928 = vmatmul.mubr.f32.gmra.mrb[12].mxu1 %v1683_v44  ;;  %v7654_v36 = vpack.c.bf16 %v1510_v24, %v1506_v13  ;;  %v1525_v44 = vld [vmem:[#allocation10 + $0x2a8] sm:$0xff]  ;;  %v1532_v13 = vld [vmem:[#allocation10 + $0x2e0] sm:$0xff]  ;;  %v7664_v29 = vpack.c.bf16 %v1535_v12, %v1531_v11 }
 0x351   : > { %7599 = vmatpush1.bf16.msra.mxu0 %v7598_v38  ;;  %7647 = vmatpush1.bf16.msra.mxu1 %v7646_v2  ;;  %v7656_v38 = vpack.c.bf16 %v1519_v34, %v1515_v33  ;;  %v1514_v2 = vld [vmem:[#allocation10 + $0x250] sm:$0xff]  ;;  %v7612_v52 = vpack.c.bf16 %v1525_v44, %v1521_v43  ;;  %v2189_v34 = vld [vmem:[#allocation10 + $0x608] sm:$0xff] }
 0x352   : > { %7601 = vmatprep.subr.bf16.mxu0 %v7600_v51  ;;  %7649 = vmatprep.subr.bf16.mxu1 %v7648_v53  ;;  %v1527_v51 = vld [vmem:[#allocation10 + $0x2b8] sm:$0xff]  ;;  %v7610_v53 = vpack.c.bf16 %v1516_v20, %v1512_v37  ;;  %v7658_v54 = vpack.c.bf16 %v1518_v39, %v1514_v2  ;;  %v1534_v33 = vld [vmem:[#allocation10 + $0x2f0] sm:$0xff]  ;;  %v2192_v39 = vld [vmem:[#allocation10 + $0x620] sm:$0xff] }
 0x353   : > { %6967 = vmatprep.mubr.msk.f32.mxu0 %vm1294_vm3, %v1689_v4  ;;  %6975 = vmatprep.mubr.msk.f32.mxu1 %vm1294_vm3, %v1689_v4  ;;  %v7660_v9 = vpack.c.bf16 %v1527_v51, %v1523_v50  ;;  %v1526_v4 = vld [vmem:[#allocation10 + $0x2b0] sm:$0xff]  ;;  %v7666_v20 = vpack.c.bf16 %v1534_v33, %v1530_v30  ;;  %v2197_v50 = vld [vmem:[#allocation10 + $0x648] sm:$0xff]  ;;  %v2208_v30 = vld [vmem:[#allocation10 + $0x6a0] sm:$0xff] }
 0x354   : > { %1821 = vmatmul.mubr.f32.gmra.mrb[14].mxu0 %v1687_v15  ;;  %1934 = vmatmul.mubr.f32.gmra.mrb[14].mxu1 %v1687_v15  ;;  %v7614_v15 = vpack.c.bf16 %v1524_v61, %v1520_v59  ;;  %v2190_v43 = vld [vmem:[#allocation10 + $0x610] sm:$0xff]  ;;  %v2201_v51 = vld [vmem:[#allocation10 + $0x668] sm:$0xff] }
 0x355   : > { %7603 = vmatpush1.bf16.msra.mxu0 %v7602_v45  ;;  %7651 = vmatpush1.bf16.msra.mxu1 %v7650_v7  ;;  %v1529_v45 = vld [vmem:[#allocation10 + $0x2c8] sm:$0xff]  ;;  %v2194_v44 = vld [vmem:[#allocation10 + $0x630] sm:$0xff] }
 0x356   : > { %7605 = vmatprep.subr.bf16.mxu0 %v7604_v16  ;;  %7653 = vmatprep.subr.bf16.mxu1 %v7652_v19  ;;  %v1533_v7 = vld [vmem:[#allocation10 + $0x2e8] sm:$0xff]  ;;  %v7662_v16 = vpack.c.bf16 %v1526_v4, %v1522_v55  ;;  %v1528_v19 = vld [vmem:[#allocation10 + $0x2c0] sm:$0xff]  ;;  %v7718_v61 = vpack.c.bf16 %v2194_v44, %v2190_v43  ;;  %v2198_v55 = vld [vmem:[#allocation10 + $0x650] sm:$0xff] }
 0x357   : > { %6976 = vmatprep.mubr.msk.f32.mxu0 %vm1294_vm3, %v1425_v10  ;;  %6984 = vmatprep.mubr.msk.f32.mxu1 %vm1294_vm3, %v1425_v10  ;;  %v7616_v24 = vpack.c.bf16 %v1533_v7, %v1529_v45  ;;  %v2193_v10 = vld [vmem:[#allocation10 + $0x628] sm:$0xff]  ;;  %v7618_v37 = vpack.c.bf16 %v1532_v13, %v1528_v19  ;;  %v2202_v4 = vld [vmem:[#allocation10 + $0x670] sm:$0xff]  ;;  %v1424_v45 = vld [vmem:[#allocation2] sm:$0xff]  ;;  %v7672_v7 = vpack.c.bf16 %v2201_v51, %v2197_v50 }
 0x358   : > { %v2205_v12 = vld [vmem:[#allocation10 + $0x688] sm:$0xff]  ;;  %v2211_v19 = vld [vmem:[#allocation10 + $0x6b8] sm:$0xff]  ;;  %v2206_v33 = vld [vmem:[#allocation10 + $0x690] sm:$0xff] }
 0x359   : > { %7607 = vmatpush1.bf16.msra.mxu0 %v7606_v18  ;;  %7655 = vmatpush1.bf16.msra.mxu1 %v7654_v36  ;;  %v2191_v18 = vld [vmem:[#allocation10 + $0x618] sm:$0xff]  ;;  %v2214_v43 = vld [vmem:[#allocation10 + $0x6d0] sm:$0xff] }
 0x35a   : > { %7609 = vmatprep.subr.bf16.mxu0 %v7608_v35  ;;  %7657 = vmatprep.subr.bf16.mxu1 %v7656_v38  ;;  %v2195_v36 = vld [vmem:[#allocation10 + $0x638] sm:$0xff]  ;;  %v2188_v35 = vld [vmem:[#allocation10 + $0x600] sm:$0xff]  ;;  %v7668_v38 = vpack.c.bf16 %v2193_v10, %v2189_v34  ;;  %v2210_v34 = vld [vmem:[#allocation10 + $0x6b0] sm:$0xff] }
 0x35b   : > { %v7716_v2 = vpack.c.bf16 %v2195_v36, %v2191_v18  ;;  %v7670_v59 = vpack.c.bf16 %v2192_v39, %v2188_v35  ;;  %v2213_v36 = vld [vmem:[#allocation10 + $0x6c8] sm:$0xff]  ;;  %v2219_v35 = vld [vmem:[#allocation10 + $0x6f8] sm:$0xff]  ;;  %v2216_v39 = vld [vmem:[#allocation10 + $0x6e0] sm:$0xff] }
 0x35c   : > { %v2218_v44 = vld [vmem:[#allocation10 + $0x6f0] sm:$0xff] }
 0x35d   : > { %7611 = vmatpush1.bf16.msra.mxu0 %v7610_v53  ;;  %7659 = vmatpush1.bf16.msra.mxu1 %v7658_v54  ;;  %v2199_v53 = vld [vmem:[#allocation10 + $0x658] sm:$0xff] }
 0x35e   : > { %7613 = vmatprep.subr.bf16.mxu0 %v7612_v52  ;;  %7661 = vmatprep.subr.bf16.mxu1 %v7660_v9  ;;  %v2203_v54 = vld [vmem:[#allocation10 + $0x678] sm:$0xff]  ;;  %v2196_v52 = vld [vmem:[#allocation10 + $0x640] sm:$0xff] }
 0x35f   : > { %v2200_v9 = vld [vmem:[#allocation10 + $0x660] sm:$0xff]  ;;  %v7720_v11 = vpack.c.bf16 %v2203_v54, %v2199_v53  ;;  %v2221_v53 = vld [vmem:[#allocation10 + $0x708] sm:$0xff] }
 0x360   : > { %v7674_v13 = vpack.c.bf16 %v2200_v9, %v2196_v52  ;;  %v2225_v54 = vld [vmem:[#allocation10 + $0x728] sm:$0xff]  ;;  %v7730_v9 = vpack.c.bf16 %v2218_v44, %v2214_v43 }
 0x361   : > { %7615 = vmatpush1.bf16.msra.mxu0 %v7614_v15  ;;  %7663 = vmatpush1.bf16.msra.mxu1 %v7662_v16  ;;  %v2209_v15 = vld [vmem:[#allocation10 + $0x6a8] sm:$0xff]  ;;  %v2207_v16 = vld [vmem:[#allocation10 + $0x698] sm:$0xff] }
 0x362   : > { %7617 = vmatprep.subr.bf16.mxu0 %v7616_v24  ;;  %7665 = vmatprep.subr.bf16.mxu1 %v7664_v29  ;;  %v7722_v24 = vpack.c.bf16 %v2202_v4, %v2198_v55  ;;  %v2204_v29 = vld [vmem:[#allocation10 + $0x680] sm:$0xff]  ;;  %v7676_v10 = vpack.c.bf16 %v2209_v15, %v2205_v12  ;;  %v7724_v18 = vpack.c.bf16 %v2211_v19, %v2207_v16  ;;  %v2222_v4 = vld [vmem:[#allocation10 + $0x710] sm:$0xff]  ;;  %v2233_v12 = vld [vmem:[#allocation10 + $0x768] sm:$0xff] }
 0x363   : > { %v2224_v55 = vld [vmem:[#allocation10 + $0x720] sm:$0xff]  ;;  %v2231_v15 = vld [vmem:[#allocation10 + $0x758] sm:$0xff]  ;;  %v2245_v43 = vld [vmem:[#allocation10 + $0x7c8] sm:$0xff] }
 0x364   : > { %v2235_v16 = vld [vmem:[#allocation10 + $0x778] sm:$0xff]  ;;  %v2249_v44 = vld [vmem:[#allocation10 + $0x7e8] sm:$0xff] }
 0x365   : > { %7619 = vmatpush1.bf16.msra.mxu0 %v7618_v37  ;;  %7667 = vmatpush1.bf16.msra.mxu1 %v7666_v20  ;;  %v2217_v37 = vld [vmem:[#allocation10 + $0x6e8] sm:$0xff]  ;;  %v2215_v20 = vld [vmem:[#allocation10 + $0x6d8] sm:$0xff] }
 0x366   : > { %7669 = vmatprep.subr.bf16.mxu0 %v7668_v38  ;;  %7717 = vmatprep.subr.bf16.mxu1 %v7716_v2  ;;  %v7678_v38 = vpack.c.bf16 %v2208_v30, %v2204_v29  ;;  %v7726_v2 = vpack.c.bf16 %v2210_v34, %v2206_v33  ;;  %v7680_v50 = vpack.c.bf16 %v2217_v37, %v2213_v36  ;;  %v2230_v29 = vld [vmem:[#allocation10 + $0x750] sm:$0xff]  ;;  %v2237_v34 = vld [vmem:[#allocation10 + $0x788] sm:$0xff]  ;;  %v2243_v36 = vld [vmem:[#allocation10 + $0x7b8] sm:$0xff] }
 0x367   : > { %v7728_v51 = vpack.c.bf16 %v2219_v35, %v2215_v20  ;;  %v2234_v30 = vld [vmem:[#allocation10 + $0x770] sm:$0xff]  ;;  %v7736_v33 = vpack.c.bf16 %v2235_v16, %v2231_v15  ;;  %v2240_v35 = vld [vmem:[#allocation10 + $0x7a0] sm:$0xff] }
 0x368   : > { %2022 = vmatmul.mubr.f32.vlgmr.msra.gmra.mrb[0].mxu0 %v1424_v45  ;;  %2135 = vmatmul.mubr.f32.vlgmr.msra.gmra.mrb[0].mxu1 %v1424_v45  ;;  %v2226_v45 = vld [vmem:[#allocation10 + $0x730] sm:$0xff]  ;;  %v7738_v20 = vpack.c.bf16 %v2234_v30, %v2230_v29 }
 0x369   : > { %7671 = vmatpush1.bf16.msra.mxu0 %v7670_v59  ;;  %7719 = vmatpush1.bf16.msra.mxu1 %v7718_v61  ;;  %v2223_v59 = vld [vmem:[#allocation10 + $0x718] sm:$0xff]  ;;  %v2258_v30 = vld [vmem:[#allocation10 + $0x830] sm:$0xff] }
 0x36a   : > { %6977 = vmatprep.mubr.msk.f32.mxu0 %vm1294_vm3, %v10633_v42  ;;  %6985 = vmatprep.mubr.msk.f32.mxu1 %vm1294_vm3, %v10633_v42  ;;  %v2212_v42 = vld [vmem:[#allocation10 + $0x6c0] sm:$0xff]  ;;  %v2227_v61 = vld [vmem:[#allocation10 + $0x738] sm:$0xff] }
 0x36b   : > { %7673 = vmatprep.subr.bf16.mxu0 %v7672_v7  ;;  %7721 = vmatprep.subr.bf16.mxu1 %v7720_v11  ;;  %v7682_v52 = vpack.c.bf16 %v2216_v39, %v2212_v42  ;;  %v7732_v7 = vpack.c.bf16 %v2227_v61, %v2223_v59  ;;  %v2229_v11 = vld [vmem:[#allocation10 + $0x748] sm:$0xff]  ;;  %v2244_v59 = vld [vmem:[#allocation10 + $0x7c0] sm:$0xff] }
 0x36c   : > { %2028 = vmatmul.mubr.f32.gmra.mrb[2].mxu0 %v10682_v58  ;;  %2141 = vmatmul.mubr.f32.gmra.mrb[2].mxu1 %v10682_v58  ;;  %v2248_v61 = vld [vmem:[#allocation10 + $0x7e0] sm:$0xff] }
 0x36d   : > { %7675 = vmatpush1.bf16.msra.mxu0 %v7674_v13  ;;  %7723 = vmatpush1.bf16.msra.mxu1 %v7722_v24  ;;  %v7734_v13 = vpack.c.bf16 %v2226_v45, %v2222_v4  ;;  %v2232_v24 = vld [vmem:[#allocation10 + $0x760] sm:$0xff]  ;;  %v2257_v45 = vld [vmem:[#allocation10 + $0x828] sm:$0xff]  ;;  %v7698_v16 = vpack.c.bf16 %v2248_v61, %v2244_v59 }
 0x36e   : > { %6978 = vmatprep.mubr.msk.f32.mxu0 %vm1294_vm3, %v10674_v41  ;;  %6986 = vmatprep.mubr.msk.f32.mxu1 %vm1294_vm3, %v10674_v41  ;;  %v2220_v41 = vld [vmem:[#allocation10 + $0x700] sm:$0xff] }
 0x36f   : > { %7677 = vmatprep.subr.bf16.mxu0 %v7676_v10  ;;  %7725 = vmatprep.subr.bf16.mxu1 %v7724_v18  ;;  %v7686_v19 = vpack.c.bf16 %v2224_v55, %v2220_v41  ;;  %v2241_v10 = vld [vmem:[#allocation10 + $0x7a8] sm:$0xff]  ;;  %v2239_v18 = vld [vmem:[#allocation10 + $0x798] sm:$0xff]  ;;  %v2250_v41 = vld [vmem:[#allocation10 + $0x7f0] sm:$0xff] }
 0x370   : > { %2034 = vmatmul.mubr.f32.gmra.mrb[4].mxu0 %v10676_v47  ;;  %2147 = vmatmul.mubr.f32.gmra.mrb[4].mxu1 %v10676_v47  ;;  %v7684_v47 = vpack.c.bf16 %v2225_v54, %v2221_v53  ;;  %v7692_v42 = vpack.c.bf16 %v2241_v10, %v2237_v34  ;;  %v7740_v39 = vpack.c.bf16 %v2243_v36, %v2239_v18  ;;  %v2253_v55 = vld [vmem:[#allocation10 + $0x808] sm:$0xff]  ;;  %v2263_v34 = vld [vmem:[#allocation10 + $0x858] sm:$0xff] }
 0x371   : > { %7679 = vmatpush1.bf16.msra.mxu0 %v7678_v38  ;;  %7727 = vmatpush1.bf16.msra.mxu1 %v7726_v2  ;;  %v2238_v38 = vld [vmem:[#allocation10 + $0x790] sm:$0xff]  ;;  %v2267_v10 = vld [vmem:[#allocation10 + $0x878] sm:$0xff] }
 0x372   : > { %6979 = vmatprep.mubr.msk.f32.mxu0 %vm1294_vm3, %v10687_v5  ;;  %6987 = vmatprep.mubr.msk.f32.mxu1 %vm1294_vm3, %v10687_v5  ;;  %v2228_v5 = vld [vmem:[#allocation10 + $0x740] sm:$0xff]  ;;  %v2242_v2 = vld [vmem:[#allocation10 + $0x7b0] sm:$0xff] }
 0x373   : > { %7681 = vmatprep.subr.bf16.mxu0 %v7680_v50  ;;  %7729 = vmatprep.subr.bf16.mxu1 %v7728_v51  ;;  %v7690_v37 = vpack.c.bf16 %v2232_v24, %v2228_v5  ;;  %v2247_v50 = vld [vmem:[#allocation10 + $0x7d8] sm:$0xff]  ;;  %v7742_v54 = vpack.c.bf16 %v2242_v2, %v2238_v38  ;;  %v2256_v5 = vld [vmem:[#allocation10 + $0x820] sm:$0xff]  ;;  %v7700_v24 = vpack.c.bf16 %v2257_v45, %v2253_v55  ;;  %v2262_v2 = vld [vmem:[#allocation10 + $0x850] sm:$0xff] }
 0x374   : > { %2040 = vmatmul.mubr.f32.gmra.mrb[6].mxu0 %v10690_v6  ;;  %2153 = vmatmul.mubr.f32.gmra.mrb[6].mxu1 %v10690_v6  ;;  %v7688_v6 = vpack.c.bf16 %v2233_v12, %v2229_v11  ;;  %v2251_v51 = vld [vmem:[#allocation10 + $0x7f8] sm:$0xff]  ;;  %v7752_v38 = vpack.c.bf16 %v2267_v10, %v2263_v34  ;;  %v2281_v55 = vld [vmem:[#allocation10 + $0x8e8] sm:$0xff]  ;;  %v2610_v34 = vld [vmem:[#allocation10 + $0x900] sm:$0xff] }
 0x375   : > { %7683 = vmatpush1.bf16.msra.mxu0 %v7682_v52  ;;  %7731 = vmatpush1.bf16.msra.mxu1 %v7730_v9  ;;  %v2184_v52 = vld [vmem:[#allocation2 + $0x8] sm:$0xfc]  ;;  %v2246_v9 = vld [vmem:[#allocation10 + $0x7d0] sm:$0xff]  ;;  %v7744_v4 = vpack.c.bf16 %v2251_v51, %v2247_v50 }
 0x376   : > { %6980 = vmatprep.mubr.msk.f32.mxu0 %vm1294_vm3, %v10717_v31  ;;  %6988 = vmatprep.mubr.msk.f32.mxu1 %vm1294_vm3, %v10717_v31  ;;  %v2236_v31 = vld [vmem:[#allocation10 + $0x780] sm:$0xff]  ;;  %v2292_v11 = vrot.slane %v2184_v52, 2  ;;  %v10874_v12 = vld [vmem:[#allocation2 + $0x18] sm:$0xff] }
 0x377   : > { %7685 = vmatprep.subr.bf16.mxu0 %v7684_v47  ;;  %7733 = vmatprep.subr.bf16.mxu1 %v7732_v7  ;;  %v7694_v53 = vpack.c.bf16 %v2240_v35, %v2236_v31  ;;  %v2255_v47 = vld [vmem:[#allocation10 + $0x818] sm:$0xff]  ;;  %v2293_v15 = vrot.slane %v10874_v12, 2  ;;  %v2264_v31 = vld [vmem:[#allocation10 + $0x860] sm:$0xff]  ;;  %v2270_v52 = vld [vmem:[#allocation10 + $0x890] sm:$0xff] }
 0x378   : > { %2046 = vmatmul.mubr.f32.gmra.mrb[8].mxu0 %v10710_v17  ;;  %2159 = vmatmul.mubr.f32.gmra.mrb[8].mxu1 %v10710_v17  ;;  %v2259_v7 = vld [vmem:[#allocation10 + $0x838] sm:$0xff]  ;;  %v2614_v10 = vld [vmem:[#allocation10 + $0x920] sm:$0xff] }
 0x379   : > { %7687 = vmatpush1.bf16.msra.mxu0 %v7686_v19  ;;  %7735 = vmatpush1.bf16.msra.mxu1 %v7734_v13  ;;  %v7746_v19 = vpack.c.bf16 %v2250_v41, %v2246_v9  ;;  %v2252_v13 = vld [vmem:[#allocation10 + $0x800] sm:$0xff]  ;;  %v7748_v29 = vpack.c.bf16 %v2259_v7, %v2255_v47  ;;  %v2294_v18 = vsel %vm2288_vm7, %v2292_v11, %v2293_v15  ;;  %v2274_v9 = vld [vmem:[#allocation10 + $0x8b0] sm:$0xff]  ;;  %v2277_v41 = vld [vmem:[#allocation10 + $0x8c8] sm:$0xff] }
 0x37a   : > { %6981 = vmatprep.mubr.msk.f32.mxu0 %vm1294_vm3, %v10750_v60  ;;  %6989 = vmatprep.mubr.msk.f32.mxu1 %vm1294_vm3, %v10750_v60  ;;  %v7702_v36 = vpack.c.bf16 %v2256_v5, %v2252_v13  ;;  %v7758_v47 = vpack.c.bf16 %v2274_v9, %v2270_v52  ;;  %v2276_v7 = vld [vmem:[#allocation10 + $0x8c0] sm:$0xff]  ;;  %v2278_v13 = vld [vmem:[#allocation10 + $0x8d0] sm:$0xff] }
 0x37b   : > { %7689 = vmatprep.subr.bf16.mxu0 %v7688_v6  ;;  %7737 = vmatprep.subr.bf16.mxu1 %v7736_v33  ;;  %v2261_v6 = vld [vmem:[#allocation10 + $0x848] sm:$0xff]  ;;  %v2280_v11 = vld [vmem:[#allocation10 + $0x8e0] sm:$0xff]  ;;  %v2282_v5 = vld [vmem:[#allocation10 + $0x8f0] sm:$0xff] }
 0x37c   : > { %2052 = vmatmul.mubr.f32.gmra.mrb[10].mxu0 %v10752_v63  ;;  %2165 = vmatmul.mubr.f32.gmra.mrb[10].mxu1 %v10752_v63  ;;  %v7696_v63 = vpack.c.bf16 %v2249_v44, %v2245_v43  ;;  %v2265_v33 = vld [vmem:[#allocation10 + $0x868] sm:$0xff]  ;;  %v2271_v44 = vld [vmem:[#allocation10 + $0x898] sm:$0xff] }
 0x37d   : > { %7691 = vmatpush1.bf16.msra.mxu0 %v7690_v37  ;;  %7739 = vmatpush1.bf16.msra.mxu1 %v7738_v20  ;;  %v2260_v20 = vld [vmem:[#allocation10 + $0x840] sm:$0xff]  ;;  %v7704_v35 = vpack.c.bf16 %v2265_v33, %v2261_v6  ;;  %v2273_v43 = vld [vmem:[#allocation10 + $0x8a8] sm:$0xff]  ;;  %v7714_v6 = vpack.c.bf16 %v2280_v11, %v2276_v7  ;;  %v7762_v33 = vpack.c.bf16 %v2282_v5, %v2278_v13  ;;  %v2633_v7 = vld [vmem:[#allocation10 + $0x9b8] sm:$0xff] }
 0x37e   : > { %6982 = vmatprep.mubr.msk.f32.mxu0 %vm1294_vm3, %v10773_v21  ;;  %6990 = vmatprep.mubr.msk.f32.mxu1 %vm1294_vm3, %v10773_v21  ;;  %v7706_v50 = vpack.c.bf16 %v2264_v31, %v2260_v20  ;;  %v2612_v20 = vld [vmem:[#allocation10 + $0x910] sm:$0xff] }
 0x37f   : > { %7693 = vmatprep.subr.bf16.mxu0 %v7692_v42  ;;  %7741 = vmatprep.subr.bf16.mxu1 %v7740_v39  ;;  %v2266_v42 = vld [vmem:[#allocation10 + $0x870] sm:$0xff]  ;;  %v2269_v39 = vld [vmem:[#allocation10 + $0x888] sm:$0xff] }
 0x380   : > { %2058 = vmatmul.mubr.f32.gmra.mrb[12].mxu0 %v10776_v14  ;;  %2171 = vmatmul.mubr.f32.gmra.mrb[12].mxu1 %v10776_v14  ;;  %v2254_v14 = vld [vmem:[#allocation10 + $0x810] sm:$0xff]  ;;  %v7754_v51 = vpack.c.bf16 %v2266_v42, %v2262_v2  ;;  %v7708_v59 = vpack.c.bf16 %v2273_v43, %v2269_v39  ;;  %v2619_v2 = vld [vmem:[#allocation10 + $0x948] sm:$0xff]  ;;  %v2621_v39 = vld [vmem:[#allocation10 + $0x958] sm:$0xff] }
 0x381   : > { %7695 = vmatpush1.bf16.msra.mxu0 %v7694_v53  ;;  %7743 = vmatpush1.bf16.msra.mxu1 %v7742_v54  ;;  %v7750_v37 = vpack.c.bf16 %v2258_v30, %v2254_v14  ;;  %v2268_v53 = vld [vmem:[#allocation10 + $0x880] sm:$0xff]  ;;  %v2613_v14 = vld [vmem:[#allocation10 + $0x918] sm:$0xff]  ;;  %v2616_v31 = vld [vmem:[#allocation10 + $0x930] sm:$0xff] }
 0x382   : > { %6983 = vmatprep.mubr.msk.f32.mxu0 %vm1294_vm3, %v10796_v48  ;;  %6991 = vmatprep.mubr.msk.f32.mxu1 %vm1294_vm3, %v10796_v48  ;;  %v2272_v54 = vld [vmem:[#allocation10 + $0x8a0] sm:$0xff]  ;;  %v2617_v30 = vld [vmem:[#allocation10 + $0x938] sm:$0xff]  ;;  %v2623_v42 = vld [vmem:[#allocation10 + $0x968] sm:$0xff] }
 0x383   : > { %7697 = vmatprep.subr.bf16.mxu0 %v7696_v63  ;;  %7745 = vmatprep.subr.bf16.mxu1 %v7744_v4  ;;  %v2279_v63 = vld [vmem:[#allocation10 + $0x8d8] sm:$0xff]  ;;  %v7710_v45 = vpack.c.bf16 %v2272_v54, %v2268_v53  ;;  %v2622_v54 = vld [vmem:[#allocation10 + $0x960] sm:$0xff]  ;;  %v7768_v9 = vpack.c.bf16 %v2623_v42, %v2619_v2  ;;  %v2632_v13 = vld [vmem:[#allocation10 + $0x9b0] sm:$0xff] }
 0x384   : > { %2064 = vmatmul.mubr.f32.gmra.mrb[14].mxu0 %v10803_v56  ;;  %2177 = vmatmul.mubr.f32.gmra.mrb[14].mxu1 %v10803_v56  ;;  %v2275_v56 = vld [vmem:[#allocation10 + $0x8b8] sm:$0xff] }
 0x385   : > { %7699 = vmatpush1.bf16.msra.mxu0 %v7698_v16  ;;  %7747 = vmatpush1.bf16.msra.mxu1 %v7746_v19  ;;  %v7756_v61 = vpack.c.bf16 %v2275_v56, %v2271_v44  ;;  %v2283_v4 = vld [vmem:[#allocation10 + $0x8f8] sm:$0xff]  ;;  %v7712_v16 = vpack.c.bf16 %v2281_v55, %v2277_v41  ;;  %v7766_v56 = vpack.c.bf16 %v2614_v10, %v2610_v34 }
 0x386   : > { %7701 = vmatprep.subr.bf16.mxu0 %v7700_v24  ;;  %7749 = vmatprep.subr.bf16.mxu1 %v7748_v29  ;;  %v7760_v19 = vpack.c.bf16 %v2283_v4, %v2279_v63  ;;  %v2611_v24 = vld [vmem:[#allocation10 + $0x908] sm:$0xff]  ;;  %v2625_v43 = vld [vmem:[#allocation10 + $0x978] sm:$0xff] }
 0x387   : > { %6992 = vmatprep.mubr.msk.f32.mxu0 %vm1294_vm3, %v2294_v18  ;;  %7000 = vmatprep.mubr.msk.f32.mxu1 %vm1294_vm3, %v2294_v18  ;;  %v2615_v29 = vld [vmem:[#allocation10 + $0x928] sm:$0xff]  ;;  %v2183_v18 = vld [vmem:[#allocation2] sm:$0xfc]  ;;  %v7816_v41 = vpack.c.bf16 %v2625_v43, %v2621_v39  ;;  %v10897_v55 = vld [vmem:[#allocation2 + $0x38] sm:$0xff]  ;;  %v2309_v39 = vrot.slane %v10750_v60, 2 }
 0x388   : > { %v2289_v44 = vrot.slane %v2183_v18, 2  ;;  %v2301_v63 = vrot.slane %v10897_v55, 2  ;;  %v2627_v4 = vld [vmem:[#allocation10 + $0x988] sm:$0xff]  ;;  %v2637_v34 = vld [vmem:[#allocation10 + $0x9d8] sm:$0xff]  ;;  %v2648_v60 = vld [vmem:[#allocation10 + $0xa30] sm:$0xff] }
 0x389   : > { %7703 = vmatpush1.bf16.msra.mxu0 %v7702_v36  ;;  %7751 = vmatpush1.bf16.msra.mxu1 %v7750_v37  ;;  %v7764_v36 = vpack.c.bf16 %v2615_v29, %v2611_v24  ;;  %v7812_v37 = vpack.c.bf16 %v2617_v30, %v2613_v14  ;;  %v10903_v14 = vld [vmem:[#allocation2 + $0x48] sm:$0xff]  ;;  %v2641_v10 = vld [vmem:[#allocation10 + $0x9f8] sm:$0xff] }
 0x38a   : > { %7705 = vmatprep.subr.bf16.mxu0 %v7704_v35  ;;  %7753 = vmatprep.subr.bf16.mxu1 %v7752_v38  ;;  %v10888_v35 = vld [vmem:[#allocation2 + $0x28] sm:$0xff]  ;;  %v2291_v52 = vsel %vm2288_vm7, %v2289_v44, %v2290_v8  ;;  %v2305_v30 = vrot.slane %v10903_v14, 2  ;;  %v7824_v42 = vpack.c.bf16 %v2641_v10, %v2637_v34 }
 0x38b   : > { %v2297_v38 = vrot.slane %v10888_v35, 2  ;;  %v2630_v8 = vld [vmem:[#allocation10 + $0x9a0] sm:$0xff]  ;;  %v2643_v43 = vld [vmem:[#allocation10 + $0xa08] sm:$0xff] }
 0x38c   : > { %v2306_v2 = vsel %vm2288_vm7, %v2301_v63, %v2305_v30  ;;  %v2647_v44 = vld [vmem:[#allocation10 + $0xa28] sm:$0xff] }
 0x38d   : > { %7707 = vmatpush1.bf16.msra.mxu0 %v7706_v50  ;;  %7755 = vmatpush1.bf16.msra.mxu1 %v7754_v51  ;;  %v7814_v50 = vpack.c.bf16 %v2616_v31, %v2612_v20  ;;  %v2618_v51 = vld [vmem:[#allocation10 + $0x940] sm:$0xff]  ;;  %v2298_v53 = vsel %vm2288_vm7, %v2293_v15, %v2297_v38  ;;  %v2302_v5 = vsel %vm2288_vm7, %v2297_v38, %v2301_v63  ;;  %v2636_v31 = vld [vmem:[#allocation10 + $0x9d0] sm:$0xff]  ;;  %v2659_v34 = vld [vmem:[#allocation10 + $0xa88] sm:$0xff] }
 0x38e   : > { %7709 = vmatprep.subr.bf16.mxu0 %v7708_v59  ;;  %7757 = vmatprep.subr.bf16.mxu1 %v7756_v61  ;;  %v2620_v59 = vld [vmem:[#allocation10 + $0x950] sm:$0xff]  ;;  %v7770_v15 = vpack.c.bf16 %v2622_v54, %v2618_v51  ;;  %v2638_v20 = vld [vmem:[#allocation10 + $0x9e0] sm:$0xff]  ;;  %v7780_v63 = vpack.c.bf16 %v2647_v44, %v2643_v43  ;;  %v2663_v10 = vld [vmem:[#allocation10 + $0xaa8] sm:$0xff] }
 0x38f   : > { %v2624_v61 = vld [vmem:[#allocation10 + $0x970] sm:$0xff]  ;;  %v2642_v54 = vld [vmem:[#allocation10 + $0xa00] sm:$0xff] }
 0x390   : > { %v7818_v11 = vpack.c.bf16 %v2624_v61, %v2620_v59  ;;  %v2640_v38 = vld [vmem:[#allocation10 + $0x9f0] sm:$0xff]  ;;  %v2646_v59 = vld [vmem:[#allocation10 + $0xa20] sm:$0xff] }
 0x391   : > { %7711 = vmatpush1.bf16.msra.mxu0 %v7710_v45  ;;  %7759 = vmatpush1.bf16.msra.mxu1 %v7758_v47  ;;  %v2631_v45 = vld [vmem:[#allocation10 + $0x9a8] sm:$0xff]  ;;  %v2629_v47 = vld [vmem:[#allocation10 + $0x998] sm:$0xff]  ;;  %v2644_v61 = vld [vmem:[#allocation10 + $0xa10] sm:$0xff] }
 0x392   : > { %7713 = vmatprep.subr.bf16.mxu0 %v7712_v16  ;;  %7761 = vmatprep.subr.bf16.mxu1 %v7760_v19  ;;  %v2626_v16 = vld [vmem:[#allocation10 + $0x980] sm:$0xff]  ;;  %v2628_v19 = vld [vmem:[#allocation10 + $0x990] sm:$0xff]  ;;  %v7772_v24 = vpack.c.bf16 %v2631_v45, %v2627_v4  ;;  %v7820_v29 = vpack.c.bf16 %v2633_v7, %v2629_v47  ;;  %v2651_v45 = vld [vmem:[#allocation10 + $0xa48] sm:$0xff] }
 0x393   : > { %v7774_v18 = vpack.c.bf16 %v2630_v8, %v2626_v16  ;;  %v2655_v47 = vld [vmem:[#allocation10 + $0xa68] sm:$0xff]  ;;  %v2653_v7 = vld [vmem:[#allocation10 + $0xa58] sm:$0xff]  ;;  %v2650_v16 = vld [vmem:[#allocation10 + $0xa40] sm:$0xff] }
 0x394   : > { %v10937_v43 = vld [vmem:[#allocation2 + $0x70] sm:$0xff] }
 0x395   : > { %7715 = vmatpush1.bf16.msra.mxu0 %v7714_v6  ;;  %7763 = vmatpush1.bf16.msra.mxu1 %v7762_v33  ;;  %v2635_v6 = vld [vmem:[#allocation10 + $0x9c8] sm:$0xff]  ;;  %v2315_v44 = vrot.slane %v10937_v43, 2 }
 0x396   : > { %7765 = vmatprep.subr.bf16.mxu0 %v7764_v36  ;;  %7813 = vmatprep.subr.bf16.mxu1 %v7812_v37  ;;  %v2639_v33 = vld [vmem:[#allocation10 + $0x9e8] sm:$0xff]  ;;  %v7822_v36 = vpack.c.bf16 %v2632_v13, %v2628_v19  ;;  %v2634_v37 = vld [vmem:[#allocation10 + $0x9c0] sm:$0xff]  ;;  %v2652_v13 = vld [vmem:[#allocation10 + $0xa50] sm:$0xff] }
 0x397   : > { %v7778_v51 = vpack.c.bf16 %v2638_v20, %v2634_v37  ;;  %v2654_v19 = vld [vmem:[#allocation10 + $0xa60] sm:$0xff] }
 0x398   : > { %2412 = vmatmul.mubr.f32.vlgmr.msra.gmra.mrb[0].mxu0 %v2291_v52  ;;  %2525 = vmatmul.mubr.f32.vlgmr.msra.gmra.mrb[0].mxu1 %v2291_v52  ;;  %v2313_v52 = vrot.slane %v10773_v21, 2  ;;  %v7782_v21 = vpack.c.bf16 %v2646_v59, %v2642_v54  ;;  %v2186_v37 = vld [vmem:[#allocation2 + $0x88] sm:$0x3]  ;;  %v2185_v54 = vld [vmem:[#allocation2 + $0x80] sm:$0x3] }
 0x399   : > { %7767 = vmatpush1.bf16.msra.mxu0 %v7766_v56  ;;  %7815 = vmatpush1.bf16.msra.mxu1 %v7814_v50  ;;  %v2645_v56 = vld [vmem:[#allocation10 + $0xa18] sm:$0xff] }
 0x39a   : > { %6993 = vmatprep.mubr.msk.f32.mxu0 %vm1294_vm3, %v2298_v53  ;;  %7001 = vmatprep.mubr.msk.f32.mxu1 %vm1294_vm3, %v2298_v53  ;;  %v2649_v50 = vld [vmem:[#allocation10 + $0xa38] sm:$0xff]  ;;  %v7826_v53 = vpack.c.bf16 %v2640_v38, %v2636_v31  ;;  %v2314_v8 = vsel %vm2288_vm7, %v2309_v39, %v2313_v52  ;;  %v7788_v38 = vpack.c.bf16 %v2663_v10, %v2659_v34  ;;  %v2674_v34 = vld [vmem:[#allocation10 + $0xb00] sm:$0xff] }
 0x39b   : > { %7769 = vmatprep.subr.bf16.mxu0 %v7768_v9  ;;  %7817 = vmatprep.subr.bf16.mxu1 %v7816_v41  ;;  %v10918_v9 = vld [vmem:[#allocation2 + $0x50] sm:$0xff]  ;;  %v7828_v4 = vpack.c.bf16 %v2649_v50, %v2645_v56  ;;  %v2321_v50 = vrot.slane %v2186_v37, 2  ;;  %v2669_v59 = vld [vmem:[#allocation10 + $0xad8] sm:$0xff] }
 0x39c   : > { %2418 = vmatmul.mubr.f32.gmra.mrb[2].mxu0 %v10705_v46  ;;  %2531 = vmatmul.mubr.f32.gmra.mrb[2].mxu1 %v10705_v46  ;;  %v7776_v46 = vpack.c.bf16 %v2639_v33, %v2635_v6  ;;  %v2307_v41 = vrot.slane %v10918_v9, 2  ;;  %v7784_v6 = vpack.c.bf16 %v2655_v47, %v2651_v45  ;;  %v2668_v45 = vld [vmem:[#allocation10 + $0xad0] sm:$0xff]  ;;  %v2683_v37 = vld [vmem:[#allocation10 + $0xb48] sm:$0xff] }
 0x39d   : > { %7771 = vmatpush1.bf16.msra.mxu0 %v7770_v15  ;;  %7819 = vmatpush1.bf16.msra.mxu1 %v7818_v11  ;;  %v2657_v15 = vld [vmem:[#allocation10 + $0xa78] sm:$0xff]  ;;  %v7830_v11 = vpack.c.bf16 %v2648_v60, %v2644_v61  ;;  %v2672_v47 = vld [vmem:[#allocation10 + $0xaf0] sm:$0xff] }
 0x39e   : > { %6994 = vmatprep.mubr.msk.f32.mxu0 %vm1294_vm3, %v2302_v5  ;;  %7002 = vmatprep.mubr.msk.f32.mxu1 %vm1294_vm3, %v2302_v5  ;;  %v2656_v5 = vld [vmem:[#allocation10 + $0xa70] sm:$0xff]  ;;  %v7832_v33 = vpack.c.bf16 %v2657_v15, %v2653_v7  ;;  %v2673_v61 = vld [vmem:[#allocation10 + $0xaf8] sm:$0xff]  ;;  %v2675_v7 = vld [vmem:[#allocation10 + $0xb08] sm:$0xff] }
 0x39f   : > { %7773 = vmatprep.subr.bf16.mxu0 %v7772_v24  ;;  %7821 = vmatprep.subr.bf16.mxu1 %v7820_v29  ;;  %v2317_v24 = vrot.slane %v10796_v48, 2  ;;  %v10930_v29 = vld [vmem:[#allocation2 + $0x60] sm:$0xff]  ;;  %v7786_v48 = vpack.c.bf16 %v2654_v19, %v2650_v16  ;;  %v7834_v20 = vpack.c.bf16 %v2656_v5, %v2652_v13  ;;  %v7840_v16 = vpack.c.bf16 %v2673_v61, %v2669_v59 }
 0x3a0   : > { %2424 = vmatmul.mubr.f32.gmra.mrb[4].mxu0 %v10713_v25  ;;  %2537 = vmatmul.mubr.f32.gmra.mrb[4].mxu1 %v10713_v25  ;;  %v2310_v25 = vsel %vm2288_vm7, %v2305_v30, %v2309_v39  ;;  %v2311_v30 = vrot.slane %v10930_v29, 2  ;;  %v2677_v19 = vld [vmem:[#allocation10 + $0xb18] sm:$0xff] }
 0x3a1   : > { %7775 = vmatpush1.bf16.msra.mxu0 %v7774_v18  ;;  %7823 = vmatpush1.bf16.msra.mxu1 %v7822_v36  ;;  %v2661_v18 = vld [vmem:[#allocation10 + $0xa98] sm:$0xff]  ;;  %v2318_v31 = vsel %vm2288_vm7, %v2313_v52, %v2317_v24 }
 0x3a2   : > { %6995 = vmatprep.mubr.msk.f32.mxu0 %vm1294_vm3, %v2306_v2  ;;  %7003 = vmatprep.mubr.msk.f32.mxu1 %vm1294_vm3, %v2306_v2  ;;  %v2665_v36 = vld [vmem:[#allocation10 + $0xab8] sm:$0xff]  ;;  %v2662_v2 = vld [vmem:[#allocation10 + $0xaa0] sm:$0xff]  ;;  %v2312_v39 = vsel %vm2288_vm7, %v2307_v41, %v2311_v30  ;;  %v2316_v15 = vsel %vm2288_vm7, %v2311_v30, %v2315_v44 }
 0x3a3   : > { %7777 = vmatprep.subr.bf16.mxu0 %v7776_v46  ;;  %7825 = vmatprep.subr.bf16.mxu1 %v7824_v42  ;;  %v2660_v46 = vld [vmem:[#allocation10 + $0xa90] sm:$0xff]  ;;  %v7836_v56 = vpack.c.bf16 %v2665_v36, %v2661_v18  ;;  %v2681_v13 = vld [vmem:[#allocation10 + $0xb38] sm:$0xff]  ;;  %v2678_v30 = vld [vmem:[#allocation10 + $0xb20] sm:$0xff] }
 0x3a4   : > { %2430 = vmatmul.mubr.f32.gmra.mrb[6].mxu0 %v10729_v40  ;;  %2543 = vmatmul.mubr.f32.gmra.mrb[6].mxu1 %v10729_v40  ;;  %v2308_v40 = vsel %vm2288_vm7, %v2303_v32, %v2307_v41  ;;  %v2658_v32 = vld [vmem:[#allocation10 + $0xa80] sm:$0xff]  ;;  %v2664_v42 = vld [vmem:[#allocation10 + $0xab0] sm:$0xff]  ;;  %v7844_v10 = vpack.c.bf16 %v2681_v13, %v2677_v19  ;;  %v2693_v59 = vld [vmem:[#allocation10 + $0xb98] sm:$0xff] }
 0x3a5   : > { %7779 = vmatpush1.bf16.msra.mxu0 %v7778_v51  ;;  %7827 = vmatpush1.bf16.msra.mxu1 %v7826_v53  ;;  %v2667_v51 = vld [vmem:[#allocation10 + $0xac8] sm:$0xff]  ;;  %v7790_v60 = vpack.c.bf16 %v2662_v2, %v2658_v32  ;;  %v7838_v52 = vpack.c.bf16 %v2664_v42, %v2660_v46  ;;  %v2670_v41 = vld [vmem:[#allocation10 + $0xae0] sm:$0xff]  ;;  %v2676_v18 = vld [vmem:[#allocation10 + $0xb10] sm:$0xff]  ;;  %v7798_v2 = vpack.c.bf16 %v2678_v30, %v2674_v34 }
 0x3a6   : > { %6996 = vmatprep.mubr.msk.f32.mxu0 %vm1294_vm3, %v2310_v25  ;;  %7004 = vmatprep.mubr.msk.f32.mxu1 %vm1294_vm3, %v2310_v25  ;;  %v2671_v53 = vld [vmem:[#allocation10 + $0xae8] sm:$0xff]  ;;  %v2666_v25 = vld [vmem:[#allocation10 + $0xac0] sm:$0xff]  ;;  %v2680_v36 = vld [vmem:[#allocation10 + $0xb30] sm:$0xff] }
 0x3a7   : > { %7781 = vmatprep.subr.bf16.mxu0 %v7780_v63  ;;  %7829 = vmatprep.subr.bf16.mxu1 %v7828_v4  ;;  %v2606_v63 = vld [vmem:[#allocation2 + $0x8] sm:$0xf8]  ;;  %v7792_v4 = vpack.c.bf16 %v2671_v53, %v2667_v51  ;;  %v2685_v32 = vld [vmem:[#allocation10 + $0xb58] sm:$0xff]  ;;  %v7846_v46 = vpack.c.bf16 %v2680_v36, %v2676_v18  ;;  %v2682_v42 = vld [vmem:[#allocation10 + $0xb40] sm:$0xff] }
 0x3a8   : > { %2436 = vmatmul.mubr.f32.gmra.mrb[8].mxu0 %v2308_v40  ;;  %2549 = vmatmul.mubr.f32.gmra.mrb[8].mxu1 %v2308_v40  ;;  %v2714_v5 = vrot.slane %v2606_v63, 3  ;;  %v2715_v40 = vrot.slane %v10874_v12, 3  ;;  %v2688_v51 = vld [vmem:[#allocation10 + $0xb70] sm:$0xff]  ;;  %v2691_v53 = vld [vmem:[#allocation10 + $0xb88] sm:$0xff]  ;;  %v2697_v61 = vld [vmem:[#allocation10 + $0xbb8] sm:$0xff] }
 0x3a9   : > { %7783 = vmatpush1.bf16.msra.mxu0 %v7782_v21  ;;  %7831 = vmatpush1.bf16.msra.mxu1 %v7830_v11  ;;  %v2322_v21 = vsel %vm2288_vm7, %v2317_v24, %v2321_v50  ;;  %v2319_v11 = vrot.slane %v2185_v54, 2  ;;  %v2684_v50 = vld [vmem:[#allocation10 + $0xb50] sm:$0xff]  ;;  %v2695_v54 = vld [vmem:[#allocation10 + $0xba8] sm:$0xff]  ;;  %v2698_v19 = vld [vmem:[#allocation10 + $0xbc0] sm:$0xff] }
 0x3aa   : > { %6997 = vmatprep.mubr.msk.f32.mxu0 %vm1294_vm3, %v2314_v8  ;;  %7005 = vmatprep.mubr.msk.f32.mxu1 %vm1294_vm3, %v2314_v8  ;;  %v2679_v8 = vld [vmem:[#allocation10 + $0xb28] sm:$0xff]  ;;  %v7804_v63 = vpack.c.bf16 %v2695_v54, %v2691_v53  ;;  %v2702_v13 = vld [vmem:[#allocation10 + $0xbe0] sm:$0xff]  ;;  %v2704_v34 = vld [vmem:[#allocation10 + $0xbf0] sm:$0xff] }
 0x3ab   : > { %7785 = vmatprep.subr.bf16.mxu0 %v7784_v6  ;;  %7833 = vmatprep.subr.bf16.mxu1 %v7832_v33  ;;  %v7794_v6 = vpack.c.bf16 %v2670_v41, %v2666_v25  ;;  %v7842_v33 = vpack.c.bf16 %v2672_v47, %v2668_v45  ;;  %v7796_v24 = vpack.c.bf16 %v2679_v8, %v2675_v7  ;;  %v2690_v25 = vld [vmem:[#allocation10 + $0xb80] sm:$0xff]  ;;  %v2692_v45 = vld [vmem:[#allocation10 + $0xb90] sm:$0xff]  ;;  %v2699_v7 = vld [vmem:[#allocation10 + $0xbc8] sm:$0xff] }
 0x3ac   : > { %2442 = vmatmul.mubr.f32.gmra.mrb[10].mxu0 %v2312_v39  ;;  %2555 = vmatmul.mubr.f32.gmra.mrb[10].mxu1 %v2312_v39  ;;  %v2686_v39 = vld [vmem:[#allocation10 + $0xb60] sm:$0xff]  ;;  %v2696_v47 = vld [vmem:[#allocation10 + $0xbb0] sm:$0xff]  ;;  %v3033_v30 = vld [vmem:[#allocation10 + $0xc08] sm:$0xff]  ;;  %v7810_v36 = vpack.c.bf16 %v2702_v13, %v2698_v19 }
 0x3ad   : > { %7787 = vmatpush1.bf16.msra.mxu0 %v7786_v48  ;;  %7835 = vmatpush1.bf16.msra.mxu1 %v7834_v20  ;;  %v2320_v48 = vsel %vm2288_vm7, %v2315_v44, %v2319_v11  ;;  %v2687_v20 = vld [vmem:[#allocation10 + $0xb68] sm:$0xff]  ;;  %v2694_v41 = vld [vmem:[#allocation10 + $0xba0] sm:$0xff]  ;;  %v2705_v11 = vld [vmem:[#allocation10 + $0xbf8] sm:$0xff]  ;;  %v7854_v8 = vpack.c.bf16 %v2696_v47, %v2692_v45  ;;  %v2723_v45 = vrot.slane %v10897_v55, 3 }
 0x3ae   : > { %6998 = vmatprep.mubr.msk.f32.mxu0 %vm1294_vm3, %v2318_v31  ;;  %7006 = vmatprep.mubr.msk.f32.mxu1 %vm1294_vm3, %v2318_v31  ;;  %v2689_v31 = vld [vmem:[#allocation10 + $0xb78] sm:$0xff]  ;;  %v7800_v44 = vpack.c.bf16 %v2687_v20, %v2683_v37  ;;  %v3032_v20 = vld [vmem:[#allocation10 + $0xc00] sm:$0xff]  ;;  %v3049_v47 = vld [vmem:[#allocation10 + $0xc88] sm:$0xff] }
 0x3af   : > { %7789 = vmatprep.subr.bf16.mxu0 %v7788_v38  ;;  %7837 = vmatprep.subr.bf16.mxu1 %v7836_v56  ;;  %v2716_v38 = vsel %vm2710_vm9, %v2714_v5, %v2715_v40  ;;  %v7848_v56 = vpack.c.bf16 %v2689_v31, %v2685_v32  ;;  %v3039_v18 = vld [vmem:[#allocation10 + $0xc38] sm:$0xff]  ;;  %v3054_v19 = vld [vmem:[#allocation10 + $0xcb0] sm:$0xff] }
 0x3b0   : > { %2448 = vmatmul.mubr.f32.gmra.mrb[12].mxu0 %v2316_v15  ;;  %2561 = vmatmul.mubr.f32.gmra.mrb[12].mxu1 %v2316_v15  ;;  %v2703_v15 = vld [vmem:[#allocation10 + $0xbe8] sm:$0xff] }
 0x3b1   : > { %7791 = vmatpush1.bf16.msra.mxu0 %v7790_v60  ;;  %7839 = vmatpush1.bf16.msra.mxu1 %v7838_v52  ;;  %v7802_v60 = vpack.c.bf16 %v2686_v39, %v2682_v42  ;;  %v7850_v52 = vpack.c.bf16 %v2688_v51, %v2684_v50  ;;  %v7808_v5 = vpack.c.bf16 %v2703_v15, %v2699_v7  ;;  %v2719_v42 = vrot.slane %v10888_v35, 3  ;;  %v3041_v39 = vld [vmem:[#allocation10 + $0xc48] sm:$0xff]  ;;  %v3043_v50 = vld [vmem:[#allocation10 + $0xc58] sm:$0xff] }
 0x3b2   : > { %6999 = vmatprep.mubr.msk.f32.mxu0 %vm1294_vm3, %v2322_v21  ;;  %7007 = vmatprep.mubr.msk.f32.mxu1 %vm1294_vm3, %v2322_v21  ;;  %v2701_v21 = vld [vmem:[#allocation10 + $0xbd8] sm:$0xff]  ;;  %v3053_v7 = vld [vmem:[#allocation10 + $0xca8] sm:$0xff] }
 0x3b3   : > { %7793 = vmatprep.subr.bf16.mxu0 %v7792_v4  ;;  %7841 = vmatprep.subr.bf16.mxu1 %v7840_v16  ;;  %v7852_v4 = vpack.c.bf16 %v2697_v61, %v2693_v59  ;;  %v7806_v16 = vpack.c.bf16 %v2694_v41, %v2690_v25  ;;  %v3047_v51 = vld [vmem:[#allocation10 + $0xc78] sm:$0xff]  ;;  %v3040_v59 = vld [vmem:[#allocation10 + $0xc40] sm:$0xff]  ;;  %v3046_v25 = vld [vmem:[#allocation10 + $0xc70] sm:$0xff]  ;;  %v2720_v41 = vsel %vm2710_vm9, %v2715_v40, %v2719_v42 }
 0x3b4   : > { %2454 = vmatmul.mubr.f32.gmra.mrb[14].mxu0 %v2320_v48  ;;  %2567 = vmatmul.mubr.f32.gmra.mrb[14].mxu1 %v2320_v48  ;;  %v2605_v48 = vld [vmem:[#allocation2] sm:$0xf8]  ;;  %v3051_v15 = vld [vmem:[#allocation10 + $0xc98] sm:$0xff]  ;;  %v2724_v13 = vsel %vm2710_vm9, %v2719_v42, %v2723_v45  ;;  %v3065_v42 = vld [vmem:[#allocation10 + $0xd08] sm:$0xff] }
 0x3b5   : > { %7795 = vmatpush1.bf16.msra.mxu0 %v7794_v6  ;;  %7843 = vmatpush1.bf16.msra.mxu1 %v7842_v33  ;;  %v7856_v6 = vpack.c.bf16 %v2705_v11, %v2701_v21  ;;  %v2700_v33 = vld [vmem:[#allocation10 + $0xbd0] sm:$0xff]  ;;  %v3055_v21 = vld [vmem:[#allocation10 + $0xcb8] sm:$0xff]  ;;  %v3052_v40 = vld [vmem:[#allocation10 + $0xca0] sm:$0xff] }
 0x3b6   : > { %7797 = vmatprep.subr.bf16.mxu0 %v7796_v24  ;;  %7845 = vmatprep.subr.bf16.mxu1 %v7844_v10  ;;  %v3037_v24 = vld [vmem:[#allocation10 + $0xc28] sm:$0xff]  ;;  %v3035_v10 = vld [vmem:[#allocation10 + $0xc18] sm:$0xff]  ;;  %v7858_v37 = vpack.c.bf16 %v2704_v34, %v2700_v33  ;;  %v2727_v33 = vrot.slane %v10903_v14, 3 }
 0x3b7   : > { %7008 = vmatprep.mubr.msk.f32.mxu0 %vm1294_vm3, %v2716_v38  ;;  %7016 = vmatprep.mubr.msk.f32.mxu1 %vm1294_vm3, %v2716_v38  ;;  %v7860_v32 = vpack.c.bf16 %v3037_v24, %v3033_v30  ;;  %v7908_v31 = vpack.c.bf16 %v3039_v18, %v3035_v10  ;;  %v3036_v38 = vld [vmem:[#allocation10 + $0xc20] sm:$0xff]  ;;  %v3057_v34 = vld [vmem:[#allocation10 + $0xcc8] sm:$0xff]  ;;  %v3059_v24 = vld [vmem:[#allocation10 + $0xcd8] sm:$0xff] }
 0x3b8   : > { %v7862_v53 = vpack.c.bf16 %v3036_v38, %v3032_v20  ;;  %v3061_v30 = vld [vmem:[#allocation10 + $0xce8] sm:$0xff]  ;;  %v3063_v10 = vld [vmem:[#allocation10 + $0xcf8] sm:$0xff]  ;;  %v3058_v20 = vld [vmem:[#allocation10 + $0xcd0] sm:$0xff] }
 0x3b9   : > { %7799 = vmatpush1.bf16.msra.mxu0 %v7798_v2  ;;  %7847 = vmatpush1.bf16.msra.mxu1 %v7846_v46  ;;  %v3034_v2 = vld [vmem:[#allocation10 + $0xc10] sm:$0xff]  ;;  %v7920_v38 = vpack.c.bf16 %v3063_v10, %v3059_v24  ;;  %v3087_v24 = vld [vmem:[#allocation10 + $0xdb8] sm:$0xff]  ;;  %v2608_v10 = vld [vmem:[#allocation2 + $0x88] sm:$0x7] }
 0x3ba   : > { %7801 = vmatprep.subr.bf16.mxu0 %v7800_v44  ;;  %7849 = vmatprep.subr.bf16.mxu1 %v7848_v56  ;;  %v3038_v46 = vld [vmem:[#allocation10 + $0xc30] sm:$0xff]  ;;  %v2711_v44 = vrot.slane %v2605_v48, 3  ;;  %v3045_v56 = vld [vmem:[#allocation10 + $0xc68] sm:$0xff]  ;;  %v3060_v48 = vld [vmem:[#allocation10 + $0xce0] sm:$0xff] }
 0x3bb   : > { %v7910_v54 = vpack.c.bf16 %v3038_v46, %v3034_v2  ;;  %v10970_v2 = vld [vmem:[#allocation2 + $0x58] sm:$0xff] }
 0x3bc   : > { %v2713_v61 = vsel %vm2710_vm9, %v2711_v44, %v2712_v0  ;;  %v2731_v46 = vrot.slane %v10970_v2, 3  ;;  %v3067_v44 = vld [vmem:[#allocation10 + $0xd18] sm:$0xff] }
 0x3bd   : > { %7803 = vmatpush1.bf16.msra.mxu0 %v7802_v60  ;;  %7851 = vmatpush1.bf16.msra.mxu1 %v7850_v52  ;;  %v3044_v60 = vld [vmem:[#allocation10 + $0xc60] sm:$0xff]  ;;  %v3042_v52 = vld [vmem:[#allocation10 + $0xc50] sm:$0xff] }
 0x3be   : > { %7805 = vmatprep.subr.bf16.mxu0 %v7804_v63  ;;  %7853 = vmatprep.subr.bf16.mxu1 %v7852_v4  ;;  %v7864_v63 = vpack.c.bf16 %v3045_v56, %v3041_v39  ;;  %v7912_v4 = vpack.c.bf16 %v3047_v51, %v3043_v50  ;;  %v7866_v0 = vpack.c.bf16 %v3044_v60, %v3040_v59  ;;  %v3069_v39 = vld [vmem:[#allocation10 + $0xd28] sm:$0xff]  ;;  %v3071_v56 = vld [vmem:[#allocation10 + $0xd38] sm:$0xff]  ;;  %v3068_v59 = vld [vmem:[#allocation10 + $0xd20] sm:$0xff] }
 0x3bf   : > { %v7914_v11 = vpack.c.bf16 %v3046_v25, %v3042_v52  ;;  %v3070_v60 = vld [vmem:[#allocation10 + $0xd30] sm:$0xff]  ;;  %v7876_v52 = vpack.c.bf16 %v3069_v39, %v3065_v42  ;;  %v7924_v25 = vpack.c.bf16 %v3071_v56, %v3067_v44  ;;  %v2743_v39 = vrot.slane %v2608_v10, 3  ;;  %v2607_v44 = vld [vmem:[#allocation2 + $0x80] sm:$0x7]  ;;  %v3089_v56 = vld [vmem:[#allocation10 + $0xdc8] sm:$0xff] }
 0x3c0   : > { %v3109_v10 = vld [vmem:[#allocation10 + $0xe68] sm:$0xff] }
 0x3c1   : > { %7807 = vmatpush1.bf16.msra.mxu0 %v7806_v16  ;;  %7855 = vmatpush1.bf16.msra.mxu1 %v7854_v8  ;;  %v3048_v16 = vld [vmem:[#allocation10 + $0xc80] sm:$0xff]  ;;  %v3050_v8 = vld [vmem:[#allocation10 + $0xc90] sm:$0xff] }
 0x3c2   : > { %7809 = vmatprep.subr.bf16.mxu0 %v7808_v5  ;;  %7857 = vmatprep.subr.bf16.mxu1 %v7856_v6  ;;  %v7868_v5 = vpack.c.bf16 %v3053_v7, %v3049_v47  ;;  %v7916_v6 = vpack.c.bf16 %v3055_v21, %v3051_v15  ;;  %v7870_v18 = vpack.c.bf16 %v3052_v40, %v3048_v16  ;;  %v3075_v47 = vld [vmem:[#allocation10 + $0xd58] sm:$0xff]  ;;  %v2733_v16 = vrot.slane %v10930_v29, 3  ;;  %v3076_v40 = vld [vmem:[#allocation10 + $0xd60] sm:$0xff] }
 0x3c3   : > { %v3079_v7 = vld [vmem:[#allocation10 + $0xd78] sm:$0xff] }
 0x3c5   : > { %7811 = vmatpush1.bf16.msra.mxu0 %v7810_v36  ;;  %7859 = vmatpush1.bf16.msra.mxu1 %v7858_v37  ;;  %v7918_v36 = vpack.c.bf16 %v3054_v19, %v3050_v8  ;;  %v3056_v37 = vld [vmem:[#allocation10 + $0xcc0] sm:$0xff]  ;;  %v3078_v8 = vld [vmem:[#allocation10 + $0xd70] sm:$0xff] }
 0x3c6   : > { %7861 = vmatprep.subr.bf16.mxu0 %v7860_v32  ;;  %7909 = vmatprep.subr.bf16.mxu1 %v7908_v31  ;;  %v3062_v32 = vld [vmem:[#allocation10 + $0xcf0] sm:$0xff]  ;;  %v2728_v31 = vsel %vm2710_vm9, %v2723_v45, %v2727_v33  ;;  %v7874_v50 = vpack.c.bf16 %v3060_v48, %v3056_v37  ;;  %v3077_v45 = vld [vmem:[#allocation10 + $0xd68] sm:$0xff]  ;;  %v3080_v37 = vld [vmem:[#allocation10 + $0xd80] sm:$0xff] }
 0x3c7   : > { %v7922_v51 = vpack.c.bf16 %v3062_v32, %v3058_v20  ;;  %v2737_v20 = vrot.slane %v10937_v43, 3  ;;  %v3084_v32 = vld [vmem:[#allocation10 + $0xda0] sm:$0xff] }
 0x3c8   : > { %2834 = vmatmul.mubr.f32.vlgmr.msra.gmra.mrb[0].mxu0 %v2713_v61  ;;  %2947 = vmatmul.mubr.f32.vlgmr.msra.gmra.mrb[0].mxu1 %v2713_v61  ;;  %v3066_v61 = vld [vmem:[#allocation10 + $0xd10] sm:$0xff] }
 0x3c9   : > { %7863 = vmatpush1.bf16.msra.mxu0 %v7862_v53  ;;  %7911 = vmatpush1.bf16.msra.mxu1 %v7910_v54  ;;  %v3064_v53 = vld [vmem:[#allocation10 + $0xd00] sm:$0xff]  ;;  %v2729_v54 = vrot.slane %v10918_v9, 3  ;;  %v7926_v21 = vpack.c.bf16 %v3070_v60, %v3066_v61 }
 0x3ca   : > { %7009 = vmatprep.mubr.msk.f32.mxu0 %vm1294_vm3, %v2720_v41  ;;  %7017 = vmatprep.mubr.msk.f32.mxu1 %vm1294_vm3, %v2720_v41  ;;  %v10979_v41 = vld [vmem:[#allocation2 + $0x68] sm:$0xff]  ;;  %v7878_v15 = vpack.c.bf16 %v3068_v59, %v3064_v53  ;;  %v3095_v53 = vld [vmem:[#allocation10 + $0xdf8] sm:$0xff] }
 0x3cb   : > { %7865 = vmatprep.subr.bf16.mxu0 %v7864_v63  ;;  %7913 = vmatprep.subr.bf16.mxu1 %v7912_v4  ;;  %v2735_v63 = vrot.slane %v10979_v41, 3  ;;  %v3073_v4 = vld [vmem:[#allocation10 + $0xd48] sm:$0xff]  ;;  %v2734_v48 = vsel %vm2710_vm9, %v2729_v54, %v2733_v16  ;;  %v3088_v61 = vld [vmem:[#allocation10 + $0xdc0] sm:$0xff] }
 0x3cc   : > { %2840 = vmatmul.mubr.f32.gmra.mrb[2].mxu0 %v10781_v26  ;;  %2953 = vmatmul.mubr.f32.gmra.mrb[2].mxu1 %v10781_v26  ;;  %v7872_v26 = vpack.c.bf16 %v3061_v30, %v3057_v34  ;;  %v3081_v34 = vld [vmem:[#allocation10 + $0xd88] sm:$0xff]  ;;  %v3092_v60 = vld [vmem:[#allocation10 + $0xde0] sm:$0xff] }
 0x3cd   : > { %7867 = vmatpush1.bf16.msra.mxu0 %v7866_v0  ;;  %7915 = vmatpush1.bf16.msra.mxu1 %v7914_v11  ;;  %v3072_v0 = vld [vmem:[#allocation10 + $0xd40] sm:$0xff]  ;;  %v2730_v11 = vsel %vm2710_vm9, %v2725_v22, %v2729_v54  ;;  %v2736_v19 = vsel %vm2710_vm9, %v2731_v46, %v2735_v63  ;;  %v3085_v30 = vld [vmem:[#allocation10 + $0xda8] sm:$0xff]  ;;  %v3083_v22 = vld [vmem:[#allocation10 + $0xd98] sm:$0xff]  ;;  %v7886_v54 = vpack.c.bf16 %v3084_v32, %v3080_v37 }
 0x3ce   : > { %7010 = vmatprep.mubr.msk.f32.mxu0 %vm1294_vm3, %v2724_v13  ;;  %7018 = vmatprep.mubr.msk.f32.mxu1 %vm1294_vm3, %v2724_v13  ;;  %v7880_v13 = vpack.c.bf16 %v3077_v45, %v3073_v4  ;;  %v7932_v42 = vpack.c.bf16 %v3087_v24, %v3083_v22  ;;  %v3097_v4 = vld [vmem:[#allocation10 + $0xe08] sm:$0xff] }
 0x3cf   : > { %7869 = vmatprep.subr.bf16.mxu0 %v7868_v5  ;;  %7917 = vmatprep.subr.bf16.mxu1 %v7916_v6  ;;  %v7928_v5 = vpack.c.bf16 %v3079_v7, %v3075_v47  ;;  %v10991_v6 = vld [vmem:[#allocation2 + $0x78] sm:$0xff]  ;;  %v2741_v47 = vrot.slane %v2607_v44, 3  ;;  %v3105_v22 = vld [vmem:[#allocation10 + $0xe48] sm:$0xff] }
 0x3d0   : > { %2846 = vmatmul.mubr.f32.gmra.mrb[4].mxu0 %v10784_v27  ;;  %2959 = vmatmul.mubr.f32.gmra.mrb[4].mxu1 %v10784_v27  ;;  %v2732_v27 = vsel %vm2710_vm9, %v2727_v33, %v2731_v46  ;;  %v2739_v33 = vrot.slane %v10991_v6, 3  ;;  %v7884_v46 = vpack.c.bf16 %v3085_v30, %v3081_v34  ;;  %v3098_v34 = vld [vmem:[#allocation10 + $0xe10] sm:$0xff]  ;;  %v3117_v44 = vld [vmem:[#allocation10 + $0xea8] sm:$0xff] }
 0x3d1   : > { %7871 = vmatpush1.bf16.msra.mxu0 %v7870_v18  ;;  %7919 = vmatpush1.bf16.msra.mxu1 %v7918_v36  ;;  %v7882_v18 = vpack.c.bf16 %v3076_v40, %v3072_v0  ;;  %v3099_v0 = vld [vmem:[#allocation10 + $0xe18] sm:$0xff]  ;;  %v3102_v30 = vld [vmem:[#allocation10 + $0xe30] sm:$0xff]  ;;  %v2742_v24 = vsel %vm2710_vm9, %v2737_v20, %v2741_v47 }
 0x3d2   : > { %7011 = vmatprep.mubr.msk.f32.mxu0 %vm1294_vm3, %v2728_v31  ;;  %7019 = vmatprep.mubr.msk.f32.mxu1 %vm1294_vm3, %v2728_v31  ;;  %v3082_v31 = vld [vmem:[#allocation10 + $0xd90] sm:$0xff]  ;;  %v2744_v45 = vsel %vm2710_vm9, %v2739_v33, %v2743_v39  ;;  %v7942_v32 = vpack.c.bf16 %v3102_v30, %v3098_v34  ;;  %v3113_v39 = vld [vmem:[#allocation10 + $0xe88] sm:$0xff]  ;;  %v3141_v34 = vrot.slane %v10888_v35, 4 }
 0x3d3   : > { %7873 = vmatprep.subr.bf16.mxu0 %v7872_v26  ;;  %7921 = vmatprep.subr.bf16.mxu1 %v7920_v38  ;;  %v3086_v26 = vld [vmem:[#allocation10 + $0xdb0] sm:$0xff]  ;;  %v2740_v38 = vsel %vm2710_vm9, %v2735_v63, %v2739_v33 }
 0x3d4   : > { %2852 = vmatmul.mubr.f32.gmra.mrb[6].mxu0 %v10801_v49  ;;  %2965 = vmatmul.mubr.f32.gmra.mrb[6].mxu1 %v10801_v49  ;;  %v3074_v49 = vld [vmem:[#allocation10 + $0xd50] sm:$0xff]  ;;  %v7934_v59 = vpack.c.bf16 %v3086_v26, %v3082_v31  ;;  %v3104_v31 = vld [vmem:[#allocation10 + $0xe40] sm:$0xff] }
 0x3d5   : > { %7875 = vmatpush1.bf16.msra.mxu0 %v7874_v50  ;;  %7923 = vmatpush1.bf16.msra.mxu1 %v7922_v51  ;;  %v7930_v36 = vpack.c.bf16 %v3078_v8, %v3074_v49  ;;  %v3093_v50 = vld [vmem:[#allocation10 + $0xde8] sm:$0xff]  ;;  %v3091_v51 = vld [vmem:[#allocation10 + $0xdd8] sm:$0xff]  ;;  %v3094_v63 = vld [vmem:[#allocation10 + $0xdf0] sm:$0xff]  ;;  %v3137_v49 = vrot.slane %v10874_v12, 4 }
 0x3d6   : > { %7012 = vmatprep.mubr.msk.f32.mxu0 %vm1294_vm3, %v2732_v27  ;;  %7020 = vmatprep.mubr.msk.f32.mxu1 %vm1294_vm3, %v2732_v27  ;;  %v3028_v27 = vld [vmem:[#allocation2 + $0x8] sm:$0xf0]  ;;  %v7888_v7 = vpack.c.bf16 %v3093_v50, %v3089_v56  ;;  %v3108_v26 = vld [vmem:[#allocation10 + $0xe60] sm:$0xff]  ;;  %v3115_v56 = vld [vmem:[#allocation10 + $0xe98] sm:$0xff] }
 0x3d7   : > { %7877 = vmatprep.subr.bf16.mxu0 %v7876_v52  ;;  %7925 = vmatprep.subr.bf16.mxu1 %v7924_v25  ;;  %v2738_v52 = vsel %vm2710_vm9, %v2733_v16, %v2737_v20  ;;  %v3090_v25 = vld [vmem:[#allocation10 + $0xdd0] sm:$0xff]  ;;  %v3136_v40 = vrot.slane %v3028_v27, 4  ;;  %v7890_v16 = vpack.c.bf16 %v3092_v60, %v3088_v61  ;;  %v7896_v20 = vpack.c.bf16 %v3109_v10, %v3105_v22  ;;  %v3119_v50 = vld [vmem:[#allocation10 + $0xeb8] sm:$0xff]  ;;  %v3535_v22 = vld [vmem:[#allocation13] sm:$0xff] }
 0x3d8   : > { %2858 = vmatmul.mubr.f32.gmra.mrb[8].mxu0 %v2730_v11  ;;  %2971 = vmatmul.mubr.f32.gmra.mrb[8].mxu1 %v2730_v11  ;;  %v3103_v11 = vld [vmem:[#allocation10 + $0xe38] sm:$0xff]  ;;  %v7938_v8 = vpack.c.bf16 %v3094_v63, %v3090_v25  ;;  %v7900_v61 = vpack.c.bf16 %v3117_v44, %v3113_v39  ;;  %v7948_v60 = vpack.c.bf16 %v3119_v50, %v3115_v56  ;;  %v3114_v27 = vld [vmem:[#allocation10 + $0xe90] sm:$0xff]  ;;  %v3121_v25 = vld [vmem:[#allocation10 + $0xec8] sm:$0xff] }
 0x3d9   : > { %7879 = vmatpush1.bf16.msra.mxu0 %v7878_v15  ;;  %7927 = vmatpush1.bf16.msra.mxu1 %v7926_v21  ;;  %v7936_v15 = vpack.c.bf16 %v3095_v53, %v3091_v51  ;;  %v3101_v21 = vld [vmem:[#allocation10 + $0xe28] sm:$0xff]  ;;  %v7940_v33 = vpack.c.bf16 %v3103_v11, %v3099_v0  ;;  %v3138_v37 = vsel %vm3132_vm10, %v3136_v40, %v3137_v49  ;;  %v3124_v11 = vld [vmem:[#allocation10 + $0xee0] sm:$0xff]  ;;  %v3122_v40 = vld [vmem:[#allocation10 + $0xed0] sm:$0xff] }
 0x3da   : > { %7013 = vmatprep.mubr.msk.f32.mxu0 %vm1294_vm3, %v2736_v19  ;;  %7021 = vmatprep.mubr.msk.f32.mxu1 %vm1294_vm3, %v2736_v19  ;;  %v3096_v19 = vld [vmem:[#allocation10 + $0xe00] sm:$0xff]  ;;  %v7898_v51 = vpack.c.bf16 %v3108_v26, %v3104_v31  ;;  %v3125_v63 = vld [vmem:[#allocation10 + $0xee8] sm:$0xff] }
 0x3db   : > { %7881 = vmatprep.subr.bf16.mxu0 %v7880_v13  ;;  %7929 = vmatprep.subr.bf16.mxu1 %v7928_v5  ;;  %v3100_v13 = vld [vmem:[#allocation10 + $0xe20] sm:$0xff]  ;;  %v7892_v5 = vpack.c.bf16 %v3101_v21, %v3097_v4  ;;  %v3123_v4 = vld [vmem:[#allocation10 + $0xed8] sm:$0xff]  ;;  %v7904_v21 = vpack.c.bf16 %v3125_v63, %v3121_v25  ;;  %v3540_v10 = vld [vmem:[#allocation13 + $0x28] sm:$0xff] }
 0x3dc   : > { %2864 = vmatmul.mubr.f32.gmra.mrb[10].mxu0 %v2734_v48  ;;  %2977 = vmatmul.mubr.f32.gmra.mrb[10].mxu1 %v2734_v48  ;;  %v7894_v48 = vpack.c.bf16 %v3100_v13, %v3096_v19  ;;  %v3538_v19 = vld [vmem:[#allocation13 + $0x18] sm:$0xff]  ;;  %v3539_v26 = vld [vmem:[#allocation13 + $0x20] sm:$0xff]  ;;  %v3548_v39 = vld [vmem:[#allocation13 + $0x68] sm:$0xff] }
 0x3dd   : > { %7883 = vmatpush1.bf16.msra.mxu0 %v7882_v18  ;;  %7931 = vmatpush1.bf16.msra.mxu1 %v7930_v36  ;;  %v3107_v18 = vld [vmem:[#allocation10 + $0xe58] sm:$0xff]  ;;  %v3551_v25 = vld [vmem:[#allocation13 + $0x80] sm:$0xff] }
 0x3de   : > { %7014 = vmatprep.mubr.msk.f32.mxu0 %vm1294_vm3, %v2740_v38  ;;  %7022 = vmatprep.mubr.msk.f32.mxu1 %vm1294_vm3, %v2740_v38  ;;  %v3111_v36 = vld [vmem:[#allocation10 + $0xe78] sm:$0xff] }
 0x3df   : > { %7885 = vmatprep.subr.bf16.mxu0 %v7884_v46  ;;  %7933 = vmatprep.subr.bf16.mxu1 %v7932_v42  ;;  %v7944_v38 = vpack.c.bf16 %v3111_v36, %v3107_v18  ;;  %v3106_v46 = vld [vmem:[#allocation10 + $0xe50] sm:$0xff]  ;;  %v3542_v18 = vld [vmem:[#allocation13 + $0x38] sm:$0xff] }
 0x3e0   : > { %2870 = vmatmul.mubr.f32.gmra.mrb[12].mxu0 %v2738_v52  ;;  %2983 = vmatmul.mubr.f32.gmra.mrb[12].mxu1 %v2738_v52  ;;  %v3110_v42 = vld [vmem:[#allocation10 + $0xe70] sm:$0xff]  ;;  %v7960_v31 = vpack.c.bf16 %v3542_v18, %v3540_v10  ;;  %v3550_v44 = vld [vmem:[#allocation13 + $0x78] sm:$0xff]  ;;  %v3563_v18 = vld [vmem:[#allocation13 + $0xe0] sm:$0xff] }
 0x3e1   : > { %7887 = vmatpush1.bf16.msra.mxu0 %v7886_v54  ;;  %7935 = vmatpush1.bf16.msra.mxu1 %v7934_v59  ;;  %v7946_v53 = vpack.c.bf16 %v3110_v42, %v3106_v46  ;;  %v3112_v54 = vld [vmem:[#allocation10 + $0xe80] sm:$0xff]  ;;  %v3118_v52 = vld [vmem:[#allocation10 + $0xeb0] sm:$0xff] }
 0x3e2   : > { %7015 = vmatprep.mubr.msk.f32.mxu0 %vm1294_vm3, %v2744_v45  ;;  %7023 = vmatprep.mubr.msk.f32.mxu1 %vm1294_vm3, %v2744_v45  ;;  %v3116_v59 = vld [vmem:[#allocation10 + $0xea0] sm:$0xff]  ;;  %v3127_v45 = vld [vmem:[#allocation10 + $0xef8] sm:$0xff] }
 0x3e3   : > { %7889 = vmatprep.subr.bf16.mxu0 %v7888_v7  ;;  %7937 = vmatprep.subr.bf16.mxu1 %v7936_v15  ;;  %v7902_v47 = vpack.c.bf16 %v3116_v59, %v3112_v54  ;;  %v7950_v7 = vpack.c.bf16 %v3118_v52, %v3114_v27  ;;  %v3120_v15 = vld [vmem:[#allocation10 + $0xec0] sm:$0xff]  ;;  %v7952_v0 = vpack.c.bf16 %v3127_v45, %v3123_v4  ;;  %v3545_v42 = vld [vmem:[#allocation13 + $0x50] sm:$0xff]  ;;  %v3151_v27 = vrot.slane %v10918_v9, 4 }
 0x3e4   : > { %2876 = vmatmul.mubr.f32.gmra.mrb[14].mxu0 %v2742_v24  ;;  %2989 = vmatmul.mubr.f32.gmra.mrb[14].mxu1 %v2742_v24  ;;  %v7906_v13 = vpack.c.bf16 %v3124_v11, %v3120_v15  ;;  %v3537_v24 = vld [vmem:[#allocation13 + $0x10] sm:$0xff]  ;;  %v3546_v46 = vld [vmem:[#allocation13 + $0x58] sm:$0xff]  ;;  %v3161_v45 = vrot.slane %v10991_v6, 4  ;;  %v3030_v15 = vld [vmem:[#allocation2 + $0x88] sm:$0xf] }
 0x3e5   : > { %7891 = vmatpush1.bf16.msra.mxu0 %v7890_v16  ;;  %7939 = vmatpush1.bf16.msra.mxu1 %v7938_v8  ;;  %v3126_v16 = vld [vmem:[#allocation10 + $0xef0] sm:$0xff]  ;;  %v3554_v59 = vld [vmem:[#allocation13 + $0x98] sm:$0xff]  ;;  %v3165_v17 = vrot.slane %v3030_v15, 4 }
 0x3e6   : > { %7893 = vmatprep.subr.bf16.mxu0 %v7892_v5  ;;  %7941 = vmatprep.subr.bf16.mxu1 %v7940_v33  ;;  %v3536_v8 = vld [vmem:[#allocation13 + $0x8] sm:$0xff]  ;;  %v7954_v5 = vpack.c.bf16 %v3126_v16, %v3122_v40  ;;  %v3027_v33 = vld [vmem:[#allocation2] sm:$0xf0]  ;;  %v3549_v54 = vld [vmem:[#allocation13 + $0x70] sm:$0xff]  ;;  %v3159_v16 = vrot.slane %v10937_v43, 4 }
 0x3e7   : > { %7024 = vmatprep.mubr.msk.f32.mxu0 %vm1294_vm3, %v3138_v37  ;;  %7032 = vmatprep.mubr.msk.f32.mxu1 %vm1294_vm3, %v3138_v37  ;;  %v7956_v30 = vpack.c.bf16 %v3538_v19, %v3536_v8  ;;  %v3133_v36 = vrot.slane %v3027_v33, 4  ;;  %v3142_v37 = vsel %vm3132_vm10, %v3137_v49, %v3141_v34  ;;  %v3553_v63 = vld [vmem:[#allocation13 + $0x90] sm:$0xff]  ;;  %v3558_v4 = vld [vmem:[#allocation13 + $0xb8] sm:$0xff]  ;;  %v3560_v11 = vld [vmem:[#allocation13 + $0xc8] sm:$0xff] }
 0x3e8   : > { %v7974_v9 = vpack.c.bf16 %v3553_v63, %v3551_v25  ;;  %v3562_v40 = vld [vmem:[#allocation13 + $0xd8] sm:$0xff]  ;;  %v3559_v19 = vld [vmem:[#allocation13 + $0xc0] sm:$0xff]  ;;  %v3564_v33 = vld [vmem:[#allocation13 + $0xe8] sm:$0xff] }
 0x3e9   : > { %7895 = vmatpush1.bf16.msra.mxu0 %v7894_v48  ;;  %7943 = vmatpush1.bf16.msra.mxu1 %v7942_v32  ;;  %v3145_v48 = vrot.slane %v10897_v55, 4  ;;  %v7958_v32 = vpack.c.bf16 %v3537_v24, %v3535_v22  ;;  %v3135_v35 = vsel %vm3132_vm10, %v3133_v36, %v3134_v28  ;;  %v3149_v55 = vrot.slane %v10903_v14, 4  ;;  %v3543_v28 = vld [vmem:[#allocation13 + $0x40] sm:$0xff]  ;;  %v3565_v36 = vld [vmem:[#allocation13 + $0xf0] sm:$0xff]  ;;  %v3588_v63 = vld [vmem:[#allocation13 + $0x1a8] sm:$0xff] }
 0x3ea   : > { %7897 = vmatprep.subr.bf16.mxu0 %v7896_v20  ;;  %7945 = vmatprep.subr.bf16.mxu1 %v7944_v38  ;;  %v3541_v20 = vld [vmem:[#allocation13 + $0x30] sm:$0xff]  ;;  %v3544_v38 = vld [vmem:[#allocation13 + $0x48] sm:$0xff]  ;;  %v3153_v14 = vrot.slane %v10970_v2, 4  ;;  %v7966_v50 = vpack.c.bf16 %v3545_v42, %v3543_v28  ;;  %v3157_v2 = vrot.slane %v10979_v41, 4  ;;  %v7980_v8 = vpack.c.bf16 %v3562_v40, %v3560_v11  ;;  %v3578_v42 = vld [vmem:[#allocation13 + $0x158] sm:$0xff] }
 0x3eb   : > { %v3146_v12 = vsel %vm3132_vm10, %v3141_v34, %v3145_v48  ;;  %v7962_v49 = vpack.c.bf16 %v3541_v20, %v3539_v26  ;;  %v7964_v58 = vpack.c.bf16 %v3546_v46, %v3544_v38  ;;  %v3150_v56 = vsel %vm3132_vm10, %v3145_v48, %v3149_v55  ;;  %v3566_v34 = vld [vmem:[#allocation13 + $0xf8] sm:$0xff]  ;;  %v3567_v26 = vld [vmem:[#allocation13 + $0x100] sm:$0xff]  ;;  %v3569_v20 = vld [vmem:[#allocation13 + $0x110] sm:$0xff] }
 0x3ec   : > { %v3158_v41 = vsel %vm3132_vm10, %v3153_v14, %v3157_v2  ;;  %v3162_v6 = vsel %vm3132_vm10, %v3157_v2, %v3161_v45  ;;  %v7984_v10 = vpack.c.bf16 %v3566_v34, %v3564_v33  ;;  %v3570_v48 = vld [vmem:[#allocation13 + $0x118] sm:$0xff]  ;;  %v3572_v38 = vld [vmem:[#allocation13 + $0x128] sm:$0xff]  ;;  %v3585_v25 = vld [vmem:[#allocation13 + $0x190] sm:$0xff]  ;;  %v3451_v40 = vlaneseq }
 0x3ed   : > { %7899 = vmatpush1.bf16.msra.mxu0 %v7898_v51  ;;  %7947 = vmatpush1.bf16.msra.mxu1 %v7946_v53  ;;  %v7968_v51 = vpack.c.bf16 %v3550_v44, %v3548_v39  ;;  %v3547_v53 = vld [vmem:[#allocation13 + $0x60] sm:$0xff]  ;;  %v3574_v46 = vld [vmem:[#allocation13 + $0x138] sm:$0xff]  ;;  %v3576_v28 = vld [vmem:[#allocation13 + $0x148] sm:$0xff] }
 0x3ee   : > { %7901 = vmatprep.subr.bf16.mxu0 %v7900_v61  ;;  %7949 = vmatprep.subr.bf16.mxu1 %v7948_v60  ;;  %v3154_v61 = vsel %vm3132_vm10, %v3149_v55, %v3153_v14  ;;  %v7970_v60 = vpack.c.bf16 %v3549_v54, %v3547_v53  ;;  %v7992_v55 = vpack.c.bf16 %v3574_v46, %v3572_v38  ;;  %v3577_v14 = vld [vmem:[#allocation13 + $0x150] sm:$0xff]  ;;  %v3586_v2 = vld [vmem:[#allocation13 + $0x198] sm:$0xff]  ;;  %v3600_v34 = vld [vmem:[#allocation13 + $0x208] sm:$0xff] }
 0x3ef   : > { %v7996_v44 = vpack.c.bf16 %v3578_v42, %v3576_v28  ;;  %v3604_v46 = vld [vmem:[#allocation13 + $0x228] sm:$0xff] }
 0x3f1   : > { %7903 = vmatpush1.bf16.msra.mxu0 %v7902_v47  ;;  %7951 = vmatpush1.bf16.msra.mxu1 %v7950_v7  ;;  %v3152_v47 = vsel %vm3132_vm10, %v3147_v3, %v3151_v27  ;;  %v3155_v7 = vrot.slane %v10930_v29, 4 }
 0x3f2   : > { %7905 = vmatprep.subr.bf16.mxu0 %v7904_v21  ;;  %7953 = vmatprep.subr.bf16.mxu1 %v7952_v0  ;;  %v3555_v21 = vld [vmem:[#allocation13 + $0xa0] sm:$0xff]  ;;  %v3557_v0 = vld [vmem:[#allocation13 + $0xb0] sm:$0xff] }
 0x3f3   : > { %v7978_v3 = vpack.c.bf16 %v3557_v0, %v3555_v21  ;;  %v3156_v29 = vsel %vm3132_vm10, %v3151_v27, %v3155_v7  ;;  %v3160_v24 = vsel %vm3132_vm10, %v3155_v7, %v3159_v16  ;;  %v3594_v7 = vld [vmem:[#allocation13 + $0x1d8] sm:$0xff]  ;;  %v3591_v21 = vld [vmem:[#allocation13 + $0x1c0] sm:$0xff]  ;;  %v3593_v0 = vld [vmem:[#allocation13 + $0x1d0] sm:$0xff] }
 0x3f4   : > { %v8014_v11 = vpack.c.bf16 %v3593_v0, %v3591_v21 }
 0x3f5   : > { %7907 = vmatpush1.bf16.msra.mxu0 %v7906_v13  ;;  %7955 = vmatpush1.bf16.msra.mxu1 %v7954_v5  ;;  %v3561_v13 = vld [vmem:[#allocation13 + $0xd0] sm:$0xff]  ;;  %v3029_v5 = vld [vmem:[#allocation2 + $0x80] sm:$0xf] }
 0x3f6   : > { %7957 = vmatprep.subr.bf16.mxu0 %v7956_v30  ;;  %v3166_v30 = vsel %vm3132_vm10, %v3161_v45, %v3165_v17  ;;  %v7982_v22 = vpack.c.bf16 %v3561_v13, %v3559_v19  ;;  %v3163_v43 = vrot.slane %v3029_v5, 4  ;;  %v3587_v45 = vld [vmem:[#allocation13 + $0x1a0] sm:$0xff]  ;;  %v11062_v17 = vld [vmem:[#allocation11] sm:$0xf]  ;;  %v3597_v13 = vld [vmem:[#allocation13 + $0x1f0] sm:$0xff] }
 0x3f7   : > { %v3595_v19 = vld [vmem:[#allocation13 + $0x1e0] sm:$0xff] }
 0x3f8   : > { %3256 = vmatmul.mubr.f32.vlgmr.msra.gmra.mrb[0].mxu0 %v3135_v35  ;;  %3369 = vmatmul.mubr.f32.vlgmr.msra.gmra.mrb[0].mxu1 %v3135_v35  ;;  %v3164_v35 = vsel %vm3132_vm10, %v3159_v16, %v3163_v43  ;;  %v3598_v16 = vld [vmem:[#allocation13 + $0x1f8] sm:$0xff]  ;;  %v8018_v33 = vpack.c.bf16 %v3597_v13, %v3595_v19  ;;  %v3611_v13 = vld [vmem:[#allocation13 + $0x260] sm:$0xff] }
 0x3f9   : > { %7025 = vmatprep.mubr.msk.f32.mxu0 %vm1294_vm3, %v3142_v37  ;;  %7033 = vmatprep.mubr.msk.f32.mxu1 %vm1294_vm3, %v3142_v37  ;;  %v3568_v37 = vld [vmem:[#allocation13 + $0x108] sm:$0xff] }
 0x3fa   : > { %7959 = vmatpush1.bf16.msra.mxu0 %v7958_v32  ;;  %v7986_v32 = vpack.c.bf16 %v3565_v36, %v3563_v18 }
 0x3fb   : > { %7961 = vmatprep.subr.bf16.mxu0 %v7960_v31  ;;  %v7988_v31 = vpack.c.bf16 %v3570_v48, %v3568_v37 }
 0x3fc   : > { %3262 = vmatmul.mubr.f32.gmra.mrb[2].mxu0 %v10808_v57  ;;  %3375 = vmatmul.mubr.f32.gmra.mrb[2].mxu1 %v10808_v57  ;;  %v3552_v57 = vld [vmem:[#allocation13 + $0x88] sm:$0xff] }
 0x3fd   : > { %7026 = vmatprep.mubr.msk.f32.mxu0 %vm1294_vm3, %v3146_v12  ;;  %7034 = vmatprep.mubr.msk.f32.mxu1 %vm1294_vm3, %v3146_v12  ;;  %v7972_v52 = vpack.c.bf16 %v3554_v59, %v3552_v57  ;;  %v7990_v12 = vpack.c.bf16 %v3569_v20, %v3567_v26  ;;  %v3579_v57 = vld [vmem:[#allocation13 + $0x160] sm:$0xff]  ;;  %v3581_v59 = vld [vmem:[#allocation13 + $0x170] sm:$0xff] }
 0x3fe   : > { %7963 = vmatpush1.bf16.msra.mxu0 %v7962_v49  ;;  %v3571_v49 = vld [vmem:[#allocation13 + $0x120] sm:$0xff]  ;;  %v3601_v20 = vld [vmem:[#allocation13 + $0x210] sm:$0xff] }
 0x3ff   : > { %7965 = vmatprep.subr.bf16.mxu0 %v7964_v58  ;;  %v3573_v58 = vld [vmem:[#allocation13 + $0x130] sm:$0xff]  ;;  %v3599_v26 = vld [vmem:[#allocation13 + $0x200] sm:$0xff] }
 0x400   : > { %3268 = vmatmul.mubr.f32.gmra.mrb[4].mxu0 %v10813_v62  ;;  %3381 = vmatmul.mubr.f32.gmra.mrb[4].mxu1 %v10813_v62  ;;  %v3556_v62 = vld [vmem:[#allocation13 + $0xa8] sm:$0xff]  ;;  %v7994_v39 = vpack.c.bf16 %v3573_v58, %v3571_v49  ;;  %v8022_v28 = vpack.c.bf16 %v3601_v20, %v3599_v26 }
 0x401   : > { %7027 = vmatprep.mubr.msk.f32.mxu0 %vm1294_vm3, %v3150_v56  ;;  %7035 = vmatprep.mubr.msk.f32.mxu1 %vm1294_vm3, %v3150_v56  ;;  %v3575_v56 = vld [vmem:[#allocation13 + $0x140] sm:$0xff] }
 0x402   : > { %7967 = vmatpush1.bf16.msra.mxu0 %v7966_v50  ;;  %v3580_v50 = vld [vmem:[#allocation13 + $0x168] sm:$0xff]  ;;  %v7998_v53 = vpack.c.bf16 %v3577_v14, %v3575_v56 }
 0x403   : > { %7969 = vmatprep.subr.bf16.mxu0 %v7968_v51  ;;  %v3582_v51 = vld [vmem:[#allocation13 + $0x178] sm:$0xff] }
 0x404   : > { %3274 = vmatmul.mubr.f32.gmra.mrb[6].mxu0 %v10823_v23  ;;  %3387 = vmatmul.mubr.f32.gmra.mrb[6].mxu1 %v10823_v23  ;;  %v7976_v23 = vpack.c.bf16 %v3558_v4, %v3556_v62  ;;  %v8000_v54 = vpack.c.bf16 %v3582_v51, %v3580_v50  ;;  %v3590_v62 = vld [vmem:[#allocation13 + $0x1b8] sm:$0xff]  ;;  %v3603_v51 = vld [vmem:[#allocation13 + $0x220] sm:$0xff] }
 0x405   : > { %7028 = vmatprep.mubr.msk.f32.mxu0 %vm1294_vm3, %v3154_v61  ;;  %7036 = vmatprep.mubr.msk.f32.mxu1 %vm1294_vm3, %v3154_v61  ;;  %v3584_v61 = vld [vmem:[#allocation13 + $0x188] sm:$0xff] }
 0x406   : > { %7971 = vmatpush1.bf16.msra.mxu0 %v7970_v60  ;;  %v8002_v60 = vpack.c.bf16 %v3581_v59, %v3579_v57  ;;  %v8004_v27 = vpack.c.bf16 %v3586_v2, %v3584_v61  ;;  %v3608_v57 = vld [vmem:[#allocation13 + $0x248] sm:$0xff]  ;;  %v3610_v59 = vld [vmem:[#allocation13 + $0x258] sm:$0xff] }
 0x407   : > { %7973 = vmatprep.subr.bf16.mxu0 %v7972_v52  ;;  %v3583_v52 = vld [vmem:[#allocation13 + $0x180] sm:$0xff] }
 0x408   : > { %3280 = vmatmul.mubr.f32.gmra.mrb[8].mxu0 %v3152_v47  ;;  %3393 = vmatmul.mubr.f32.gmra.mrb[8].mxu1 %v3152_v47  ;;  %v8006_v4 = vpack.c.bf16 %v3585_v25, %v3583_v52  ;;  %v3592_v47 = vld [vmem:[#allocation13 + $0x1c8] sm:$0xff] }
 0x409   : > { %7029 = vmatprep.mubr.msk.f32.mxu0 %vm1294_vm3, %v3158_v41  ;;  %7037 = vmatprep.mubr.msk.f32.mxu1 %vm1294_vm3, %v3158_v41  ;;  %v8008_v41 = vpack.c.bf16 %v3590_v62, %v3588_v63 }
 0x40a   : > { %7975 = vmatpush1.bf16.msra.mxu0 %v7974_v9  ;;  %v3589_v9 = vld [vmem:[#allocation13 + $0x1b0] sm:$0xff] }
 0x40b   : > { %7977 = vmatprep.subr.bf16.mxu0 %v7976_v23  ;;  %v8010_v15 = vpack.c.bf16 %v3589_v9, %v3587_v45  ;;  %v8012_v23 = vpack.c.bf16 %v3594_v7, %v3592_v47  ;;  %v3607_v45 = vld [vmem:[#allocation13 + $0x240] sm:$0xff]  ;;  %v3609_v9 = vld [vmem:[#allocation13 + $0x250] sm:$0xff]  ;;  %v3612_v7 = vld [vmem:[#allocation13 + $0x268] sm:$0xff] }
 0x40c   : > { %3286 = vmatmul.mubr.f32.gmra.mrb[10].mxu0 %v3156_v29  ;;  %3399 = vmatmul.mubr.f32.gmra.mrb[10].mxu1 %v3156_v29  ;;  %v3596_v29 = vld [vmem:[#allocation13 + $0x1e8] sm:$0xff] }
 0x40d   : > { %7030 = vmatprep.mubr.msk.f32.mxu0 %vm1294_vm3, %v3162_v6  ;;  %7038 = vmatprep.mubr.msk.f32.mxu1 %vm1294_vm3, %v3162_v6  ;;  %v11060_v6 = vshrl.u32 %v3451_v40, 7 }
 0x40e   : > { %7979 = vmatpush1.bf16.msra.mxu0 %v7978_v3 }
 0x40f   : > { %7981 = vmatprep.subr.bf16.mxu0 %v7980_v8  ;;  %v3461_v3 = vsub.s32 2, %v11060_v6  ;;  %v8016_v8 = vpack.c.bf16 %v3598_v16, %v3596_v29  ;;  %v3457_v43 = vsub.s32 1, %v11060_v6 }
 0x410   : > { %3292 = vmatmul.mubr.f32.gmra.mrb[12].mxu0 %v3160_v24  ;;  %3405 = vmatmul.mubr.f32.gmra.mrb[12].mxu1 %v3160_v24  ;;  %v3453_v24 = vsub.s32 0, %v11060_v6 }
 0x411   : > { %7031 = vmatprep.mubr.msk.f32.mxu0 %vm1294_vm3, %v3166_v30  ;;  %7039 = vmatprep.mubr.msk.f32.mxu1 %vm1294_vm3, %v3166_v30  ;;  %v11066_v5 = vrot.slane %v11062_v17, %v3461_v3  ;;  %v3602_v30 = vld [vmem:[#allocation13 + $0x218] sm:$0xff]  ;;  %v11078_v18 = vrot.slane %v11062_v17, %v3457_v43 }
 0x412   : > { %7983 = vmatpush1.bf16.msra.mxu0 %v7982_v22  ;;  %v8020_v22 = vpack.c.bf16 %v3602_v30, %v3600_v34  ;;  %v3616_v30 = vld [vmem:[#allocation13 + $0x288] sm:$0xff] }
 0x413   : > { %7985 = vmatprep.subr.bf16.mxu0 %v7984_v10  ;;  %v11073_v10 = vrot.slane %v11062_v17, %v3453_v24 }
 0x414   : > { %3298 = vmatmul.mubr.f32.gmra.mrb[14].mxu0 %v3164_v35  ;;  %3411 = vmatmul.mubr.f32.gmra.mrb[14].mxu1 %v3164_v35 }
 0x415   : > { %3973 = vmatprep.mubr.f32.mxu1 %v9925_v1 }
 0x416   : > { %7987 = vmatpush1.bf16.msra.mxu0 %v7986_v32 }
 0x417   : > { %7989 = vmatprep.subr.bf16.mxu0 %v7988_v31 }
 0x41a   : > { %7991 = vmatpush1.bf16.msra.mxu0 %v7990_v12  ;;  %v3606_v12 = vld [vmem:[#allocation13 + $0x238] sm:$0xff] }
 0x41b   : > { %7993 = vmatprep.subr.bf16.mxu0 %v7992_v55  ;;  %v8024_v50 = vpack.c.bf16 %v3606_v12, %v3604_v46 }
 0x41e   : > { %7995 = vmatpush1.bf16.msra.mxu0 %v7994_v39 }
 0x41f   : > { %7997 = vmatprep.subr.bf16.mxu0 %v7996_v44 }
 0x422   : > { %7999 = vmatpush1.bf16.msra.mxu0 %v7998_v53  ;;  %v3605_v53 = vld [vmem:[#allocation13 + $0x230] sm:$0xff] }
 0x423   : > { %8001 = vmatprep.subr.bf16.mxu0 %v8000_v54 }
 0x426   : > { %8003 = vmatpush1.bf16.msra.mxu0 %v8002_v60 }
 0x427   : > { %8005 = vmatprep.subr.bf16.mxu0 %v8004_v27  ;;  %v8026_v27 = vpack.c.bf16 %v3605_v53, %v3603_v51 }
 0x42a   : > { %8007 = vmatpush1.bf16.msra.mxu0 %v8006_v4 }
 0x42b   : > { %8009 = vmatprep.subr.bf16.mxu0 %v8008_v41  ;;  %v8028_v41 = vpack.c.bf16 %v3610_v59, %v3608_v57 }
 0x42e   : > { %8011 = vmatpush1.bf16.msra.mxu0 %v8010_v15  ;;  %v3614_v15 = vld [vmem:[#allocation13 + $0x278] sm:$0xff] }
 0x42f   : > { %8013 = vmatprep.subr.bf16.mxu0 %v8012_v23  ;;  %v8032_v19 = vpack.c.bf16 %v3614_v15, %v3612_v7 }
 0x432   : > { %8015 = vmatpush1.bf16.msra.mxu0 %v8014_v11  ;;  %v8030_v11 = vpack.c.bf16 %v3609_v9, %v3607_v45  ;;  %v3626_v45 = vld [vmem:[#allocation13 + $0x2d8] sm:$0xff] }
 0x433   : > { %8017 = vmatprep.subr.bf16.mxu0 %v8016_v8 }
 0x436   : > { %8019 = vmatpush1.bf16.msra.mxu0 %v8018_v33  ;;  %v3613_v33 = vld [vmem:[#allocation13 + $0x270] sm:$0xff] }
 0x437   : > { %8021 = vmatprep.subr.bf16.mxu0 %v8020_v22  ;;  %v3618_v22 = vld [vmem:[#allocation13 + $0x298] sm:$0xff] }
 0x4cb   : > { %v3257_v36 = vpop.f32.mrb[0].mxu0  ;;  %v3370_v37 = vpop.f32.mrb[0].mxu1 }
 0x4cc   : > { %v3471_v48 = vadd.f32 %v11073_v10, %v3257_v36  ;;  %v11082_v32 = vadd.f32 %v11066_v5, %v3370_v37  ;;  %v3259_v35 = vpop.f32.mrb[1].mxu0  ;;  %v11084_v31 = vpop.f32.mrb[1].mxu1 }
 0x4cd   : > { %v3472_v38 = vadd.f32 %v11078_v18, %v3259_v35  ;;  %v8034_v35 = vpack.c.bf16 %v3613_v33, %v3611_v13 }
 0x4ce   : > { %v3503_v42 = vmax.f32 %v3471_v48, 0.0 }
 0x4cf   : > { %v3504_v55 = vmax.f32 %v3472_v38, 0.0  ;;  %v3263_v49 = vpop.f32.mrb[2].mxu0  ;;  %v3376_v58 = vpop.f32.mrb[2].mxu1 }
 0x4d0   : > { %v3475_v39 = vadd.f32 %v11073_v10, %v3263_v49  ;;  %v11089_v44 = vadd.f32 %v11066_v5, %v3376_v58  ;;  %v3265_v56 = vpop.f32.mrb[3].mxu0  ;;  %v11091_v14 = vpop.f32.mrb[3].mxu1  ;;  %v3615_v49 = vld [vmem:[#allocation13 + $0x280] sm:$0xff]  ;;  %v3617_v58 = vld [vmem:[#allocation13 + $0x290] sm:$0xff] }
 0x4d1   : > { %v3476_v54 = vadd.f32 %v11078_v18, %v3265_v56  ;;  %3727 = vmatprep.mubr.f32.mxu0 %v3504_v55  ;;  %v8036_v55 = vpack.c.bf16 %v3618_v22, %v3616_v30  ;;  %v8038_v53 = vpack.c.bf16 %v3617_v58, %v3615_v49  ;;  %v3630_v30 = vld [vmem:[#allocation13 + $0x2f8] sm:$0xff]  ;;  %v3627_v49 = vld [vmem:[#allocation13 + $0x2e0] sm:$0xff]  ;;  %v3629_v58 = vld [vmem:[#allocation13 + $0x2f0] sm:$0xff] }
 0x4d2   : > { %3728 = vmatmul.mubr.f32.vlgmr.msra.gmra.mrb[16].mxu0 %v3503_v42  ;;  %v3507_v52 = vmax.f32 %v3475_v39, 0.0  ;;  %v3620_v42 = vld [vmem:[#allocation13 + $0x2a8] sm:$0xff]  ;;  %v3622_v39 = vld [vmem:[#allocation13 + $0x2b8] sm:$0xff] }
 0x4d3   : > { %v3508_v61 = vmax.f32 %v3476_v54, 0.0  ;;  %8023 = vmatpush1.bf16.msra.mxu0 %v8022_v28  ;;  %v3269_v2 = vpop.f32.mrb[4].mxu0  ;;  %v3382_v60 = vpop.f32.mrb[4].mxu1 }
 0x4d4   : > { %v3479_v25 = vadd.f32 %v11073_v10, %v3269_v2  ;;  %v11096_v63 = vadd.f32 %v11066_v5, %v3382_v60  ;;  %v3271_v62 = vpop.f32.mrb[5].mxu0  ;;  %v11098_v4 = vpop.f32.mrb[5].mxu1  ;;  %8025 = vmatprep.subr.bf16.mxu0 %v8024_v50  ;;  %v8040_v60 = vpack.c.bf16 %v3622_v39, %v3620_v42  ;;  %v3632_v39 = vld [vmem:[#allocation13 + $0x308] sm:$0xff] }
 0x4d5   : > { %v3480_v47 = vadd.f32 %v11078_v18, %v3271_v62  ;;  %3733 = vmatprep.mubr.f32.mxu0 %v3508_v61 }
 0x4d6   : > { %3734 = vmatmul.mubr.f32.gmra.mrb[18].mxu0 %v3507_v52  ;;  %v3511_v40 = vmax.f32 %v3479_v25, 0.0  ;;  %v3621_v52 = vld [vmem:[#allocation13 + $0x2b0] sm:$0xff]  ;;  %v3465_v25 = vsub.s32 3, %v11060_v6 }
 0x4d7   : > { %v3512_v23 = vmax.f32 %v3480_v47, 0.0  ;;  %8027 = vmatpush1.bf16.msra.mxu0 %v8026_v27  ;;  %v3275_v21 = vpop.f32.mrb[6].mxu0  ;;  %v3388_v0 = vpop.f32.mrb[6].mxu1  ;;  %v3619_v27 = vld [vmem:[#allocation13 + $0x2a0] sm:$0xff] }
 0x4d8   : > { %v3483_v3 = vadd.f32 %v11073_v10, %v3275_v21  ;;  %v11103_v29 = vadd.f32 %v11066_v5, %v3388_v0  ;;  %v3277_v16 = vpop.f32.mrb[7].mxu0  ;;  %v11105_v8 = vpop.f32.mrb[7].mxu1  ;;  %8029 = vmatprep.subr.bf16.mxu0 %v8028_v41  ;;  %v3624_v41 = vld [vmem:[#allocation13 + $0x2c8] sm:$0xff]  ;;  %v8042_v15 = vpack.c.bf16 %v3621_v52, %v3619_v27  ;;  %v11130_v13 = vrot.slane %v11062_v17, %v3465_v25  ;;  %v3635_v27 = vld [vmem:[#allocation13 + $0x320] sm:$0xff]  ;;  %v3637_v52 = vld [vmem:[#allocation13 + $0x330] sm:$0xff] }
 0x4d9   : > { %v3484_v34 = vadd.f32 %v11078_v18, %v3277_v16  ;;  %3739 = vmatprep.mubr.f32.mxu0 %v3512_v23  ;;  %v3623_v16 = vld [vmem:[#allocation13 + $0x2c0] sm:$0xff]  ;;  %v3640_v25 = vld [vmem:[#allocation13 + $0x348] sm:$0xff] }
 0x4da   : > { %3740 = vmatmul.mubr.f32.gmra.mrb[20].mxu0 %v3511_v40  ;;  %v3515_v26 = vmax.f32 %v3483_v3, 0.0  ;;  %v8044_v3 = vpack.c.bf16 %v3626_v45, %v3624_v41  ;;  %v8058_v41 = vpack.c.bf16 %v3637_v52, %v3635_v27  ;;  %v3486_v52 = vadd.f32 %v11130_v13, %v11105_v8 }
 0x4db   : > { %v3516_v36 = vmax.f32 %v3484_v34, 0.0  ;;  %8031 = vmatpush1.bf16.msra.mxu0 %v8030_v11  ;;  %v3281_v37 = vpop.f32.mrb[8].mxu0  ;;  %v3394_v48 = vpop.f32.mrb[8].mxu1  ;;  %v3628_v34 = vld [vmem:[#allocation13 + $0x2e8] sm:$0xff] }
 0x4dc   : > { %v3487_v20 = vadd.f32 %v11073_v10, %v3281_v37  ;;  %v11110_v38 = vadd.f32 %v11066_v5, %v3394_v48  ;;  %v3283_v46 = vpop.f32.mrb[9].mxu0  ;;  %v11112_v12 = vpop.f32.mrb[9].mxu1  ;;  %8033 = vmatprep.subr.bf16.mxu0 %v8032_v19  ;;  %v3625_v19 = vld [vmem:[#allocation13 + $0x2d0] sm:$0xff] }
 0x4dd   : > { %v3488_v28 = vadd.f32 %v11078_v18, %v3283_v46  ;;  %3745 = vmatprep.mubr.f32.mxu0 %v3516_v36  ;;  %v8046_v48 = vpack.c.bf16 %v3625_v19, %v3623_v16  ;;  %v3648_v16 = vld [vmem:[#allocation13 + $0x388] sm:$0xff]  ;;  %v3650_v19 = vld [vmem:[#allocation13 + $0x398] sm:$0xff] }
 0x4de   : > { %3746 = vmatmul.mubr.f32.gmra.mrb[22].mxu0 %v3515_v26  ;;  %v3519_v54 = vmax.f32 %v3487_v20, 0.0  ;;  %v3521_v8 = vmax.f32 %v11110_v38, 0.0 }
 0x4df   : > { %v3520_v56 = vmax.f32 %v3488_v28, 0.0  ;;  %8035 = vmatpush1.bf16.msra.mxu0 %v8034_v35  ;;  %v3287_v50 = vpop.f32.mrb[10].mxu0  ;;  %v3400_v51 = vpop.f32.mrb[10].mxu1  ;;  %v3474_v28 = vadd.f32 %v11130_v13, %v11084_v31 }
 0x4e0   : > { %v3491_v57 = vadd.f32 %v11073_v10, %v3287_v50  ;;  %v11117_v59 = vadd.f32 %v11066_v5, %v3400_v51  ;;  %v3289_v61 = vpop.f32.mrb[11].mxu0  ;;  %v11119_v2 = vpop.f32.mrb[11].mxu1  ;;  %8037 = vmatprep.subr.bf16.mxu0 %v8036_v55  ;;  %v8048_v55 = vpack.c.bf16 %v3630_v30, %v3628_v34  ;;  %v8068_v34 = vpack.c.bf16 %v3650_v19, %v3648_v16  ;;  %v3647_v30 = vld [vmem:[#allocation13 + $0x380] sm:$0xff] }
 0x4e1   : > { %v3492_v62 = vadd.f32 %v11078_v18, %v3289_v61  ;;  %3751 = vmatprep.mubr.f32.mxu0 %v3520_v56  ;;  %v3634_v56 = vld [vmem:[#allocation13 + $0x318] sm:$0xff]  ;;  %v3636_v61 = vld [vmem:[#allocation13 + $0x328] sm:$0xff] }
 0x4e2   : > { %3752 = vmatmul.mubr.f32.gmra.mrb[24].mxu0 %v3519_v54  ;;  %v3523_v23 = vmax.f32 %v3491_v57, 0.0  ;;  %v8052_v51 = vpack.c.bf16 %v3634_v56, %v3632_v39  ;;  %v3633_v54 = vld [vmem:[#allocation13 + $0x310] sm:$0xff]  ;;  %v3506_v57 = vmax.f32 %v3474_v28, 0.0  ;;  %v3660_v56 = vld [vmem:[#allocation13 + $0x3e8] sm:$0xff] }
 0x4e3   : > { %v3524_v9 = vmax.f32 %v3492_v62, 0.0  ;;  %8039 = vmatpush1.bf16.msra.mxu0 %v8038_v53  ;;  %v3293_v47 = vpop.f32.mrb[12].mxu0  ;;  %v3406_v7 = vpop.f32.mrb[12].mxu1  ;;  %v3631_v53 = vld [vmem:[#allocation13 + $0x300] sm:$0xff]  ;;  %v3642_v62 = vld [vmem:[#allocation13 + $0x358] sm:$0xff]  ;;  %v3657_v39 = vld [vmem:[#allocation13 + $0x3d0] sm:$0xff] }
 0x4e4   : > { %v3495_v21 = vadd.f32 %v11073_v10, %v3293_v47  ;;  %v11125_v0 = vadd.f32 %v11066_v5, %v3406_v7  ;;  %v3295_v11 = vpop.f32.mrb[13].mxu0  ;;  %v11127_v40 = vpop.f32.mrb[13].mxu1  ;;  %8041 = vmatprep.subr.bf16.mxu0 %v8040_v60  ;;  %v3638_v60 = vld [vmem:[#allocation13 + $0x338] sm:$0xff]  ;;  %v8060_v45 = vpack.c.bf16 %v3642_v62, %v3640_v25  ;;  %v3641_v47 = vld [vmem:[#allocation13 + $0x350] sm:$0xff]  ;;  %v3644_v7 = vld [vmem:[#allocation13 + $0x368] sm:$0xff]  ;;  %v3513_v25 = vmax.f32 %v11096_v63, 0.0 }
 0x4e5   : > { %v3496_v33 = vadd.f32 %v11078_v18, %v3295_v11  ;;  %3757 = vmatprep.mubr.f32.mxu0 %v3524_v9  ;;  %v8056_v31 = vpack.c.bf16 %v3638_v60, %v3636_v61  ;;  %v3639_v9 = vld [vmem:[#allocation13 + $0x340] sm:$0xff]  ;;  %v3505_v61 = vmax.f32 %v11082_v32, 0.0  ;;  %v3490_v32 = vadd.f32 %v11130_v13, %v11112_v12 }
 0x4e6   : > { %3758 = vmatmul.mubr.f32.gmra.mrb[26].mxu0 %v3523_v23  ;;  %v3527_v35 = vmax.f32 %v3495_v21, 0.0  ;;  %v8062_v23 = vpack.c.bf16 %v3641_v47, %v3639_v9  ;;  %v3643_v11 = vld [vmem:[#allocation13 + $0x360] sm:$0xff]  ;;  %v3498_v63 = vadd.f32 %v11130_v13, %v11127_v40  ;;  %v3525_v12 = vmax.f32 %v11117_v59, 0.0 }
 0x4e7   : > { %v3528_v22 = vmax.f32 %v3496_v33, 0.0  ;;  %8043 = vmatpush1.bf16.msra.mxu0 %v8042_v15  ;;  %v3299_v36 = vpop.f32.mrb[14].mxu0  ;;  %v3412_v37 = vpop.f32.mrb[14].mxu1  ;;  %v3646_v15 = vld [vmem:[#allocation13 + $0x378] sm:$0xff]  ;;  %v3522_v62 = vmax.f32 %v3490_v32, 0.0 }
 0x4e8   : > { %v3499_v26 = vadd.f32 %v11073_v10, %v3299_v36  ;;  %v11135_v20 = vadd.f32 %v11066_v5, %v3412_v37  ;;  %v3301_v46 = vpop.f32.mrb[15].mxu0  ;;  %v11137_v17 = vpop.f32.mrb[15].mxu1  ;;  %8045 = vmatprep.subr.bf16.mxu0 %v8044_v3  ;;  %v8050_v5 = vpack.c.bf16 %v3629_v58, %v3627_v49  ;;  %v8064_v21 = vpack.c.bf16 %v3646_v15, %v3644_v7  ;;  %v3645_v3 = vld [vmem:[#allocation13 + $0x370] sm:$0xff]  ;;  %v3652_v36 = vld [vmem:[#allocation13 + $0x3a8] sm:$0xff]  ;;  %v3654_v37 = vld [vmem:[#allocation13 + $0x3b8] sm:$0xff] }
 0x4e9   : > { %v3500_v42 = vadd.f32 %v11078_v18, %v3301_v46  ;;  %3763 = vmatprep.mubr.f32.mxu0 %v3528_v22  ;;  %v8054_v18 = vpack.c.bf16 %v3633_v54, %v3631_v53  ;;  %v8066_v33 = vpack.c.bf16 %v3645_v3, %v3643_v11  ;;  %v3649_v22 = vld [vmem:[#allocation13 + $0x390] sm:$0xff]  ;;  %v3658_v49 = vld [vmem:[#allocation13 + $0x3d8] sm:$0xff] }
 0x4ea   : > { %3764 = vmatmul.mubr.f32.gmra.mrb[28].mxu0 %v3527_v35  ;;  %v3531_v50 = vmax.f32 %v3499_v26, 0.0  ;;  %v8072_v35 = vpack.c.bf16 %v3654_v37, %v3652_v36  ;;  %v3651_v26 = vld [vmem:[#allocation13 + $0x3a0] sm:$0xff]  ;;  %v3653_v46 = vld [vmem:[#allocation13 + $0x3b0] sm:$0xff]  ;;  %v3533_v38 = vmax.f32 %v11135_v20, 0.0 }
 0x4eb   : > { %v3532_v10 = vmax.f32 %v3500_v42, 0.0  ;;  %8047 = vmatpush1.bf16.msra.mxu0 %v8046_v48  ;;  %v8070_v48 = vpack.c.bf16 %v3649_v22, %v3647_v30  ;;  %v8074_v58 = vpack.c.bf16 %v3653_v46, %v3651_v26  ;;  %v3655_v42 = vld [vmem:[#allocation13 + $0x3c0] sm:$0xff]  ;;  %v3661_v53 = vld [vmem:[#allocation13 + $0x3f0] sm:$0xff] }
 0x4ec   : > { %8049 = vmatprep.subr.bf16.mxu0 %v8048_v55  ;;  %v3656_v55 = vld [vmem:[#allocation13 + $0x3c8] sm:$0xff]  ;;  %v4092_v37 = vld [vmem:[#allocation16 + $0x208] sm:$0xff] }
 0x4ed   : > { %3769 = vmatprep.mubr.f32.mxu0 %v3532_v10  ;;  %v8076_v28 = vpack.c.bf16 %v3658_v49, %v3656_v55  ;;  %v3662_v10 = vld [vmem:[#allocation13 + $0x3f8] sm:$0xff] }
 0x4ee   : > { %3770 = vmatmul.mubr.f32.gmra.mrb[30].mxu0 %v3531_v50  ;;  %v8080_v50 = vpack.c.bf16 %v3662_v10, %v3660_v56  ;;  %v3889_v56 = vld [vmem:[#allocation14] sm:$0xff] }
 0x4ef   : > { %8051 = vmatpush1.bf16.msra.mxu0 %v8050_v5  ;;  %3840 = vmatprep.mubr.f32.mxu0 %v3506_v57  ;;  %v8078_v5 = vpack.c.bf16 %v3657_v39, %v3655_v42  ;;  %v3478_v57 = vadd.f32 %v11130_v13, %v11091_v14  ;;  %v3518_v14 = vmax.f32 %v3486_v52, 0.0  ;;  %v4096_v42 = vld [vmem:[#allocation16 + $0x228] sm:$0xff]  ;;  %v4098_v39 = vld [vmem:[#allocation16 + $0x238] sm:$0xff] }
 0x4f0   : > { %8053 = vmatprep.subr.bf16.mxu0 %v8052_v51  ;;  %v3659_v51 = vld [vmem:[#allocation13 + $0x3e0] sm:$0xff] }
 0x4f1   : > { %v8082_v54 = vpack.c.bf16 %v3661_v53, %v3659_v51  ;;  %v3510_v60 = vmax.f32 %v3478_v57, 0.0  ;;  %v4097_v51 = vld [vmem:[#allocation16 + $0x230] sm:$0xff]  ;;  %v4100_v53 = vld [vmem:[#allocation16 + $0x248] sm:$0xff]  ;;  %v3890_v57 = vld [vmem:[#allocation14 + $0x8] sm:$0xff] }
 0x4f2   : > { %v4106_v52 = vld [vmem:[#allocation16 + $0x278] sm:$0xff] }
 0x4f3   : > { %8055 = vmatpush1.bf16.msra.mxu0 %v8054_v18  ;;  %v3482_v18 = vadd.f32 %v11130_v13, %v11098_v4  ;;  %v3517_v4 = vmax.f32 %v11103_v29, 0.0  ;;  %v3502_v29 = vadd.f32 %v11130_v13, %v11137_v17 }
 0x4f4   : > { %8057 = vmatprep.subr.bf16.mxu0 %v8056_v31  ;;  %v3509_v31 = vmax.f32 %v11089_v44, 0.0  ;;  %v3494_v44 = vadd.f32 %v11130_v13, %v11119_v2  ;;  %v3529_v2 = vmax.f32 %v11125_v0, 0.0 }
 0x4f5   : > { %v3514_v27 = vmax.f32 %v3482_v18, 0.0  ;;  %v3534_v9 = vmax.f32 %v3502_v29, 0.0  ;;  %v4099_v18 = vld [vmem:[#allocation16 + $0x240] sm:$0xff]  ;;  %v4109_v29 = vld [vmem:[#allocation16 + $0x290] sm:$0xff] }
 0x4f7   : > { %8059 = vmatpush1.bf16.msra.mxu0 %v8058_v41  ;;  %v3526_v41 = vmax.f32 %v3494_v44, 0.0  ;;  %v4108_v44 = vld [vmem:[#allocation16 + $0x288] sm:$0xff] }
 0x4f8   : > { %8061 = vmatprep.subr.bf16.mxu0 %v8060_v45  ;;  %v3530_v45 = vmax.f32 %v3498_v63, 0.0 }
 0x4fb   : > { %8063 = vmatpush1.bf16.msra.mxu0 %v8062_v23 }
 0x4fc   : > { %8065 = vmatprep.subr.bf16.mxu0 %v8064_v21 }
 0x4ff   : > { %8067 = vmatpush1.bf16.msra.mxu0 %v8066_v33 }
 0x500   : > { %8069 = vmatprep.subr.bf16.mxu0 %v8068_v34 }
 0x503   : > { %8071 = vmatpush1.bf16.msra.mxu0 %v8070_v48  ;;  %v4094_v48 = vld [vmem:[#allocation16 + $0x218] sm:$0xff] }
 0x504   : > { %8073 = vmatprep.subr.bf16.mxu0 %v8072_v35  ;;  %v8100_v49 = vpack.c.bf16 %v4094_v48, %v4092_v37  ;;  %v4123_v37 = vld [vmem:[#allocation16 + $0x300] sm:$0xff]  ;;  %v4125_v48 = vld [vmem:[#allocation16 + $0x310] sm:$0xff] }
 0x507   : > { %8075 = vmatpush1.bf16.msra.mxu0 %v8074_v58  ;;  %v4091_v58 = vld [vmem:[#allocation16 + $0x200] sm:$0xff] }
 0x508   : > { %8077 = vmatprep.subr.bf16.mxu0 %v8076_v28  ;;  %v4093_v28 = vld [vmem:[#allocation16 + $0x210] sm:$0xff] }
 0x509   : > { %v8102_v10 = vpack.c.bf16 %v4093_v28, %v4091_v58  ;;  %v4129_v58 = vld [vmem:[#allocation16 + $0x330] sm:$0xff]  ;;  %v4132_v28 = vld [vmem:[#allocation16 + $0x348] sm:$0xff] }
 0x50b   : > { %8079 = vmatpush1.bf16.msra.mxu0 %v8078_v5  ;;  %v8104_v5 = vpack.c.bf16 %v4098_v39, %v4096_v42  ;;  %v4134_v42 = vld [vmem:[#allocation16 + $0x358] sm:$0xff] }
 0x50c   : > { %8081 = vmatprep.subr.bf16.mxu0 %v8080_v50  ;;  %v4095_v50 = vld [vmem:[#allocation16 + $0x220] sm:$0xff] }
 0x50f   : > { %8083 = vmatpush1.bf16.msra.mxu0 %v8082_v54  ;;  %v4102_v54 = vld [vmem:[#allocation16 + $0x258] sm:$0xff] }
 0x512   : > { %3841 = vmatmul.mubr.f32.vlgmr.msra.gmra.mrb[16].mxu0 %v3505_v61  ;;  %v8106_v61 = vpack.c.bf16 %v4097_v51, %v4095_v50  ;;  %v4136_v50 = vld [vmem:[#allocation16 + $0x368] sm:$0xff]  ;;  %v4138_v51 = vld [vmem:[#allocation16 + $0x378] sm:$0xff] }
 0x513   : > { %3846 = vmatprep.mubr.f32.mxu0 %v3510_v60  ;;  %v8108_v60 = vpack.c.bf16 %v4102_v54, %v4100_v53  ;;  %v8144_v54 = vpack.c.bf16 %v4138_v51, %v4136_v50 }
 0x516   : > { %3847 = vmatmul.mubr.f32.gmra.mrb[18].mxu0 %v3509_v31  ;;  %v4101_v31 = vld [vmem:[#allocation16 + $0x250] sm:$0xff] }
 0x517   : > { %3852 = vmatprep.mubr.f32.mxu0 %v3514_v27  ;;  %v4104_v27 = vld [vmem:[#allocation16 + $0x268] sm:$0xff] }
 0x518   : > { %v8112_v32 = vpack.c.bf16 %v4106_v52, %v4104_v27  ;;  %v4139_v27 = vld [vmem:[#allocation16 + $0x380] sm:$0xff] }
 0x51a   : > { %3853 = vmatmul.mubr.f32.gmra.mrb[20].mxu0 %v3513_v25  ;;  %v3891_v25 = vld [vmem:[#allocation14 + $0x10] sm:$0xff] }
 0x51b   : > { %3858 = vmatprep.mubr.f32.mxu0 %v3518_v14  ;;  %v8110_v14 = vpack.c.bf16 %v4101_v31, %v4099_v18  ;;  %v4140_v18 = vld [vmem:[#allocation16 + $0x388] sm:$0xff]  ;;  %v4142_v31 = vld [vmem:[#allocation16 + $0x398] sm:$0xff] }
 0x51c   : > { %v8148_v52 = vpack.c.bf16 %v4142_v31, %v4140_v18  ;;  %v4031_v18 = vld [vmem:[#allocation16 + $0x48] sm:$0xff]  ;;  %v4033_v31 = vld [vmem:[#allocation16 + $0x58] sm:$0xff] }
 0x51e   : > { %3859 = vmatmul.mubr.f32.gmra.mrb[22].mxu0 %v3517_v4  ;;  %v4103_v4 = vld [vmem:[#allocation16 + $0x260] sm:$0xff] }
 0x51f   : > { %3864 = vmatprep.mubr.f32.mxu0 %v3522_v62  ;;  %v4105_v62 = vld [vmem:[#allocation16 + $0x270] sm:$0xff] }
 0x520   : > { %v8114_v63 = vpack.c.bf16 %v4105_v62, %v4103_v4  ;;  %v4146_v4 = vld [vmem:[#allocation16 + $0x3b8] sm:$0xff]  ;;  %v4143_v62 = vld [vmem:[#allocation16 + $0x3a0] sm:$0xff] }
 0x522   : > { %3865 = vmatmul.mubr.f32.gmra.mrb[24].mxu0 %v3521_v8  ;;  %v4110_v8 = vld [vmem:[#allocation16 + $0x298] sm:$0xff] }
 0x523   : > { %3870 = vmatprep.mubr.f32.mxu0 %v3526_v41  ;;  %v3892_v41 = vld [vmem:[#allocation14 + $0x18] sm:$0xff] }
 0x526   : > { %3871 = vmatmul.mubr.f32.gmra.mrb[26].mxu0 %v3525_v12  ;;  %v8116_v12 = vpack.c.bf16 %v4110_v8, %v4108_v44  ;;  %v4145_v8 = vld [vmem:[#allocation16 + $0x3b0] sm:$0xff] }
 0x527   : > { %3876 = vmatprep.mubr.f32.mxu0 %v3530_v45  ;;  %v4107_v45 = vld [vmem:[#allocation16 + $0x280] sm:$0xff] }
 0x52a   : > { %3877 = vmatmul.mubr.f32.gmra.mrb[28].mxu0 %v3529_v2  ;;  %v4112_v2 = vld [vmem:[#allocation16 + $0x2a8] sm:$0xff] }
 0x52b   : > { %3882 = vmatprep.mubr.f32.mxu0 %v3534_v9  ;;  %v4114_v9 = vld [vmem:[#allocation16 + $0x2b8] sm:$0xff] }
 0x52e   : > { %3883 = vmatmul.mubr.f32.gmra.mrb[30].mxu0 %v3533_v38  ;;  %v3893_v38 = vld [vmem:[#allocation14 + $0x20] sm:$0xf] }
 0x5e5   : > { %v3842_v47 = vpop.f32.mrb[16].mxu0 }
 0x5e6   : > { %v3844_v40 = vpop.f32.mrb[17].mxu0 }
 0x5e9   : > { %v3848_v7 = vpop.f32.mrb[18].mxu0 }
 0x5ea   : > { %v8086_v15 = vpack.c.bf16 %v3848_v7, %v3842_v47  ;;  %v3850_v23 = vpop.f32.mrb[19].mxu0  ;;  %v8118_v47 = vpack.c.bf16 %v4109_v29, %v4107_v45  ;;  %v4111_v7 = vld [vmem:[#allocation16 + $0x2a0] sm:$0xff] }
 0x5eb   : > { %v8084_v59 = vpack.c.bf16 %v3850_v23, %v3844_v40  ;;  %v8120_v40 = vpack.c.bf16 %v4114_v9, %v4112_v2  ;;  %v4116_v23 = vld [vmem:[#allocation16 + $0x2c8] sm:$0xff]  ;;  %v4147_v45 = vld [vmem:[#allocation16 + $0x3c0] sm:$0xff]  ;;  %v4149_v2 = vld [vmem:[#allocation16 + $0x3d0] sm:$0xff] }
 0x5ec   : > { %v8158_v9 = vpack.c.bf16 %v4149_v2, %v4147_v45  ;;  %v8172_v45 = vpack.c.bf16 %v4033_v31, %v4031_v18  ;;  %v4032_v2 = vld [vmem:[#allocation16 + $0x50] sm:$0xff] }
 0x5ed   : > { %v3854_v21 = vpop.f32.mrb[20].mxu0  ;;  %8085 = vmatprep.subr.bf16.mxu1 %v8084_v59  ;;  %v4118_v59 = vld [vmem:[#allocation16 + $0x2d8] sm:$0xff] }
 0x5ee   : > { %v3856_v11 = vpop.f32.mrb[21].mxu0  ;;  %8087 = vmatpush1.bf16.msra.mxu1 %v8086_v15  ;;  %v4113_v15 = vld [vmem:[#allocation16 + $0x2b0] sm:$0xff] }
 0x5f1   : > { %v3860_v13 = vpop.f32.mrb[22].mxu0 }
 0x5f2   : > { %v8090_v17 = vpack.c.bf16 %v3860_v13, %v3854_v21  ;;  %v3862_v3 = vpop.f32.mrb[23].mxu0  ;;  %v8122_v21 = vpack.c.bf16 %v4113_v15, %v4111_v7  ;;  %v4115_v13 = vld [vmem:[#allocation16 + $0x2c0] sm:$0xff]  ;;  %v4153_v15 = vld [vmem:[#allocation16 + $0x3f0] sm:$0xff] }
 0x5f3   : > { %v8088_v0 = vpack.c.bf16 %v3862_v3, %v3856_v11  ;;  %v8124_v11 = vpack.c.bf16 %v4118_v59, %v4116_v23  ;;  %v4120_v3 = vld [vmem:[#allocation16 + $0x2e8] sm:$0xff] }
 0x5f4   : > { %v4023_v59 = vld [vmem:[#allocation16 + $0x8] sm:$0xff] }
 0x5f5   : > { %v3866_v16 = vpop.f32.mrb[24].mxu0  ;;  %8089 = vmatprep.subr.bf16.mxu1 %v8088_v0  ;;  %v4122_v0 = vld [vmem:[#allocation16 + $0x2f8] sm:$0xff] }
 0x5f6   : > { %v3868_v19 = vpop.f32.mrb[25].mxu0  ;;  %8091 = vmatpush1.bf16.msra.mxu1 %v8090_v17  ;;  %v4117_v17 = vld [vmem:[#allocation16 + $0x2d0] sm:$0xff] }
 0x5f9   : > { %v3872_v20 = vpop.f32.mrb[26].mxu0 }
 0x5fa   : > { %v8094_v33 = vpack.c.bf16 %v3872_v20, %v3866_v16  ;;  %v3874_v34 = vpop.f32.mrb[27].mxu0  ;;  %v8126_v16 = vpack.c.bf16 %v4117_v17, %v4115_v13  ;;  %v4119_v20 = vld [vmem:[#allocation16 + $0x2e0] sm:$0xff] }
 0x5fb   : > { %v8092_v30 = vpack.c.bf16 %v3874_v34, %v3868_v19  ;;  %v8128_v19 = vpack.c.bf16 %v4122_v0, %v4120_v3  ;;  %v4124_v34 = vld [vmem:[#allocation16 + $0x308] sm:$0xff] }
 0x5fd   : > { %v3878_v22 = vpop.f32.mrb[28].mxu0  ;;  %8093 = vmatprep.subr.bf16.mxu1 %v8092_v30  ;;  %v4126_v30 = vld [vmem:[#allocation16 + $0x318] sm:$0xff] }
 0x5fe   : > { %v3880_v36 = vpop.f32.mrb[29].mxu0  ;;  %8095 = vmatpush1.bf16.msra.mxu1 %v8094_v33  ;;  %v4121_v33 = vld [vmem:[#allocation16 + $0x2f0] sm:$0xff] }
 0x601   : > { %v3884_v35 = vpop.f32.mrb[30].mxu0 }
 0x602   : > { %v8098_v26 = vpack.c.bf16 %v3884_v35, %v3878_v22  ;;  %v3886_v46 = vpop.f32.mrb[31].mxu0  ;;  %v8130_v22 = vpack.c.bf16 %v4121_v33, %v4119_v20  ;;  %v4128_v35 = vld [vmem:[#allocation16 + $0x328] sm:$0xff]  ;;  %v4024_v20 = vld [vmem:[#allocation16 + $0x10] sm:$0xff] }
 0x603   : > { %v8096_v55 = vpack.c.bf16 %v3886_v46, %v3880_v36  ;;  %v8132_v36 = vpack.c.bf16 %v4126_v30, %v4124_v34  ;;  %v8134_v46 = vpack.c.bf16 %v4125_v48, %v4123_v37  ;;  %v4027_v33 = vld [vmem:[#allocation16 + $0x28] sm:$0xff] }
 0x605   : > { %8097 = vmatprep.subr.bf16.mxu1 %v8096_v55 }
 0x606   : > { %8099 = vmatpush1.bf16.msra.mxu1 %v8098_v26  ;;  %v4130_v26 = vld [vmem:[#allocation16 + $0x338] sm:$0xff] }
 0x607   : > { %8101 = vmatprep.subr.bf16.mxu1 %v8100_v49  ;;  %v8136_v55 = vpack.c.bf16 %v4130_v26, %v4128_v35  ;;  %v4127_v49 = vld [vmem:[#allocation16 + $0x320] sm:$0xff] }
 0x608   : > { %v8138_v39 = vpack.c.bf16 %v4129_v58, %v4127_v49 }
 0x609   : > { %7040 = vmatmul.mubr.msk.f32.vlgmr.msra.gmra.mrb[16].mxu1 %vm1294_vm3, %v3889_v56  ;;  %v8140_v56 = vpack.c.bf16 %v4134_v42, %v4132_v28 }
 0x60a   : > { %3979 = vmatprep.mubr.f32.mxu1 %v9925_v1  ;;  %8103 = vmatpush1.bf16.msra.mxu1 %v8102_v10  ;;  %v4131_v10 = vld [vmem:[#allocation16 + $0x340] sm:$0xff] }
 0x60b   : > { %8105 = vmatprep.subr.bf16.mxu1 %v8104_v5  ;;  %v4133_v5 = vld [vmem:[#allocation16 + $0x350] sm:$0xff] }
 0x60c   : > { %v8142_v53 = vpack.c.bf16 %v4133_v5, %v4131_v10  ;;  %v4026_v10 = vld [vmem:[#allocation16 + $0x20] sm:$0xff]  ;;  %v4028_v5 = vld [vmem:[#allocation16 + $0x30] sm:$0xff] }
 0x60d   : > { %7041 = vmatmul.mubr.msk.f32.gmra.mrb[18].mxu1 %vm1294_vm3, %v3890_v57  ;;  %v4135_v57 = vld [vmem:[#allocation16 + $0x360] sm:$0xff] }
 0x60e   : > { %3985 = vmatprep.mubr.f32.mxu1 %v9925_v1  ;;  %8107 = vmatpush1.bf16.msra.mxu1 %v8106_v61  ;;  %v4137_v61 = vld [vmem:[#allocation16 + $0x370] sm:$0xff] }
 0x60f   : > { %8109 = vmatprep.subr.bf16.mxu1 %v8108_v60  ;;  %v8146_v60 = vpack.c.bf16 %v4137_v61, %v4135_v57 }
 0x611   : > { %7042 = vmatmul.mubr.msk.f32.gmra.mrb[20].mxu1 %vm1294_vm3, %v3891_v25  ;;  %v4141_v25 = vld [vmem:[#allocation16 + $0x390] sm:$0xff] }
 0x612   : > { %3991 = vmatprep.mubr.f32.mxu1 %v9925_v1  ;;  %8111 = vmatpush1.bf16.msra.mxu1 %v8110_v14  ;;  %v8150_v14 = vpack.c.bf16 %v4141_v25, %v4139_v27  ;;  %v8170_v25 = vpack.c.bf16 %v4028_v5, %v4026_v10 }
 0x613   : > { %8113 = vmatprep.subr.bf16.mxu1 %v8112_v32  ;;  %v4144_v32 = vld [vmem:[#allocation16 + $0x3a8] sm:$0xff] }
 0x614   : > { %v8152_v44 = vpack.c.bf16 %v4146_v4, %v4144_v32 }
 0x615   : > { %7043 = vmatmul.mubr.msk.f32.gmra.mrb[22].mxu1 %vm1294_vm3, %v3892_v41  ;;  %v8154_v41 = vpack.c.bf16 %v4145_v8, %v4143_v62 }
 0x616   : > { %3997 = vmatprep.mubr.f32.mxu1 %v9925_v1  ;;  %8115 = vmatpush1.bf16.msra.mxu1 %v8114_v63  ;;  %v4148_v63 = vld [vmem:[#allocation16 + $0x3c8] sm:$0xff] }
 0x617   : > { %8117 = vmatprep.subr.bf16.mxu1 %v8116_v12  ;;  %v4150_v12 = vld [vmem:[#allocation16 + $0x3d8] sm:$0xff] }
 0x618   : > { %v8156_v29 = vpack.c.bf16 %v4150_v12, %v4148_v63 }
 0x619   : > { %7044 = vmatmul.mubr.msk.f32.gmra.mrb[24].mxu1 %vm1294_vm3, %v3893_v38  ;;  %v4152_v38 = vld [vmem:[#allocation16 + $0x3e8] sm:$0xff] }
 0x61a   : > { %8119 = vmatpush1.bf16.msra.mxu1 %v8118_v47  ;;  %v4154_v47 = vld [vmem:[#allocation16 + $0x3f8] sm:$0xff] }
 0x61b   : > { %8121 = vmatprep.subr.bf16.mxu1 %v8120_v40  ;;  %v4151_v40 = vld [vmem:[#allocation16 + $0x3e0] sm:$0xff]  ;;  %v8160_v7 = vpack.c.bf16 %v4154_v47, %v4152_v38 }
 0x61c   : > { %v8162_v23 = vpack.c.bf16 %v4153_v15, %v4151_v40 }
 0x61e   : > { %8123 = vmatpush1.bf16.msra.mxu1 %v8122_v21  ;;  %v4025_v21 = vld [vmem:[#allocation16 + $0x18] sm:$0xff] }
 0x61f   : > { %8125 = vmatprep.subr.bf16.mxu1 %v8124_v11  ;;  %v8164_v11 = vpack.c.bf16 %v4025_v21, %v4023_v59 }
 0x622   : > { %8127 = vmatpush1.bf16.msra.mxu1 %v8126_v16 }
 0x623   : > { %8129 = vmatprep.subr.bf16.mxu1 %v8128_v19  ;;  %v4022_v19 = vld [vmem:[#allocation16] sm:$0xff] }
 0x624   : > { %v8166_v42 = vpack.c.bf16 %v4024_v20, %v4022_v19 }
 0x626   : > { %8131 = vmatpush1.bf16.msra.mxu1 %v8130_v22 }
 0x627   : > { %8133 = vmatprep.subr.bf16.mxu1 %v8132_v36  ;;  %v4029_v36 = vld [vmem:[#allocation16 + $0x38] sm:$0xff] }
 0x62a   : > { %8135 = vmatpush1.bf16.msra.mxu1 %v8134_v46 }
 0x62b   : > { %8137 = vmatprep.subr.bf16.mxu1 %v8136_v55 }
 0x62e   : > { %8139 = vmatpush1.bf16.msra.mxu1 %v8138_v39  ;;  %v8168_v39 = vpack.c.bf16 %v4029_v36, %v4027_v33  ;;  %v4034_v36 = vld [vmem:[#allocation16 + $0x60] sm:$0xff] }
 0x62f   : > { %8141 = vmatprep.subr.bf16.mxu1 %v8140_v56 }
 0x632   : > { %8143 = vmatpush1.bf16.msra.mxu1 %v8142_v53 }
 0x633   : > { %8145 = vmatprep.subr.bf16.mxu1 %v8144_v54 }
 0x636   : > { %8147 = vmatpush1.bf16.msra.mxu1 %v8146_v60 }
 0x637   : > { %8149 = vmatprep.subr.bf16.mxu1 %v8148_v52 }
 0x63a   : > { %8151 = vmatpush1.bf16.msra.mxu1 %v8150_v14 }
 0x63b   : > { %8153 = vmatprep.subr.bf16.mxu1 %v8152_v44 }
 0x63e   : > { %8155 = vmatpush1.bf16.msra.mxu1 %v8154_v41 }
 0x63f   : > { %8157 = vmatprep.subr.bf16.mxu1 %v8156_v29  ;;  %v4030_v29 = vld [vmem:[#allocation16 + $0x40] sm:$0xff] }
 0x640   : > { %v8174_v19 = vpack.c.bf16 %v4032_v2, %v4030_v29 }
 0x642   : > { %8159 = vmatpush1.bf16.msra.mxu1 %v8158_v9  ;;  %v4035_v9 = vld [vmem:[#allocation16 + $0x68] sm:$0xff] }
 0x643   : > { %8161 = vmatprep.subr.bf16.mxu1 %v8160_v7  ;;  %v4037_v7 = vld [vmem:[#allocation16 + $0x78] sm:$0xff] }
 0x646   : > { %8163 = vmatpush1.bf16.msra.mxu1 %v8162_v23 }
 0x647   : > { %8165 = vmatprep.subr.bf16.mxu1 %v8164_v11 }
 0x6dc   : > { %v11173_v13 = vpop.f32.mrb[16].mxu1 }
 0x6dd   : > { %4004 = vst [vmem:[#allocation3] sm:$0xff] %v11173_v13  ;;  %v11176_v17 = vpop.f32.mrb[17].mxu1 }
 0x6de   : > { %4005 = vst [vmem:[#allocation3 + $0x8] sm:$0xff] %v11176_v17 }
 0x6e0   : > { %v11179_v3 = vpop.f32.mrb[18].mxu1 }
 0x6e1   : > { %v11181_v0 = vpop.f32.mrb[19].mxu1  ;;  %v4166_v16 = vrot.slane %v11179_v3, 1  ;;  %v4443_v37 = vrot.slane %v11179_v3, 2  ;;  %v4639_v41 = vrot.slane %v11179_v3, 3  ;;  %v4835_v21 = vrot.slane %v11179_v3, 4 }
 0x6e2   : > { %v4169_v30 = vrot.slane %v11181_v0, 1  ;;  %v4446_v28 = vrot.slane %v11181_v0, 2  ;;  %v4642_v8 = vrot.slane %v11181_v0, 3  ;;  %v4838_v47 = vrot.slane %v11181_v0, 4 }
 0x6e4   : > { %v11184_v34 = vpop.f32.mrb[20].mxu1  ;;  %v4086_v22 = vld [vmem:[#allocation3] sm:$0xfe] }
 0x6e5   : > { %v11188_v48 = vpop.f32.mrb[21].mxu1  ;;  %v4087_v35 = vld [vmem:[#allocation3 + $0x8] sm:$0xfe]  ;;  %v4165_v26 = vrot.slane %v4086_v22, 1  ;;  %v4171_v46 = vrot.slane %v11184_v34, 1  ;;  %v4448_v55 = vrot.slane %v11184_v34, 2  ;;  %v8176_v22 = vpack.c.bf16 %v4037_v7, %v4035_v9 }
 0x6e6   : > { %v4168_v49 = vrot.slane %v4087_v35, 1  ;;  %v4173_v58 = vrot.slane %v11188_v48, 1  ;;  %v4450_v54 = vrot.slane %v11188_v48, 2  ;;  %v4646_v15 = vrot.slane %v11188_v48, 3  ;;  %v4036_v35 = vld [vmem:[#allocation16 + $0x70] sm:$0xff] }
 0x6e7   : > { %v4172_v56 = vsel %vm1655_vm4, %v4166_v16, %v4171_v46  ;;  %v11203_v57 = vsel %vm2288_vm7, %v4443_v37, %v4448_v55  ;;  %v4167_v60 = vsel %vm1655_vm4, %v4165_v26, %v4166_v16  ;;  %v4644_v23 = vrot.slane %v11184_v34, 3  ;;  %v4044_v7 = vld [vmem:[#allocation16 + $0xb0] sm:$0xff] }
 0x6e8   : > { %v11195_v50 = vpop.f32.mrb[22].mxu1  ;;  %v4170_v51 = vsel %vm1655_vm4, %v4168_v49, %v4169_v30  ;;  %v4174_v53 = vsel %vm1655_vm4, %v4169_v30, %v4173_v58  ;;  %v11214_v32 = vsel %vm2288_vm7, %v4446_v28, %v4450_v54  ;;  %v4842_v16 = vrot.slane %v11188_v48, 4  ;;  %v4041_v49 = vld [vmem:[#allocation16 + $0x98] sm:$0xff] }
 0x6e9   : > { %v11205_v61 = vpop.f32.mrb[23].mxu1  ;;  %4255 = vmatprep.mubr.f32.mxu1 %v4170_v51  ;;  %v4175_v27 = vrot.slane %v11195_v50, 1  ;;  %v4452_v52 = vrot.slane %v11195_v50, 2  ;;  %v4648_v11 = vrot.slane %v11195_v50, 3  ;;  %v11245_v20 = vsel %vm2710_vm9, %v4642_v8, %v4646_v15 }
 0x6ea   : > { %4256 = vmatmul.mubr.f32.vlgmr.msra.gmra.mrb[26].mxu1 %v4167_v60  ;;  %v4177_v14 = vrot.slane %v11205_v61, 1  ;;  %v4454_v4 = vrot.slane %v11205_v61, 2  ;;  %v4650_v59 = vrot.slane %v11205_v61, 3  ;;  %v11250_v33 = vsel %vm2710_vm9, %v4639_v41, %v4644_v23  ;;  %v4040_v60 = vld [vmem:[#allocation16 + $0x90] sm:$0xff] }
 0x6eb   : > { %8167 = vmatpush1.bf16.msra.mxu1 %v8166_v42  ;;  %4261 = vmatprep.mubr.f32.mxu1 %v4174_v53  ;;  %v4176_v62 = vsel %vm1655_vm4, %v4171_v46, %v4175_v27  ;;  %v11223_v44 = vsel %vm2288_vm7, %v4448_v55, %v4452_v52  ;;  %v4840_v30 = vrot.slane %v11184_v34, 4  ;;  %v11261_v46 = vsel %vm2710_vm9, %v4644_v23, %v4648_v11  ;;  %v4039_v55 = vld [vmem:[#allocation16 + $0x88] sm:$0xff]  ;;  %v4049_v23 = vld [vmem:[#allocation16 + $0xd8] sm:$0xff] }
 0x6ec   : > { %v3999_v63 = vpop.f32.mrb[24].mxu1  ;;  %8169 = vmatprep.subr.bf16.mxu1 %v8168_v39  ;;  %v4178_v12 = vsel %vm1655_vm4, %v4173_v58, %v4177_v14  ;;  %v11233_v38 = vsel %vm2288_vm7, %v4450_v54, %v4454_v4  ;;  %v11256_v26 = vsel %vm2710_vm9, %v4646_v15, %v4650_v59  ;;  %v11266_v58 = vsel %vm3132_vm10, %v4838_v47, %v4842_v16  ;;  %v4038_v54 = vld [vmem:[#allocation16 + $0x80] sm:$0xff]  ;;  %v4047_v15 = vld [vmem:[#allocation16 + $0xc8] sm:$0xff] }
 0x6ed   : > { %4012 = vst [vmem:[#allocation3 + $0x40] sm:$0xf] %v3999_v63  ;;  %v4001_v40 = vpop.f32.mrb[25].mxu1  ;;  %v11271_v42 = vsel %vm3132_vm10, %v4835_v21, %v4840_v30  ;;  %v4846_v39 = vrot.slane %v11205_v61, 4  ;;  %v8178_v10 = vpack.c.bf16 %v4036_v35, %v4034_v36  ;;  %v8180_v53 = vpack.c.bf16 %v4041_v49, %v4039_v55  ;;  %v4045_v63 = vld [vmem:[#allocation16 + $0xb8] sm:$0xff]  ;;  %v4050_v55 = vld [vmem:[#allocation16 + $0xe0] sm:$0xff] }
 0x6ee   : > { %4013 = vst [vmem:[#allocation3 + $0x48] sm:$0xf] %v4001_v40  ;;  %4262 = vmatmul.mubr.f32.gmra.mrb[28].mxu1 %v4172_v56  ;;  %v4844_v56 = vrot.slane %v11195_v50, 4  ;;  %v8182_v29 = vpack.c.bf16 %v4040_v60, %v4038_v54  ;;  %v4042_v40 = vld [vmem:[#allocation16 + $0xa0] sm:$0xff]  ;;  %v4053_v36 = vld [vmem:[#allocation16 + $0xf8] sm:$0xff]  ;;  %v4052_v49 = vld [vmem:[#allocation16 + $0xf0] sm:$0xff] }
 0x6ef   : > { %8171 = vmatpush1.bf16.msra.mxu1 %v8170_v25  ;;  %4267 = vmatprep.mubr.f32.mxu1 %v4178_v12  ;;  %v11278_v5 = vsel %vm3132_vm10, %v4842_v16, %v4846_v39  ;;  %v8186_v16 = vpack.c.bf16 %v4044_v7, %v4042_v40  ;;  %v4054_v54 = vld [vmem:[#allocation16 + $0x100] sm:$0xff]  ;;  %v4056_v60 = vld [vmem:[#allocation16 + $0x110] sm:$0xff] }
 0x6f0   : > { %8173 = vmatprep.subr.bf16.mxu1 %v8172_v45  ;;  %v11283_v18 = vsel %vm3132_vm10, %v4840_v30, %v4844_v56  ;;  %v4048_v30 = vld [vmem:[#allocation16 + $0xd0] sm:$0xff]  ;;  %v4062_v7 = vld [vmem:[#allocation16 + $0x140] sm:$0xff] }
 0x6f2   : > { %4268 = vmatmul.mubr.f32.gmra.mrb[30].mxu1 %v4176_v62  ;;  %v4043_v62 = vld [vmem:[#allocation16 + $0xa8] sm:$0xff] }
 0x6f3   : > { %8175 = vmatpush1.bf16.msra.mxu1 %v8174_v19  ;;  %v8184_v9 = vpack.c.bf16 %v4045_v63, %v4043_v62  ;;  %v4046_v19 = vld [vmem:[#allocation16 + $0xc0] sm:$0xff]  ;;  %v8198_v62 = vpack.c.bf16 %v4056_v60, %v4054_v54 }
 0x6f4   : > { %8177 = vmatprep.subr.bf16.mxu1 %v8176_v22  ;;  %v4088_v51 = vld [vmem:[#allocation3 + $0x40] sm:$0x1]  ;;  %v4051_v22 = vld [vmem:[#allocation16 + $0xe8] sm:$0xff] }
 0x6f5   : > { %v4089_v31 = vld [vmem:[#allocation3 + $0x48] sm:$0x1]  ;;  %v4179_v25 = vrot.slane %v4088_v51, 1  ;;  %v8192_v35 = vpack.c.bf16 %v4053_v36, %v4051_v22  ;;  %v4057_v51 = vld [vmem:[#allocation16 + $0x118] sm:$0xff]  ;;  %v4068_v22 = vld [vmem:[#allocation16 + $0x170] sm:$0xff] }
 0x6f6   : > { %v4181_v12 = vrot.slane %v4089_v31, 1  ;;  %v4059_v31 = vld [vmem:[#allocation16 + $0x128] sm:$0xff]  ;;  %v4074_v60 = vld [vmem:[#allocation16 + $0x1a0] sm:$0xff] }
 0x6f7   : > { %v4180_v45 = vsel %vm1655_vm4, %v4175_v27, %v4179_v25  ;;  %8179 = vmatpush1.bf16.msra.mxu1 %v8178_v10  ;;  %v8188_v27 = vpack.c.bf16 %v4049_v23, %v4047_v15  ;;  %v4055_v10 = vld [vmem:[#allocation16 + $0x108] sm:$0xff]  ;;  %v4061_v25 = vld [vmem:[#allocation16 + $0x138] sm:$0xff]  ;;  %v4064_v15 = vld [vmem:[#allocation16 + $0x150] sm:$0xff] }
 0x6f8   : > { %v4182_v2 = vsel %vm1655_vm4, %v4177_v14, %v4181_v12  ;;  %8181 = vmatprep.subr.bf16.mxu1 %v8180_v53  ;;  %v8190_v14 = vpack.c.bf16 %v4048_v30, %v4046_v19  ;;  %v8194_v53 = vpack.c.bf16 %v4052_v49, %v4050_v55  ;;  %v8200_v63 = vpack.c.bf16 %v4061_v25, %v4059_v31  ;;  %v4058_v12 = vld [vmem:[#allocation16 + $0x120] sm:$0xff]  ;;  %v4067_v23 = vld [vmem:[#allocation16 + $0x168] sm:$0xff]  ;;  %v4076_v31 = vld [vmem:[#allocation16 + $0x1b0] sm:$0xff] }
 0x6f9   : > { %4273 = vmatprep.mubr.f32.mxu1 %v4182_v2  ;;  %v4065_v2 = vld [vmem:[#allocation16 + $0x158] sm:$0xff]  ;;  %v4066_v30 = vld [vmem:[#allocation16 + $0x160] sm:$0xff]  ;;  %v4071_v36 = vld [vmem:[#allocation16 + $0x188] sm:$0xff] }
 0x6fa   : > { %4274 = vmatmul.mubr.f32.gmra.mrb[32].mxu1 %v4180_v45  ;;  %v4060_v45 = vld [vmem:[#allocation16 + $0x130] sm:$0xff]  ;;  %v4070_v49 = vld [vmem:[#allocation16 + $0x180] sm:$0xff]  ;;  %v4079_v25 = vld [vmem:[#allocation16 + $0x1c8] sm:$0xff] }
 0x6fb   : > { %4344 = vmatprep.mubr.f32.mxu1 %v11176_v17  ;;  %8183 = vmatpush1.bf16.msra.mxu1 %v8182_v29  ;;  %v8196_v17 = vpack.c.bf16 %v4057_v51, %v4055_v10  ;;  %v4063_v29 = vld [vmem:[#allocation16 + $0x148] sm:$0xff]  ;;  %v4072_v10 = vld [vmem:[#allocation16 + $0x190] sm:$0xff] }
 0x6fc   : > { %8185 = vmatprep.subr.bf16.mxu1 %v8184_v9  ;;  %v8202_v9 = vpack.c.bf16 %v4060_v45, %v4058_v12  ;;  %v8204_v40 = vpack.c.bf16 %v4065_v2, %v4063_v29  ;;  %v4075_v51 = vld [vmem:[#allocation16 + $0x1a8] sm:$0xff]  ;;  %v4078_v45 = vld [vmem:[#allocation16 + $0x1c0] sm:$0xff]  ;;  %v4080_v29 = vld [vmem:[#allocation16 + $0x1d0] sm:$0xff] }
 0x6fd   : > { %v4083_v2 = vld [vmem:[#allocation16 + $0x1e8] sm:$0xff] }
 0x6ff   : > { %8187 = vmatpush1.bf16.msra.mxu1 %v8186_v16  ;;  %v4069_v16 = vld [vmem:[#allocation16 + $0x178] sm:$0xff] }
 0x700   : > { %8189 = vmatprep.subr.bf16.mxu1 %v8188_v27  ;;  %v8206_v27 = vpack.c.bf16 %v4064_v15, %v4062_v7  ;;  %v8208_v19 = vpack.c.bf16 %v4069_v16, %v4067_v23  ;;  %v4082_v15 = vld [vmem:[#allocation16 + $0x1e0] sm:$0xff]  ;;  %v4084_v23 = vld [vmem:[#allocation16 + $0x1f0] sm:$0xff]  ;;  %v4375_v16 = vld [vmem:[#allocation16 + $0x408] sm:$0xff] }
 0x703   : > { %8191 = vmatpush1.bf16.msra.mxu1 %v8190_v14  ;;  %v4073_v14 = vld [vmem:[#allocation16 + $0x198] sm:$0xff] }
 0x704   : > { %8193 = vmatprep.subr.bf16.mxu1 %v8192_v35  ;;  %v8210_v35 = vpack.c.bf16 %v4068_v22, %v4066_v30  ;;  %v8212_v55 = vpack.c.bf16 %v4073_v14, %v4071_v36  ;;  %v4374_v22 = vld [vmem:[#allocation16 + $0x400] sm:$0xff]  ;;  %v4376_v36 = vld [vmem:[#allocation16 + $0x410] sm:$0xff]  ;;  %v4379_v14 = vld [vmem:[#allocation16 + $0x428] sm:$0xff] }
 0x707   : > { %8195 = vmatpush1.bf16.msra.mxu1 %v8194_v53  ;;  %v4077_v53 = vld [vmem:[#allocation16 + $0x1b8] sm:$0xff] }
 0x708   : > { %8197 = vmatprep.subr.bf16.mxu1 %v8196_v17  ;;  %v8214_v17 = vpack.c.bf16 %v4072_v10, %v4070_v49  ;;  %v8216_v54 = vpack.c.bf16 %v4077_v53, %v4075_v51  ;;  %v4378_v10 = vld [vmem:[#allocation16 + $0x420] sm:$0xff]  ;;  %v4380_v51 = vld [vmem:[#allocation16 + $0x430] sm:$0xff]  ;;  %v4383_v53 = vld [vmem:[#allocation16 + $0x448] sm:$0xff] }
 0x70b   : > { %8199 = vmatpush1.bf16.msra.mxu1 %v8198_v62  ;;  %v4081_v62 = vld [vmem:[#allocation16 + $0x1d8] sm:$0xff] }
 0x70c   : > { %8201 = vmatprep.subr.bf16.mxu1 %v8200_v63  ;;  %v8218_v63 = vpack.c.bf16 %v4076_v31, %v4074_v60  ;;  %v8220_v12 = vpack.c.bf16 %v4081_v62, %v4079_v25  ;;  %v4382_v31 = vld [vmem:[#allocation16 + $0x440] sm:$0xff]  ;;  %v4384_v25 = vld [vmem:[#allocation16 + $0x450] sm:$0xff]  ;;  %v4387_v62 = vld [vmem:[#allocation16 + $0x468] sm:$0xff] }
 0x70f   : > { %8203 = vmatpush1.bf16.msra.mxu1 %v8202_v9  ;;  %v4085_v9 = vld [vmem:[#allocation16 + $0x1f8] sm:$0xff] }
 0x710   : > { %8205 = vmatprep.subr.bf16.mxu1 %v8204_v40  ;;  %v8222_v40 = vpack.c.bf16 %v4080_v29, %v4078_v45  ;;  %v8224_v7 = vpack.c.bf16 %v4085_v9, %v4083_v2  ;;  %v4370_v45 = vld [vmem:[#allocation3 + $0x8] sm:$0xfc] }
 0x711   : > { %v4388_v2 = vld [vmem:[#allocation16 + $0x470] sm:$0xff]  ;;  %v4391_v9 = vld [vmem:[#allocation16 + $0x488] sm:$0xff] }
 0x713   : > { %8207 = vmatpush1.bf16.msra.mxu1 %v8206_v27  ;;  %v4377_v27 = vld [vmem:[#allocation16 + $0x418] sm:$0xff] }
 0x714   : > { %8209 = vmatprep.subr.bf16.mxu1 %v8208_v19  ;;  %v8226_v19 = vpack.c.bf16 %v4084_v23, %v4082_v15  ;;  %v8228_v30 = vpack.c.bf16 %v4377_v27, %v4375_v16  ;;  %v4390_v16 = vld [vmem:[#allocation16 + $0x480] sm:$0xff]  ;;  %v4395_v27 = vld [vmem:[#allocation16 + $0x4a8] sm:$0xff] }
 0x717   : > { %8211 = vmatpush1.bf16.msra.mxu1 %v8210_v35  ;;  %v4381_v35 = vld [vmem:[#allocation16 + $0x438] sm:$0xff] }
 0x718   : > { %8213 = vmatprep.subr.bf16.mxu1 %v8212_v55  ;;  %v8230_v55 = vpack.c.bf16 %v4376_v36, %v4374_v22  ;;  %v8232_v49 = vpack.c.bf16 %v4381_v35, %v4379_v14  ;;  %v4394_v36 = vld [vmem:[#allocation16 + $0x4a0] sm:$0xff]  ;;  %v4396_v14 = vld [vmem:[#allocation16 + $0x4b0] sm:$0xff]  ;;  %v4399_v35 = vld [vmem:[#allocation16 + $0x4c8] sm:$0xff] }
 0x71b   : > { %8215 = vmatpush1.bf16.msra.mxu1 %v8214_v17  ;;  %v4385_v17 = vld [vmem:[#allocation16 + $0x458] sm:$0xff] }
 0x71c   : > { %8217 = vmatprep.subr.bf16.mxu1 %v8216_v54  ;;  %v8234_v54 = vpack.c.bf16 %v4380_v51, %v4378_v10  ;;  %v8236_v60 = vpack.c.bf16 %v4385_v17, %v4383_v53  ;;  %v4398_v51 = vld [vmem:[#allocation16 + $0x4c0] sm:$0xff]  ;;  %v4400_v53 = vld [vmem:[#allocation16 + $0x4d0] sm:$0xff]  ;;  %v4403_v17 = vld [vmem:[#allocation16 + $0x4e8] sm:$0xff] }
 0x71f   : > { %8219 = vmatpush1.bf16.msra.mxu1 %v8218_v63  ;;  %v4389_v63 = vld [vmem:[#allocation16 + $0x478] sm:$0xff] }
 0x720   : > { %8221 = vmatprep.subr.bf16.mxu1 %v8220_v12  ;;  %v8238_v12 = vpack.c.bf16 %v4384_v25, %v4382_v31  ;;  %v8240_v29 = vpack.c.bf16 %v4389_v63, %v4387_v62  ;;  %v4402_v31 = vld [vmem:[#allocation16 + $0x4e0] sm:$0xff]  ;;  %v4404_v25 = vld [vmem:[#allocation16 + $0x4f0] sm:$0xff]  ;;  %v4407_v62 = vld [vmem:[#allocation16 + $0x508] sm:$0xff] }
 0x721   : > { %v4409_v63 = vld [vmem:[#allocation16 + $0x518] sm:$0xff] }
 0x723   : > { %8223 = vmatpush1.bf16.msra.mxu1 %v8222_v40  ;;  %v4393_v40 = vld [vmem:[#allocation16 + $0x498] sm:$0xff] }
 0x724   : > { %8225 = vmatprep.subr.bf16.mxu1 %v8224_v7  ;;  %v4445_v7 = vrot.slane %v4370_v45, 2  ;;  %v8244_v23 = vpack.c.bf16 %v4393_v40, %v4391_v9  ;;  %v8260_v45 = vpack.c.bf16 %v4409_v63, %v4407_v62  ;;  %v4413_v9 = vld [vmem:[#allocation16 + $0x538] sm:$0xff]  ;;  %v4426_v63 = vld [vmem:[#allocation16 + $0x5a0] sm:$0xff] }
 0x727   : > { %8227 = vmatpush1.bf16.msra.mxu1 %v8226_v19  ;;  %v4397_v19 = vld [vmem:[#allocation16 + $0x4b8] sm:$0xff] }
 0x728   : > { %8229 = vmatprep.subr.bf16.mxu1 %v8228_v30  ;;  %v4447_v30 = vsel %vm2288_vm7, %v4445_v7, %v4446_v28  ;;  %v8248_v22 = vpack.c.bf16 %v4397_v19, %v4395_v27 }
 0x72a   : > { %4345 = vmatmul.mubr.f32.vlgmr.msra.gmra.mrb[26].mxu1 %v11173_v13  ;;  %v4386_v13 = vld [vmem:[#allocation16 + $0x460] sm:$0xff] }
 0x72b   : > { %4350 = vmatprep.mubr.f32.mxu1 %v11181_v0  ;;  %8231 = vmatpush1.bf16.msra.mxu1 %v8230_v55  ;;  %v8242_v15 = vpack.c.bf16 %v4388_v2, %v4386_v13  ;;  %v4401_v55 = vld [vmem:[#allocation16 + $0x4d8] sm:$0xff]  ;;  %v4408_v13 = vld [vmem:[#allocation16 + $0x510] sm:$0xff]  ;;  %v4411_v2 = vld [vmem:[#allocation16 + $0x528] sm:$0xff] }
 0x72c   : > { %8233 = vmatprep.subr.bf16.mxu1 %v8232_v49  ;;  %v8250_v49 = vpack.c.bf16 %v4396_v14, %v4394_v36  ;;  %v8252_v10 = vpack.c.bf16 %v4401_v55, %v4399_v35  ;;  %v8264_v7 = vpack.c.bf16 %v4413_v9, %v4411_v2  ;;  %v4421_v36 = vld [vmem:[#allocation16 + $0x578] sm:$0xff]  ;;  %v4418_v55 = vld [vmem:[#allocation16 + $0x560] sm:$0xff] }
 0x72d   : > { %v4430_v9 = vld [vmem:[#allocation16 + $0x5c0] sm:$0xff] }
 0x72e   : > { %4351 = vmatmul.mubr.f32.gmra.mrb[28].mxu1 %v11179_v3 }
 0x72f   : > { %4356 = vmatprep.mubr.f32.mxu1 %v11188_v48  ;;  %8235 = vmatpush1.bf16.msra.mxu1 %v8234_v54  ;;  %v4392_v48 = vld [vmem:[#allocation16 + $0x490] sm:$0xff]  ;;  %v4405_v54 = vld [vmem:[#allocation16 + $0x4f8] sm:$0xff] }
 0x730   : > { %8237 = vmatprep.subr.bf16.mxu1 %v8236_v60  ;;  %v8254_v60 = vpack.c.bf16 %v4400_v53, %v4398_v51  ;;  %v8256_v28 = vpack.c.bf16 %v4405_v54, %v4403_v17  ;;  %v4425_v51 = vld [vmem:[#allocation16 + $0x598] sm:$0xff]  ;;  %v4422_v54 = vld [vmem:[#allocation16 + $0x580] sm:$0xff] }
 0x732   : > { %4357 = vmatmul.mubr.f32.gmra.mrb[30].mxu1 %v11184_v34  ;;  %v8246_v34 = vpack.c.bf16 %v4392_v48, %v4390_v16  ;;  %v4415_v16 = vld [vmem:[#allocation16 + $0x548] sm:$0xff]  ;;  %v4417_v48 = vld [vmem:[#allocation16 + $0x558] sm:$0xff] }
 0x733   : > { %4362 = vmatprep.mubr.f32.mxu1 %v11205_v61  ;;  %8239 = vmatpush1.bf16.msra.mxu1 %v8238_v12  ;;  %v8258_v12 = vpack.c.bf16 %v4404_v25, %v4402_v31  ;;  %v8268_v19 = vpack.c.bf16 %v4417_v48, %v4415_v16  ;;  %v4429_v31 = vld [vmem:[#allocation16 + $0x5b8] sm:$0xff]  ;;  %v4434_v48 = vld [vmem:[#allocation16 + $0x5e0] sm:$0xff] }
 0x734   : > { %8241 = vmatprep.subr.bf16.mxu1 %v8240_v29  ;;  %v4406_v29 = vld [vmem:[#allocation16 + $0x500] sm:$0xff] }
 0x735   : > { %v8262_v40 = vpack.c.bf16 %v4408_v13, %v4406_v29  ;;  %v4433_v29 = vld [vmem:[#allocation16 + $0x5d8] sm:$0xff]  ;;  %v4957_v61 = vld [vmem:[#allocation17] sm:$0x3] }
 0x736   : > { %4363 = vmatmul.mubr.f32.gmra.mrb[32].mxu1 %v11195_v50  ;;  %v4966_v50 = vrot.slane %v4957_v61, %v3457_v43 }
 0x737   : > { %8243 = vmatpush1.bf16.msra.mxu1 %v8242_v15  ;;  %4532 = vmatprep.mubr.f32.mxu1 %v4447_v30  ;;  %v4410_v15 = vld [vmem:[#allocation16 + $0x520] sm:$0xff] }
 0x738   : > { %8245 = vmatprep.subr.bf16.mxu1 %v8244_v23  ;;  %v4412_v23 = vld [vmem:[#allocation16 + $0x530] sm:$0xff]  ;;  %v4414_v30 = vld [vmem:[#allocation16 + $0x540] sm:$0xff] }
 0x739   : > { %v8266_v27 = vpack.c.bf16 %v4412_v23, %v4410_v15  ;;  %v4437_v15 = vld [vmem:[#allocation16 + $0x5f8] sm:$0xff] }
 0x73b   : > { %8247 = vmatpush1.bf16.msra.mxu1 %v8246_v34  ;;  %v4416_v34 = vld [vmem:[#allocation16 + $0x550] sm:$0xff] }
 0x73c   : > { %8249 = vmatprep.subr.bf16.mxu1 %v8248_v22  ;;  %v4419_v22 = vld [vmem:[#allocation16 + $0x568] sm:$0xff]  ;;  %v8270_v14 = vpack.c.bf16 %v4416_v34, %v4414_v30  ;;  %v4573_v30 = vld [vmem:[#allocation16 + $0x618] sm:$0xff] }
 0x73d   : > { %v8272_v35 = vpack.c.bf16 %v4421_v36, %v4419_v22  ;;  %v4369_v34 = vld [vmem:[#allocation3] sm:$0xfc] }
 0x73f   : > { %8251 = vmatpush1.bf16.msra.mxu1 %v8250_v49  ;;  %v4420_v49 = vld [vmem:[#allocation16 + $0x570] sm:$0xff] }
 0x740   : > { %8253 = vmatprep.subr.bf16.mxu1 %v8252_v10  ;;  %v4423_v10 = vld [vmem:[#allocation16 + $0x588] sm:$0xff]  ;;  %v8274_v53 = vpack.c.bf16 %v4420_v49, %v4418_v55  ;;  %v4442_v55 = vrot.slane %v4369_v34, 2  ;;  %v4588_v34 = vld [vmem:[#allocation16 + $0x690] sm:$0xff] }
 0x741   : > { %v8276_v17 = vpack.c.bf16 %v4425_v51, %v4423_v10  ;;  %v4575_v49 = vld [vmem:[#allocation16 + $0x628] sm:$0xff]  ;;  %v4577_v10 = vld [vmem:[#allocation16 + $0x638] sm:$0xff] }
 0x743   : > { %8255 = vmatpush1.bf16.msra.mxu1 %v8254_v60  ;;  %v4424_v60 = vld [vmem:[#allocation16 + $0x590] sm:$0xff] }
 0x744   : > { %8257 = vmatprep.subr.bf16.mxu1 %v8256_v28  ;;  %v4427_v28 = vld [vmem:[#allocation16 + $0x5a8] sm:$0xff]  ;;  %v8278_v25 = vpack.c.bf16 %v4424_v60, %v4422_v54  ;;  %v4576_v54 = vld [vmem:[#allocation16 + $0x630] sm:$0xff]  ;;  %v4444_v60 = vsel %vm2288_vm7, %v4442_v55, %v4443_v37 }
 0x745   : > { %v8280_v62 = vpack.c.bf16 %v4429_v31, %v4427_v28  ;;  %v4579_v28 = vld [vmem:[#allocation16 + $0x648] sm:$0xff]  ;;  %v4581_v31 = vld [vmem:[#allocation16 + $0x658] sm:$0xff] }
 0x746   : > { %v5001_v55 = vld [vmem:[%s11685_s19 + $0x80] sm:$0xff] }
 0x747   : > { %8259 = vmatpush1.bf16.msra.mxu1 %v8258_v12  ;;  %v4428_v12 = vld [vmem:[#allocation16 + $0x5b0] sm:$0xff] }
 0x748   : > { %8261 = vmatprep.subr.bf16.mxu1 %v8260_v45  ;;  %v4431_v45 = vld [vmem:[#allocation16 + $0x5c8] sm:$0xff]  ;;  %v8282_v13 = vpack.c.bf16 %v4428_v12, %v4426_v63  ;;  %v8300_v63 = vpack.c.bf16 %v4581_v31, %v4579_v28  ;;  %v4578_v12 = vld [vmem:[#allocation16 + $0x640] sm:$0xff] }
 0x749   : > { %v8284_v2 = vpack.c.bf16 %v4433_v29, %v4431_v45  ;;  %v4580_v45 = vld [vmem:[#allocation16 + $0x650] sm:$0xff]  ;;  %v4583_v29 = vld [vmem:[#allocation16 + $0x668] sm:$0xff] }
 0x74a   : > { %v8302_v37 = vpack.c.bf16 %v4580_v45, %v4578_v12  ;;  %v4987_v31 = vld [vmem:[%s11685_s19 + $0x10] sm:$0xff]  ;;  %v4597_v12 = vld [vmem:[#allocation16 + $0x6d8] sm:$0xff] }
 0x74b   : > { %8263 = vmatpush1.bf16.msra.mxu1 %v8262_v40  ;;  %v4432_v40 = vld [vmem:[#allocation16 + $0x5d0] sm:$0xff]  ;;  %v5006_v45 = vld [vmem:[%s11685_s19 + $0xa8] sm:$0xff] }
 0x74c   : > { %8265 = vmatprep.subr.bf16.mxu1 %v8264_v7  ;;  %v4435_v7 = vld [vmem:[#allocation16 + $0x5e8] sm:$0xff]  ;;  %v8286_v23 = vpack.c.bf16 %v4432_v40, %v4430_v9  ;;  %v4371_v9 = vld [vmem:[#allocation3 + $0x40] sm:$0x3] }
 0x74d   : > { %v8288_v16 = vpack.c.bf16 %v4437_v15, %v4435_v7  ;;  %v4566_v40 = vld [vmem:[#allocation3 + $0x8] sm:$0xf8]  ;;  %v4582_v7 = vld [vmem:[#allocation16 + $0x660] sm:$0xff] }
 0x74e   : > { %v4584_v15 = vld [vmem:[#allocation16 + $0x670] sm:$0xff] }
 0x74f   : > { %8267 = vmatpush1.bf16.msra.mxu1 %v8266_v27  ;;  %v4436_v27 = vld [vmem:[#allocation16 + $0x5f0] sm:$0xff] }
 0x750   : > { %8269 = vmatprep.subr.bf16.mxu1 %v8268_v19  ;;  %v4571_v19 = vld [vmem:[#allocation16 + $0x608] sm:$0xff]  ;;  %v8290_v22 = vpack.c.bf16 %v4436_v27, %v4434_v48  ;;  %v4589_v48 = vld [vmem:[#allocation16 + $0x698] sm:$0xff]  ;;  %v4641_v27 = vrot.slane %v4566_v40, 3 }
 0x751   : > { %v8292_v36 = vpack.c.bf16 %v4573_v30, %v4571_v19  ;;  %v4586_v30 = vld [vmem:[#allocation16 + $0x680] sm:$0xff] }
 0x752   : > { %v4990_v40 = vld [vmem:[%s11685_s19 + $0x28] sm:$0xff] }
 0x753   : > { %8271 = vmatpush1.bf16.msra.mxu1 %v8270_v14  ;;  %v4570_v14 = vld [vmem:[#allocation16 + $0x600] sm:$0xff] }
 0x754   : > { %8273 = vmatprep.subr.bf16.mxu1 %v8272_v35  ;;  %v4572_v35 = vld [vmem:[#allocation16 + $0x610] sm:$0xff] }
 0x755   : > { %v8294_v51 = vpack.c.bf16 %v4572_v35, %v4570_v14  ;;  %v4590_v14 = vld [vmem:[#allocation16 + $0x6a0] sm:$0xff]  ;;  %v4592_v35 = vld [vmem:[#allocation16 + $0x6b0] sm:$0xff] }
 0x757   : > { %8275 = vmatpush1.bf16.msra.mxu1 %v8274_v53  ;;  %v8296_v53 = vpack.c.bf16 %v4577_v10, %v4575_v49  ;;  %v5002_v49 = vld [vmem:[%s11685_s19 + $0x88] sm:$0xff]  ;;  %v4985_v10 = vld [vmem:[%s11685_s19] sm:$0xff] }
 0x758   : > { %8277 = vmatprep.subr.bf16.mxu1 %v8276_v17  ;;  %v4574_v17 = vld [vmem:[#allocation16 + $0x620] sm:$0xff] }
 0x75b   : > { %8279 = vmatpush1.bf16.msra.mxu1 %v8278_v25  ;;  %v8298_v25 = vpack.c.bf16 %v4576_v54, %v4574_v17  ;;  %v5003_v17 = vld [vmem:[%s11685_s19 + $0x90] sm:$0xff]  ;;  %v5004_v54 = vld [vmem:[%s11685_s19 + $0x98] sm:$0xff] }
 0x75c   : > { %8281 = vmatprep.subr.bf16.mxu1 %v8280_v62  ;;  %v4372_v62 = vld [vmem:[#allocation3 + $0x48] sm:$0x3] }
 0x75f   : > { %8283 = vmatpush1.bf16.msra.mxu1 %v8282_v13  ;;  %v4585_v13 = vld [vmem:[#allocation16 + $0x678] sm:$0xff] }
 0x760   : > { %8285 = vmatprep.subr.bf16.mxu1 %v8284_v2  ;;  %v4458_v2 = vrot.slane %v4372_v62, 2  ;;  %v5005_v62 = vld [vmem:[%s11685_s19 + $0xa0] sm:$0xff] }
 0x763   : > { %8287 = vmatpush1.bf16.msra.mxu1 %v8286_v23  ;;  %v4456_v23 = vrot.slane %v4371_v9, 2  ;;  %v8428_v9 = vpack.c.bf16 %v5006_v45, %v5005_v62  ;;  %v4995_v45 = vld [vmem:[%s11685_s19 + $0x50] sm:$0xff] }
 0x764   : > { %8289 = vmatprep.subr.bf16.mxu1 %v8288_v16  ;;  %v4587_v16 = vld [vmem:[#allocation16 + $0x688] sm:$0xff] }
 0x765   : > { %v8308_v19 = vpack.c.bf16 %v4589_v48, %v4587_v16  ;;  %v4599_v16 = vld [vmem:[#allocation16 + $0x6e8] sm:$0xff]  ;;  %v4601_v48 = vld [vmem:[#allocation16 + $0x6f8] sm:$0xff] }
 0x767   : > { %8291 = vmatpush1.bf16.msra.mxu1 %v8290_v22  ;;  %v4591_v22 = vld [vmem:[#allocation16 + $0x6a8] sm:$0xff] }
 0x768   : > { %8293 = vmatprep.subr.bf16.mxu1 %v8292_v36  ;;  %v4643_v36 = vsel %vm2710_vm9, %v4641_v27, %v4642_v8  ;;  %v8424_v8 = vpack.c.bf16 %v5004_v54, %v5003_v17  ;;  %v4604_v54 = vld [vmem:[#allocation16 + $0x710] sm:$0xff] }
 0x76a   : > { %4533 = vmatmul.mubr.f32.vlgmr.msra.gmra.mrb[26].mxu1 %v4444_v60 }
 0x76b   : > { %4538 = vmatprep.mubr.f32.mxu1 %v11214_v32  ;;  %8295 = vmatpush1.bf16.msra.mxu1 %v8294_v51  ;;  %v8304_v32 = vpack.c.bf16 %v4585_v13, %v4583_v29  ;;  %v8420_v51 = vpack.c.bf16 %v5002_v49, %v5001_v55  ;;  %v8314_v13 = vpack.c.bf16 %v4592_v35, %v4590_v14  ;;  %v4603_v14 = vld [vmem:[#allocation16 + $0x708] sm:$0xff]  ;;  %v4605_v35 = vld [vmem:[#allocation16 + $0x718] sm:$0xff] }
 0x76c   : > { %8297 = vmatprep.subr.bf16.mxu1 %v8296_v53  ;;  %v4986_v53 = vld [vmem:[%s11685_s19 + $0x8] sm:$0xff]  ;;  %v8324_v17 = vpack.c.bf16 %v4605_v35, %v4603_v14 }
 0x76d   : > { %v8422_v28 = vpack.c.bf16 %v4986_v53, %v4985_v10  ;;  %8421 = vmatprep.subr.bf16.mxu0 %v8420_v51  ;;  %v4602_v10 = vld [vmem:[#allocation16 + $0x700] sm:$0xff]  ;;  %v4993_v51 = vld [vmem:[%s11685_s19 + $0x40] sm:$0xff] }
 0x76e   : > { %4539 = vmatmul.mubr.f32.gmra.mrb[28].mxu1 %v11203_v57  ;;  %v4459_v57 = vsel %vm2288_vm7, %v4454_v4, %v4458_v2  ;;  %v4593_v4 = vld [vmem:[#allocation16 + $0x6b8] sm:$0xff]  ;;  %v4594_v2 = vld [vmem:[#allocation16 + $0x6c0] sm:$0xff]  ;;  %v8326_v62 = vpack.c.bf16 %v4604_v54, %v4602_v10  ;;  %v4627_v54 = vld [vmem:[#allocation16 + $0x7c8] sm:$0xff] }
 0x76f   : > { %4544 = vmatprep.mubr.f32.mxu1 %v11233_v38  ;;  %8299 = vmatpush1.bf16.msra.mxu1 %v8298_v25  ;;  %v8306_v38 = vpack.c.bf16 %v4584_v15, %v4582_v7  ;;  %v8312_v60 = vpack.c.bf16 %v4593_v4, %v4591_v22  ;;  %v4988_v25 = vld [vmem:[%s11685_s19 + $0x18] sm:$0xff]  ;;  %v5007_v15 = vld [vmem:[%s11685_s19 + $0xb0] sm:$0xff]  ;;  %v5009_v4 = vld [vmem:[%s11685_s19 + $0xc0] sm:$0xff] }
 0x770   : > { %8301 = vmatprep.subr.bf16.mxu1 %v8300_v63  ;;  %v4595_v63 = vld [vmem:[#allocation16 + $0x6c8] sm:$0xff]  ;;  %8423 = vmatpush3.bf16.msra.mxu0 %v8422_v28  ;;  %v8426_v29 = vpack.c.bf16 %v4988_v25, %v4987_v31  ;;  %v4596_v7 = vld [vmem:[#allocation16 + $0x6d0] sm:$0xff]  ;;  %v4994_v53 = vld [vmem:[%s11685_s19 + $0x48] sm:$0xff] }
 0x771   : > { %8425 = vmatprep.subr.bf16.mxu0 %v8424_v8  ;;  %v8318_v27 = vpack.c.bf16 %v4596_v7, %v4594_v2  ;;  %v4600_v22 = vld [vmem:[#allocation16 + $0x6f0] sm:$0xff]  ;;  %v4607_v8 = vld [vmem:[#allocation16 + $0x728] sm:$0xff]  ;;  %v4609_v31 = vld [vmem:[#allocation16 + $0x738] sm:$0xff]  ;;  %v8438_v25 = vpack.c.bf16 %v4994_v53, %v4993_v51 }
 0x772   : > { %4545 = vmatmul.mubr.f32.gmra.mrb[30].mxu1 %v11223_v44  ;;  %v4457_v44 = vsel %vm2288_vm7, %v4452_v52, %v4456_v23  ;;  %v8310_v52 = vpack.c.bf16 %v4588_v34, %v4586_v30  ;;  %v5008_v23 = vld [vmem:[%s11685_s19 + $0xb8] sm:$0xff]  ;;  %v4991_v30 = vld [vmem:[%s11685_s19 + $0x30] sm:$0xff]  ;;  %v4625_v10 = vld [vmem:[#allocation16 + $0x7b8] sm:$0xff] }
 0x773   : > { %4550 = vmatprep.mubr.f32.mxu1 %v4459_v57  ;;  %8303 = vmatpush1.bf16.msra.mxu1 %v8302_v37  ;;  %v4989_v37 = vld [vmem:[%s11685_s19 + $0x20] sm:$0xff]  ;;  %v4992_v34 = vld [vmem:[%s11685_s19 + $0x38] sm:$0xff]  ;;  %v4618_v35 = vld [vmem:[#allocation16 + $0x780] sm:$0xff] }
 0x774   : > { %8305 = vmatprep.subr.bf16.mxu1 %v8304_v32  ;;  %v8316_v32 = vpack.c.bf16 %v4597_v12, %v4595_v63  ;;  %8427 = vmatpush3.bf16.msra.mxu0 %v8426_v29  ;;  %v8430_v57 = vpack.c.bf16 %v4990_v40, %v4989_v37  ;;  %v8434_v55 = vpack.c.bf16 %v4992_v34, %v4991_v30  ;;  %v5012_v28 = vld [vmem:[%s11685_s19 + $0xd8] sm:$0xff]  ;;  %v4606_v63 = vld [vmem:[#allocation16 + $0x720] sm:$0xff] }
 0x775   : > { %8429 = vmatprep.subr.bf16.mxu0 %v8428_v9  ;;  %v4996_v29 = vld [vmem:[%s11685_s19 + $0x58] sm:$0xff]  ;;  %v5013_v9 = vld [vmem:[%s11685_s19 + $0xe0] sm:$0xff]  ;;  %v5014_v37 = vld [vmem:[%s11685_s19 + $0xe8] sm:$0xff] }
 0x776   : > { %4551 = vmatmul.mubr.f32.gmra.mrb[32].mxu1 %v4457_v44  ;;  %v8320_v44 = vpack.c.bf16 %v4601_v48, %v4599_v16  ;;  %v4608_v2 = vld [vmem:[#allocation16 + $0x730] sm:$0xff]  ;;  %v4611_v40 = vld [vmem:[#allocation16 + $0x748] sm:$0xff]  ;;  %v8442_v7 = vpack.c.bf16 %v4996_v29, %v4995_v45  ;;  %v4610_v48 = vld [vmem:[#allocation16 + $0x740] sm:$0xff] }
 0x777   : > { %8307 = vmatpush1.bf16.msra.mxu1 %v8306_v38  ;;  %4728 = vmatprep.mubr.f32.mxu1 %v4643_v36  ;;  %v4598_v38 = vld [vmem:[#allocation16 + $0x6e0] sm:$0xff] }
 0x778   : > { %8309 = vmatprep.subr.bf16.mxu1 %v8308_v19  ;;  %v8432_v19 = vpack.c.bf16 %v5008_v23, %v5007_v15  ;;  %v5010_v36 = vld [vmem:[%s11685_s19 + $0xc8] sm:$0xff]  ;;  %8431 = vmatpush3.bf16.msra.mxu0 %v8430_v57  ;;  %v8322_v49 = vpack.c.bf16 %v4600_v22, %v4598_v38  ;;  %v8330_v15 = vpack.c.bf16 %v4608_v2, %v4606_v63  ;;  %v4612_v57 = vld [vmem:[#allocation16 + $0x750] sm:$0xff]  ;;  %v4619_v22 = vld [vmem:[#allocation16 + $0x788] sm:$0xff] }
 0x779   : > { %v8444_v23 = vpack.c.bf16 %v5014_v37, %v5013_v9  ;;  %v4617_v38 = vld [vmem:[#allocation16 + $0x778] sm:$0xff]  ;;  %v4614_v34 = vld [vmem:[#allocation16 + $0x760] sm:$0xff]  ;;  %v4767_v2 = vld [vmem:[#allocation16 + $0x808] sm:$0xff] }
 0x77a   : > { %8433 = vmatprep.subr.bf16.mxu0 %v8432_v19  ;;  %v8334_v19 = vpack.c.bf16 %v4612_v57, %v4610_v48  ;;  %v4622_v53 = vld [vmem:[#allocation16 + $0x7a0] sm:$0xff]  ;;  %v4633_v63 = vld [vmem:[#allocation16 + $0x7f8] sm:$0xff] }
 0x77b   : > { %8311 = vmatpush1.bf16.msra.mxu1 %v8310_v52  ;;  %v8436_v52 = vpack.c.bf16 %v5010_v36, %v5009_v4  ;;  %v4621_v4 = vld [vmem:[#allocation16 + $0x798] sm:$0xff]  ;;  %v4630_v29 = vld [vmem:[#allocation16 + $0x7e0] sm:$0xff] }
 0x77c   : > { %8313 = vmatprep.subr.bf16.mxu1 %v8312_v60  ;;  %v5011_v60 = vld [vmem:[%s11685_s19 + $0xd0] sm:$0xff]  ;;  %8435 = vmatpush3.bf16.msra.mxu0 %v8434_v55  ;;  %v8340_v14 = vpack.c.bf16 %v4621_v4, %v4619_v22  ;;  %v4620_v55 = vld [vmem:[#allocation16 + $0x790] sm:$0xff]  ;;  %v4769_v9 = vld [vmem:[#allocation16 + $0x818] sm:$0xff] }
 0x77d   : > { %8437 = vmatprep.subr.bf16.mxu0 %v8436_v52  ;;  %v8440_v12 = vpack.c.bf16 %v5012_v28, %v5011_v60  ;;  %v8342_v52 = vpack.c.bf16 %v4620_v55, %v4618_v35  ;;  %v4629_v60 = vld [vmem:[#allocation16 + $0x7d8] sm:$0xff]  ;;  %v4565_v37 = vld [vmem:[#allocation3] sm:$0xf8]  ;;  %v4568_v4 = vld [vmem:[#allocation3 + $0x48] sm:$0x7] }
 0x77e   : > { %v4773_v48 = vld [vmem:[#allocation16 + $0x838] sm:$0xff]  ;;  %v4776_v35 = vld [vmem:[#allocation16 + $0x850] sm:$0xff]  ;;  %v4779_v55 = vld [vmem:[#allocation16 + $0x868] sm:$0xff] }
 0x77f   : > { %8315 = vmatpush1.bf16.msra.mxu1 %v8314_v13  ;;  %v8328_v13 = vpack.c.bf16 %v4609_v31, %v4607_v8  ;;  %v8348_v8 = vpack.c.bf16 %v4629_v60, %v4627_v54  ;;  %v4626_v31 = vld [vmem:[#allocation16 + $0x7c0] sm:$0xff]  ;;  %v4783_v60 = vld [vmem:[#allocation16 + $0x888] sm:$0xff] }
 0x780   : > { %8317 = vmatprep.subr.bf16.mxu1 %v8316_v32  ;;  %v4613_v32 = vld [vmem:[#allocation16 + $0x758] sm:$0xff]  ;;  %8439 = vmatpush3.bf16.msra.mxu0 %v8438_v25  ;;  %v4628_v25 = vld [vmem:[#allocation16 + $0x7d0] sm:$0xff] }
 0x781   : > { %8441 = vmatprep.subr.bf16.mxu0 %v8440_v12  ;;  %v8332_v16 = vpack.c.bf16 %v4613_v32, %v4611_v40  ;;  %v8350_v12 = vpack.c.bf16 %v4628_v25, %v4626_v31  ;;  %v8356_v32 = vpack.c.bf16 %v4769_v9, %v4767_v2  ;;  %v4782_v25 = vld [vmem:[#allocation16 + $0x880] sm:$0xff]  ;;  %v4788_v2 = vld [vmem:[#allocation16 + $0x8b0] sm:$0xff]  ;;  %v4791_v9 = vld [vmem:[#allocation16 + $0x8c8] sm:$0xff] }
 0x783   : > { %8319 = vmatpush1.bf16.msra.mxu1 %v8318_v27  ;;  %v4615_v27 = vld [vmem:[#allocation16 + $0x768] sm:$0xff] }
 0x784   : > { %8321 = vmatprep.subr.bf16.mxu1 %v8320_v44  ;;  %8443 = vmatpush3.bf16.msra.mxu0 %v8442_v7  ;;  %v8336_v30 = vpack.c.bf16 %v4617_v38, %v4615_v27  ;;  %v4616_v44 = vld [vmem:[#allocation16 + $0x770] sm:$0xff]  ;;  %v4766_v7 = vld [vmem:[#allocation16 + $0x800] sm:$0xff] }
 0x785   : > { %8445 = vmatprep.subr.bf16.mxu0 %v8444_v23  ;;  %v8338_v36 = vpack.c.bf16 %v4616_v44, %v4614_v34  ;;  %v4638_v23 = vrot.slane %v4565_v37, 3  ;;  %v4770_v38 = vld [vmem:[#allocation16 + $0x820] sm:$0xff]  ;;  %v4775_v34 = vld [vmem:[#allocation16 + $0x848] sm:$0xff]  ;;  %v4777_v44 = vld [vmem:[#allocation16 + $0x858] sm:$0xff] }
 0x786   : > { %v4793_v37 = vld [vmem:[#allocation16 + $0x8d8] sm:$0xff] }
 0x787   : > { %8323 = vmatpush1.bf16.msra.mxu1 %v8322_v49  ;;  %v4623_v49 = vld [vmem:[#allocation16 + $0x7a8] sm:$0xff] }
 0x788   : > { %8325 = vmatprep.subr.bf16.mxu1 %v8324_v17  ;;  %v8344_v51 = vpack.c.bf16 %v4625_v10, %v4623_v49  ;;  %v4624_v17 = vld [vmem:[#allocation16 + $0x7b0] sm:$0xff]  ;;  %v4781_v49 = vld [vmem:[#allocation16 + $0x878] sm:$0xff]  ;;  %v4654_v10 = vrot.slane %v4568_v4, 3 }
 0x789   : > { %v8346_v28 = vpack.c.bf16 %v4624_v17, %v4622_v53  ;;  %v4778_v53 = vld [vmem:[#allocation16 + $0x860] sm:$0xff]  ;;  %v4780_v17 = vld [vmem:[#allocation16 + $0x870] sm:$0xff] }
 0x78b   : > { %8327 = vmatpush1.bf16.msra.mxu1 %v8326_v62  ;;  %v4631_v62 = vld [vmem:[#allocation16 + $0x7e8] sm:$0xff] }
 0x78c   : > { %8329 = vmatprep.subr.bf16.mxu1 %v8328_v13  ;;  %v8352_v45 = vpack.c.bf16 %v4633_v63, %v4631_v62  ;;  %v4632_v13 = vld [vmem:[#allocation16 + $0x7f0] sm:$0xff] }
 0x78d   : > { %v8354_v40 = vpack.c.bf16 %v4632_v13, %v4630_v29  ;;  %v4784_v62 = vld [vmem:[#allocation16 + $0x890] sm:$0xff]  ;;  %v4786_v13 = vld [vmem:[#allocation16 + $0x8a0] sm:$0xff] }
 0x78f   : > { %8331 = vmatpush1.bf16.msra.mxu1 %v8330_v15  ;;  %v4768_v15 = vld [vmem:[#allocation16 + $0x810] sm:$0xff] }
 0x790   : > { %8333 = vmatprep.subr.bf16.mxu1 %v8332_v16  ;;  %v4771_v16 = vld [vmem:[#allocation16 + $0x828] sm:$0xff]  ;;  %v8358_v57 = vpack.c.bf16 %v4768_v15, %v4766_v7  ;;  %v4792_v7 = vld [vmem:[#allocation16 + $0x8d0] sm:$0xff] }
 0x791   : > { %v8360_v27 = vpack.c.bf16 %v4773_v48, %v4771_v16  ;;  %v4795_v15 = vld [vmem:[#allocation16 + $0x8e8] sm:$0xff]  ;;  %v4794_v16 = vld [vmem:[#allocation16 + $0x8e0] sm:$0xff]  ;;  %v4796_v48 = vld [vmem:[#allocation16 + $0x8f0] sm:$0xff] }
 0x793   : > { %8335 = vmatpush1.bf16.msra.mxu1 %v8334_v19  ;;  %v4772_v19 = vld [vmem:[#allocation16 + $0x830] sm:$0xff] }
 0x794   : > { %8337 = vmatprep.subr.bf16.mxu1 %v8336_v30  ;;  %v4640_v30 = vsel %vm2710_vm9, %v4638_v23, %v4639_v41  ;;  %v8362_v22 = vpack.c.bf16 %v4772_v19, %v4770_v38  ;;  %v4797_v23 = vld [vmem:[#allocation16 + $0x8f8] sm:$0xff]  ;;  %v8386_v38 = vpack.c.bf16 %v4796_v48, %v4794_v16  ;;  %v4761_v16 = vld [vmem:[#allocation3] sm:$0xf0] }
 0x797   : > { %8339 = vmatpush1.bf16.msra.mxu1 %v8338_v36  ;;  %v8364_v36 = vpack.c.bf16 %v4777_v44, %v4775_v34  ;;  %v4800_v34 = vld [vmem:[#allocation16 + $0x910] sm:$0xff]  ;;  %v4803_v44 = vld [vmem:[#allocation16 + $0x928] sm:$0xff] }
 0x798   : > { %8341 = vmatprep.subr.bf16.mxu1 %v8340_v14  ;;  %v4774_v14 = vld [vmem:[#allocation16 + $0x840] sm:$0xff] }
 0x799   : > { %v8366_v41 = vpack.c.bf16 %v4776_v35, %v4774_v14  ;;  %v4802_v14 = vld [vmem:[#allocation16 + $0x920] sm:$0xff]  ;;  %v4804_v35 = vld [vmem:[#allocation16 + $0x930] sm:$0xff] }
 0x79b   : > { %8343 = vmatpush1.bf16.msra.mxu1 %v8342_v52  ;;  %v4567_v52 = vld [vmem:[#allocation3 + $0x40] sm:$0x7] }
 0x79c   : > { %8345 = vmatprep.subr.bf16.mxu1 %v8344_v51  ;;  %v4762_v51 = vld [vmem:[#allocation3 + $0x8] sm:$0xf0]  ;;  %v4652_v54 = vrot.slane %v4567_v52, 3 }
 0x79e   : > { %v4653_v63 = vsel %vm2710_vm9, %v4648_v11, %v4652_v54  ;;  %v8380_v11 = vpack.c.bf16 %v4793_v37, %v4791_v9 }
 0x79f   : > { %8347 = vmatpush1.bf16.msra.mxu1 %v8346_v28  ;;  %v4785_v28 = vld [vmem:[#allocation16 + $0x898] sm:$0xff] }
 0x7a0   : > { %8349 = vmatprep.subr.bf16.mxu1 %v8348_v8  ;;  %v4837_v8 = vrot.slane %v4762_v51, 4  ;;  %v8372_v31 = vpack.c.bf16 %v4785_v28, %v4783_v60  ;;  %v4808_v51 = vld [vmem:[#allocation16 + $0x950] sm:$0xff]  ;;  %v4810_v60 = vld [vmem:[#allocation16 + $0x960] sm:$0xff] }
 0x7a1   : > { %v4812_v28 = vld [vmem:[#allocation16 + $0x970] sm:$0xff] }
 0x7a3   : > { %8351 = vmatpush1.bf16.msra.mxu1 %v8350_v12  ;;  %v4787_v12 = vld [vmem:[#allocation16 + $0x8a8] sm:$0xff] }
 0x7a4   : > { %8353 = vmatprep.subr.bf16.mxu1 %v8352_v45  ;;  %v4789_v45 = vld [vmem:[#allocation16 + $0x8b8] sm:$0xff] }
 0x7a5   : > { %v8376_v29 = vpack.c.bf16 %v4789_v45, %v4787_v12  ;;  %v4821_v12 = vld [vmem:[#allocation16 + $0x9b8] sm:$0xff] }
 0x7a7   : > { %8355 = vmatpush1.bf16.msra.mxu1 %v8354_v40  ;;  %v8378_v40 = vpack.c.bf16 %v4788_v2, %v4786_v13  ;;  %v4823_v13 = vld [vmem:[#allocation16 + $0x9c8] sm:$0xff]  ;;  %v4825_v2 = vld [vmem:[#allocation16 + $0x9d8] sm:$0xff] }
 0x7a8   : > { %8357 = vmatprep.subr.bf16.mxu1 %v8356_v32  ;;  %v4790_v32 = vld [vmem:[#allocation16 + $0x8c0] sm:$0xff]  ;;  %v8412_v37 = vpack.c.bf16 %v4825_v2, %v4823_v13 }
 0x7a9   : > { %v8382_v0 = vpack.c.bf16 %v4792_v7, %v4790_v32  ;;  %v4827_v32 = vld [vmem:[#allocation16 + $0x9e8] sm:$0xff]  ;;  %v4829_v7 = vld [vmem:[#allocation16 + $0x9f8] sm:$0xff] }
 0x7aa   : > { %4729 = vmatmul.mubr.f32.vlgmr.msra.gmra.mrb[26].mxu1 %v4640_v30  ;;  %v4798_v30 = vld [vmem:[#allocation16 + $0x900] sm:$0xff] }
 0x7ab   : > { %4734 = vmatprep.mubr.f32.mxu1 %v11245_v20  ;;  %8359 = vmatpush1.bf16.msra.mxu1 %v8358_v57  ;;  %v8368_v20 = vpack.c.bf16 %v4781_v49, %v4779_v55  ;;  %v4799_v57 = vld [vmem:[#allocation16 + $0x908] sm:$0xff]  ;;  %v8390_v4 = vpack.c.bf16 %v4800_v34, %v4798_v30  ;;  %v4809_v49 = vld [vmem:[#allocation16 + $0x958] sm:$0xff]  ;;  %v4763_v30 = vld [vmem:[#allocation3 + $0x40] sm:$0xf] }
 0x7ac   : > { %8361 = vmatprep.subr.bf16.mxu1 %v8360_v27  ;;  %v4801_v27 = vld [vmem:[#allocation16 + $0x918] sm:$0xff]  ;;  %v4807_v55 = vld [vmem:[#allocation16 + $0x948] sm:$0xff]  ;;  %v4848_v34 = vrot.slane %v4763_v30, 4 }
 0x7ad   : > { %v8388_v19 = vpack.c.bf16 %v4801_v27, %v4799_v57  ;;  %v8396_v52 = vpack.c.bf16 %v4809_v49, %v4807_v55  ;;  %v4834_v57 = vrot.slane %v4761_v16, 4  ;;  %v5102_v16 = vld [vmem:[#allocation19] sm:$0xff]  ;;  %v5183_v30 = vld [vmem:[#allocation20 + $0x28] sm:$0xff] }
 0x7ae   : > { %4735 = vmatmul.mubr.f32.gmra.mrb[28].mxu1 %v11250_v33  ;;  %v4655_v33 = vsel %vm2710_vm9, %v4650_v59, %v4654_v10  ;;  %v8374_v59 = vpack.c.bf16 %v4784_v62, %v4782_v25  ;;  %v8394_v10 = vpack.c.bf16 %v4804_v35, %v4802_v14  ;;  %v4814_v25 = vld [vmem:[#allocation16 + $0x980] sm:$0xff]  ;;  %v4816_v62 = vld [vmem:[#allocation16 + $0x990] sm:$0xff] }
 0x7af   : > { %4740 = vmatprep.mubr.f32.mxu1 %v11256_v26  ;;  %8363 = vmatpush1.bf16.msra.mxu1 %v8362_v22  ;;  %v8370_v26 = vpack.c.bf16 %v4780_v17, %v4778_v53  ;;  %v4805_v22 = vld [vmem:[#allocation16 + $0x938] sm:$0xff]  ;;  %v8406_v45 = vpack.c.bf16 %v4816_v62, %v4814_v25  ;;  %v4836_v27 = vsel %vm3132_vm10, %v4834_v57, %v4835_v21 }
 0x7b0   : > { %8365 = vmatprep.subr.bf16.mxu1 %v8364_v36  ;;  %v8392_v36 = vpack.c.bf16 %v4805_v22, %v4803_v44  ;;  %v4813_v53 = vld [vmem:[#allocation16 + $0x978] sm:$0xff]  ;;  %v4849_v21 = vsel %vm3132_vm10, %v4844_v56, %v4848_v34  ;;  %v5015_v22 = vld [vmem:[%s11685_s19 + $0xf0] sm:$0xff] }
 0x7b1   : > { %v5180_v57 = vld [vmem:[#allocation20 + $0x10] sm:$0xff] }
 0x7b2   : > { %4741 = vmatmul.mubr.f32.gmra.mrb[30].mxu1 %v11261_v46  ;;  %v4839_v46 = vsel %vm3132_vm10, %v4837_v8, %v4838_v47  ;;  %v8384_v47 = vpack.c.bf16 %v4797_v23, %v4795_v15  ;;  %v4817_v8 = vld [vmem:[#allocation16 + $0x998] sm:$0xff]  ;;  %v8416_v23 = vpack.c.bf16 %v4829_v7, %v4827_v32 }
 0x7b3   : > { %4746 = vmatprep.mubr.f32.mxu1 %v4655_v33  ;;  %8367 = vmatpush1.bf16.msra.mxu1 %v8366_v41  ;;  %v4806_v41 = vld [vmem:[#allocation16 + $0x940] sm:$0xff]  ;;  %v4815_v33 = vld [vmem:[#allocation16 + $0x988] sm:$0xff] }
 0x7b4   : > { %8369 = vmatprep.subr.bf16.mxu1 %v8368_v20  ;;  %v4811_v20 = vld [vmem:[#allocation16 + $0x968] sm:$0xff]  ;;  %v8398_v17 = vpack.c.bf16 %v4808_v51, %v4806_v41 }
 0x7b5   : > { %v8400_v54 = vpack.c.bf16 %v4813_v53, %v4811_v20 }
 0x7b6   : > { %4747 = vmatmul.mubr.f32.gmra.mrb[32].mxu1 %v4653_v63  ;;  %v4819_v63 = vld [vmem:[#allocation16 + $0x9a8] sm:$0xff] }
 0x7b7   : > { %8371 = vmatpush1.bf16.msra.mxu1 %v8370_v26  ;;  %4924 = vmatprep.mubr.f32.mxu1 %v4839_v46  ;;  %v8402_v26 = vpack.c.bf16 %v4812_v28, %v4810_v60  ;;  %v8408_v46 = vpack.c.bf16 %v4821_v12, %v4819_v63  ;;  %v9927_v12 = vmov 0.0|0.0  }
 0x7b8   : > { %8373 = vmatprep.subr.bf16.mxu1 %v8372_v31  ;;  %v8404_v31 = vpack.c.bf16 %v4817_v8, %v4815_v33 }
 0x7bb   : > { %8375 = vmatpush1.bf16.msra.mxu1 %v8374_v59  ;;  %v4818_v59 = vld [vmem:[#allocation16 + $0x9a0] sm:$0xff] }
 0x7bc   : > { %8377 = vmatprep.subr.bf16.mxu1 %v8376_v29  ;;  %v4820_v29 = vld [vmem:[#allocation16 + $0x9b0] sm:$0xff] }
 0x7bd   : > { %v8410_v9 = vpack.c.bf16 %v4820_v29, %v4818_v59 }
 0x7bf   : > { %8379 = vmatpush1.bf16.msra.mxu1 %v8378_v40  ;;  %v4822_v40 = vld [vmem:[#allocation16 + $0x9c0] sm:$0xff] }
 0x7c0   : > { %8381 = vmatprep.subr.bf16.mxu1 %v8380_v11  ;;  %v4824_v11 = vld [vmem:[#allocation16 + $0x9d0] sm:$0xff] }
 0x7c1   : > { %v8414_v15 = vpack.c.bf16 %v4824_v11, %v4822_v40 }
 0x7c3   : > { %8383 = vmatpush1.bf16.msra.mxu1 %v8382_v0  ;;  %v4826_v0 = vld [vmem:[#allocation16 + $0x9e0] sm:$0xff] }
 0x7c4   : > { %8385 = vmatprep.subr.bf16.mxu1 %v8384_v47  ;;  %v4828_v47 = vld [vmem:[#allocation16 + $0x9f0] sm:$0xff] }
 0x7c5   : > { %v8418_v48 = vpack.c.bf16 %v4828_v47, %v4826_v0  ;;  %v5179_v0 = vld [vmem:[#allocation20 + $0x8] sm:$0xff] }
 0x7c7   : > { %8387 = vmatpush1.bf16.msra.mxu1 %v8386_v38  ;;  %v4764_v38 = vld [vmem:[#allocation3 + $0x48] sm:$0xf] }
 0x7c8   : > { %8389 = vmatprep.subr.bf16.mxu1 %v8388_v19  ;;  %v4850_v19 = vrot.slane %v4764_v38, 4 }
 0x7ca   : > { %v4851_v3 = vsel %vm3132_vm10, %v4846_v39, %v4850_v19  ;;  %v4962_v39 = vrot.slane %v4957_v61, %v3453_v24  ;;  %v5182_v19 = vld [vmem:[#allocation20 + $0x20] sm:$0xff] }
 0x7cb   : > { %8391 = vmatpush1.bf16.msra.mxu1 %v8390_v4  ;;  %v5016_v4 = vld [vmem:[%s11685_s19 + $0xf8] sm:$0xff]  ;;  %v8465_v34 = vpack.c.bf16 %v5183_v30, %v5182_v19  ;;  %v5595_v30 = vld [vmem:[#allocation20 + $0x150] sm:$0xff] }
 0x7cc   : > { %8393 = vmatprep.subr.bf16.mxu1 %v8392_v36  ;;  %v4999_v36 = vld [vmem:[%s11685_s19 + $0x70] sm:$0xff]  ;;  %v5265_v61 = vld [vmem:[#allocation20 + $0x60] sm:$0xff] }
 0x7cf   : > { %8395 = vmatpush1.bf16.msra.mxu1 %v8394_v10 }
 0x7d0   : > { %8397 = vmatprep.subr.bf16.mxu1 %v8396_v52 }
 0x7d3   : > { %8399 = vmatpush1.bf16.msra.mxu1 %v8398_v17 }
 0x7d4   : > { %8401 = vmatprep.subr.bf16.mxu1 %v8400_v54 }
 0x7d7   : > { %8403 = vmatpush1.bf16.msra.mxu1 %v8402_v26 }
 0x7d8   : > { %8405 = vmatprep.subr.bf16.mxu1 %v8404_v31 }
 0x7db   : > { %8407 = vmatpush1.bf16.msra.mxu1 %v8406_v45 }
 0x7dc   : > { %8409 = vmatprep.subr.bf16.mxu1 %v8408_v46 }
 0x7df   : > { %8411 = vmatpush1.bf16.msra.mxu1 %v8410_v9 }
 0x7e0   : > { %8413 = vmatprep.subr.bf16.mxu1 %v8412_v37 }
 0x7e3   : > { %8415 = vmatpush1.bf16.msra.mxu1 %v8414_v15 }
 0x7e4   : > { %8417 = vmatprep.subr.bf16.mxu1 %v8416_v23  ;;  %v5178_v23 = vld [vmem:[#allocation20] sm:$0xff] }
 0x7e7   : > { %8419 = vmatpush1.bf16.msra.mxu1 %v8418_v48  ;;  %v8459_v48 = vpack.c.bf16 %v5179_v0, %v5178_v23  ;;  %v5515_v23 = vld [vmem:[#allocation20 + $0x128] sm:$0xff] }
 0x7ea   : > { %4925 = vmatmul.mubr.f32.vlgmr.msra.gmra.mrb[26].mxu1 %v4836_v27  ;;  %v5181_v27 = vld [vmem:[#allocation20 + $0x18] sm:$0xff] }
 0x7eb   : > { %4930 = vmatprep.mubr.f32.mxu1 %v11266_v58  ;;  %v4997_v58 = vld [vmem:[%s11685_s19 + $0x60] sm:$0xff]  ;;  %v8462_v38 = vpack.c.bf16 %v5181_v27, %v5180_v57 }
 0x7ec   : > { %v5593_v57 = vld [vmem:[#allocation20 + $0x140] sm:$0xff]  ;;  %v5594_v27 = vld [vmem:[#allocation20 + $0x148] sm:$0xff] }
 0x7ee   : > { %4931 = vmatmul.mubr.f32.gmra.mrb[28].mxu1 %v11271_v42  ;;  %v4998_v42 = vld [vmem:[%s11685_s19 + $0x68] sm:$0xff] }
 0x7ef   : > { %4936 = vmatprep.mubr.f32.mxu1 %v11278_v5  ;;  %v8446_v44 = vpack.c.bf16 %v4998_v42, %v4997_v58  ;;  %v8448_v5 = vpack.c.bf16 %v5016_v4, %v5015_v22  ;;  %v5261_v42 = vld [vmem:[#allocation20 + $0x40] sm:$0xff]  ;;  %v5263_v4 = vld [vmem:[#allocation20 + $0x50] sm:$0xff] }
 0x7f1   : > { %8447 = vmatpush3.bf16.msra.mxu0 %v8446_v44  ;;  %v5262_v44 = vld [vmem:[#allocation20 + $0x48] sm:$0xff] }
 0x7f2   : > { %4937 = vmatmul.mubr.f32.gmra.mrb[30].mxu1 %v11283_v18  ;;  %8449 = vmatprep.subr.bf16.mxu0 %v8448_v5  ;;  %v5000_v18 = vld [vmem:[%s11685_s19 + $0x78] sm:$0xff]  ;;  %v8471_v22 = vpack.c.bf16 %v5262_v44, %v5261_v42  ;;  %v5599_v44 = vld [vmem:[#allocation20 + $0x170] sm:$0xff] }
 0x7f3   : > { %4942 = vmatprep.mubr.f32.mxu1 %v4851_v3  ;;  %v8450_v14 = vpack.c.bf16 %v5000_v18, %v4999_v36  ;;  %v5184_v3 = vld [vmem:[#allocation20 + $0x30] sm:$0xff]  ;;  %v5264_v5 = vld [vmem:[#allocation20 + $0x58] sm:$0xff] }
 0x7f5   : > { %8451 = vmatpush3.bf16.msra.mxu0 %v8450_v14  ;;  %v8474_v14 = vpack.c.bf16 %v5264_v5, %v5263_v4  ;;  %v5676_v5 = vld [vmem:[#allocation20 + $0x180] sm:$0xff] }
 0x7f6   : > { %4943 = vmatmul.mubr.f32.gmra.mrb[32].mxu1 %v4849_v21  ;;  %8452 = vmatprep.subr.bf16.mxu0 %v9927_v12  ;;  %v5185_v21 = vld [vmem:[#allocation20 + $0x38] sm:$0xff] }
 0x7f7   : > { %v8468_v58 = vpack.c.bf16 %v5185_v21, %v5184_v3  ;;  %v5597_v21 = vld [vmem:[#allocation20 + $0x160] sm:$0xff] }
 0x8bd   : > { %v4926_v56 = vpop.f32.mrb[26].mxu1 }
 0x8be   : > { %v4969_v35 = vadd.f32 %v4962_v39, %v4926_v56  ;;  %v4928_v55 = vpop.f32.mrb[27].mxu1  ;;  %v5267_v56 = vld [vmem:[#allocation20 + $0x70] sm:$0xff] }
 0x8bf   : > { %v4970_v49 = vadd.f32 %v4966_v50, %v4928_v55 }
 0x8c0   : > { %v4977_v41 = vmax.f32 %v4969_v35, 0.0  ;;  %v5268_v35 = vld [vmem:[#allocation20 + $0x78] sm:$0xff] }
 0x8c1   : > { %v4978_v10 = vmax.f32 %v4970_v49, 0.0  ;;  %v4932_v52 = vpop.f32.mrb[28].mxu1  ;;  %v8480_v55 = vpack.c.bf16 %v5268_v35, %v5267_v56  ;;  %v5344_v49 = vld [vmem:[#allocation20 + $0x80] sm:$0xff] }
 0x8c2   : > { %v4971_v51 = vadd.f32 %v4962_v39, %v4932_v52  ;;  %v4934_v20 = vpop.f32.mrb[29].mxu1  ;;  %v5680_v35 = vld [vmem:[#allocation20 + $0x1a0] sm:$0xff] }
 0x8c3   : > { %v4972_v53 = vadd.f32 %v4966_v50, %v4934_v20  ;;  %5081 = vmatprep.mubr.f32.mxu0 %v4978_v10  ;;  %v5345_v10 = vld [vmem:[#allocation20 + $0x88] sm:$0xff]  ;;  %v5347_v20 = vld [vmem:[#allocation20 + $0x98] sm:$0xff] }
 0x8c4   : > { %5082 = vmatmul.mubr.f32.vlgmr.msra.gmra.mrb[32].mxu0 %v4977_v41  ;;  %v4979_v60 = vmax.f32 %v4971_v51, 0.0  ;;  %v8483_v52 = vpack.c.bf16 %v5345_v10, %v5344_v49  ;;  %v5346_v51 = vld [vmem:[#allocation20 + $0x90] sm:$0xff] }
 0x8c5   : > { %v4980_v17 = vmax.f32 %v4972_v53, 0.0  ;;  %v4938_v54 = vpop.f32.mrb[30].mxu1  ;;  %v8486_v53 = vpack.c.bf16 %v5347_v20, %v5346_v51  ;;  %v5682_v10 = vld [vmem:[#allocation20 + $0x1b0] sm:$0xff]  ;;  %v5759_v51 = vld [vmem:[#allocation20 + $0x1c0] sm:$0xff]  ;;  %v5760_v20 = vld [vmem:[#allocation20 + $0x1c8] sm:$0xff] }
 0x8c6   : > { %v4973_v28 = vadd.f32 %v4962_v39, %v4938_v54  ;;  %v4940_v24 = vpop.f32.mrb[31].mxu1  ;;  %v5349_v54 = vld [vmem:[#allocation20 + $0xa8] sm:$0xff] }
 0x8c7   : > { %v4974_v33 = vadd.f32 %v4966_v50, %v4940_v24  ;;  %5086 = vmatprep.mubr.f32.mxu0 %v4980_v17  ;;  %v5348_v17 = vld [vmem:[#allocation20 + $0xa0] sm:$0xff]  ;;  %v5351_v24 = vld [vmem:[#allocation20 + $0xb8] sm:$0xff] }
 0x8c8   : > { %5087 = vmatmul.mubr.f32.gmra.mrb[34].mxu0 %v4979_v60  ;;  %v4981_v8 = vmax.f32 %v4973_v28, 0.0  ;;  %v8489_v60 = vpack.c.bf16 %v5349_v54, %v5348_v17  ;;  %v5350_v28 = vld [vmem:[#allocation20 + $0xb0] sm:$0xff] }
 0x8c9   : > { %v4982_v6 = vmax.f32 %v4974_v33, 0.0  ;;  %v4944_v43 = vpop.f32.mrb[32].mxu1  ;;  %v8492_v33 = vpack.c.bf16 %v5351_v24, %v5350_v28  ;;  %v5761_v54 = vld [vmem:[#allocation20 + $0x1d0] sm:$0xff]  ;;  %v5763_v24 = vld [vmem:[#allocation20 + $0x1e0] sm:$0xff] }
 0x8ca   : > { %v4975_v26 = vadd.f32 %v4962_v39, %v4944_v43  ;;  %v4946_v31 = vpop.f32.mrb[33].mxu1  ;;  %v5266_v39 = vld [vmem:[#allocation20 + $0x68] sm:$0xff] }
 0x8cb   : > { %v4976_v25 = vadd.f32 %v4966_v50, %v4946_v31  ;;  %5091 = vmatprep.mubr.f32.mxu0 %v4982_v6  ;;  %v8477_v50 = vpack.c.bf16 %v5266_v39, %v5265_v61  ;;  %v5427_v6 = vld [vmem:[#allocation20 + $0xc0] sm:$0xff]  ;;  %v5428_v43 = vld [vmem:[#allocation20 + $0xc8] sm:$0xff]  ;;  %v5429_v31 = vld [vmem:[#allocation20 + $0xd0] sm:$0xff] }
 0x8cc   : > { %5092 = vmatmul.mubr.f32.gmra.mrb[36].mxu0 %v4981_v8  ;;  %v4983_v63 = vmax.f32 %v4975_v26, 0.0  ;;  %v8495_v8 = vpack.c.bf16 %v5428_v43, %v5427_v6  ;;  %v5678_v39 = vld [vmem:[#allocation20 + $0x190] sm:$0xff] }
 0x8cd   : > { %v4984_v62 = vmax.f32 %v4976_v25, 0.0  ;;  %v5430_v25 = vld [vmem:[#allocation20 + $0xd8] sm:$0xff]  ;;  %v5765_v43 = vld [vmem:[#allocation20 + $0x1f0] sm:$0xff] }
 0x8cf   : > { %5096 = vmatprep.mubr.f32.mxu0 %v4984_v62  ;;  %v8498_v62 = vpack.c.bf16 %v5430_v25, %v5429_v31  ;;  %v5842_v31 = vld [vmem:[%s11686_s18] sm:$0xff]  ;;  %v5843_v25 = vld [vmem:[%s11686_s18 + $0x8] sm:$0xff] }
 0x8d0   : > { %5097 = vmatmul.mubr.f32.gmra.mrb[38].mxu0 %v4983_v63  ;;  %v5431_v63 = vld [vmem:[#allocation20 + $0xe0] sm:$0xff] }
 0x8d1   : > { %7234 = vmatprep.mubr.msk.f32.mxu0 %vm9928_vm12, %v9925_v1 }
 0x997   : > { %v7098_v45 = vpop.f32.mrb[32].mxu0 }
 0x998   : > { %v7099_v46 = vpop.f32.mrb[33].mxu0 }
 0x999   : > { %v7100_v59 = vadd.f32 %v7099_v46, %v7098_v45  ;;  %v5432_v45 = vld [vmem:[#allocation20 + $0xe8] sm:$0xff] }
 0x99a   : > { %v8501_v46 = vpack.c.bf16 %v5432_v45, %v5431_v63  ;;  %v5844_v45 = vld [vmem:[%s11686_s18 + $0x10] sm:$0xff] }
 0x99b   : > { %v7101_v29 = vpop.f32.mrb[34].mxu0 }
 0x99c   : > { %v7102_v13 = vpop.f32.mrb[35].mxu0 }
 0x99d   : > { %v7103_v2 = vadd.f32 %v7102_v13, %v7101_v29  ;;  %v5434_v29 = vld [vmem:[#allocation20 + $0xf8] sm:$0xff] }
 0x99f   : > { %v8453_v9 = vpack.c.bf16 %v7103_v2, %v7100_v59  ;;  %v7104_v37 = vpop.f32.mrb[36].mxu0  ;;  %v5433_v59 = vld [vmem:[#allocation20 + $0xf0] sm:$0xff]  ;;  %v5510_v2 = vld [vmem:[#allocation20 + $0x100] sm:$0xff] }
 0x9a0   : > { %v7105_v40 = vpop.f32.mrb[37].mxu0  ;;  %v8504_v13 = vpack.c.bf16 %v5434_v29, %v5433_v59  ;;  %v5846_v29 = vld [vmem:[%s11686_s18 + $0x20] sm:$0xff] }
 0x9a1   : > { %v7106_v11 = vadd.f32 %v7105_v40, %v7104_v37  ;;  %8454 = vmatpush3.bf16.msra.mxu0 %v8453_v9  ;;  %v5511_v9 = vld [vmem:[#allocation20 + $0x108] sm:$0xff] }
 0x9a2   : > { %8455 = vmatprep.subr.bf16.mxu0 %v9927_v12  ;;  %v8507_v37 = vpack.c.bf16 %v5511_v9, %v5510_v2  ;;  %v5849_v9 = vld [vmem:[%s11686_s18 + $0x38] sm:$0xff] }
 0x9a3   : > { %v7107_v32 = vpop.f32.mrb[38].mxu0 }
 0x9a4   : > { %v7108_v7 = vpop.f32.mrb[39].mxu0 }
 0x9a5   : > { %v7109_v15 = vadd.f32 %v7108_v7, %v7107_v32  ;;  %v5513_v32 = vld [vmem:[#allocation20 + $0x118] sm:$0xff] }
 0x9a7   : > { %v8456_v47 = vpack.c.bf16 %v7109_v15, %v7106_v11  ;;  %v5512_v11 = vld [vmem:[#allocation20 + $0x110] sm:$0xff]  ;;  %v5514_v15 = vld [vmem:[#allocation20 + $0x120] sm:$0xff] }
 0x9a8   : > { %v8510_v7 = vpack.c.bf16 %v5513_v32, %v5512_v11  ;;  %v8513_v0 = vpack.c.bf16 %v5515_v23, %v5514_v15  ;;  %v5927_v23 = vld [vmem:[#allocation26] sm:$0xff] }
 0x9a9   : > { %8457 = vmatpush3.bf16.msra.mxu0 %v8456_v47  ;;  %v5516_v47 = vld [vmem:[#allocation20 + $0x130] sm:$0xff] }
 0x9aa   : > { %8458 = vmatprep.subr.bf16.mxu0 %v9927_v12 }
 0x9ac   : > { %7235 = vmatmul.mubr.msk.f32.vlgmr.msra.gmra.mrb[40].mxu0 %vm5103_vm13, %v5102_v16  ;;  %v5517_v16 = vld [vmem:[#allocation20 + $0x138] sm:$0xff] }
 0x9ad   : > { %8460 = vmatpush3.bf16.msra.mxu0 %v8459_v48  ;;  %7253 = vmatprep.mubr.msk.f32.mxu0 %vm9928_vm12, %v9925_v1  ;;  %v8516_v48 = vpack.c.bf16 %v5517_v16, %v5516_v47  ;;  %v5925_v47 = vld [vmem:[#allocation25] sm:$0xff]  ;;  %v5926_v16 = vld [vmem:[#allocation25 + $0x8] sm:$0xff] }
 0x9ae   : > { %8461 = vmatprep.subr.bf16.mxu0 %v9927_v12 }
 0x9b1   : > { %8463 = vmatpush3.bf16.msra.mxu0 %v8462_v38  ;;  %v8519_v38 = vpack.c.bf16 %v5594_v27, %v5593_v57  ;;  %v5850_v57 = vld [vmem:[#allocation23] sm:$0x1] }
 0x9b2   : > { %8464 = vmatprep.subr.bf16.mxu0 %v9927_v12 }
 0x9b5   : > { %8466 = vmatpush3.bf16.msra.mxu0 %v8465_v34  ;;  %v5596_v34 = vld [vmem:[#allocation20 + $0x158] sm:$0xff] }
 0x9b6   : > { %8467 = vmatprep.subr.bf16.mxu0 %v9927_v12  ;;  %v8522_v3 = vpack.c.bf16 %v5596_v34, %v5595_v30 }
 0x9b9   : > { %8469 = vmatpush3.bf16.msra.mxu0 %v8468_v58  ;;  %v5598_v58 = vld [vmem:[#allocation20 + $0x168] sm:$0xff] }
 0x9ba   : > { %8470 = vmatprep.subr.bf16.mxu0 %v9927_v12  ;;  %v8525_v42 = vpack.c.bf16 %v5598_v58, %v5597_v21  ;;  %v6080_v21 = vld [vmem:[#allocation29 + $0x8] sm:$0xff]  ;;  %v6081_v58 = vld [vmem:[#allocation29 + $0x10] sm:$0xff] }
 0xa7f   : > { %v11395_v36 = vpop.f32.mrb[40].mxu0 }
 0xa80   : > { %7254 = vmatmul.mubr.msk.f32.vlgmr.msra.gmra.mrb[42].mxu0 %vm1294_vm3, %v11395_v36  ;;  %v7236_v18 = vpop.f32.mrb[41].mxu0  ;;  %v5269_v41 = vrot.slane %v11395_v36, 1  ;;  %v5352_v26 = vrot.slane %v11395_v36, 2  ;;  %v5435_v40 = vrot.slane %v11395_v36, 3  ;;  %v5518_v19 = vrot.slane %v11395_v36, 4 }
 0xa81   : > { %8472 = vmatpush3.bf16.msra.mxu0 %v8471_v22  ;;  %7272 = vmatprep.mubr.msk.f32.mxu0 %vm9928_vm12, %v9925_v1  ;;  %v5600_v22 = vld [vmem:[#allocation20 + $0x178] sm:$0xff]  ;;  %v5677_v18 = vld [vmem:[#allocation20 + $0x188] sm:$0xff]  ;;  %v5601_v61 = vrot.slane %v11395_v36, 5  ;;  %v5684_v17 = vrot.slane %v11395_v36, 6  ;;  %v5767_v63 = vrot.slane %v11395_v36, 7 }
 0xa82   : > { %8473 = vmatprep.subr.bf16.mxu0 %v9927_v12  ;;  %v8528_v4 = vpack.c.bf16 %v5600_v22, %v5599_v44  ;;  %v5848_v36 = vld [vmem:[%s11686_s18 + $0x30] sm:$0xff] }
 0xa83   : > { %v6082_v44 = vld [vmem:[#allocation29 + $0x18] sm:$0xff] }
 0xa84   : > { %v8573_v22 = vpack.c.bf16 %v6082_v44, %v6081_v58 }
 0xa85   : > { %8475 = vmatpush3.bf16.msra.mxu0 %v8474_v14  ;;  %v8531_v14 = vpack.c.bf16 %v5677_v18, %v5676_v5  ;;  %v6076_v5 = vld [vmem:[#allocation28] sm:$0x1] }
 0xa86   : > { %8476 = vmatprep.subr.bf16.mxu0 %v9927_v12 }
 0xa89   : > { %8478 = vmatpush3.bf16.msra.mxu0 %v8477_v50  ;;  %v5679_v50 = vld [vmem:[#allocation20 + $0x198] sm:$0xff] }
 0xa8a   : > { %8479 = vmatprep.subr.bf16.mxu0 %v9927_v12  ;;  %v8534_v56 = vpack.c.bf16 %v5679_v50, %v5678_v39  ;;  %v6159_v39 = vld [vmem:[%s11687_s12 + $0x8] sm:$0xff] }
 0xa8d   : > { %8481 = vmatpush3.bf16.msra.mxu0 %v8480_v55  ;;  %v5681_v55 = vld [vmem:[#allocation20 + $0x1a8] sm:$0xff] }
 0xa8e   : > { %8482 = vmatprep.subr.bf16.mxu0 %v9927_v12  ;;  %v8537_v49 = vpack.c.bf16 %v5681_v55, %v5680_v35  ;;  %v6160_v55 = vld [vmem:[%s11687_s12 + $0x10] sm:$0xff] }
 0xa90   : > { %7273 = vmatmul.mubr.msk.f32.vlgmr.msra.gmra.mrb[42].mxu0 %vm1294_vm3, %v5269_v41 }
 0xa91   : > { %8484 = vmatpush3.bf16.msra.mxu0 %v8483_v52  ;;  %7291 = vmatprep.mubr.msk.f32.mxu0 %vm9928_vm12, %v9925_v1  ;;  %v5683_v52 = vld [vmem:[#allocation20 + $0x1b8] sm:$0xff] }
 0xa92   : > { %8485 = vmatprep.subr.bf16.mxu0 %v9927_v12  ;;  %v8540_v41 = vpack.c.bf16 %v5683_v52, %v5682_v10  ;;  %v6083_v52 = vld [vmem:[#allocation31] sm:$0x1] }
 0xa95   : > { %8487 = vmatpush3.bf16.msra.mxu0 %v8486_v53  ;;  %v8543_v53 = vpack.c.bf16 %v5760_v20, %v5759_v51 }
 0xa96   : > { %8488 = vmatprep.subr.bf16.mxu0 %v9927_v12 }
 0xa99   : > { %8490 = vmatpush3.bf16.msra.mxu0 %v8489_v60  ;;  %v5762_v60 = vld [vmem:[#allocation20 + $0x1d8] sm:$0xff] }
 0xa9a   : > { %8491 = vmatprep.subr.bf16.mxu0 %v9927_v12  ;;  %v8546_v28 = vpack.c.bf16 %v5762_v60, %v5761_v54  ;;  %v6238_v54 = vld [vmem:[#allocation32] sm:$0xff]  ;;  %v6239_v60 = vld [vmem:[#allocation32 + $0x8] sm:$0xff] }
 0xa9d   : > { %8493 = vmatpush3.bf16.msra.mxu0 %v8492_v33  ;;  %v5764_v33 = vld [vmem:[#allocation20 + $0x1e8] sm:$0xff] }
 0xa9e   : > { %8494 = vmatprep.subr.bf16.mxu0 %v9927_v12  ;;  %v8549_v6 = vpack.c.bf16 %v5764_v33, %v5763_v24  ;;  %v6384_v24 = vld [vmem:[#allocation37] sm:$0xff]  ;;  %v6385_v33 = vld [vmem:[#allocation37 + $0x8] sm:$0xff] }
 0xaa0   : > { %7292 = vmatmul.mubr.msk.f32.vlgmr.msra.gmra.mrb[42].mxu0 %vm1294_vm3, %v5352_v26 }
 0xaa1   : > { %8496 = vmatpush3.bf16.msra.mxu0 %v8495_v8  ;;  %7310 = vmatprep.mubr.msk.f32.mxu0 %vm9928_vm12, %v9925_v1  ;;  %v5766_v8 = vld [vmem:[#allocation20 + $0x1f8] sm:$0xff] }
 0xaa2   : > { %8497 = vmatprep.subr.bf16.mxu0 %v9927_v12  ;;  %v8552_v26 = vpack.c.bf16 %v5766_v8, %v5765_v43  ;;  %v8585_v43 = vpack.c.bf16 %v6385_v33, %v6384_v24  ;;  %v6387_v8 = vld [vmem:[#allocation37 + $0x18] sm:$0xff] }
 0xaa5   : > { %8499 = vmatpush3.bf16.msra.mxu0 %v8498_v62  ;;  %v8555_v62 = vpack.c.bf16 %v5843_v25, %v5842_v31  ;;  %v6162_v31 = vld [vmem:[#allocation4] sm:$0x1] }
 0xaa6   : > { %8500 = vmatprep.subr.bf16.mxu0 %v9927_v12 }
 0xaa9   : > { %8502 = vmatpush3.bf16.msra.mxu0 %v8501_v46  ;;  %v5845_v46 = vld [vmem:[%s11686_s18 + $0x18] sm:$0xff] }
 0xaaa   : > { %8503 = vmatprep.subr.bf16.mxu0 %v9927_v12  ;;  %v8558_v59 = vpack.c.bf16 %v5845_v46, %v5844_v45 }
 0xaad   : > { %8505 = vmatpush3.bf16.msra.mxu0 %v8504_v13  ;;  %v5847_v13 = vld [vmem:[%s11686_s18 + $0x28] sm:$0xff] }
 0xaae   : > { %8506 = vmatprep.subr.bf16.mxu0 %v9927_v12  ;;  %v8561_v2 = vpack.c.bf16 %v5847_v13, %v5846_v29  ;;  %v6381_v29 = vld [vmem:[#allocation35] sm:$0x1] }
 0xab0   : > { %7311 = vmatmul.mubr.msk.f32.vlgmr.msra.gmra.mrb[42].mxu0 %vm1294_vm3, %v5435_v40  ;;  %v5177_v40 = vld [vmem:[#allocation22] sm:$0x1] }
 0xab1   : > { %8508 = vmatpush3.bf16.msra.mxu0 %v8507_v37  ;;  %7329 = vmatprep.mubr.msk.f32.mxu0 %vm9928_vm12, %v9925_v1  ;;  %v8564_v37 = vpack.c.bf16 %v5849_v9, %v5848_v36  ;;  %v6463_v36 = vld [vmem:[%s11688_s6] sm:$0xff]  ;;  %v6464_v9 = vld [vmem:[%s11688_s6 + $0x8] sm:$0xff] }
 0xab2   : > { %8509 = vmatprep.subr.bf16.mxu0 %v9927_v12 }
 0xab5   : > { %8511 = vmatpush3.bf16.msra.mxu0 %v8510_v7 }
 0xab6   : > { %8512 = vmatprep.subr.bf16.mxu0 %v9927_v12 }
 0xab9   : > { %8514 = vmatpush3.bf16.msra.mxu0 %v8513_v0  ;;  %v5924_v0 = vld [vmem:[%s1077_s3] sm:$0x1]  ;;  %s9757_s3 = scalar_lea.vmem %s9756_s16, 32 }
 0xaba   : > { %8515 = vmatprep.subr.bf16.mxu0 %v9927_v12  ;;  %p9759_p2 = scmp.lt.s32.totalorder %s9757_s3, %s9751_s20 }
 0xabc   : > { %p9760_p1 = por %p9759_p2, %p9758_p8 }
 0xabd   : > { %8517 = vmatpush3.bf16.msra.mxu0 %v8516_v48  ;;  %v8567_v48 = vpack.c.bf16 %v5926_v16, %v5925_v47 }
 0xabe   : > { %8518 = vmatprep.subr.bf16.mxu0 %v9927_v12  ;;  %p9761_p12 = pnand %p9760_p1, %p9754_p0 }
 0xac0   : > { %7330 = vmatmul.mubr.msk.f32.vlgmr.msra.gmra.mrb[42].mxu0 %vm1294_vm3, %v5518_v19 }
 0xac1   : > { %8520 = vmatpush3.bf16.msra.mxu0 %v8519_v38  ;;  %7348 = vmatprep.mubr.msk.f32.mxu0 %vm9928_vm12, %v9925_v1 }
 0xac2   : > { %8521 = vmatprep.subr.bf16.mxu0 %v9927_v12 }
 0xac5   : > { %8523 = vmatpush3.bf16.msra.mxu0 %v8522_v3  ;;  %v6079_v3 = vld [vmem:[#allocation29] sm:$0xff] }
 0xac6   : > { %8524 = vmatprep.subr.bf16.mxu0 %v9927_v12 }
 0xac9   : > { %8526 = vmatpush3.bf16.msra.mxu0 %v8525_v42  ;;  %v8570_v42 = vpack.c.bf16 %v6080_v21, %v6079_v3 }
 0xaca   : > { %8527 = vmatprep.subr.bf16.mxu0 %v9927_v12 }
 0xacd   : > { %8529 = vmatpush3.bf16.msra.mxu0 %v8528_v4 }
 0xace   : > { %8530 = vmatprep.subr.bf16.mxu0 %v9927_v12 }
 0xad0   : > { %7349 = vmatmul.mubr.msk.f32.vlgmr.msra.gmra.mrb[42].mxu0 %vm1294_vm3, %v5601_v61  ;;  %v6158_v61 = vld [vmem:[%s11687_s12] sm:$0xff] }
 0xad1   : > { %8532 = vmatpush3.bf16.msra.mxu0 %v8531_v14  ;;  %7367 = vmatprep.mubr.msk.f32.mxu0 %vm9928_vm12, %v9925_v1 }
 0xad2   : > { %8533 = vmatprep.subr.bf16.mxu0 %v9927_v12 }
 0xad5   : > { %8535 = vmatpush3.bf16.msra.mxu0 %v8534_v56  ;;  %v8576_v56 = vpack.c.bf16 %v6159_v39, %v6158_v61 }
 0xad6   : > { %8536 = vmatprep.subr.bf16.mxu0 %v9927_v12 }
 0xad9   : > { %8538 = vmatpush3.bf16.msra.mxu0 %v8537_v49  ;;  %v6161_v49 = vld [vmem:[%s11687_s12 + $0x18] sm:$0xff] }
 0xada   : > { %8539 = vmatprep.subr.bf16.mxu0 %v9927_v12  ;;  %v8579_v10 = vpack.c.bf16 %v6161_v49, %v6160_v55 }
 0xadd   : > { %8541 = vmatpush3.bf16.msra.mxu0 %v8540_v41 }
 0xade   : > { %8542 = vmatprep.subr.bf16.mxu0 %v9927_v12 }
 0xae0   : > { %7368 = vmatmul.mubr.msk.f32.vlgmr.msra.gmra.mrb[42].mxu0 %vm1294_vm3, %v5684_v17  ;;  %v6240_v17 = vld [vmem:[#allocation34] sm:$0xff] }
 0xae1   : > { %8544 = vmatpush3.bf16.msra.mxu0 %v8543_v53  ;;  %7386 = vmatprep.mubr.msk.f32.mxu0 %vm9928_vm12, %v9925_v1 }
 0xae2   : > { %8545 = vmatprep.subr.bf16.mxu0 %v9927_v12 }
 0xae5   : > { %8547 = vmatpush3.bf16.msra.mxu0 %v8546_v28  ;;  %v8582_v28 = vpack.c.bf16 %v6239_v60, %v6238_v54 }
 0xae6   : > { %8548 = vmatprep.subr.bf16.mxu0 %v9927_v12 }
 0xae9   : > { %8550 = vmatpush3.bf16.msra.mxu0 %v8549_v6  ;;  %v6386_v6 = vld [vmem:[#allocation37 + $0x10] sm:$0xff] }
 0xaea   : > { %8551 = vmatprep.subr.bf16.mxu0 %v9927_v12 }
 0xaed   : > { %8553 = vmatpush3.bf16.msra.mxu0 %v8552_v26  ;;  %v8588_v26 = vpack.c.bf16 %v6387_v8, %v6386_v6 }
 0xaee   : > { %8554 = vmatprep.subr.bf16.mxu0 %v9927_v12 }
 0xaf0   : > { %7387 = vmatmul.mubr.msk.f32.vlgmr.msra.gmra.mrb[42].mxu0 %vm1294_vm3, %v5767_v63 }
 0xaf1   : > { %8556 = vmatpush3.bf16.msra.mxu0 %v8555_v62  ;;  %7405 = vmatprep.mubr.msk.f32.mxu0 %vm9928_vm12, %v9925_v1 }
 0xaf2   : > { %8557 = vmatprep.subr.bf16.mxu0 %v9927_v12 }
 0xaf5   : > { %8559 = vmatpush3.bf16.msra.mxu0 %v8558_v59 }
 0xaf6   : > { %8560 = vmatprep.subr.bf16.mxu0 %v9927_v12 }
 0xaf9   : > { %8562 = vmatpush3.bf16.msra.mxu0 %v8561_v2 }
 0xafa   : > { %8563 = vmatprep.subr.bf16.mxu0 %v9927_v12 }
 0xafd   : > { %8565 = vmatpush3.bf16.msra.mxu0 %v8564_v37 }
 0xafe   : > { %7408 = vmatprep.subr.mxu0 %v9925_v1 }
 0xbc3   : > { %v5836_v11 = vpop.f32.mrb[42].mxu0 }
 0xbc4   : > { %v8596_v32 = vadd.f32 %v5836_v11, %v5177_v40  ;;  %v7388_v7 = vpop.f32.mrb[43].mxu0  ;;  %v8591_v40 = vpack.c.bf16 %v6464_v9, %v6463_v36 }
 0xbc5   : > { %v6466_v7 = vld [vmem:[%s11688_s6 + $0x18] sm:$0xff] }
 0xbc6   : > { %v5841_v15 = vmax.f32 %v8596_v32, 0.0  ;;  %v6465_v32 = vld [vmem:[%s11688_s6 + $0x10] sm:$0xff] }
 0xbc8   : > { %7406 = vmatmul.mubr.msk.f32.vlgmr.msra.gmra.mrb[44].mxu0 %vm1294_vm3, %v5841_v15  ;;  %v8594_v15 = vpack.c.bf16 %v6466_v7, %v6465_v32 }
 0xbc9   : > { %7409 = vmatpush3.msra.mxu0 %v5927_v23  ;;  %7410 = vmatprep.mubr.msk.f32.mxu0 %vm9928_vm12, %v9925_v1  ;;  %v6388_v23 = vld [vmem:[#allocation38] sm:$0x1] }
 0xbca   : > { %8566 = vmatprep.subr.bf16.mxu0 %v9927_v12 }
 0xbcc   : > { %7411 = vmatmul.mubr.msk.f32.vlgmr.msra.gmra.mrb[46].mxu0 %vm5928_vm14, %v5924_v0 }
 0xbcd   : > { %7417 = vmatprep.mubr.msk.f32.mxu0 %vm9928_vm12, %v9925_v1  ;;  %8568 = vmatpush3.bf16.msra.mxu0 %v8567_v48 }
 0xbce   : > { %8569 = vmatprep.subr.bf16.mxu0 %v9927_v12 }
 0xc9b   : > { %v5920_v27 = vpop.f32.mrb[44].mxu0 }
 0xc9c   : > { %v5921_v38 = vadd.f32 %v5920_v27, %v5850_v57  ;;  %v7407_v19 = vpop.f32.mrb[45].mxu0  ;;  %v6467_v57 = vld [vmem:[#allocation40] sm:$0x1] }
 0xc9e   : > { %7418 = vmatmul.mubr.msk.f32.vlgmr.msra.gmra.mrb[48].mxu0 %vm6002_vm15, %v5921_v38 }
 0xc9f   : > { %v5998_v30 = vpop.f32.mrb[46].mxu0  ;;  %7428 = vmatprep.mubr.msk.f32.mxu0 %vm9928_vm12, %v9925_v1  ;;  %8571 = vmatpush3.bf16.msra.mxu0 %v8570_v42 }
 0xca0   : > { %v7412_v34 = vpop.f32.mrb[47].mxu0  ;;  %8572 = vmatprep.subr.bf16.mxu0 %v9927_v12 }
 0xca3   : > { %8574 = vmatpush3.bf16.msra.mxu0 %v8573_v22 }
 0xca4   : > { %8575 = vmatprep.subr.bf16.mxu0 %v9927_v12 }
 0xd71   : > { %v6072_v4 = vpop.f32.mrb[48].mxu0 }
 0xd72   : > { %v6073_v18 = vadd.f32 %v6072_v4, %v5998_v30  ;;  %v7419_v14 = vpop.f32.mrb[49].mxu0 }
 0xd74   : > { %v6077_v50 = vadd.f32 %v6076_v5, %v6073_v18 }
 0xd76   : > { %v6078_v35 = vmax.f32 %v6077_v50, 0.0 }
 0xd78   : > { %7429 = vmatmul.mubr.msk.f32.vlgmr.msra.gmra.mrb[50].mxu0 %vm5103_vm13, %v6078_v35 }
 0xd79   : > { %8577 = vmatpush3.bf16.msra.mxu0 %v8576_v56  ;;  %7439 = vmatprep.mubr.msk.f32.mxu0 %vm9928_vm12, %v9925_v1 }
 0xd7a   : > { %8578 = vmatprep.subr.bf16.mxu0 %v9927_v12 }
 0xd7d   : > { %8580 = vmatpush3.bf16.msra.mxu0 %v8579_v10 }
 0xd7e   : > { %7442 = vmatprep.subr.mxu0 %v9925_v1 }
 0xe4b   : > { %v6153_v41 = vpop.f32.mrb[50].mxu0 }
 0xe4c   : > { %v6154_v51 = vadd.f32 %v6153_v41, %v6083_v52  ;;  %v7430_v20 = vpop.f32.mrb[51].mxu0 }
 0xe4e   : > { %v6157_v53 = vmax.f32 %v6154_v51, 0.0 }
 0xe50   : > { %7440 = vmatmul.mubr.msk.f32.vlgmr.msra.gmra.mrb[52].mxu0 %vm5103_vm13, %v6157_v53 }
 0xe51   : > { %7443 = vmatpush3.msra.mxu0 %v6240_v17  ;;  %7444 = vmatprep.mubr.msk.f32.mxu0 %vm9928_vm12, %v9925_v1 }
 0xe52   : > { %8581 = vmatprep.subr.bf16.mxu0 %v9927_v12 }
 0xe54   : > { %7445 = vmatmul.mubr.msk.f32.vlgmr.msra.gmra.mrb[54].mxu0 %vm5928_vm14, %v5924_v0 }
 0xe55   : > { %8583 = vmatpush3.bf16.msra.mxu0 %v8582_v28  ;;  %7451 = vmatprep.mubr.msk.f32.mxu0 %vm9928_vm12, %v9925_v1 }
 0xe56   : > { %8584 = vmatprep.subr.bf16.mxu0 %v9927_v12 }
 0xe58   : > { %7452 = vmatmul.mubr.msk.f32.vlgmr.msra.gmra.mrb[56].mxu0 %vm6002_vm15, %v5921_v38 }
 0xe59   : > { %7462 = vmatprep.mubr.msk.f32.mxu0 %vm9928_vm12, %v9925_v1  ;;  %8586 = vmatpush3.bf16.msra.mxu0 %v8585_v43 }
 0xe5a   : > { %8587 = vmatprep.subr.bf16.mxu0 %v9927_v12 }
 0xe5d   : > { %8589 = vmatpush3.bf16.msra.mxu0 %v8588_v26 }
 0xe5e   : > { %8590 = vmatprep.subr.bf16.mxu0 %v9927_v12 }
 0xf23   : > { %v6232_v25 = vpop.f32.mrb[52].mxu0 }
 0xf24   : > { %v6233_v62 = vadd.f32 %v6232_v25, %v6162_v31  ;;  %v7441_v63 = vpop.f32.mrb[53].mxu0 }
 0xf26   : > { %6237 = vst.msk [vmem:[%s1244_s8] sm:$0x1] %vm6236_vm0, %v6233_v62 }
 0xf27   : > { %v6307_v45 = vpop.f32.mrb[54].mxu0 }
 0xf28   : > { %v7446_v46 = vpop.f32.mrb[55].mxu0 }
 0xf2b   : > { %v6377_v59 = vpop.f32.mrb[56].mxu0 }
 0xf2c   : > { %v6378_v13 = vadd.f32 %v6377_v59, %v6307_v45  ;;  %v7453_v2 = vpop.f32.mrb[57].mxu0 }
 0xf2e   : > { %v6382_v37 = vadd.f32 %v6381_v29, %v6378_v13 }
 0xf30   : > { %v6383_v11 = vmax.f32 %v6382_v37, 0.0 }
 0xf32   : > { %7463 = vmatmul.mubr.msk.f32.vlgmr.msra.gmra.mrb[58].mxu0 %vm5103_vm13, %v6383_v11 }
 0xf33   : > { %8592 = vmatpush3.bf16.msra.mxu0 %v8591_v40  ;;  %7473 = vmatprep.mubr.msk.f32.mxu0 %vm9928_vm12, %v9925_v1 }
 0xf34   : > { %8593 = vmatprep.subr.bf16.mxu0 %v9927_v12 }
 0xf37   : > { %8595 = vmatpush3.bf16.msra.mxu0 %v8594_v15 }
0x1005   : > { %v6458_v0 = vpop.f32.mrb[58].mxu0 }
0x1006   : > { %v6459_v47 = vadd.f32 %v6458_v0, %v6388_v23  ;;  %v7464_v16 = vpop.f32.mrb[59].mxu0 }
0x1008   : > { %v6462_v48 = vmax.f32 %v6459_v47, 0.0 }
0x100a   : > { %7474 = vmatmul.mubr.msk.f32.vlgmr.msra.gmra.mrb[60].mxu0 %vm5103_vm13, %v6462_v48 }
0x10dd   : > { %v6537_v1 = vpop.f32.mrb[60].mxu0 }
0x10de   : > { %v6538_v27 = vadd.f32 %v6537_v1, %v6467_v57  ;;  %v7475_v12 = vpop.f32.mrb[61].mxu0 }
0x10e0   : > { %9091 = vtanh.f32 %v6538_v27 }
0x10ea   : > { %v9092_v38 = vpop.eup %9091 }
0x10eb   : > { %6543 = vst.msk [vmem:[%s1236_s13] sm:$0x1] %vm6542_vm1, %v9092_v38 }
0x10ec   : > { %9764 = shalt.err (!%p9761_p12)
}
0x10ed   : > { %s9765_s21 = scalar_lea.hbm %s11521_s2, 16  ;;  %s9769_s5 = scalar_lea.hbm %s11689_s14, 32 }
0x10ee   : > { %p9766_p13 = scmp.ne.s32.totalorder %s11521_s2, %s9765_s21  ;;  %p9770_p10 = scmp.lt.u32.totalorder %s11521_s2, %s11689_s14 }
0x10ef   : > { %p9771_p11 = scmp.lt.u32.totalorder %s9769_s5, %s9765_s21  ;;  %p9773_p3 = scmp.lt.u32.totalorder %s9765_s21, %s11521_s2 }
0x10f0   : > { %p9767_p5 = pnand %p9766_p13, %p11690_p4 }
0x10f1   : > { %p9772_p6 = por %p9771_p11, %p9770_p10 }
0x10f2   : > { %p9768_p7 = pneg %p9767_p5 }
0x10f3   : > { %p9774_p9 = por %p9773_p3, %p9772_p6 }
0x10f5   : > { %p9775_p0 = pnand %p9774_p9, %p9768_p7 }
0x10f7   : > { %9778 = shalt.err (!%p9775_p0)
}
0x10f8   : > { %8878 = dma.vmem_to_hbm [thread:$0]  (%p11690_p4), %s11523_s22, 16, %s11521_s2, %s6545_s17  }
0x10f9 PF: > { %s6575_s23 = sand.u32 1, %s9853_s9   ;;  %p11691_p8 = scmp.ne.s32.totalorder %s11656_s26, 0 }
0x10fa   : > { %p11692_p2 = scmp.ge.s32.totalorder %s9865_s27, 2  ;;  %s6576_s8 = scalar_lea.sflag [#allocation7], %s6575_s23 }
0x10fc   : > { %p8952_p1 = pnand %p11692_p2, %p11691_p8 }
0x10fe   : > { %9848 = dma.done.wait (!%p8952_p1), %s6576_s8, 16  }
0x10ff   : > { %9850 = vsyncadd (!%p8952_p1), %s6576_s8, 4294967280  ;;  %p88_p12 = scmp.ge.s32.totalorder %s10408_s7, 4   ;;  %s11693_s9 = smov %s9857_s0 }
0x1100   : > { %s11694_s0 = smov %s9861_s24  ;;  %s11695_s24 = smov %s10420_s4 }
0x1101   : > { %s11696_s27 = smov %s10408_s7  ;;  %90 = sbr.rel (!%p88_p12) target bundleno = 76 (0x4c), region = 332 }
0x1108   :  { %6586 = vsyncpa [#allocation6], 1 }
0x1109   :  { %6588 = vsyncpa [#allocation6 + $0x1], 1 }
0x110a   :  { %6589 = vsyncpa [#allocation9], 1 }
0x110b   :  { %6591 = vsyncpa [#allocation9 + $0x1], 1 }
0x110c   :  { %6592 = vsyncpa [#allocation12], 1 }
0x110d   :  { %6593 = vsyncpa [#allocation15], 1 }
0x110e   :  { %6594 = vsyncpa [#allocation18], 1 }
0x110f   :  { %6595 = vsyncpa [#allocation21], 1 }
0x1110   :  { %6596 = vsyncpa [#allocation24], 1 }
0x1111   :  { %6597 = vsyncpa [#allocation27], 1 }
0x1112   :  { %6598 = vsyncpa [#allocation30], 1 }
0x1113   :  { %6599 = vsyncpa [#allocation33], 1 }
0x1114   :  { %6600 = vsyncpa [#allocation36], 1 }
0x1115   :  { %6601 = vsyncpa [#allocation39], 1 }
0x1116   :  { %6602 = vsyncpa [#allocation7], 1 }
0x1117   :  { %6604 = vsyncpa [#allocation7 + $0x1], 1 }

</bundles_post_ra>
